<compile_context>
chip_gen: v7x
topology: tpu7x:2x2x1
jax: 0.10.0
libtpu: 0.0.40
codegen_flags: <defaults>
</compile_context>

<pallas_src>
import functools
import math

import jax
import jax.numpy as jnp
from jax.experimental import pallas as pl
from jax.experimental.pallas import tpu as pltpu

_VMEM_LIMIT = 48 * 1024 * 1024      # safe on v7x (64 MiB physical), fine on v5e/v6e
_BN_EPS = 1e-5


def _pick_tm(M, row_bytes, budget=16 * 1024 * 1024):
    """Largest row-tile (multiple of 8, divisor of M) whose pipeline buffers fit."""
    cap = max(8, budget // max(int(row_bytes), 1))
    for t in (4096, 2048, 1024, 512, 256, 128, 64, 32, 16, 8):
        if t <= cap and M % t == 0:
            return t
    return M


# ----------------------------------------------------------------------------
# Pallas kernels
# ----------------------------------------------------------------------------
def _conv_bn_kernel(t_ref, w_ref, y_ref, s1_ref, s2_ref):
    """One deep matmul per tile + per-channel sum / sum-of-squares for BatchNorm."""
    @pl.when(pl.program_id(0) == 0)
    def _():
        s1_ref[...] = jnp.zeros_like(s1_ref)
        s2_ref[...] = jnp.zeros_like(s2_ref)

    y = jnp.dot(t_ref[...], w_ref[...], preferred_element_type=jnp.float32)
    y_ref[...] = y
    s1_ref[...] += jnp.sum(y, axis=0, keepdims=True)
    s2_ref[...] += jnp.sum(y * y, axis=0, keepdims=True)


def conv_bn_matmul(taps, w2d):
    """taps: (M, Kc) bf16, w2d: (Kc, Cout) bf16 -> (y f32 (M,Cout), sum, sumsq)."""
    M, Kc = taps.shape
    Cout = w2d.shape[1]
    row_bytes = 2 * Kc * 2 + 2 * Cout * 4           # double-buffered taps + y rows
    tm = _pick_tm(M, row_bytes)
    grid = (M // tm,)
    taps_spec = pl.BlockSpec((tm, Kc), lambda i: (i, 0))
    w_spec = pl.BlockSpec((Kc, Cout), lambda i: (0, 0))      # weights stay VMEM-resident
    y_spec = pl.BlockSpec((tm, Cout), lambda i: (i, 0))
    s_spec = pl.BlockSpec((1, Cout), lambda i: (0, 0))       # accumulated across the grid
    return pl.pallas_call(
        _conv_bn_kernel,
        out_shape=(jax.ShapeDtypeStruct((M, Cout), jnp.float32),
                   jax.ShapeDtypeStruct((1, Cout), jnp.float32),
                   jax.ShapeDtypeStruct((1, Cout), jnp.float32)),
        grid_spec=pltpu.PrefetchScalarGridSpec(
            num_scalar_prefetch=0,
            grid=grid,
            in_specs=[taps_spec, w_spec],
            out_specs=(y_spec, s_spec, s_spec)),
        compiler_params=pltpu.CompilerParams(
            dimension_semantics=("arbitrary",),     # stats accumulate across the axis
            vmem_limit_bytes=_VMEM_LIMIT),
    )(taps, w2d)


def _affine_kernel(x_ref, s_ref, b_ref, o_ref, *, relu):
    y = x_ref[...] * s_ref[...] + b_ref[...]
    if relu:
        y = jnp.maximum(y, 0.0)
    o_ref[...] = y


def _affine_res_kernel(x_ref, s_ref, b_ref, r_ref, o_ref, *, relu):
    y = x_ref[...] * s_ref[...] + b_ref[...] + r_ref[...]
    if relu:
        y = jnp.maximum(y, 0.0)
    o_ref[...] = y


def affine_act(x, scale, shift, residual=None, relu=False):
    """Fused y = x*scale + shift (+ residual) (ReLU).  x: (M, C) f32."""
    M, C = x.shape
    tm = _pick_tm(M, 3 * 2 * C * 4)
    grid = (M // tm,)
    s2 = scale.reshape(1, C).astype(jnp.float32)
    b2 = shift.reshape(1, C).astype(jnp.float32)
    row_spec = pl.BlockSpec((tm, C), lambda i: (i, 0))
    vec_spec = pl.BlockSpec((1, C), lambda i: (0, 0))
    if residual is None:
        kern = functools.partial(_affine_kernel, relu=relu)
        in_specs = [row_spec, vec_spec, vec_spec]
        args = (x, s2, b2)
    else:
        kern = functools.partial(_affine_res_kernel, relu=relu)
        in_specs = [row_spec, vec_spec, vec_spec, row_spec]
        args = (x, s2, b2, residual.astype(jnp.float32))
    return pl.pallas_call(
        kern,
        out_shape=jax.ShapeDtypeStruct((M, C), jnp.float32),
        grid_spec=pltpu.PrefetchScalarGridSpec(
            num_scalar_prefetch=0,
            grid=grid,
            in_specs=in_specs,
            out_specs=row_spec),
        compiler_params=pltpu.CompilerParams(
            dimension_semantics=("parallel",),
            vmem_limit_bytes=_VMEM_LIMIT),
    )(*args)


# ----------------------------------------------------------------------------
# Layer wrappers (JAX glue: tap slicing, BN finalize, phase interleave)
# ----------------------------------------------------------------------------
def _bn_scale_shift(s1, s2, count, gamma, beta):
    """Training-mode BatchNorm3d (batch statistics, biased variance)."""
    mean = s1.reshape(-1) / count
    var = jnp.maximum(s2.reshape(-1) / count - mean * mean, 0.0)
    scale = gamma * jax.lax.rsqrt(var + _BN_EPS)
    shift = beta - mean * scale
    return scale, shift


def _conv3d_im2col(x, stride):
    """3x3x3 / pad=1 im2col with the 27 taps folded into the contraction dim (bf16)."""
    N, D, H, W, C = x.shape
    xp = jnp.pad(x, ((0, 0), (1, 1), (1, 1), (1, 1), (0, 0)))
    Do = (D - 1) // stride + 1
    Ho = (H - 1) // stride + 1
    Wo = (W - 1) // stride + 1
    taps = []
    for kd in range(3):
        for kh in range(3):
            for kw in range(3):
                sl = jax.lax.slice(
                    xp,
                    (0, kd, kh, kw, 0),
                    (N, kd + (Do - 1) * stride + 1,
                     kh + (Ho - 1) * stride + 1,
                     kw + (Wo - 1) * stride + 1, C),
                    (1, stride, stride, stride, 1))
                taps.append(sl.reshape(N * Do * Ho * Wo, C))
    taps = jnp.concatenate(taps, axis=1).astype(jnp.bfloat16)   # (M, 27*C)
    return taps, (N, Do, Ho, Wo)


def convbn3d(x, p, stride, relu, residual=None):
    """convbn_3d (bias-free Conv3d k=3 pad=1 + BatchNorm3d) + optional residual/ReLU."""
    Cin = x.shape[-1]
    Cout = p['w'].shape[-1]
    taps, (N, Do, Ho, Wo) = _conv3d_im2col(x, stride)
    w2d = p['w'].reshape(27 * Cin, Cout).astype(jnp.bfloat16)
    y, s1, s2 = conv_bn_matmul(taps, w2d)
    M = y.shape[0]
    scale, shift = _bn_scale_shift(s1, s2, float(M), p['gamma'], p['beta'])
    r = residual.reshape(M, Cout) if residual is not None else None
    out = affine_act(y, scale, shift, residual=r, relu=relu)
    return out.reshape(N, Do, Ho, Wo, Cout)


# Transposed-conv phase selection: (output parity, input offset) -> kernel index.
#   out[2i]   = x[i]   * w[k=1]
#   out[2i+1] = x[i]   * w[k=2] + x[i+1] * w[k=0]
_KSEL = {(0, 0): 1, (0, 1): -1, (1, 0): 2, (1, 1): 0}      # -1: tap unused -> zero block


def _transpose_phase_weight(w):
    """(3,3,3,Cin,Cout) -> (8*Cin, 8*Cout): rows = 2x2x2 input taps (dd,dh,dw),
    cols = 8 output parity phases (pd,ph,pw); unused (tap, phase) blocks are zero."""
    Cin, Cout = w.shape[3], w.shape[4]
    zero = jnp.zeros((Cin, Cout), w.dtype)
    rows = []
    for dd in (0, 1):
        for dh in (0, 1):
            for dw in (0, 1):
                blocks = []
                for pd in (0, 1):
                    for ph in (0, 1):
                        for pw in (0, 1):
                            kd = _KSEL[(pd, dd)]
                            kh = _KSEL[(ph, dh)]
                            kw = _KSEL[(pw, dw)]
                            blocks.append(zero if (kd < 0 or kh < 0 or kw < 0)
                                          else w[kd, kh, kw])
                rows.append(jnp.concatenate(blocks, axis=1))
    return jnp.concatenate(rows, axis=0)                     # (8*Cin, 8*Cout)


def convtransbn3d(x, p, relu, residual=None):
    """ConvTranspose3d(k=3, stride=2, pad=1, output_padding=1, bias=False) + BN3d
    as a single matmul over the 2x2x2 tap neighborhood with an 8-phase weight
    matrix, + optional residual / ReLU (applied in the lane-dense phase layout)."""
    N, D, H, W, Cin = x.shape
    Cout = p['w'].shape[-1]
    M = N * D * H * W
    xp = jnp.pad(x, ((0, 0), (0, 1), (0, 1), (0, 1), (0, 0)))
    taps = []
    for dd in (0, 1):
        for dh in (0, 1):
            for dw in (0, 1):
                sl = jax.lax.slice(xp, (0, dd, dh, dw, 0),
                                   (N, dd + D, dh + H, dw + W, Cin))
                taps.append(sl.reshape(M, Cin))
    taps = jnp.concatenate(taps, axis=1).astype(jnp.bfloat16)        # (M, 8*Cin)
    wmat = _transpose_phase_weight(p['w']).astype(jnp.bfloat16)      # (8*Cin, 8*Cout)

    y, s1, s2 = conv_bn_matmul(taps, wmat)                           # (M, 8*Cout)
    # BN statistics: combine the 8 phase copies of every real channel.
    s1c = s1.reshape(8, Cout).sum(axis=0)
    s2c = s2.reshape(8, Cout).sum(axis=0)
    scale, shift = _bn_scale_shift(s1c, s2c, float(8 * M), p['gamma'], p['beta'])
    scale8 = jnp.tile(scale, 8)
    shift8 = jnp.tile(shift, 8)

    r = None
    if residual is not None:
        # (N, 2D, 2H, 2W, C) -> phase layout (M, 8*Cout)
        r = residual.reshape(N, D, 2, H, 2, W, 2, Cout)
        r = jnp.transpose(r, (0, 1, 3, 5, 2, 4, 6, 7)).reshape(M, 8 * Cout)

    out = affine_act(y, scale8, shift8, residual=r, relu=relu)       # (M, 8*Cout)
    # Interleave: out[n, 2d+pd, 2h+ph, 2w+pw, c] = phase (pd,ph,pw) value at (n,d,h,w,c)
    out = out.reshape(N, D, H, W, 2, 2, 2, Cout)
    out = jnp.transpose(out, (0, 1, 4, 2, 5, 3, 6, 7)).reshape(N, 2 * D, 2 * H, 2 * W, Cout)
    return out


# ----------------------------------------------------------------------------
# Parameter initialization (deterministic)
# ----------------------------------------------------------------------------
class _KeyGen:
    def __init__(self, key):
        self._key = key

    def __call__(self):
        self._key, sub = jax.random.split(self._key)
        return sub


def _init_convbn3d(kg, cin, cout):
    n = 3 * 3 * 3 * cout
    w = jax.random.normal(kg(), (3, 3, 3, cin, cout), jnp.float32) * math.sqrt(2.0 / n)
    return {'w': w,
            'gamma': jnp.ones((cout,), jnp.float32),
            'beta': jnp.zeros((cout,), jnp.float32)}


def init_params(key, inplanes):
    kg = _KeyGen(key)
    c = inplanes
    return {'conv1': _init_convbn3d(kg, c, 2 * c),
            'conv2': _init_convbn3d(kg, 2 * c, 2 * c),
            'conv3': _init_convbn3d(kg, 2 * c, 2 * c),
            'conv4': _init_convbn3d(kg, 2 * c, 2 * c),
            'conv5': _init_convbn3d(kg, 2 * c, 2 * c),   # ConvTranspose3d weights
            'conv6': _init_convbn3d(kg, 2 * c, c)}       # ConvTranspose3d weights


# ----------------------------------------------------------------------------
# hourglass.forward
# ----------------------------------------------------------------------------
def _to_ndhwc(t):
    return jnp.transpose(t, (0, 2, 3, 4, 1)).astype(jnp.float32)


def hourglass_forward(params, x, presqu=None, postsqu=None):
    """Mirrors hourglass.forward(x, presqu, postsqu); NCDHW in, NCDHW out."""
    xc = _to_ndhwc(x)
    post_c = _to_ndhwc(postsqu) if postsqu is not None else None
    pres_c = _to_ndhwc(presqu) if presqu is not None else None

    out = convbn3d(xc, params['conv1'], stride=2, relu=True)                 # conv1+ReLU
    pre = convbn3d(out, params['conv2'], stride=1, relu=True,
                   residual=post_c)                                          # conv2(+postsqu)+ReLU
    out = convbn3d(pre, params['conv3'], stride=2, relu=True)                # conv3+ReLU
    out = convbn3d(out, params['conv4'], stride=1, relu=True)                # conv4+ReLU
    res5 = pres_c if presqu is not None else pre
    post = convtransbn3d(out, params['conv5'], relu=True, residual=res5)     # conv5+res+ReLU
    out = convtransbn3d(post, params['conv6'], relu=False)                   # conv6 (BN only)

    # TODO(synk): BatchNorm running-stat (momentum) updates are module state, not
    # part of the functional forward output, so they are not emitted here.
    to_ncdhw = lambda t: jnp.transpose(t, (0, 4, 1, 2, 3))
    return to_ncdhw(out), to_ncdhw(pre), to_ncdhw(post)


# ----------------------------------------------------------------------------
if __name__ == "__main__":
    key = jax.random.PRNGKey(0)
    kx, kp = jax.random.split(key)
    # Small shapes consistent with the module: D,H,W divisible by 4 (two stride-2 stages).
    N, inplanes, D, H, W = 2, 16, 8, 16, 16
    x = jax.random.normal(kx, (N, inplanes, D, H, W), jnp.float32)   # NCDHW like PyTorch
    params = init_params(kp, inplanes)

    out, pre, post = jax.jit(hourglass_forward)(params, x)   # presqu=None, postsqu=None
    jax.block_until_ready((out, pre, post))

    assert out.shape == (N, inplanes, D, H, W)
    assert pre.shape == (N, 2 * inplanes, D // 2, H // 2, W // 2)
    assert post.shape == (N, 2 * inplanes, D // 2, H // 2, W // 2)
    assert bool(jnp.all(jnp.isfinite(out)))
    assert bool(jnp.all(jnp.isfinite(pre)))
    assert bool(jnp.all(jnp.isfinite(post)))
    print("KERNEL_OK")
</pallas_src>

<mosaic_0001>
module attributes {stable_mosaic.version = 11 : i64} {
  func.func @_conv_bn_kernel(%arg0: i32, %arg1: memref<512x432xbf16, #tpu.memory_space<vmem>>, %arg2: memref<432x32xbf16, #tpu.memory_space<vmem>>, %arg3: memref<512x32xf32, #tpu.memory_space<vmem>>, %arg4: memref<1x32xf32, #tpu.memory_space<vmem>>, %arg5: memref<1x32xf32, #tpu.memory_space<vmem>>) attributes {dimension_semantics = [#tpu.dimension_semantics<arbitrary>], iteration_bounds = array<i64: 1>, scalar_prefetch = 0 : i64, scratch_operands = 0 : i64, tpu.core_type = #tpu.core_type<tc>, window_params = [{transform_indices = @transform_0, window_bounds = array<i64: 512, 432>}, {pipeline_mode = #tpu.pipeline_mode<synchronous>, transform_indices = @transform_1, window_bounds = array<i64: 432, 32>}, {transform_indices = @transform_2, window_bounds = array<i64: 512, 32>}, {pipeline_mode = #tpu.pipeline_mode<synchronous>, transform_indices = @transform_3, window_bounds = array<i64: 1, 32>}, {pipeline_mode = #tpu.pipeline_mode<synchronous>, transform_indices = @transform_4, window_bounds = array<i64: 1, 32>}]} {
    %c0_i32 = arith.constant 0 : i32
    %0 = arith.cmpi eq, %arg0, %c0_i32 : i32
    %1 = arith.extui %0 : i1 to i32
    %c0_i32_0 = arith.constant 0 : i32
    %2 = arith.cmpi ne, %1, %c0_i32_0 : i32
    scf.if %2 {
      %cst_16 = arith.constant 0.000000e+00 : f32
      %18 = vector.broadcast %cst_16 : f32 to vector<1x32xf32>
      %c0_17 = arith.constant 0 : index
      %c0_18 = arith.constant 0 : index
      %19 = vector.load %arg4[%c0_17, %c0_18] : memref<1x32xf32, #tpu.memory_space<vmem>>, vector<1x32xf32>
      tpu.vector_store %arg4[%c0_17, %c0_18], %18 {strides = array<i32>} : memref<1x32xf32, #tpu.memory_space<vmem>>, vector<1x32xf32>,
      %cst_19 = arith.constant 0.000000e+00 : f32
      %20 = vector.broadcast %cst_19 : f32 to vector<1x32xf32>
      %c0_20 = arith.constant 0 : index
      %c0_21 = arith.constant 0 : index
      %21 = vector.load %arg5[%c0_20, %c0_21] : memref<1x32xf32, #tpu.memory_space<vmem>>, vector<1x32xf32>
      tpu.vector_store %arg5[%c0_20, %c0_21], %20 {strides = array<i32>} : memref<1x32xf32, #tpu.memory_space<vmem>>, vector<1x32xf32>,
    } else {
    }
    %c0 = arith.constant 0 : index
    %c0_1 = arith.constant 0 : index
    %3 = vector.load %arg1[%c0, %c0_1] : memref<512x432xbf16, #tpu.memory_space<vmem>>, vector<512x432xbf16>
    %c0_2 = arith.constant 0 : index
    %c0_3 = arith.constant 0 : index
    %4 = vector.load %arg2[%c0_2, %c0_3] : memref<432x32xbf16, #tpu.memory_space<vmem>>, vector<432x32xbf16>
    %cst = arith.constant dense<0.000000e+00> : vector<512x32xf32>
    %5 = tpu.matmul %3, %4, %cst {dimension_numbers = #tpu.dot_dimension_numbers<[1], [0], [0], [1], [0, 0, 1, 1], [], []>} : vector<512x432xbf16>, vector<432x32xbf16>, vector<512x32xf32> -> vector<512x32xf32>
    %c0_4 = arith.constant 0 : index
    %c0_5 = arith.constant 0 : index
    %6 = vector.load %arg3[%c0_4, %c0_5] : memref<512x32xf32, #tpu.memory_space<vmem>>, vector<512x32xf32>
    tpu.vector_store %arg3[%c0_4, %c0_5], %5 {strides = array<i32>} : memref<512x32xf32, #tpu.memory_space<vmem>>, vector<512x32xf32>,
    %c0_6 = arith.constant 0 : index
    %c0_7 = arith.constant 0 : index
    %7 = vector.load %arg4[%c0_6, %c0_7] : memref<1x32xf32, #tpu.memory_space<vmem>>, vector<1x32xf32>
    %cst_8 = arith.constant dense<0.000000e+00> : vector<32xf32>
    %8 = vector.multi_reduction <add>, %5, %cst_8 [0] : vector<512x32xf32> to vector<32xf32>
    %9 = vector.shape_cast %8 : vector<32xf32> to vector<1x32xf32>
    %10 = arith.addf %7, %9 : vector<1x32xf32>
    %c0_9 = arith.constant 0 : index
    %c0_10 = arith.constant 0 : index
    %11 = vector.load %arg4[%c0_9, %c0_10] : memref<1x32xf32, #tpu.memory_space<vmem>>, vector<1x32xf32>
    tpu.vector_store %arg4[%c0_9, %c0_10], %10 {strides = array<i32>} : memref<1x32xf32, #tpu.memory_space<vmem>>, vector<1x32xf32>,
    %c0_11 = arith.constant 0 : index
    %c0_12 = arith.constant 0 : index
    %12 = vector.load %arg5[%c0_11, %c0_12] : memref<1x32xf32, #tpu.memory_space<vmem>>, vector<1x32xf32>
    %13 = arith.mulf %5, %5 : vector<512x32xf32>
    %cst_13 = arith.constant dense<0.000000e+00> : vector<32xf32>
    %14 = vector.multi_reduction <add>, %13, %cst_13 [0] : vector<512x32xf32> to vector<32xf32>
    %15 = vector.shape_cast %14 : vector<32xf32> to vector<1x32xf32>
    %16 = arith.addf %12, %15 : vector<1x32xf32>
    %c0_14 = arith.constant 0 : index
    %c0_15 = arith.constant 0 : index
    %17 = vector.load %arg5[%c0_14, %c0_15] : memref<1x32xf32, #tpu.memory_space<vmem>>, vector<1x32xf32>
    tpu.vector_store %arg5[%c0_14, %c0_15], %16 {strides = array<i32>} : memref<1x32xf32, #tpu.memory_space<vmem>>, vector<1x32xf32>,
    return
  }
  func.func @transform_0(%arg0: i32) -> (i32, i32) {
    %c0_i32 = arith.constant 0 : i32
    %c0_i32_0 = arith.constant 0 : i32
    return %arg0, %c0_i32 : i32, i32
  }
  func.func @transform_1(%arg0: i32) -> (i32, i32) {
    %c0_i32 = arith.constant 0 : i32
    %c0_i32_0 = arith.constant 0 : i32
    %c0_i32_1 = arith.constant 0 : i32
    return %c0_i32, %c0_i32_0 : i32, i32
  }
  func.func @transform_2(%arg0: i32) -> (i32, i32) {
    %c0_i32 = arith.constant 0 : i32
    %c0_i32_0 = arith.constant 0 : i32
    return %arg0, %c0_i32 : i32, i32
  }
  func.func @transform_3(%arg0: i32) -> (i32, i32) {
    %c0_i32 = arith.constant 0 : i32
    %c0_i32_0 = arith.constant 0 : i32
    %c0_i32_1 = arith.constant 0 : i32
    return %c0_i32, %c0_i32_0 : i32, i32
  }
  func.func @transform_4(%arg0: i32) -> (i32, i32) {
    %c0_i32 = arith.constant 0 : i32
    %c0_i32_0 = arith.constant 0 : i32
    %c0_i32_1 = arith.constant 0 : i32
    return %c0_i32, %c0_i32_0 : i32, i32
  }
}

module attributes {stable_mosaic.version = 11 : i64} {
  func.func @_affine_kernel(%arg0: i32, %arg1: memref<512x32xf32, #tpu.memory_space<vmem>>, %arg2: memref<1x32xf32, #tpu.memory_space<vmem>>, %arg3: memref<1x32xf32, #tpu.memory_space<vmem>>, %arg4: memref<512x32xf32, #tpu.memory_space<vmem>>) attributes {dimension_semantics = [#tpu.dimension_semantics<parallel>], iteration_bounds = array<i64: 1>, scalar_prefetch = 0 : i64, scratch_operands = 0 : i64, tpu.core_type = #tpu.core_type<tc>, window_params = [{transform_indices = @transform_0, window_bounds = array<i64: 512, 32>}, {pipeline_mode = #tpu.pipeline_mode<synchronous>, transform_indices = @transform_1, window_bounds = array<i64: 1, 32>}, {pipeline_mode = #tpu.pipeline_mode<synchronous>, transform_indices = @transform_2, window_bounds = array<i64: 1, 32>}, {transform_indices = @transform_3, window_bounds = array<i64: 512, 32>}]} {
    %c0 = arith.constant 0 : index
    %c0_0 = arith.constant 0 : index
    %0 = vector.load %arg1[%c0, %c0_0] : memref<512x32xf32, #tpu.memory_space<vmem>>, vector<512x32xf32>
    %c0_1 = arith.constant 0 : index
    %c0_2 = arith.constant 0 : index
    %1 = vector.load %arg2[%c0_1, %c0_2] : memref<1x32xf32, #tpu.memory_space<vmem>>, vector<1x32xf32>
    %2 = vector.broadcast %1 : vector<1x32xf32> to vector<512x32xf32>
    %3 = arith.mulf %0, %2 : vector<512x32xf32>
    %c0_3 = arith.constant 0 : index
    %c0_4 = arith.constant 0 : index
    %4 = vector.load %arg3[%c0_3, %c0_4] : memref<1x32xf32, #tpu.memory_space<vmem>>, vector<1x32xf32>
    %5 = vector.broadcast %4 : vector<1x32xf32> to vector<512x32xf32>
    %6 = arith.addf %3, %5 : vector<512x32xf32>
    %cst = arith.constant 0.000000e+00 : f32
    %7 = vector.broadcast %cst : f32 to vector<512x32xf32>
    %8 = arith.maximumf %6, %7 : vector<512x32xf32>
    %c0_5 = arith.constant 0 : index
    %c0_6 = arith.constant 0 : index
    %9 = vector.load %arg4[%c0_5, %c0_6] : memref<512x32xf32, #tpu.memory_space<vmem>>, vector<512x32xf32>
    tpu.vector_store %arg4[%c0_5, %c0_6], %8 {strides = array<i32>} : memref<512x32xf32, #tpu.memory_space<vmem>>, vector<512x32xf32>,
    return
  }
  func.func @transform_0(%arg0: i32) -> (i32, i32) {
    %c0_i32 = arith.constant 0 : i32
    %c0_i32_0 = arith.constant 0 : i32
    return %arg0, %c0_i32 : i32, i32
  }
  func.func @transform_1(%arg0: i32) -> (i32, i32) {
    %c0_i32 = arith.constant 0 : i32
    %c0_i32_0 = arith.constant 0 : i32
    %c0_i32_1 = arith.constant 0 : i32
    return %c0_i32, %c0_i32_0 : i32, i32
  }
  func.func @transform_2(%arg0: i32) -> (i32, i32) {
    %c0_i32 = arith.constant 0 : i32
    %c0_i32_0 = arith.constant 0 : i32
    %c0_i32_1 = arith.constant 0 : i32
    return %c0_i32, %c0_i32_0 : i32, i32
  }
  func.func @transform_3(%arg0: i32) -> (i32, i32) {
    %c0_i32 = arith.constant 0 : i32
    %c0_i32_0 = arith.constant 0 : i32
    return %arg0, %c0_i32 : i32, i32
  }
}

module attributes {stable_mosaic.version = 11 : i64} {
  func.func @_conv_bn_kernel(%arg0: i32, %arg1: memref<512x864xbf16, #tpu.memory_space<vmem>>, %arg2: memref<864x32xbf16, #tpu.memory_space<vmem>>, %arg3: memref<512x32xf32, #tpu.memory_space<vmem>>, %arg4: memref<1x32xf32, #tpu.memory_space<vmem>>, %arg5: memref<1x32xf32, #tpu.memory_space<vmem>>) attributes {dimension_semantics = [#tpu.dimension_semantics<arbitrary>], iteration_bounds = array<i64: 1>, scalar_prefetch = 0 : i64, scratch_operands = 0 : i64, tpu.core_type = #tpu.core_type<tc>, window_params = [{transform_indices = @transform_0, window_bounds = array<i64: 512, 864>}, {pipeline_mode = #tpu.pipeline_mode<synchronous>, transform_indices = @transform_1, window_bounds = array<i64: 864, 32>}, {transform_indices = @transform_2, window_bounds = array<i64: 512, 32>}, {pipeline_mode = #tpu.pipeline_mode<synchronous>, transform_indices = @transform_3, window_bounds = array<i64: 1, 32>}, {pipeline_mode = #tpu.pipeline_mode<synchronous>, transform_indices = @transform_4, window_bounds = array<i64: 1, 32>}]} {
    %c0_i32 = arith.constant 0 : i32
    %0 = arith.cmpi eq, %arg0, %c0_i32 : i32
    %1 = arith.extui %0 : i1 to i32
    %c0_i32_0 = arith.constant 0 : i32
    %2 = arith.cmpi ne, %1, %c0_i32_0 : i32
    scf.if %2 {
      %cst_16 = arith.constant 0.000000e+00 : f32
      %18 = vector.broadcast %cst_16 : f32 to vector<1x32xf32>
      %c0_17 = arith.constant 0 : index
      %c0_18 = arith.constant 0 : index
      %19 = vector.load %arg4[%c0_17, %c0_18] : memref<1x32xf32, #tpu.memory_space<vmem>>, vector<1x32xf32>
      tpu.vector_store %arg4[%c0_17, %c0_18], %18 {strides = array<i32>} : memref<1x32xf32, #tpu.memory_space<vmem>>, vector<1x32xf32>,
      %cst_19 = arith.constant 0.000000e+00 : f32
      %20 = vector.broadcast %cst_19 : f32 to vector<1x32xf32>
      %c0_20 = arith.constant 0 : index
      %c0_21 = arith.constant 0 : index
      %21 = vector.load %arg5[%c0_20, %c0_21] : memref<1x32xf32, #tpu.memory_space<vmem>>, vector<1x32xf32>
      tpu.vector_store %arg5[%c0_20, %c0_21], %20 {strides = array<i32>} : memref<1x32xf32, #tpu.memory_space<vmem>>, vector<1x32xf32>,
    } else {
    }
    %c0 = arith.constant 0 : index
    %c0_1 = arith.constant 0 : index
    %3 = vector.load %arg1[%c0, %c0_1] : memref<512x864xbf16, #tpu.memory_space<vmem>>, vector<512x864xbf16>
    %c0_2 = arith.constant 0 : index
    %c0_3 = arith.constant 0 : index
    %4 = vector.load %arg2[%c0_2, %c0_3] : memref<864x32xbf16, #tpu.memory_space<vmem>>, vector<864x32xbf16>
    %cst = arith.constant dense<0.000000e+00> : vector<512x32xf32>
    %5 = tpu.matmul %3, %4, %cst {dimension_numbers = #tpu.dot_dimension_numbers<[1], [0], [0], [1], [0, 0, 1, 1], [], []>} : vector<512x864xbf16>, vector<864x32xbf16>, vector<512x32xf32> -> vector<512x32xf32>
    %c0_4 = arith.constant 0 : index
    %c0_5 = arith.constant 0 : index
    %6 = vector.load %arg3[%c0_4, %c0_5] : memref<512x32xf32, #tpu.memory_space<vmem>>, vector<512x32xf32>
    tpu.vector_store %arg3[%c0_4, %c0_5], %5 {strides = array<i32>} : memref<512x32xf32, #tpu.memory_space<vmem>>, vector<512x32xf32>,
    %c0_6 = arith.constant 0 : index
    %c0_7 = arith.constant 0 : index
    %7 = vector.load %arg4[%c0_6, %c0_7] : memref<1x32xf32, #tpu.memory_space<vmem>>, vector<1x32xf32>
    %cst_8 = arith.constant dense<0.000000e+00> : vector<32xf32>
    %8 = vector.multi_reduction <add>, %5, %cst_8 [0] : vector<512x32xf32> to vector<32xf32>
    %9 = vector.shape_cast %8 : vector<32xf32> to vector<1x32xf32>
    %10 = arith.addf %7, %9 : vector<1x32xf32>
    %c0_9 = arith.constant 0 : index
    %c0_10 = arith.constant 0 : index
    %11 = vector.load %arg4[%c0_9, %c0_10] : memref<1x32xf32, #tpu.memory_space<vmem>>, vector<1x32xf32>
    tpu.vector_store %arg4[%c0_9, %c0_10], %10 {strides = array<i32>} : memref<1x32xf32, #tpu.memory_space<vmem>>, vector<1x32xf32>,
    %c0_11 = arith.constant 0 : index
    %c0_12 = arith.constant 0 : index
    %12 = vector.load %arg5[%c0_11, %c0_12] : memref<1x32xf32, #tpu.memory_space<vmem>>, vector<1x32xf32>
    %13 = arith.mulf %5, %5 : vector<512x32xf32>
    %cst_13 = arith.constant dense<0.000000e+00> : vector<32xf32>
    %14 = vector.multi_reduction <add>, %13, %cst_13 [0] : vector<512x32xf32> to vector<32xf32>
    %15 = vector.shape_cast %14 : vector<32xf32> to vector<1x32xf32>
    %16 = arith.addf %12, %15 : vector<1x32xf32>
    %c0_14 = arith.constant 0 : index
    %c0_15 = arith.constant 0 : index
    %17 = vector.load %arg5[%c0_14, %c0_15] : memref<1x32xf32, #tpu.memory_space<vmem>>, vector<1x32xf32>
    tpu.vector_store %arg5[%c0_14, %c0_15], %16 {strides = array<i32>} : memref<1x32xf32, #tpu.memory_space<vmem>>, vector<1x32xf32>,
    return
  }
  func.func @transform_0(%arg0: i32) -> (i32, i32) {
    %c0_i32 = arith.constant 0 : i32
    %c0_i32_0 = arith.constant 0 : i32
    return %arg0, %c0_i32 : i32, i32
  }
  func.func @transform_1(%arg0: i32) -> (i32, i32) {
    %c0_i32 = arith.constant 0 : i32
    %c0_i32_0 = arith.constant 0 : i32
    %c0_i32_1 = arith.constant 0 : i32
    return %c0_i32, %c0_i32_0 : i32, i32
  }
  func.func @transform_2(%arg0: i32) -> (i32, i32) {
    %c0_i32 = arith.constant 0 : i32
    %c0_i32_0 = arith.constant 0 : i32
    return %arg0, %c0_i32 : i32, i32
  }
  func.func @transform_3(%arg0: i32) -> (i32, i32) {
    %c0_i32 = arith.constant 0 : i32
    %c0_i32_0 = arith.constant 0 : i32
    %c0_i32_1 = arith.constant 0 : i32
    return %c0_i32, %c0_i32_0 : i32, i32
  }
  func.func @transform_4(%arg0: i32) -> (i32, i32) {
    %c0_i32 = arith.constant 0 : i32
    %c0_i32_0 = arith.constant 0 : i32
    %c0_i32_1 = arith.constant 0 : i32
    return %c0_i32, %c0_i32_0 : i32, i32
  }
}

module attributes {stable_mosaic.version = 11 : i64} {
  func.func @_conv_bn_kernel(%arg0: i32, %arg1: memref<64x864xbf16, #tpu.memory_space<vmem>>, %arg2: memref<864x32xbf16, #tpu.memory_space<vmem>>, %arg3: memref<64x32xf32, #tpu.memory_space<vmem>>, %arg4: memref<1x32xf32, #tpu.memory_space<vmem>>, %arg5: memref<1x32xf32, #tpu.memory_space<vmem>>) attributes {dimension_semantics = [#tpu.dimension_semantics<arbitrary>], iteration_bounds = array<i64: 1>, scalar_prefetch = 0 : i64, scratch_operands = 0 : i64, tpu.core_type = #tpu.core_type<tc>, window_params = [{transform_indices = @transform_0, window_bounds = array<i64: 64, 864>}, {pipeline_mode = #tpu.pipeline_mode<synchronous>, transform_indices = @transform_1, window_bounds = array<i64: 864, 32>}, {transform_indices = @transform_2, window_bounds = array<i64: 64, 32>}, {pipeline_mode = #tpu.pipeline_mode<synchronous>, transform_indices = @transform_3, window_bounds = array<i64: 1, 32>}, {pipeline_mode = #tpu.pipeline_mode<synchronous>, transform_indices = @transform_4, window_bounds = array<i64: 1, 32>}]} {
    %c0_i32 = arith.constant 0 : i32
    %0 = arith.cmpi eq, %arg0, %c0_i32 : i32
    %1 = arith.extui %0 : i1 to i32
    %c0_i32_0 = arith.constant 0 : i32
    %2 = arith.cmpi ne, %1, %c0_i32_0 : i32
    scf.if %2 {
      %cst_16 = arith.constant 0.000000e+00 : f32
      %18 = vector.broadcast %cst_16 : f32 to vector<1x32xf32>
      %c0_17 = arith.constant 0 : index
      %c0_18 = arith.constant 0 : index
      %19 = vector.load %arg4[%c0_17, %c0_18] : memref<1x32xf32, #tpu.memory_space<vmem>>, vector<1x32xf32>
      tpu.vector_store %arg4[%c0_17, %c0_18], %18 {strides = array<i32>} : memref<1x32xf32, #tpu.memory_space<vmem>>, vector<1x32xf32>,
      %cst_19 = arith.constant 0.000000e+00 : f32
      %20 = vector.broadcast %cst_19 : f32 to vector<1x32xf32>
      %c0_20 = arith.constant 0 : index
      %c0_21 = arith.constant 0 : index
      %21 = vector.load %arg5[%c0_20, %c0_21] : memref<1x32xf32, #tpu.memory_space<vmem>>, vector<1x32xf32>
      tpu.vector_store %arg5[%c0_20, %c0_21], %20 {strides = array<i32>} : memref<1x32xf32, #tpu.memory_space<vmem>>, vector<1x32xf32>,
    } else {
    }
    %c0 = arith.constant 0 : index
    %c0_1 = arith.constant 0 : index
    %3 = vector.load %arg1[%c0, %c0_1] : memref<64x864xbf16, #tpu.memory_space<vmem>>, vector<64x864xbf16>
    %c0_2 = arith.constant 0 : index
    %c0_3 = arith.constant 0 : index
    %4 = vector.load %arg2[%c0_2, %c0_3] : memref<864x32xbf16, #tpu.memory_space<vmem>>, vector<864x32xbf16>
    %cst = arith.constant dense<0.000000e+00> : vector<64x32xf32>
    %5 = tpu.matmul %3, %4, %cst {dimension_numbers = #tpu.dot_dimension_numbers<[1], [0], [0], [1], [0, 0, 1, 1], [], []>} : vector<64x864xbf16>, vector<864x32xbf16>, vector<64x32xf32> -> vector<64x32xf32>
    %c0_4 = arith.constant 0 : index
    %c0_5 = arith.constant 0 : index
    %6 = vector.load %arg3[%c0_4, %c0_5] : memref<64x32xf32, #tpu.memory_space<vmem>>, vector<64x32xf32>
    tpu.vector_store %arg3[%c0_4, %c0_5], %5 {strides = array<i32>} : memref<64x32xf32, #tpu.memory_space<vmem>>, vector<64x32xf32>,
    %c0_6 = arith.constant 0 : index
    %c0_7 = arith.constant 0 : index
    %7 = vector.load %arg4[%c0_6, %c0_7] : memref<1x32xf32, #tpu.memory_space<vmem>>, vector<1x32xf32>
    %cst_8 = arith.constant dense<0.000000e+00> : vector<32xf32>
    %8 = vector.multi_reduction <add>, %5, %cst_8 [0] : vector<64x32xf32> to vector<32xf32>
    %9 = vector.shape_cast %8 : vector<32xf32> to vector<1x32xf32>
    %10 = arith.addf %7, %9 : vector<1x32xf32>
    %c0_9 = arith.constant 0 : index
    %c0_10 = arith.constant 0 : index
    %11 = vector.load %arg4[%c0_9, %c0_10] : memref<1x32xf32, #tpu.memory_space<vmem>>, vector<1x32xf32>
    tpu.vector_store %arg4[%c0_9, %c0_10], %10 {strides = array<i32>} : memref<1x32xf32, #tpu.memory_space<vmem>>, vector<1x32xf32>,
    %c0_11 = arith.constant 0 : index
    %c0_12 = arith.constant 0 : index
    %12 = vector.load %arg5[%c0_11, %c0_12] : memref<1x32xf32, #tpu.memory_space<vmem>>, vector<1x32xf32>
    %13 = arith.mulf %5, %5 : vector<64x32xf32>
    %cst_13 = arith.constant dense<0.000000e+00> : vector<32xf32>
    %14 = vector.multi_reduction <add>, %13, %cst_13 [0] : vector<64x32xf32> to vector<32xf32>
    %15 = vector.shape_cast %14 : vector<32xf32> to vector<1x32xf32>
    %16 = arith.addf %12, %15 : vector<1x32xf32>
    %c0_14 = arith.constant 0 : index
    %c0_15 = arith.constant 0 : index
    %17 = vector.load %arg5[%c0_14, %c0_15] : memref<1x32xf32, #tpu.memory_space<vmem>>, vector<1x32xf32>
    tpu.vector_store %arg5[%c0_14, %c0_15], %16 {strides = array<i32>} : memref<1x32xf32, #tpu.memory_space<vmem>>, vector<1x32xf32>,
    return
  }
  func.func @transform_0(%arg0: i32) -> (i32, i32) {
    %c0_i32 = arith.constant 0 : i32
    %c0_i32_0 = arith.constant 0 : i32
    return %arg0, %c0_i32 : i32, i32
  }
  func.func @transform_1(%arg0: i32) -> (i32, i32) {
    %c0_i32 = arith.constant 0 : i32
    %c0_i32_0 = arith.constant 0 : i32
    %c0_i32_1 = arith.constant 0 : i32
    return %c0_i32, %c0_i32_0 : i32, i32
  }
  func.func @transform_2(%arg0: i32) -> (i32, i32) {
    %c0_i32 = arith.constant 0 : i32
    %c0_i32_0 = arith.constant 0 : i32
    return %arg0, %c0_i32 : i32, i32
  }
  func.func @transform_3(%arg0: i32) -> (i32, i32) {
    %c0_i32 = arith.constant 0 : i32
    %c0_i32_0 = arith.constant 0 : i32
    %c0_i32_1 = arith.constant 0 : i32
    return %c0_i32, %c0_i32_0 : i32, i32
  }
  func.func @transform_4(%arg0: i32) -> (i32, i32) {
    %c0_i32 = arith.constant 0 : i32
    %c0_i32_0 = arith.constant 0 : i32
    %c0_i32_1 = arith.constant 0 : i32
    return %c0_i32, %c0_i32_0 : i32, i32
  }
}

module attributes {stable_mosaic.version = 11 : i64} {
  func.func @_affine_kernel(%arg0: i32, %arg1: memref<64x32xf32, #tpu.memory_space<vmem>>, %arg2: memref<1x32xf32, #tpu.memory_space<vmem>>, %arg3: memref<1x32xf32, #tpu.memory_space<vmem>>, %arg4: memref<64x32xf32, #tpu.memory_space<vmem>>) attributes {dimension_semantics = [#tpu.dimension_semantics<parallel>], iteration_bounds = array<i64: 1>, scalar_prefetch = 0 : i64, scratch_operands = 0 : i64, tpu.core_type = #tpu.core_type<tc>, window_params = [{transform_indices = @transform_0, window_bounds = array<i64: 64, 32>}, {pipeline_mode = #tpu.pipeline_mode<synchronous>, transform_indices = @transform_1, window_bounds = array<i64: 1, 32>}, {pipeline_mode = #tpu.pipeline_mode<synchronous>, transform_indices = @transform_2, window_bounds = array<i64: 1, 32>}, {transform_indices = @transform_3, window_bounds = array<i64: 64, 32>}]} {
    %c0 = arith.constant 0 : index
    %c0_0 = arith.constant 0 : index
    %0 = vector.load %arg1[%c0, %c0_0] : memref<64x32xf32, #tpu.memory_space<vmem>>, vector<64x32xf32>
    %c0_1 = arith.constant 0 : index
    %c0_2 = arith.constant 0 : index
    %1 = vector.load %arg2[%c0_1, %c0_2] : memref<1x32xf32, #tpu.memory_space<vmem>>, vector<1x32xf32>
    %2 = vector.broadcast %1 : vector<1x32xf32> to vector<64x32xf32>
    %3 = arith.mulf %0, %2 : vector<64x32xf32>
    %c0_3 = arith.constant 0 : index
    %c0_4 = arith.constant 0 : index
    %4 = vector.load %arg3[%c0_3, %c0_4] : memref<1x32xf32, #tpu.memory_space<vmem>>, vector<1x32xf32>
    %5 = vector.broadcast %4 : vector<1x32xf32> to vector<64x32xf32>
    %6 = arith.addf %3, %5 : vector<64x32xf32>
    %cst = arith.constant 0.000000e+00 : f32
    %7 = vector.broadcast %cst : f32 to vector<64x32xf32>
    %8 = arith.maximumf %6, %7 : vector<64x32xf32>
    %c0_5 = arith.constant 0 : index
    %c0_6 = arith.constant 0 : index
    %9 = vector.load %arg4[%c0_5, %c0_6] : memref<64x32xf32, #tpu.memory_space<vmem>>, vector<64x32xf32>
    tpu.vector_store %arg4[%c0_5, %c0_6], %8 {strides = array<i32>} : memref<64x32xf32, #tpu.memory_space<vmem>>, vector<64x32xf32>,
    return
  }
  func.func @transform_0(%arg0: i32) -> (i32, i32) {
    %c0_i32 = arith.constant 0 : i32
    %c0_i32_0 = arith.constant 0 : i32
    return %arg0, %c0_i32 : i32, i32
  }
  func.func @transform_1(%arg0: i32) -> (i32, i32) {
    %c0_i32 = arith.constant 0 : i32
    %c0_i32_0 = arith.constant 0 : i32
    %c0_i32_1 = arith.constant 0 : i32
    return %c0_i32, %c0_i32_0 : i32, i32
  }
  func.func @transform_2(%arg0: i32) -> (i32, i32) {
    %c0_i32 = arith.constant 0 : i32
    %c0_i32_0 = arith.constant 0 : i32
    %c0_i32_1 = arith.constant 0 : i32
    return %c0_i32, %c0_i32_0 : i32, i32
  }
  func.func @transform_3(%arg0: i32) -> (i32, i32) {
    %c0_i32 = arith.constant 0 : i32
    %c0_i32_0 = arith.constant 0 : i32
    return %arg0, %c0_i32 : i32, i32
  }
}

module attributes {stable_mosaic.version = 11 : i64} {
  func.func @_conv_bn_kernel(%arg0: i32, %arg1: memref<64x256xbf16, #tpu.memory_space<vmem>>, %arg2: memref<256x256xbf16, #tpu.memory_space<vmem>>, %arg3: memref<64x256xf32, #tpu.memory_space<vmem>>, %arg4: memref<1x256xf32, #tpu.memory_space<vmem>>, %arg5: memref<1x256xf32, #tpu.memory_space<vmem>>) attributes {dimension_semantics = [#tpu.dimension_semantics<arbitrary>], iteration_bounds = array<i64: 1>, scalar_prefetch = 0 : i64, scratch_operands = 0 : i64, tpu.core_type = #tpu.core_type<tc>, window_params = [{transform_indices = @transform_0, window_bounds = array<i64: 64, 256>}, {pipeline_mode = #tpu.pipeline_mode<synchronous>, transform_indices = @transform_1, window_bounds = array<i64: 256, 256>}, {transform_indices = @transform_2, window_bounds = array<i64: 64, 256>}, {pipeline_mode = #tpu.pipeline_mode<synchronous>, transform_indices = @transform_3, window_bounds = array<i64: 1, 256>}, {pipeline_mode = #tpu.pipeline_mode<synchronous>, transform_indices = @transform_4, window_bounds = array<i64: 1, 256>}]} {
    %c0_i32 = arith.constant 0 : i32
    %0 = arith.cmpi eq, %arg0, %c0_i32 : i32
    %1 = arith.extui %0 : i1 to i32
    %c0_i32_0 = arith.constant 0 : i32
    %2 = arith.cmpi ne, %1, %c0_i32_0 : i32
    scf.if %2 {
      %cst_16 = arith.constant 0.000000e+00 : f32
      %18 = vector.broadcast %cst_16 : f32 to vector<1x256xf32>
      %c0_17 = arith.constant 0 : index
      %c0_18 = arith.constant 0 : index
      %19 = vector.load %arg4[%c0_17, %c0_18] : memref<1x256xf32, #tpu.memory_space<vmem>>, vector<1x256xf32>
      tpu.vector_store %arg4[%c0_17, %c0_18], %18 {strides = array<i32>} : memref<1x256xf32, #tpu.memory_space<vmem>>, vector<1x256xf32>,
      %cst_19 = arith.constant 0.000000e+00 : f32
      %20 = vector.broadcast %cst_19 : f32 to vector<1x256xf32>
      %c0_20 = arith.constant 0 : index
      %c0_21 = arith.constant 0 : index
      %21 = vector.load %arg5[%c0_20, %c0_21] : memref<1x256xf32, #tpu.memory_space<vmem>>, vector<1x256xf32>
      tpu.vector_store %arg5[%c0_20, %c0_21], %20 {strides = array<i32>} : memref<1x256xf32, #tpu.memory_space<vmem>>, vector<1x256xf32>,
    } else {
    }
    %c0 = arith.constant 0 : index
    %c0_1 = arith.constant 0 : index
    %3 = vector.load %arg1[%c0, %c0_1] : memref<64x256xbf16, #tpu.memory_space<vmem>>, vector<64x256xbf16>
    %c0_2 = arith.constant 0 : index
    %c0_3 = arith.constant 0 : index
    %4 = vector.load %arg2[%c0_2, %c0_3] : memref<256x256xbf16, #tpu.memory_space<vmem>>, vector<256x256xbf16>
    %cst = arith.constant dense<0.000000e+00> : vector<64x256xf32>
    %5 = tpu.matmul %3, %4, %cst {dimension_numbers = #tpu.dot_dimension_numbers<[1], [0], [0], [1], [0, 0, 1, 1], [], []>} : vector<64x256xbf16>, vector<256x256xbf16>, vector<64x256xf32> -> vector<64x256xf32>
    %c0_4 = arith.constant 0 : index
    %c0_5 = arith.constant 0 : index
    %6 = vector.load %arg3[%c0_4, %c0_5] : memref<64x256xf32, #tpu.memory_space<vmem>>, vector<64x256xf32>
    tpu.vector_store %arg3[%c0_4, %c0_5], %5 {strides = array<i32>} : memref<64x256xf32, #tpu.memory_space<vmem>>, vector<64x256xf32>,
    %c0_6 = arith.constant 0 : index
    %c0_7 = arith.constant 0 : index
    %7 = vector.load %arg4[%c0_6, %c0_7] : memref<1x256xf32, #tpu.memory_space<vmem>>, vector<1x256xf32>
    %cst_8 = arith.constant dense<0.000000e+00> : vector<256xf32>
    %8 = vector.multi_reduction <add>, %5, %cst_8 [0] : vector<64x256xf32> to vector<256xf32>
    %9 = vector.shape_cast %8 : vector<256xf32> to vector<1x256xf32>
    %10 = arith.addf %7, %9 : vector<1x256xf32>
    %c0_9 = arith.constant 0 : index
    %c0_10 = arith.constant 0 : index
    %11 = vector.load %arg4[%c0_9, %c0_10] : memref<1x256xf32, #tpu.memory_space<vmem>>, vector<1x256xf32>
    tpu.vector_store %arg4[%c0_9, %c0_10], %10 {strides = array<i32>} : memref<1x256xf32, #tpu.memory_space<vmem>>, vector<1x256xf32>,
    %c0_11 = arith.constant 0 : index
    %c0_12 = arith.constant 0 : index
    %12 = vector.load %arg5[%c0_11, %c0_12] : memref<1x256xf32, #tpu.memory_space<vmem>>, vector<1x256xf32>
    %13 = arith.mulf %5, %5 : vector<64x256xf32>
    %cst_13 = arith.constant dense<0.000000e+00> : vector<256xf32>
    %14 = vector.multi_reduction <add>, %13, %cst_13 [0] : vector<64x256xf32> to vector<256xf32>
    %15 = vector.shape_cast %14 : vector<256xf32> to vector<1x256xf32>
    %16 = arith.addf %12, %15 : vector<1x256xf32>
    %c0_14 = arith.constant 0 : index
    %c0_15 = arith.constant 0 : index
    %17 = vector.load %arg5[%c0_14, %c0_15] : memref<1x256xf32, #tpu.memory_space<vmem>>, vector<1x256xf32>
    tpu.vector_store %arg5[%c0_14, %c0_15], %16 {strides = array<i32>} : memref<1x256xf32, #tpu.memory_space<vmem>>, vector<1x256xf32>,
    return
  }
  func.func @transform_0(%arg0: i32) -> (i32, i32) {
    %c0_i32 = arith.constant 0 : i32
    %c0_i32_0 = arith.constant 0 : i32
    return %arg0, %c0_i32 : i32, i32
  }
  func.func @transform_1(%arg0: i32) -> (i32, i32) {
    %c0_i32 = arith.constant 0 : i32
    %c0_i32_0 = arith.constant 0 : i32
    %c0_i32_1 = arith.constant 0 : i32
    return %c0_i32, %c0_i32_0 : i32, i32
  }
  func.func @transform_2(%arg0: i32) -> (i32, i32) {
    %c0_i32 = arith.constant 0 : i32
    %c0_i32_0 = arith.constant 0 : i32
    return %arg0, %c0_i32 : i32, i32
  }
  func.func @transform_3(%arg0: i32) -> (i32, i32) {
    %c0_i32 = arith.constant 0 : i32
    %c0_i32_0 = arith.constant 0 : i32
    %c0_i32_1 = arith.constant 0 : i32
    return %c0_i32, %c0_i32_0 : i32, i32
  }
  func.func @transform_4(%arg0: i32) -> (i32, i32) {
    %c0_i32 = arith.constant 0 : i32
    %c0_i32_0 = arith.constant 0 : i32
    %c0_i32_1 = arith.constant 0 : i32
    return %c0_i32, %c0_i32_0 : i32, i32
  }
}

module attributes {stable_mosaic.version = 11 : i64} {
  func.func @_affine_res_kernel(%arg0: i32, %arg1: memref<64x256xf32, #tpu.memory_space<vmem>>, %arg2: memref<1x256xf32, #tpu.memory_space<vmem>>, %arg3: memref<1x256xf32, #tpu.memory_space<vmem>>, %arg4: memref<64x256xf32, #tpu.memory_space<vmem>>, %arg5: memref<64x256xf32, #tpu.memory_space<vmem>>) attributes {dimension_semantics = [#tpu.dimension_semantics<parallel>], iteration_bounds = array<i64: 1>, scalar_prefetch = 0 : i64, scratch_operands = 0 : i64, tpu.core_type = #tpu.core_type<tc>, window_params = [{transform_indices = @transform_0, window_bounds = array<i64: 64, 256>}, {pipeline_mode = #tpu.pipeline_mode<synchronous>, transform_indices = @transform_1, window_bounds = array<i64: 1, 256>}, {pipeline_mode = #tpu.pipeline_mode<synchronous>, transform_indices = @transform_2, window_bounds = array<i64: 1, 256>}, {transform_indices = @transform_3, window_bounds = array<i64: 64, 256>}, {transform_indices = @transform_4, window_bounds = array<i64: 64, 256>}]} {
    %c0 = arith.constant 0 : index
    %c0_0 = arith.constant 0 : index
    %0 = vector.load %arg1[%c0, %c0_0] : memref<64x256xf32, #tpu.memory_space<vmem>>, vector<64x256xf32>
    %c0_1 = arith.constant 0 : index
    %c0_2 = arith.constant 0 : index
    %1 = vector.load %arg2[%c0_1, %c0_2] : memref<1x256xf32, #tpu.memory_space<vmem>>, vector<1x256xf32>
    %2 = vector.broadcast %1 : vector<1x256xf32> to vector<64x256xf32>
    %3 = arith.mulf %0, %2 : vector<64x256xf32>
    %c0_3 = arith.constant 0 : index
    %c0_4 = arith.constant 0 : index
    %4 = vector.load %arg3[%c0_3, %c0_4] : memref<1x256xf32, #tpu.memory_space<vmem>>, vector<1x256xf32>
    %5 = vector.broadcast %4 : vector<1x256xf32> to vector<64x256xf32>
    %6 = arith.addf %3, %5 : vector<64x256xf32>
    %c0_5 = arith.constant 0 : index
    %c0_6 = arith.constant 0 : index
    %7 = vector.load %arg4[%c0_5, %c0_6] : memref<64x256xf32, #tpu.memory_space<vmem>>, vector<64x256xf32>
    %8 = arith.addf %6, %7 : vector<64x256xf32>
    %cst = arith.constant 0.000000e+00 : f32
    %9 = vector.broadcast %cst : f32 to vector<64x256xf32>
    %10 = arith.maximumf %8, %9 : vector<64x256xf32>
    %c0_7 = arith.constant 0 : index
    %c0_8 = arith.constant 0 : index
    %11 = vector.load %arg5[%c0_7, %c0_8] : memref<64x256xf32, #tpu.memory_space<vmem>>, vector<64x256xf32>
    tpu.vector_store %arg5[%c0_7, %c0_8], %10 {strides = array<i32>} : memref<64x256xf32, #tpu.memory_space<vmem>>, vector<64x256xf32>,
    return
  }
  func.func @transform_0(%arg0: i32) -> (i32, i32) {
    %c0_i32 = arith.constant 0 : i32
    %c0_i32_0 = arith.constant 0 : i32
    return %arg0, %c0_i32 : i32, i32
  }
  func.func @transform_1(%arg0: i32) -> (i32, i32) {
    %c0_i32 = arith.constant 0 : i32
    %c0_i32_0 = arith.constant 0 : i32
    %c0_i32_1 = arith.constant 0 : i32
    return %c0_i32, %c0_i32_0 : i32, i32
  }
  func.func @transform_2(%arg0: i32) -> (i32, i32) {
    %c0_i32 = arith.constant 0 : i32
    %c0_i32_0 = arith.constant 0 : i32
    %c0_i32_1 = arith.constant 0 : i32
    return %c0_i32, %c0_i32_0 : i32, i32
  }
  func.func @transform_3(%arg0: i32) -> (i32, i32) {
    %c0_i32 = arith.constant 0 : i32
    %c0_i32_0 = arith.constant 0 : i32
    return %arg0, %c0_i32 : i32, i32
  }
  func.func @transform_4(%arg0: i32) -> (i32, i32) {
    %c0_i32 = arith.constant 0 : i32
    %c0_i32_0 = arith.constant 0 : i32
    return %arg0, %c0_i32 : i32, i32
  }
}

module attributes {stable_mosaic.version = 11 : i64} {
  func.func @_affine_kernel(%arg0: i32, %arg1: memref<512x128xf32, #tpu.memory_space<vmem>>, %arg2: memref<1x128xf32, #tpu.memory_space<vmem>>, %arg3: memref<1x128xf32, #tpu.memory_space<vmem>>, %arg4: memref<512x128xf32, #tpu.memory_space<vmem>>) attributes {dimension_semantics = [#tpu.dimension_semantics<parallel>], iteration_bounds = array<i64: 1>, scalar_prefetch = 0 : i64, scratch_operands = 0 : i64, tpu.core_type = #tpu.core_type<tc>, window_params = [{transform_indices = @transform_0, window_bounds = array<i64: 512, 128>}, {pipeline_mode = #tpu.pipeline_mode<synchronous>, transform_indices = @transform_1, window_bounds = array<i64: 1, 128>}, {pipeline_mode = #tpu.pipeline_mode<synchronous>, transform_indices = @transform_2, window_bounds = array<i64: 1, 128>}, {transform_indices = @transform_3, window_bounds = array<i64: 512, 128>}]} {
    %c0 = arith.constant 0 : index
    %c0_0 = arith.constant 0 : index
    %0 = vector.load %arg1[%c0, %c0_0] : memref<512x128xf32, #tpu.memory_space<vmem>>, vector<512x128xf32>
    %c0_1 = arith.constant 0 : index
    %c0_2 = arith.constant 0 : index
    %1 = vector.load %arg2[%c0_1, %c0_2] : memref<1x128xf32, #tpu.memory_space<vmem>>, vector<1x128xf32>
    %2 = vector.broadcast %1 : vector<1x128xf32> to vector<512x128xf32>
    %3 = arith.mulf %0, %2 : vector<512x128xf32>
    %c0_3 = arith.constant 0 : index
    %c0_4 = arith.constant 0 : index
    %4 = vector.load %arg3[%c0_3, %c0_4] : memref<1x128xf32, #tpu.memory_space<vmem>>, vector<1x128xf32>
    %5 = vector.broadcast %4 : vector<1x128xf32> to vector<512x128xf32>
    %6 = arith.addf %3, %5 : vector<512x128xf32>
    %c0_5 = arith.constant 0 : index
    %c0_6 = arith.constant 0 : index
    %7 = vector.load %arg4[%c0_5, %c0_6] : memref<512x128xf32, #tpu.memory_space<vmem>>, vector<512x128xf32>
    tpu.vector_store %arg4[%c0_5, %c0_6], %6 {strides = array<i32>} : memref<512x128xf32, #tpu.memory_space<vmem>>, vector<512x128xf32>,
    return
  }
  func.func @transform_0(%arg0: i32) -> (i32, i32) {
    %c0_i32 = arith.constant 0 : i32
    %c0_i32_0 = arith.constant 0 : i32
    return %arg0, %c0_i32 : i32, i32
  }
  func.func @transform_1(%arg0: i32) -> (i32, i32) {
    %c0_i32 = arith.constant 0 : i32
    %c0_i32_0 = arith.constant 0 : i32
    %c0_i32_1 = arith.constant 0 : i32
    return %c0_i32, %c0_i32_0 : i32, i32
  }
  func.func @transform_2(%arg0: i32) -> (i32, i32) {
    %c0_i32 = arith.constant 0 : i32
    %c0_i32_0 = arith.constant 0 : i32
    %c0_i32_1 = arith.constant 0 : i32
    return %c0_i32, %c0_i32_0 : i32, i32
  }
  func.func @transform_3(%arg0: i32) -> (i32, i32) {
    %c0_i32 = arith.constant 0 : i32
    %c0_i32_0 = arith.constant 0 : i32
    return %arg0, %c0_i32 : i32, i32
  }
}

module attributes {stable_mosaic.version = 11 : i64} {
  func.func @_conv_bn_kernel(%arg0: i32, %arg1: memref<512x256xbf16, #tpu.memory_space<vmem>>, %arg2: memref<256x128xbf16, #tpu.memory_space<vmem>>, %arg3: memref<512x128xf32, #tpu.memory_space<vmem>>, %arg4: memref<1x128xf32, #tpu.memory_space<vmem>>, %arg5: memref<1x128xf32, #tpu.memory_space<vmem>>) attributes {dimension_semantics = [#tpu.dimension_semantics<arbitrary>], iteration_bounds = array<i64: 1>, scalar_prefetch = 0 : i64, scratch_operands = 0 : i64, tpu.core_type = #tpu.core_type<tc>, window_params = [{transform_indices = @transform_0, window_bounds = array<i64: 512, 256>}, {pipeline_mode = #tpu.pipeline_mode<synchronous>, transform_indices = @transform_1, window_bounds = array<i64: 256, 128>}, {transform_indices = @transform_2, window_bounds = array<i64: 512, 128>}, {pipeline_mode = #tpu.pipeline_mode<synchronous>, transform_indices = @transform_3, window_bounds = array<i64: 1, 128>}, {pipeline_mode = #tpu.pipeline_mode<synchronous>, transform_indices = @transform_4, window_bounds = array<i64: 1, 128>}]} {
    %c0_i32 = arith.constant 0 : i32
    %0 = arith.cmpi eq, %arg0, %c0_i32 : i32
    %1 = arith.extui %0 : i1 to i32
    %c0_i32_0 = arith.constant 0 : i32
    %2 = arith.cmpi ne, %1, %c0_i32_0 : i32
    scf.if %2 {
      %cst_16 = arith.constant 0.000000e+00 : f32
      %18 = vector.broadcast %cst_16 : f32 to vector<1x128xf32>
      %c0_17 = arith.constant 0 : index
      %c0_18 = arith.constant 0 : index
      %19 = vector.load %arg4[%c0_17, %c0_18] : memref<1x128xf32, #tpu.memory_space<vmem>>, vector<1x128xf32>
      tpu.vector_store %arg4[%c0_17, %c0_18], %18 {strides = array<i32>} : memref<1x128xf32, #tpu.memory_space<vmem>>, vector<1x128xf32>,
      %cst_19 = arith.constant 0.000000e+00 : f32
      %20 = vector.broadcast %cst_19 : f32 to vector<1x128xf32>
      %c0_20 = arith.constant 0 : index
      %c0_21 = arith.constant 0 : index
      %21 = vector.load %arg5[%c0_20, %c0_21] : memref<1x128xf32, #tpu.memory_space<vmem>>, vector<1x128xf32>
      tpu.vector_store %arg5[%c0_20, %c0_21], %20 {strides = array<i32>} : memref<1x128xf32, #tpu.memory_space<vmem>>, vector<1x128xf32>,
    } else {
    }
    %c0 = arith.constant 0 : index
    %c0_1 = arith.constant 0 : index
    %3 = vector.load %arg1[%c0, %c0_1] : memref<512x256xbf16, #tpu.memory_space<vmem>>, vector<512x256xbf16>
    %c0_2 = arith.constant 0 : index
    %c0_3 = arith.constant 0 : index
    %4 = vector.load %arg2[%c0_2, %c0_3] : memref<256x128xbf16, #tpu.memory_space<vmem>>, vector<256x128xbf16>
    %cst = arith.constant dense<0.000000e+00> : vector<512x128xf32>
    %5 = tpu.matmul %3, %4, %cst {dimension_numbers = #tpu.dot_dimension_numbers<[1], [0], [0], [1], [0, 0, 1, 1], [], []>} : vector<512x256xbf16>, vector<256x128xbf16>, vector<512x128xf32> -> vector<512x128xf32>
    %c0_4 = arith.constant 0 : index
    %c0_5 = arith.constant 0 : index
    %6 = vector.load %arg3[%c0_4, %c0_5] : memref<512x128xf32, #tpu.memory_space<vmem>>, vector<512x128xf32>
    tpu.vector_store %arg3[%c0_4, %c0_5], %5 {strides = array<i32>} : memref<512x128xf32, #tpu.memory_space<vmem>>, vector<512x128xf32>,
    %c0_6 = arith.constant 0 : index
    %c0_7 = arith.constant 0 : index
    %7 = vector.load %arg4[%c0_6, %c0_7] : memref<1x128xf32, #tpu.memory_space<vmem>>, vector<1x128xf32>
    %cst_8 = arith.constant dense<0.000000e+00> : vector<128xf32>
    %8 = vector.multi_reduction <add>, %5, %cst_8 [0] : vector<512x128xf32> to vector<128xf32>
    %9 = vector.shape_cast %8 : vector<128xf32> to vector<1x128xf32>
    %10 = arith.addf %7, %9 : vector<1x128xf32>
    %c0_9 = arith.constant 0 : index
    %c0_10 = arith.constant 0 : index
    %11 = vector.load %arg4[%c0_9, %c0_10] : memref<1x128xf32, #tpu.memory_space<vmem>>, vector<1x128xf32>
    tpu.vector_store %arg4[%c0_9, %c0_10], %10 {strides = array<i32>} : memref<1x128xf32, #tpu.memory_space<vmem>>, vector<1x128xf32>,
    %c0_11 = arith.constant 0 : index
    %c0_12 = arith.constant 0 : index
    %12 = vector.load %arg5[%c0_11, %c0_12] : memref<1x128xf32, #tpu.memory_space<vmem>>, vector<1x128xf32>
    %13 = arith.mulf %5, %5 : vector<512x128xf32>
    %cst_13 = arith.constant dense<0.000000e+00> : vector<128xf32>
    %14 = vector.multi_reduction <add>, %13, %cst_13 [0] : vector<512x128xf32> to vector<128xf32>
    %15 = vector.shape_cast %14 : vector<128xf32> to vector<1x128xf32>
    %16 = arith.addf %12, %15 : vector<1x128xf32>
    %c0_14 = arith.constant 0 : index
    %c0_15 = arith.constant 0 : index
    %17 = vector.load %arg5[%c0_14, %c0_15] : memref<1x128xf32, #tpu.memory_space<vmem>>, vector<1x128xf32>
    tpu.vector_store %arg5[%c0_14, %c0_15], %16 {strides = array<i32>} : memref<1x128xf32, #tpu.memory_space<vmem>>, vector<1x128xf32>,
    return
  }
  func.func @transform_0(%arg0: i32) -> (i32, i32) {
    %c0_i32 = arith.constant 0 : i32
    %c0_i32_0 = arith.constant 0 : i32
    return %arg0, %c0_i32 : i32, i32
  }
  func.func @transform_1(%arg0: i32) -> (i32, i32) {
    %c0_i32 = arith.constant 0 : i32
    %c0_i32_0 = arith.constant 0 : i32
    %c0_i32_1 = arith.constant 0 : i32
    return %c0_i32, %c0_i32_0 : i32, i32
  }
  func.func @transform_2(%arg0: i32) -> (i32, i32) {
    %c0_i32 = arith.constant 0 : i32
    %c0_i32_0 = arith.constant 0 : i32
    return %arg0, %c0_i32 : i32, i32
  }
  func.func @transform_3(%arg0: i32) -> (i32, i32) {
    %c0_i32 = arith.constant 0 : i32
    %c0_i32_0 = arith.constant 0 : i32
    %c0_i32_1 = arith.constant 0 : i32
    return %c0_i32, %c0_i32_0 : i32, i32
  }
  func.func @transform_4(%arg0: i32) -> (i32, i32) {
    %c0_i32 = arith.constant 0 : i32
    %c0_i32_0 = arith.constant 0 : i32
    %c0_i32_1 = arith.constant 0 : i32
    return %c0_i32, %c0_i32_0 : i32, i32
  }
}

</mosaic_0001>

<bundles_post_ra>
// kernel: hourglass_forward.13
= control target key start
LH: loop header
LB: loop body
LE: loop exit
PB: predicated region body
PF: predicated region fallthrough
CT: control target
= control target key end

     0   :  { %vm284_vm0 = vcmask 261120   ;;  %s961_s0 = inlined_call_operand.vmem [shape: f32[512,32], index: 0, kind: input, shape index: {}]   ;;  %s962_s1 = inlined_call_operand.vmem [shape: f32[1,32], index: 1, kind: input, shape index: {}]   ;;  %s963_s2 = inlined_call_operand.vmem [shape: f32[1,32], index: 2, kind: input, shape index: {}]   ;;  %s964_s3 = inlined_call_operand.vmem [shape: f32[512,32], index: 3, kind: output, shape index: {}]  }
   0x1   :  { %v14_v0 = vld [vmem:[%s961_s0] sm:$0xff]  ;;  %v15_v4 = vld [vmem:[%s961_s0 + $0x8] sm:$0xff]  ;;  %v16_v5 = vld [vmem:[%s961_s0 + $0x10] sm:$0xff] }
   0x2   :  { %v381_v1 = vld [vmem:[%s962_s1] ss:$0 sm:$0xff]  ;;  %v17_v6 = vld [vmem:[%s961_s0 + $0x18] sm:$0xff]  ;;  %v19_v11 = vld [vmem:[%s961_s0 + $0x28] sm:$0xff] }
   0x3   :  { %v386_v2 = vld [vmem:[%s963_s2] ss:$0 sm:$0xff]  ;;  %v85_v3 = vmul.f32 %v381_v1, %v14_v0  ;;  %v86_v7 = vmul.f32 %v381_v1, %v15_v4  ;;  %v87_v8 = vmul.f32 %v381_v1, %v16_v5  ;;  %v88_v9 = vmul.f32 %v381_v1, %v17_v6  ;;  %v20_v12 = vld [vmem:[%s961_s0 + $0x30] sm:$0xff]  ;;  %v21_v17 = vld [vmem:[%s961_s0 + $0x38] sm:$0xff] }
   0x4   :  { %v18_v10 = vld [vmem:[%s961_s0 + $0x20] sm:$0xff]  ;;  %v90_v15 = vmul.f32 %v381_v1, %v19_v11  ;;  %v91_v16 = vmul.f32 %v381_v1, %v20_v12  ;;  %v92_v21 = vmul.f32 %v381_v1, %v21_v17  ;;  %v23_v27 = vld [vmem:[%s961_s0 + $0x48] sm:$0xff]  ;;  %v24_v28 = vld [vmem:[%s961_s0 + $0x50] sm:$0xff] }
   0x5   :  { %v156_v13 = vadd.f32 %v386_v2, %v85_v3  ;;  %v89_v14 = vmul.f32 %v381_v1, %v18_v10  ;;  %v157_v18 = vadd.f32 %v386_v2, %v86_v7  ;;  %v158_v19 = vadd.f32 %v386_v2, %v87_v8  ;;  %v22_v22 = vld [vmem:[%s961_s0 + $0x40] sm:$0xff]  ;;  %v25_v29 = vld [vmem:[%s961_s0 + $0x58] sm:$0xff]  ;;  %v27_v35 = vld [vmem:[%s961_s0 + $0x68] sm:$0xff] }
   0x6   :  { %v159_v20 = vadd.f32 %v386_v2, %v88_v9  ;;  %v161_v25 = vadd.f32 %v386_v2, %v90_v15  ;;  %v162_v26 = vadd.f32 %v386_v2, %v91_v16  ;;  %v163_v33 = vadd.f32 %v386_v2, %v92_v21  ;;  %v26_v34 = vld [vmem:[%s961_s0 + $0x60] sm:$0xff]  ;;  %v28_v36 = vld [vmem:[%s961_s0 + $0x70] sm:$0xff]  ;;  %v29_v41 = vld [vmem:[%s961_s0 + $0x78] sm:$0xff] }
   0x7   :  { %v220_v23 = vmax.f32 %v156_v13, 0.0  ;;  %v160_v24 = vadd.f32 %v386_v2, %v89_v14  ;;  %v221_v30 = vmax.f32 %v157_v18, 0.0  ;;  %v222_v31 = vmax.f32 %v158_v19, 0.0  ;;  %v30_v54 = vld [vmem:[%s961_s0 + $0x80] sm:$0xff]  ;;  %v31_v59 = vld [vmem:[%s961_s0 + $0x88] sm:$0xff]  ;;  %v32_v60 = vld [vmem:[%s961_s0 + $0x90] sm:$0xff] }
   0x8   :  { %v223_v32 = vmax.f32 %v159_v20, 0.0  ;;  %v225_v38 = vmax.f32 %v161_v25, 0.0  ;;  %v226_v39 = vmax.f32 %v162_v26, 0.0  ;;  %v93_v40 = vmul.f32 %v381_v1, %v22_v22  ;;  %v33_v61 = vld [vmem:[%s961_s0 + $0x98] sm:$0xff]  ;;  %v34_v4 = vld [vmem:[%s961_s0 + $0xa0] sm:$0xff]  ;;  %v35_v5 = vld [vmem:[%s961_s0 + $0xa8] sm:$0xff] }
   0x9   :  { %285 = vst.msk [vmem:[%s964_s3] sm:$0xff] %vm284_vm0, %v220_v23  ;;  %v224_v37 = vmax.f32 %v160_v24, 0.0  ;;  %286 = vst.msk [vmem:[%s964_s3 + $0x8] sm:$0xff] %vm284_vm0, %v221_v30  ;;  %v227_v42 = vmax.f32 %v163_v33, 0.0  ;;  %v94_v43 = vmul.f32 %v381_v1, %v23_v27  ;;  %v95_v44 = vmul.f32 %v381_v1, %v24_v28  ;;  %v36_v6 = vld [vmem:[%s961_s0 + $0xb0] sm:$0xff]  ;;  %v37_v11 = vld [vmem:[%s961_s0 + $0xb8] sm:$0xff] }
   0xa   :  { %287 = vst.msk [vmem:[%s964_s3 + $0x10] sm:$0xff] %vm284_vm0, %v222_v31  ;;  %288 = vst.msk [vmem:[%s964_s3 + $0x18] sm:$0xff] %vm284_vm0, %v223_v32  ;;  %v96_v45 = vmul.f32 %v381_v1, %v25_v29  ;;  %v164_v46 = vadd.f32 %v386_v2, %v93_v40  ;;  %v97_v47 = vmul.f32 %v381_v1, %v26_v34  ;;  %v38_v24 = vld [vmem:[%s961_s0 + $0xc0] sm:$0xff]  ;;  %v39_v29 = vld [vmem:[%s961_s0 + $0xc8] sm:$0xff] }
   0xb   :  { %289 = vst.msk [vmem:[%s964_s3 + $0x20] sm:$0xff] %vm284_vm0, %v224_v37  ;;  %290 = vst.msk [vmem:[%s964_s3 + $0x28] sm:$0xff] %vm284_vm0, %v225_v38  ;;  %v98_v48 = vmul.f32 %v381_v1, %v27_v35  ;;  %v99_v49 = vmul.f32 %v381_v1, %v28_v36  ;;  %v165_v50 = vadd.f32 %v386_v2, %v94_v43  ;;  %v40_v30 = vld [vmem:[%s961_s0 + $0xd0] sm:$0xff]  ;;  %v41_v31 = vld [vmem:[%s961_s0 + $0xd8] sm:$0xff] }
   0xc   :  { %291 = vst.msk [vmem:[%s964_s3 + $0x30] sm:$0xff] %vm284_vm0, %v226_v39  ;;  %292 = vst.msk [vmem:[%s964_s3 + $0x38] sm:$0xff] %vm284_vm0, %v227_v42  ;;  %v166_v51 = vadd.f32 %v386_v2, %v95_v44  ;;  %v167_v52 = vadd.f32 %v386_v2, %v96_v45  ;;  %v100_v53 = vmul.f32 %v381_v1, %v29_v41  ;;  %v228_v55 = vmax.f32 %v164_v46, 0.0  ;;  %v42_v36 = vld [vmem:[%s961_s0 + $0xe0] sm:$0xff]  ;;  %v43_v37 = vld [vmem:[%s961_s0 + $0xe8] sm:$0xff] }
   0xd   :  { %v168_v56 = vadd.f32 %v386_v2, %v97_v47  ;;  %v169_v57 = vadd.f32 %v386_v2, %v98_v48  ;;  %v170_v58 = vadd.f32 %v386_v2, %v99_v49  ;;  %v229_v62 = vmax.f32 %v165_v50, 0.0  ;;  %v44_v38 = vld [vmem:[%s961_s0 + $0xf0] sm:$0xff]  ;;  %v45_v43 = vld [vmem:[%s961_s0 + $0xf8] sm:$0xff] }
   0xe   :  { %v230_v63 = vmax.f32 %v166_v51, 0.0  ;;  %v231_v0 = vmax.f32 %v167_v52, 0.0  ;;  %v171_v3 = vadd.f32 %v386_v2, %v100_v53  ;;  %293 = vst.msk [vmem:[%s964_s3 + $0x40] sm:$0xff] %vm284_vm0, %v228_v55  ;;  %v101_v10 = vmul.f32 %v381_v1, %v30_v54 }
   0xf   :  { %v232_v7 = vmax.f32 %v168_v56, 0.0  ;;  %v233_v8 = vmax.f32 %v169_v57, 0.0  ;;  %v234_v9 = vmax.f32 %v170_v58, 0.0  ;;  %294 = vst.msk [vmem:[%s964_s3 + $0x48] sm:$0xff] %vm284_vm0, %v229_v62  ;;  %v102_v13 = vmul.f32 %v381_v1, %v31_v59  ;;  %v46_v56 = vld [vmem:[%s961_s0 + $0x100] sm:$0xff]  ;;  %v48_v62 = vld [vmem:[%s961_s0 + $0x110] sm:$0xff] }
  0x10   :  { %295 = vst.msk [vmem:[%s964_s3 + $0x50] sm:$0xff] %vm284_vm0, %v230_v63  ;;  %296 = vst.msk [vmem:[%s964_s3 + $0x58] sm:$0xff] %vm284_vm0, %v231_v0  ;;  %v235_v12 = vmax.f32 %v171_v3, 0.0  ;;  %v103_v14 = vmul.f32 %v381_v1, %v32_v60  ;;  %v104_v15 = vmul.f32 %v381_v1, %v33_v61  ;;  %v172_v16 = vadd.f32 %v386_v2, %v101_v10  ;;  %v47_v61 = vld [vmem:[%s961_s0 + $0x108] sm:$0xff]  ;;  %v49_v63 = vld [vmem:[%s961_s0 + $0x118] sm:$0xff] }
  0x11   :  { %297 = vst.msk [vmem:[%s964_s3 + $0x60] sm:$0xff] %vm284_vm0, %v232_v7  ;;  %298 = vst.msk [vmem:[%s964_s3 + $0x68] sm:$0xff] %vm284_vm0, %v233_v8  ;;  %v105_v17 = vmul.f32 %v381_v1, %v34_v4  ;;  %v106_v18 = vmul.f32 %v381_v1, %v35_v5  ;;  %v107_v19 = vmul.f32 %v381_v1, %v36_v6  ;;  %v50_v6 = vld [vmem:[%s961_s0 + $0x120] sm:$0xff]  ;;  %v51_v7 = vld [vmem:[%s961_s0 + $0x128] sm:$0xff] }
  0x12   :  { %299 = vst.msk [vmem:[%s964_s3 + $0x70] sm:$0xff] %vm284_vm0, %v234_v9  ;;  %300 = vst.msk [vmem:[%s964_s3 + $0x78] sm:$0xff] %vm284_vm0, %v235_v12  ;;  %v173_v20 = vadd.f32 %v386_v2, %v102_v13  ;;  %v174_v21 = vadd.f32 %v386_v2, %v103_v14  ;;  %v175_v22 = vadd.f32 %v386_v2, %v104_v15  ;;  %v236_v25 = vmax.f32 %v172_v16, 0.0  ;;  %v52_v8 = vld [vmem:[%s961_s0 + $0x130] sm:$0xff]  ;;  %v53_v13 = vld [vmem:[%s961_s0 + $0x138] sm:$0xff] }
  0x13   :  { %v108_v23 = vmul.f32 %v381_v1, %v37_v11  ;;  %v176_v26 = vadd.f32 %v386_v2, %v105_v17  ;;  %v177_v27 = vadd.f32 %v386_v2, %v106_v18  ;;  %v178_v28 = vadd.f32 %v386_v2, %v107_v19 }
  0x14   :  { %v237_v32 = vmax.f32 %v173_v20, 0.0  ;;  %v238_v33 = vmax.f32 %v174_v21, 0.0  ;;  %v239_v34 = vmax.f32 %v175_v22, 0.0  ;;  %301 = vst.msk [vmem:[%s964_s3 + $0x80] sm:$0xff] %vm284_vm0, %v236_v25  ;;  %v109_v42 = vmul.f32 %v381_v1, %v38_v24 }
  0x15   :  { %v179_v35 = vadd.f32 %v386_v2, %v108_v23  ;;  %v240_v39 = vmax.f32 %v176_v26, 0.0  ;;  %v241_v40 = vmax.f32 %v177_v27, 0.0  ;;  %v242_v41 = vmax.f32 %v178_v28, 0.0  ;;  %v54_v26 = vld [vmem:[%s961_s0 + $0x140] sm:$0xff] }
  0x16   :  { %302 = vst.msk [vmem:[%s964_s3 + $0x88] sm:$0xff] %vm284_vm0, %v237_v32  ;;  %303 = vst.msk [vmem:[%s964_s3 + $0x90] sm:$0xff] %vm284_vm0, %v238_v33  ;;  %v110_v45 = vmul.f32 %v381_v1, %v39_v29  ;;  %v111_v46 = vmul.f32 %v381_v1, %v40_v30  ;;  %v112_v47 = vmul.f32 %v381_v1, %v41_v31  ;;  %v55_v31 = vld [vmem:[%s961_s0 + $0x148] sm:$0xff]  ;;  %v56_v32 = vld [vmem:[%s961_s0 + $0x150] sm:$0xff] }
  0x17   :  { %304 = vst.msk [vmem:[%s964_s3 + $0x98] sm:$0xff] %vm284_vm0, %v239_v34  ;;  %v243_v44 = vmax.f32 %v179_v35, 0.0  ;;  %305 = vst.msk [vmem:[%s964_s3 + $0xa0] sm:$0xff] %vm284_vm0, %v240_v39  ;;  %v180_v48 = vadd.f32 %v386_v2, %v109_v42  ;;  %v113_v49 = vmul.f32 %v381_v1, %v42_v36  ;;  %v114_v50 = vmul.f32 %v381_v1, %v43_v37  ;;  %v57_v33 = vld [vmem:[%s961_s0 + $0x158] sm:$0xff]  ;;  %v59_v39 = vld [vmem:[%s961_s0 + $0x168] sm:$0xff] }
  0x18   :  { %306 = vst.msk [vmem:[%s964_s3 + $0xa8] sm:$0xff] %vm284_vm0, %v241_v40  ;;  %307 = vst.msk [vmem:[%s964_s3 + $0xb0] sm:$0xff] %vm284_vm0, %v242_v41  ;;  %v115_v51 = vmul.f32 %v381_v1, %v44_v38  ;;  %v181_v52 = vadd.f32 %v386_v2, %v110_v45  ;;  %v182_v53 = vadd.f32 %v386_v2, %v111_v46  ;;  %v58_v38 = vld [vmem:[%s961_s0 + $0x160] sm:$0xff]  ;;  %v60_v40 = vld [vmem:[%s961_s0 + $0x170] sm:$0xff] }
  0x19   :  { %308 = vst.msk [vmem:[%s964_s3 + $0xb8] sm:$0xff] %vm284_vm0, %v243_v44  ;;  %v183_v54 = vadd.f32 %v386_v2, %v112_v47  ;;  %v116_v55 = vmul.f32 %v381_v1, %v45_v43  ;;  %v244_v57 = vmax.f32 %v180_v48, 0.0  ;;  %v184_v58 = vadd.f32 %v386_v2, %v113_v49  ;;  %v61_v45 = vld [vmem:[%s961_s0 + $0x178] sm:$0xff] }
  0x1a   :  { %v185_v59 = vadd.f32 %v386_v2, %v114_v50  ;;  %v186_v60 = vadd.f32 %v386_v2, %v115_v51  ;;  %v245_v0 = vmax.f32 %v181_v52, 0.0  ;;  %v246_v3 = vmax.f32 %v182_v53, 0.0 }
  0x1b   :  { %v247_v4 = vmax.f32 %v183_v54, 0.0  ;;  %v187_v5 = vadd.f32 %v386_v2, %v116_v55  ;;  %309 = vst.msk [vmem:[%s964_s3 + $0xc0] sm:$0xff] %vm284_vm0, %v244_v57  ;;  %v248_v9 = vmax.f32 %v184_v58, 0.0  ;;  %v117_v12 = vmul.f32 %v381_v1, %v46_v56  ;;  %v62_v58 = vld [vmem:[%s961_s0 + $0x180] sm:$0xff] }
  0x1c   :  { %v249_v10 = vmax.f32 %v185_v59, 0.0  ;;  %v250_v11 = vmax.f32 %v186_v60, 0.0  ;;  %310 = vst.msk [vmem:[%s964_s3 + $0xc8] sm:$0xff] %vm284_vm0, %v245_v0  ;;  %311 = vst.msk [vmem:[%s964_s3 + $0xd0] sm:$0xff] %vm284_vm0, %v246_v3  ;;  %v118_v15 = vmul.f32 %v381_v1, %v47_v61  ;;  %v119_v16 = vmul.f32 %v381_v1, %v48_v62  ;;  %v64_v0 = vld [vmem:[%s961_s0 + $0x190] sm:$0xff]  ;;  %v65_v3 = vld [vmem:[%s961_s0 + $0x198] sm:$0xff] }
  0x1d   :  { %312 = vst.msk [vmem:[%s964_s3 + $0xd8] sm:$0xff] %vm284_vm0, %v247_v4  ;;  %v251_v14 = vmax.f32 %v187_v5, 0.0  ;;  %v120_v17 = vmul.f32 %v381_v1, %v49_v63  ;;  %313 = vst.msk [vmem:[%s964_s3 + $0xe0] sm:$0xff] %vm284_vm0, %v248_v9  ;;  %v188_v18 = vadd.f32 %v386_v2, %v117_v12  ;;  %v121_v19 = vmul.f32 %v381_v1, %v50_v6  ;;  %v63_v63 = vld [vmem:[%s961_s0 + $0x188] sm:$0xff] }
  0x1e   :  { %314 = vst.msk [vmem:[%s964_s3 + $0xe8] sm:$0xff] %vm284_vm0, %v249_v10  ;;  %315 = vst.msk [vmem:[%s964_s3 + $0xf0] sm:$0xff] %vm284_vm0, %v250_v11  ;;  %v122_v20 = vmul.f32 %v381_v1, %v51_v7  ;;  %v123_v21 = vmul.f32 %v381_v1, %v52_v8  ;;  %v189_v22 = vadd.f32 %v386_v2, %v118_v15  ;;  %v66_v8 = vld [vmem:[%s961_s0 + $0x1a0] sm:$0xff]  ;;  %v67_v9 = vld [vmem:[%s961_s0 + $0x1a8] sm:$0xff] }
  0x1f   :  { %316 = vst.msk [vmem:[%s964_s3 + $0xf8] sm:$0xff] %vm284_vm0, %v251_v14  ;;  %v190_v23 = vadd.f32 %v386_v2, %v119_v16  ;;  %v191_v24 = vadd.f32 %v386_v2, %v120_v17  ;;  %v124_v25 = vmul.f32 %v381_v1, %v53_v13  ;;  %v252_v27 = vmax.f32 %v188_v18, 0.0  ;;  %v68_v10 = vld [vmem:[%s961_s0 + $0x1b0] sm:$0xff]  ;;  %v69_v15 = vld [vmem:[%s961_s0 + $0x1b8] sm:$0xff] }
  0x20   :  { %v192_v28 = vadd.f32 %v386_v2, %v121_v19  ;;  %v193_v29 = vadd.f32 %v386_v2, %v122_v20  ;;  %v194_v30 = vadd.f32 %v386_v2, %v123_v21  ;;  %v253_v34 = vmax.f32 %v189_v22, 0.0 }
  0x21   :  { %v254_v35 = vmax.f32 %v190_v23, 0.0  ;;  %v255_v36 = vmax.f32 %v191_v24, 0.0  ;;  %v195_v37 = vadd.f32 %v386_v2, %v124_v25  ;;  %317 = vst.msk [vmem:[%s964_s3 + $0x100] sm:$0xff] %vm284_vm0, %v252_v27  ;;  %v125_v44 = vmul.f32 %v381_v1, %v54_v26 }
  0x22   :  { %v256_v41 = vmax.f32 %v192_v28, 0.0  ;;  %v257_v42 = vmax.f32 %v193_v29, 0.0  ;;  %v258_v43 = vmax.f32 %v194_v30, 0.0  ;;  %318 = vst.msk [vmem:[%s964_s3 + $0x108] sm:$0xff] %vm284_vm0, %v253_v34  ;;  %v126_v47 = vmul.f32 %v381_v1, %v55_v31  ;;  %v70_v28 = vld [vmem:[%s961_s0 + $0x1c0] sm:$0xff]  ;;  %v72_v34 = vld [vmem:[%s961_s0 + $0x1d0] sm:$0xff] }
  0x23   :  { %319 = vst.msk [vmem:[%s964_s3 + $0x110] sm:$0xff] %vm284_vm0, %v254_v35  ;;  %320 = vst.msk [vmem:[%s964_s3 + $0x118] sm:$0xff] %vm284_vm0, %v255_v36  ;;  %v259_v46 = vmax.f32 %v195_v37, 0.0  ;;  %v127_v48 = vmul.f32 %v381_v1, %v56_v32  ;;  %v128_v49 = vmul.f32 %v381_v1, %v57_v33  ;;  %v196_v50 = vadd.f32 %v386_v2, %v125_v44  ;;  %v71_v33 = vld [vmem:[%s961_s0 + $0x1c8] sm:$0xff]  ;;  %v73_v35 = vld [vmem:[%s961_s0 + $0x1d8] sm:$0xff] }
  0x24   :  { %321 = vst.msk [vmem:[%s964_s3 + $0x120] sm:$0xff] %vm284_vm0, %v256_v41  ;;  %322 = vst.msk [vmem:[%s964_s3 + $0x128] sm:$0xff] %vm284_vm0, %v257_v42  ;;  %v129_v51 = vmul.f32 %v381_v1, %v58_v38  ;;  %v130_v52 = vmul.f32 %v381_v1, %v59_v39  ;;  %v131_v53 = vmul.f32 %v381_v1, %v60_v40  ;;  %v74_v40 = vld [vmem:[%s961_s0 + $0x1e0] sm:$0xff]  ;;  %v75_v41 = vld [vmem:[%s961_s0 + $0x1e8] sm:$0xff] }
  0x25   :  { %323 = vst.msk [vmem:[%s964_s3 + $0x130] sm:$0xff] %vm284_vm0, %v258_v43  ;;  %324 = vst.msk [vmem:[%s964_s3 + $0x138] sm:$0xff] %vm284_vm0, %v259_v46  ;;  %v197_v54 = vadd.f32 %v386_v2, %v126_v47  ;;  %v198_v55 = vadd.f32 %v386_v2, %v127_v48  ;;  %v199_v56 = vadd.f32 %v386_v2, %v128_v49  ;;  %v260_v59 = vmax.f32 %v196_v50, 0.0  ;;  %v76_v42 = vld [vmem:[%s961_s0 + $0x1f0] sm:$0xff]  ;;  %v77_v47 = vld [vmem:[%s961_s0 + $0x1f8] sm:$0xff] }
  0x26   :  { %v132_v57 = vmul.f32 %v381_v1, %v61_v45  ;;  %v200_v60 = vadd.f32 %v386_v2, %v129_v51  ;;  %v201_v61 = vadd.f32 %v386_v2, %v130_v52  ;;  %v202_v62 = vadd.f32 %v386_v2, %v131_v53 }
  0x27   :  { %v261_v4 = vmax.f32 %v197_v54, 0.0  ;;  %v262_v5 = vmax.f32 %v198_v55, 0.0  ;;  %v263_v6 = vmax.f32 %v199_v56, 0.0  ;;  %325 = vst.msk [vmem:[%s964_s3 + $0x140] sm:$0xff] %vm284_vm0, %v260_v59  ;;  %v133_v14 = vmul.f32 %v381_v1, %v62_v58 }
  0x28   :  { %v203_v7 = vadd.f32 %v386_v2, %v132_v57  ;;  %v264_v11 = vmax.f32 %v200_v60, 0.0  ;;  %v265_v12 = vmax.f32 %v201_v61, 0.0  ;;  %v266_v13 = vmax.f32 %v202_v62, 0.0 }
  0x29   :  { %326 = vst.msk [vmem:[%s964_s3 + $0x148] sm:$0xff] %vm284_vm0, %v261_v4  ;;  %327 = vst.msk [vmem:[%s964_s3 + $0x150] sm:$0xff] %vm284_vm0, %v262_v5  ;;  %v134_v17 = vmul.f32 %v381_v1, %v63_v63  ;;  %v135_v18 = vmul.f32 %v381_v1, %v64_v0  ;;  %v136_v19 = vmul.f32 %v381_v1, %v65_v3 }
  0x2a   :  { %328 = vst.msk [vmem:[%s964_s3 + $0x158] sm:$0xff] %vm284_vm0, %v263_v6  ;;  %v267_v16 = vmax.f32 %v203_v7, 0.0  ;;  %329 = vst.msk [vmem:[%s964_s3 + $0x160] sm:$0xff] %vm284_vm0, %v264_v11  ;;  %v204_v20 = vadd.f32 %v386_v2, %v133_v14  ;;  %v137_v21 = vmul.f32 %v381_v1, %v66_v8  ;;  %v138_v22 = vmul.f32 %v381_v1, %v67_v9 }
  0x2b   :  { %330 = vst.msk [vmem:[%s964_s3 + $0x168] sm:$0xff] %vm284_vm0, %v265_v12  ;;  %331 = vst.msk [vmem:[%s964_s3 + $0x170] sm:$0xff] %vm284_vm0, %v266_v13  ;;  %v139_v23 = vmul.f32 %v381_v1, %v68_v10  ;;  %v205_v24 = vadd.f32 %v386_v2, %v134_v17  ;;  %v206_v25 = vadd.f32 %v386_v2, %v135_v18 }
  0x2c   :  { %332 = vst.msk [vmem:[%s964_s3 + $0x178] sm:$0xff] %vm284_vm0, %v267_v16  ;;  %v207_v26 = vadd.f32 %v386_v2, %v136_v19  ;;  %v140_v27 = vmul.f32 %v381_v1, %v69_v15  ;;  %v268_v29 = vmax.f32 %v204_v20, 0.0  ;;  %v208_v30 = vadd.f32 %v386_v2, %v137_v21 }
  0x2d   :  { %v209_v31 = vadd.f32 %v386_v2, %v138_v22  ;;  %v210_v32 = vadd.f32 %v386_v2, %v139_v23  ;;  %v269_v36 = vmax.f32 %v205_v24, 0.0  ;;  %v270_v37 = vmax.f32 %v206_v25, 0.0 }
  0x2e   :  { %v271_v38 = vmax.f32 %v207_v26, 0.0  ;;  %v211_v39 = vadd.f32 %v386_v2, %v140_v27  ;;  %333 = vst.msk [vmem:[%s964_s3 + $0x180] sm:$0xff] %vm284_vm0, %v268_v29  ;;  %v272_v43 = vmax.f32 %v208_v30, 0.0  ;;  %v141_v46 = vmul.f32 %v381_v1, %v70_v28 }
  0x2f   :  { %v273_v44 = vmax.f32 %v209_v31, 0.0  ;;  %v274_v45 = vmax.f32 %v210_v32, 0.0  ;;  %334 = vst.msk [vmem:[%s964_s3 + $0x188] sm:$0xff] %vm284_vm0, %v269_v36  ;;  %335 = vst.msk [vmem:[%s964_s3 + $0x190] sm:$0xff] %vm284_vm0, %v270_v37  ;;  %v142_v49 = vmul.f32 %v381_v1, %v71_v33  ;;  %v143_v50 = vmul.f32 %v381_v1, %v72_v34 }
  0x30   :  { %336 = vst.msk [vmem:[%s964_s3 + $0x198] sm:$0xff] %vm284_vm0, %v271_v38  ;;  %v275_v48 = vmax.f32 %v211_v39, 0.0  ;;  %v144_v51 = vmul.f32 %v381_v1, %v73_v35  ;;  %337 = vst.msk [vmem:[%s964_s3 + $0x1a0] sm:$0xff] %vm284_vm0, %v272_v43  ;;  %v212_v52 = vadd.f32 %v386_v2, %v141_v46  ;;  %v145_v53 = vmul.f32 %v381_v1, %v74_v40 }
  0x31   :  { %338 = vst.msk [vmem:[%s964_s3 + $0x1a8] sm:$0xff] %vm284_vm0, %v273_v44  ;;  %339 = vst.msk [vmem:[%s964_s3 + $0x1b0] sm:$0xff] %vm284_vm0, %v274_v45  ;;  %v146_v54 = vmul.f32 %v381_v1, %v75_v41  ;;  %v147_v55 = vmul.f32 %v381_v1, %v76_v42  ;;  %v213_v56 = vadd.f32 %v386_v2, %v142_v49 }
  0x32   :  { %340 = vst.msk [vmem:[%s964_s3 + $0x1b8] sm:$0xff] %vm284_vm0, %v275_v48  ;;  %v214_v57 = vadd.f32 %v386_v2, %v143_v50  ;;  %v215_v58 = vadd.f32 %v386_v2, %v144_v51  ;;  %v148_v59 = vmul.f32 %v381_v1, %v77_v47  ;;  %v276_v60 = vmax.f32 %v212_v52, 0.0 }
  0x33   :  { %v216_v61 = vadd.f32 %v386_v2, %v145_v53  ;;  %v217_v62 = vadd.f32 %v386_v2, %v146_v54  ;;  %v218_v63 = vadd.f32 %v386_v2, %v147_v55  ;;  %v277_v0 = vmax.f32 %v213_v56, 0.0 }
  0x34   :  { %v278_v3 = vmax.f32 %v214_v57, 0.0  ;;  %v279_v4 = vmax.f32 %v215_v58, 0.0  ;;  %v219_v5 = vadd.f32 %v386_v2, %v148_v59  ;;  %341 = vst.msk [vmem:[%s964_s3 + $0x1c0] sm:$0xff] %vm284_vm0, %v276_v60 }
  0x35   :  { %v280_v6 = vmax.f32 %v216_v61, 0.0  ;;  %v281_v7 = vmax.f32 %v217_v62, 0.0  ;;  %v282_v1 = vmax.f32 %v218_v63, 0.0  ;;  %342 = vst.msk [vmem:[%s964_s3 + $0x1c8] sm:$0xff] %vm284_vm0, %v277_v0 }
  0x36   :  { %343 = vst.msk [vmem:[%s964_s3 + $0x1d0] sm:$0xff] %vm284_vm0, %v278_v3  ;;  %344 = vst.msk [vmem:[%s964_s3 + $0x1d8] sm:$0xff] %vm284_vm0, %v279_v4  ;;  %v283_v2 = vmax.f32 %v219_v5, 0.0 }
  0x37   :  { %345 = vst.msk [vmem:[%s964_s3 + $0x1e0] sm:$0xff] %vm284_vm0, %v280_v6  ;;  %346 = vst.msk [vmem:[%s964_s3 + $0x1e8] sm:$0xff] %vm284_vm0, %v281_v7 }
  0x38   :  { %347 = vst.msk [vmem:[%s964_s3 + $0x1f0] sm:$0xff] %vm284_vm0, %v282_v1  ;;  %348 = vst.msk [vmem:[%s964_s3 + $0x1f8] sm:$0xff] %vm284_vm0, %v283_v2 }

// kernel: hourglass_forward.12
= control target key start
LH: loop header
LB: loop body
LE: loop exit
PB: predicated region body
PF: predicated region fallthrough
CT: control target
= control target key end

     0   :  { %v2530_v0 = vmov 0   ;;  %vm974_vm0 = vcmask 392192   ;;  %vm1649_vm1 = vcmask 261120   ;;  %vm19_vm2 = vcmask 253952   ;;  %s3502_s1 = inlined_call_operand.vmem [shape: bf16[432,32], index: 1, kind: input, shape index: {}]   ;;  %s3503_s0 = inlined_call_operand.vmem [shape: bf16[512,432], index: 0, kind: input, shape index: {}]   ;;  %s3504_s2 = inlined_call_operand.vmem [shape: f32[512,32], index: 2, kind: output, shape index: {0}]   ;;  %s3505_s3 = inlined_call_operand.vmem [shape: f32[1,32], index: 3, kind: output, shape index: {1}]   ;;  %s3506_s4 = inlined_call_operand.vmem [shape: f32[1,32], index: 4, kind: output, shape index: {2}]  }
   0x1   :  { %1071 = vmatprep.subr.bf16.mxu1 %v2530_v0  ;;  %v2316_v1 = vld [vmem:[%s3502_s1] sm:$0xff]   ;;  %1360 = vmatprep.subr.bf16.mxu0 %v2530_v0  ;;  %v2317_v2 = vld [vmem:[%s3502_s1 + $0x8] sm:$0xff]   ;;  %v2318_v4 = vld [vmem:[%s3502_s1 + $0x10] sm:$0xff]  }
   0x2   :  { %1072 = vmatpush1.bf16.msra.mxu1 %v2316_v1  ;;  %v2321_v3 = vld [vmem:[%s3502_s1 + $0x80] sm:$0xff]   ;;  %v2323_v5 = vld [vmem:[%s3502_s1 + $0x88] sm:$0xff]   ;;  %v2319_v6 = vld [vmem:[%s3502_s1 + $0x18] sm:$0xff]  }
   0x3   :  { %1073 = vmatprep.subr.bf16.mxu1 %v2530_v0  ;;  %1361 = vmatpush1.bf16.msra.mxu0 %v2321_v3  ;;  %v2325_v7 = vld [vmem:[%s3502_s1 + $0x90] sm:$0xff]   ;;  %v2320_v8 = vld [vmem:[%s3502_s1 + $0x20] sm:$0xff]   ;;  %v2327_v9 = vld [vmem:[%s3502_s1 + $0x98] sm:$0xff]  }
   0x4   :  { %1362 = vmatprep.subr.bf16.mxu0 %v2530_v0  ;;  %v2322_v10 = vld [vmem:[%s3502_s1 + $0x28] sm:$0xff]   ;;  %v2329_v11 = vld [vmem:[%s3502_s1 + $0xa0] sm:$0xff]   ;;  %v2324_v12 = vld [vmem:[%s3502_s1 + $0x30] sm:$0xff]  }
   0x5   :  { %v2331_v13 = vld [vmem:[%s3502_s1 + $0xa8] sm:$0xff]   ;;  %v2326_v14 = vld [vmem:[%s3502_s1 + $0x38] sm:$0xff]   ;;  %v2333_v15 = vld [vmem:[%s3502_s1 + $0xb0] sm:$0xff]  }
   0x6   :  { %1074 = vmatpush1.bf16.msra.mxu1 %v2317_v2  ;;  %v2344_v16 = vld [vmem:[%s3503_s0 + $0xc] ss:$16 sps:$4 sm:$0xff]   ;;  %v2348_v17 = vld [vmem:[%s3503_s0 + $0x4] ss:$16 sps:$4 sm:$0xff]   ;;  %v2342_v27 = vld [vmem:[%s3503_s0 + $0x8] ss:$16 sps:$4 sm:$0xff]  }
   0x7   :  { %1075 = vmatprep.subr.bf16.mxu1 %v2530_v0  ;;  %1363 = vmatpush1.bf16.msra.mxu0 %v2323_v5  ;;  %v2328_v18 = vld [vmem:[%s3502_s1 + $0x40] sm:$0xff]   ;;  %v2335_v19 = vld [vmem:[%s3502_s1 + $0xb8] sm:$0xff]   ;;  %v2330_v20 = vld [vmem:[%s3502_s1 + $0x48] sm:$0xff]  }
   0x8   :  { %1364 = vmatprep.subr.bf16.mxu0 %v2530_v0  ;;  %2218 = vmatprep.mubr.msk.bf16.mxu0 %vm974_vm0, %v2344_v16  ;;  %v2337_v21 = vld [vmem:[%s3502_s1 + $0xc0] sm:$0xff]   ;;  %v2332_v22 = vld [vmem:[%s3502_s1 + $0x50] sm:$0xff]   ;;  %v2339_v23 = vld [vmem:[%s3502_s1 + $0xc8] sm:$0xff]  }
   0x9   :  { %1103 = vmatprep.mubr.bf16.mxu1 %v2348_v17  ;;  %v2334_v24 = vld [vmem:[%s3502_s1 + $0x58] sm:$0xff]   ;;  %v2341_v25 = vld [vmem:[%s3502_s1 + $0xd0] sm:$0xff]   ;;  %v2336_v26 = vld [vmem:[%s3502_s1 + $0x60] sm:$0xff]  }
   0xa   :  { %1076 = vmatpush1.bf16.msra.mxu1 %v2318_v4  ;;  %v2349_v28 = vld [vmem:[%s3503_s0 + $0x2c] ss:$16 sps:$4 sm:$0xff]   ;;  %v2340_v30 = vld [vmem:[%s3502_s1 + $0x70] sm:$0xff]   ;;  %v2351_v31 = vld [vmem:[%s3503_s0 + $0x28] ss:$16 sps:$4 sm:$0xff]  }
   0xb   :  { %1077 = vmatprep.subr.bf16.mxu1 %v2530_v0  ;;  %1365 = vmatpush1.bf16.msra.mxu0 %v2325_v7  ;;  %v2338_v29 = vld [vmem:[%s3502_s1 + $0x68] sm:$0xff]   ;;  %v2345_v33 = vld [vmem:[%s3502_s1 + $0x78] sm:$0xff]   ;;  %v2346_v34 = vld [vmem:[%s3503_s0] ss:$16 sps:$4 sm:$0xff]  }
   0xc   :  { %1366 = vmatprep.subr.bf16.mxu0 %v2530_v0  ;;  %v2355_v32 = vld [vmem:[%s3503_s0 + $0x4c] ss:$16 sps:$4 sm:$0xff]   ;;  %v2352_v35 = vld [vmem:[%s3503_s0 + $0x24] ss:$16 sps:$4 sm:$0xff]   ;;  %v2357_v36 = vld [vmem:[%s3503_s0 + $0x48] ss:$16 sps:$4 sm:$0xff]  }
   0xd   :  { %v2361_v37 = vld [vmem:[%s3503_s0 + $0x6c] ss:$16 sps:$4 sm:$0xff]   ;;  %v2354_v38 = vld [vmem:[%s3503_s0 + $0x20] ss:$16 sps:$4 sm:$0xff]   ;;  %v2358_v39 = vld [vmem:[%s3503_s0 + $0x44] ss:$16 sps:$4 sm:$0xff]  }
   0xe   :  { %1078 = vmatpush1.bf16.msra.mxu1 %v2319_v6  ;;  %v2363_v40 = vld [vmem:[%s3503_s0 + $0x68] ss:$16 sps:$4 sm:$0xff]   ;;  %v2367_v41 = vld [vmem:[%s3503_s0 + $0x8c] ss:$16 sps:$4 sm:$0xff]   ;;  %v2360_v42 = vld [vmem:[%s3503_s0 + $0x40] ss:$16 sps:$4 sm:$0xff]  }
   0xf   :  { %1079 = vmatprep.subr.bf16.mxu1 %v2530_v0  ;;  %1367 = vmatpush1.bf16.msra.mxu0 %v2327_v9  ;;  %v2364_v43 = vld [vmem:[%s3503_s0 + $0x64] ss:$16 sps:$4 sm:$0xff]   ;;  %v2369_v44 = vld [vmem:[%s3503_s0 + $0x88] ss:$16 sps:$4 sm:$0xff]   ;;  %v2373_v45 = vld [vmem:[%s3503_s0 + $0xac] ss:$16 sps:$4 sm:$0xff]  }
  0x10   :  { %1368 = vmatprep.subr.bf16.mxu0 %v2530_v0  ;;  %v2366_v46 = vld [vmem:[%s3503_s0 + $0x60] ss:$16 sps:$4 sm:$0xff]   ;;  %v2370_v47 = vld [vmem:[%s3503_s0 + $0x84] ss:$16 sps:$4 sm:$0xff]   ;;  %v2375_v48 = vld [vmem:[%s3503_s0 + $0xa8] ss:$16 sps:$4 sm:$0xff]  }
  0x11   :  { %v2379_v49 = vld [vmem:[%s3503_s0 + $0xcc] ss:$16 sps:$4 sm:$0xff]   ;;  %v2372_v50 = vld [vmem:[%s3503_s0 + $0x80] ss:$16 sps:$4 sm:$0xff]   ;;  %v2376_v51 = vld [vmem:[%s3503_s0 + $0xa4] ss:$16 sps:$4 sm:$0xff]  }
  0x12   :  { %1080 = vmatpush1.bf16.msra.mxu1 %v2320_v8  ;;  %v2381_v52 = vld [vmem:[%s3503_s0 + $0xc8] ss:$16 sps:$4 sm:$0xff]   ;;  %v2385_v53 = vld [vmem:[%s3503_s0 + $0xec] ss:$16 sps:$4 sm:$0xff]   ;;  %v2378_v54 = vld [vmem:[%s3503_s0 + $0xa0] ss:$16 sps:$4 sm:$0xff]  }
  0x13   :  { %1081 = vmatprep.subr.bf16.mxu1 %v2530_v0  ;;  %1369 = vmatpush1.bf16.msra.mxu0 %v2329_v11  ;;  %v2382_v55 = vld [vmem:[%s3503_s0 + $0xc4] ss:$16 sps:$4 sm:$0xff]   ;;  %v2387_v56 = vld [vmem:[%s3503_s0 + $0xe8] ss:$16 sps:$4 sm:$0xff]   ;;  %v2391_v57 = vld [vmem:[%s3503_s0 + $0x10c] ss:$16 sps:$4 sm:$0xff]  }
  0x14   :  { %1370 = vmatprep.subr.bf16.mxu0 %v2530_v0  ;;  %v2384_v58 = vld [vmem:[%s3503_s0 + $0xc0] ss:$16 sps:$4 sm:$0xff]   ;;  %v2388_v59 = vld [vmem:[%s3503_s0 + $0xe4] ss:$16 sps:$4 sm:$0xff]   ;;  %v2393_v60 = vld [vmem:[%s3503_s0 + $0x108] ss:$16 sps:$4 sm:$0xff]  }
  0x15   :  { %v2397_v61 = vld [vmem:[%s3503_s0 + $0x12c] ss:$16 sps:$4 sm:$0xff]   ;;  %v2390_v62 = vld [vmem:[%s3503_s0 + $0xe0] ss:$16 sps:$4 sm:$0xff]   ;;  %v2394_v63 = vld [vmem:[%s3503_s0 + $0x104] ss:$16 sps:$4 sm:$0xff]  }
  0x16   :  { %1082 = vmatpush1.bf16.msra.mxu1 %v2322_v10  ;;  %v2403_v1 = vld [vmem:[%s3503_s0 + $0x14c] ss:$16 sps:$4 sm:$0xff]   ;;  %v2396_v2 = vld [vmem:[%s3503_s0 + $0x100] ss:$16 sps:$4 sm:$0xff]   ;;  %v2400_v3 = vld [vmem:[%s3503_s0 + $0x124] ss:$16 sps:$4 sm:$0xff]  }
  0x17   :  { %1083 = vmatprep.subr.bf16.mxu1 %v2530_v0  ;;  %1371 = vmatpush1.bf16.msra.mxu0 %v2331_v13  ;;  %v2405_v4 = vld [vmem:[%s3503_s0 + $0x148] ss:$16 sps:$4 sm:$0xff]   ;;  %v2409_v5 = vld [vmem:[%s3503_s0 + $0x16c] ss:$16 sps:$4 sm:$0xff]   ;;  %v2402_v6 = vld [vmem:[%s3503_s0 + $0x120] ss:$16 sps:$4 sm:$0xff]  }
  0x18   :  { %1372 = vmatprep.subr.bf16.mxu0 %v2530_v0  ;;  %v2406_v7 = vld [vmem:[%s3503_s0 + $0x144] ss:$16 sps:$4 sm:$0xff]   ;;  %v2411_v8 = vld [vmem:[%s3503_s0 + $0x168] ss:$16 sps:$4 sm:$0xff]   ;;  %v2415_v9 = vld [vmem:[%s3503_s0 + $0x18c] ss:$16 sps:$4 sm:$0xff]  }
  0x19   :  { %v2408_v10 = vld [vmem:[%s3503_s0 + $0x140] ss:$16 sps:$4 sm:$0xff]   ;;  %v2412_v11 = vld [vmem:[%s3503_s0 + $0x164] ss:$16 sps:$4 sm:$0xff]   ;;  %v2421_v13 = vld [vmem:[%s3503_s0 + $0x1ac] ss:$16 sps:$4 sm:$0xff]  }
  0x1a   :  { %1084 = vmatpush1.bf16.msra.mxu1 %v2324_v12  ;;  %v2417_v12 = vld [vmem:[%s3503_s0 + $0x188] ss:$16 sps:$4 sm:$0xff]   ;;  %v2427_v17 = vld [vmem:[%s3503_s0 + $0x1cc] ss:$16 sps:$4 sm:$0xff]  }
  0x1b   :  { %1085 = vmatprep.subr.bf16.mxu1 %v2530_v0  ;;  %1373 = vmatpush1.bf16.msra.mxu0 %v2333_v15  ;;  %v2418_v15 = vld [vmem:[%s3503_s0 + $0x184] ss:$16 sps:$4 sm:$0xff]   ;;  %v2423_v16 = vld [vmem:[%s3503_s0 + $0x1a8] ss:$16 sps:$4 sm:$0xff]  }
  0x1c   :  { %1374 = vmatprep.subr.bf16.mxu0 %v2530_v0 }
  0x1e   :  { %1086 = vmatpush1.bf16.msra.mxu1 %v2326_v14  ;;  %v2414_v14 = vld [vmem:[%s3503_s0 + $0x160] ss:$16 sps:$4 sm:$0xff]  }
  0x1f   :  { %1087 = vmatprep.subr.bf16.mxu1 %v2530_v0  ;;  %1375 = vmatpush1.bf16.msra.mxu0 %v2335_v19  ;;  %v2424_v19 = vld [vmem:[%s3503_s0 + $0x1a4] ss:$16 sps:$4 sm:$0xff]  }
  0x20   :  { %1376 = vmatprep.subr.bf16.mxu0 %v2530_v0 }
  0x22   :  { %1088 = vmatpush1.bf16.msra.mxu1 %v2328_v18  ;;  %v2420_v18 = vld [vmem:[%s3503_s0 + $0x180] ss:$16 sps:$4 sm:$0xff]  }
  0x23   :  { %1089 = vmatprep.subr.bf16.mxu1 %v2530_v0  ;;  %1377 = vmatpush1.bf16.msra.mxu0 %v2337_v21  ;;  %v2433_v21 = vld [vmem:[%s3503_s0 + $0x1ec] ss:$16 sps:$4 sm:$0xff]  }
  0x24   :  { %1378 = vmatprep.subr.bf16.mxu0 %v2530_v0 }
  0x26   :  { %1090 = vmatpush1.bf16.msra.mxu1 %v2330_v20  ;;  %v2429_v20 = vld [vmem:[%s3503_s0 + $0x1c8] ss:$16 sps:$4 sm:$0xff]  }
  0x27   :  { %1091 = vmatprep.subr.bf16.mxu1 %v2530_v0  ;;  %1379 = vmatpush1.bf16.msra.mxu0 %v2339_v23  ;;  %v2430_v23 = vld [vmem:[%s3503_s0 + $0x1c4] ss:$16 sps:$4 sm:$0xff]  }
  0x28   :  { %1380 = vmatprep.subr.bf16.mxu0 %v2530_v0 }
  0x2a   :  { %1092 = vmatpush1.bf16.msra.mxu1 %v2332_v22  ;;  %v2426_v22 = vld [vmem:[%s3503_s0 + $0x1a0] ss:$16 sps:$4 sm:$0xff]  }
  0x2b   :  { %1093 = vmatprep.subr.bf16.mxu1 %v2530_v0  ;;  %1381 = vmatpush1.bf16.msra.mxu0 %v2341_v25  ;;  %v2439_v25 = vld [vmem:[%s3503_s0 + $0x20c] ss:$16 sps:$4 sm:$0xff]  }
  0x2e   :  { %1094 = vmatpush1.bf16.msra.mxu1 %v2334_v24  ;;  %1393 = vmatmul.mubr.bf16.vlgmr.msra.gmra.mrb[0].mxu0 %v2342_v27  ;;  %v2435_v24 = vld [vmem:[%s3503_s0 + $0x1e8] ss:$16 sps:$4 sm:$0xff]   ;;  %v2436_v27 = vld [vmem:[%s3503_s0 + $0x1e4] ss:$16 sps:$4 sm:$0xff]  }
  0x2f   :  { %1095 = vmatprep.subr.bf16.mxu1 %v2530_v0  ;;  %2219 = vmatprep.mubr.msk.bf16.mxu0 %vm974_vm0, %v2349_v28  ;;  %v2441_v28 = vld [vmem:[%s3503_s0 + $0x208] ss:$16 sps:$4 sm:$0xff]  }
  0x32   :  { %1096 = vmatpush1.bf16.msra.mxu1 %v2336_v26  ;;  %v2432_v26 = vld [vmem:[%s3503_s0 + $0x1c0] ss:$16 sps:$4 sm:$0xff]  }
  0x33   :  { %1097 = vmatprep.subr.bf16.mxu1 %v2530_v0 }
  0x36   :  { %1098 = vmatpush1.bf16.msra.mxu1 %v2338_v29  ;;  %1401 = vmatmul.mubr.bf16.gmra.mrb[4].mxu0 %v2351_v31  ;;  %v2445_v29 = vld [vmem:[%s3503_s0 + $0x22c] ss:$16 sps:$4 sm:$0xff]   ;;  %v2442_v31 = vld [vmem:[%s3503_s0 + $0x204] ss:$16 sps:$4 sm:$0xff]  }
  0x37   :  { %1099 = vmatprep.subr.bf16.mxu1 %v2530_v0  ;;  %2220 = vmatprep.mubr.msk.bf16.mxu0 %vm974_vm0, %v2355_v32  ;;  %v2447_v32 = vld [vmem:[%s3503_s0 + $0x228] ss:$16 sps:$4 sm:$0xff]  }
  0x3a   :  { %1100 = vmatpush1.bf16.msra.mxu1 %v2340_v30  ;;  %v2438_v30 = vld [vmem:[%s3503_s0 + $0x1e0] ss:$16 sps:$4 sm:$0xff]  }
  0x3b   :  { %1101 = vmatprep.subr.bf16.mxu1 %v2530_v0  ;;  %v2399_v0 = vld [vmem:[%s3503_s0 + $0x128] ss:$16 sps:$4 sm:$0xff]  }
  0x3e   :  { %1102 = vmatpush1.bf16.msra.mxu1 %v2345_v33  ;;  %1409 = vmatmul.mubr.bf16.gmra.mrb[8].mxu0 %v2357_v36  ;;  %v2451_v33 = vld [vmem:[%s3503_s0 + $0x24c] ss:$16 sps:$4 sm:$0xff]   ;;  %v2453_v36 = vld [vmem:[%s3503_s0 + $0x248] ss:$16 sps:$4 sm:$0xff]  }
  0x3f   :  { %2221 = vmatprep.mubr.msk.bf16.mxu0 %vm974_vm0, %v2361_v37  ;;  %v2457_v37 = vld [vmem:[%s3503_s0 + $0x26c] ss:$16 sps:$4 sm:$0xff]  }
  0x41   :  { %1104 = vmatmul.mubr.bf16.vlgmr.msra.gmra.mrb[0].mxu1 %v2346_v34  ;;  %v2444_v34 = vld [vmem:[%s3503_s0 + $0x200] ss:$16 sps:$4 sm:$0xff]  }
  0x42   :  { %1111 = vmatprep.mubr.bf16.mxu1 %v2352_v35  ;;  %v2448_v35 = vld [vmem:[%s3503_s0 + $0x224] ss:$16 sps:$4 sm:$0xff]  }
  0x46   :  { %1417 = vmatmul.mubr.bf16.gmra.mrb[12].mxu0 %v2363_v40  ;;  %v2459_v40 = vld [vmem:[%s3503_s0 + $0x268] ss:$16 sps:$4 sm:$0xff]  }
  0x47   :  { %2222 = vmatprep.mubr.msk.bf16.mxu0 %vm974_vm0, %v2367_v41  ;;  %v2463_v41 = vld [vmem:[%s3503_s0 + $0x28c] ss:$16 sps:$4 sm:$0xff]  }
  0x49   :  { %1112 = vmatmul.mubr.bf16.gmra.mrb[4].mxu1 %v2354_v38  ;;  %v2450_v38 = vld [vmem:[%s3503_s0 + $0x220] ss:$16 sps:$4 sm:$0xff]  }
  0x4a   :  { %1119 = vmatprep.mubr.bf16.mxu1 %v2358_v39  ;;  %v2454_v39 = vld [vmem:[%s3503_s0 + $0x244] ss:$16 sps:$4 sm:$0xff]  }
  0x4e   :  { %1425 = vmatmul.mubr.bf16.gmra.mrb[16].mxu0 %v2369_v44  ;;  %v2465_v44 = vld [vmem:[%s3503_s0 + $0x288] ss:$16 sps:$4 sm:$0xff]  }
  0x4f   :  { %2223 = vmatprep.mubr.msk.bf16.mxu0 %vm974_vm0, %v2373_v45  ;;  %v2469_v45 = vld [vmem:[%s3503_s0 + $0x2ac] ss:$16 sps:$4 sm:$0xff]  }
  0x51   :  { %1120 = vmatmul.mubr.bf16.gmra.mrb[8].mxu1 %v2360_v42  ;;  %v2456_v42 = vld [vmem:[%s3503_s0 + $0x240] ss:$16 sps:$4 sm:$0xff]  }
  0x52   :  { %1127 = vmatprep.mubr.bf16.mxu1 %v2364_v43  ;;  %v2460_v43 = vld [vmem:[%s3503_s0 + $0x264] ss:$16 sps:$4 sm:$0xff]  }
  0x56   :  { %1433 = vmatmul.mubr.bf16.gmra.mrb[20].mxu0 %v2375_v48  ;;  %v2471_v48 = vld [vmem:[%s3503_s0 + $0x2a8] ss:$16 sps:$4 sm:$0xff]  }
  0x57   :  { %2224 = vmatprep.mubr.msk.bf16.mxu0 %vm974_vm0, %v2379_v49  ;;  %v2475_v49 = vld [vmem:[%s3503_s0 + $0x2cc] ss:$16 sps:$4 sm:$0xff]  }
  0x59   :  { %1128 = vmatmul.mubr.bf16.gmra.mrb[12].mxu1 %v2366_v46  ;;  %v2462_v46 = vld [vmem:[%s3503_s0 + $0x260] ss:$16 sps:$4 sm:$0xff]  }
  0x5a   :  { %1135 = vmatprep.mubr.bf16.mxu1 %v2370_v47  ;;  %v2466_v47 = vld [vmem:[%s3503_s0 + $0x284] ss:$16 sps:$4 sm:$0xff]  }
  0x5e   :  { %1441 = vmatmul.mubr.bf16.gmra.mrb[24].mxu0 %v2381_v52  ;;  %v2477_v52 = vld [vmem:[%s3503_s0 + $0x2c8] ss:$16 sps:$4 sm:$0xff]  }
  0x5f   :  { %2225 = vmatprep.mubr.msk.bf16.mxu0 %vm974_vm0, %v2385_v53  ;;  %v2481_v53 = vld [vmem:[%s3503_s0 + $0x2ec] ss:$16 sps:$4 sm:$0xff]  }
  0x61   :  { %1136 = vmatmul.mubr.bf16.gmra.mrb[16].mxu1 %v2372_v50  ;;  %v2468_v50 = vld [vmem:[%s3503_s0 + $0x280] ss:$16 sps:$4 sm:$0xff]  }
  0x62   :  { %1143 = vmatprep.mubr.bf16.mxu1 %v2376_v51  ;;  %v2472_v51 = vld [vmem:[%s3503_s0 + $0x2a4] ss:$16 sps:$4 sm:$0xff]  }
  0x66   :  { %1449 = vmatmul.mubr.bf16.gmra.mrb[28].mxu0 %v2387_v56  ;;  %v2483_v56 = vld [vmem:[%s3503_s0 + $0x2e8] ss:$16 sps:$4 sm:$0xff]  }
  0x67   :  { %2226 = vmatprep.mubr.msk.bf16.mxu0 %vm974_vm0, %v2391_v57  ;;  %v2487_v57 = vld [vmem:[%s3503_s0 + $0x30c] ss:$16 sps:$4 sm:$0xff]  }
  0x69   :  { %1144 = vmatmul.mubr.bf16.gmra.mrb[20].mxu1 %v2378_v54  ;;  %v2474_v54 = vld [vmem:[%s3503_s0 + $0x2a0] ss:$16 sps:$4 sm:$0xff]  }
  0x6a   :  { %1151 = vmatprep.mubr.bf16.mxu1 %v2382_v55  ;;  %v2478_v55 = vld [vmem:[%s3503_s0 + $0x2c4] ss:$16 sps:$4 sm:$0xff]  }
  0x6e   :  { %1457 = vmatmul.mubr.bf16.gmra.mrb[32].mxu0 %v2393_v60  ;;  %v2489_v60 = vld [vmem:[%s3503_s0 + $0x308] ss:$16 sps:$4 sm:$0xff]  }
  0x6f   :  { %2227 = vmatprep.mubr.msk.bf16.mxu0 %vm974_vm0, %v2397_v61  ;;  %v2493_v61 = vld [vmem:[%s3503_s0 + $0x32c] ss:$16 sps:$4 sm:$0xff]  }
  0x71   :  { %1152 = vmatmul.mubr.bf16.gmra.mrb[24].mxu1 %v2384_v58  ;;  %v2480_v58 = vld [vmem:[%s3503_s0 + $0x2c0] ss:$16 sps:$4 sm:$0xff]  }
  0x72   :  { %1159 = vmatprep.mubr.bf16.mxu1 %v2388_v59  ;;  %v2484_v59 = vld [vmem:[%s3503_s0 + $0x2e4] ss:$16 sps:$4 sm:$0xff]  }
  0x76   :  { %1465 = vmatmul.mubr.bf16.gmra.mrb[36].mxu0 %v2399_v0  ;;  %v2495_v0 = vld [vmem:[%s3503_s0 + $0x328] ss:$16 sps:$4 sm:$0xff]  }
  0x77   :  { %2228 = vmatprep.mubr.msk.bf16.mxu0 %vm974_vm0, %v2403_v1  ;;  %v2499_v1 = vld [vmem:[%s3503_s0 + $0x34c] ss:$16 sps:$4 sm:$0xff]  }
  0x79   :  { %1160 = vmatmul.mubr.bf16.gmra.mrb[28].mxu1 %v2390_v62  ;;  %v2486_v62 = vld [vmem:[%s3503_s0 + $0x2e0] ss:$16 sps:$4 sm:$0xff]  }
  0x7a   :  { %1167 = vmatprep.mubr.bf16.mxu1 %v2394_v63  ;;  %v2490_v63 = vld [vmem:[%s3503_s0 + $0x304] ss:$16 sps:$4 sm:$0xff]  }
  0x7e   :  { %1473 = vmatmul.mubr.bf16.gmra.mrb[40].mxu0 %v2405_v4  ;;  %v2501_v4 = vld [vmem:[%s3503_s0 + $0x348] ss:$16 sps:$4 sm:$0xff]  }
  0x7f   :  { %2229 = vmatprep.mubr.msk.bf16.mxu0 %vm974_vm0, %v2409_v5  ;;  %v2505_v5 = vld [vmem:[%s3503_s0 + $0x36c] ss:$16 sps:$4 sm:$0xff]  }
  0x81   :  { %1168 = vmatmul.mubr.bf16.gmra.mrb[32].mxu1 %v2396_v2  ;;  %v2492_v2 = vld [vmem:[%s3503_s0 + $0x300] ss:$16 sps:$4 sm:$0xff]  }
  0x82   :  { %1175 = vmatprep.mubr.bf16.mxu1 %v2400_v3  ;;  %v2496_v3 = vld [vmem:[%s3503_s0 + $0x324] ss:$16 sps:$4 sm:$0xff]  }
  0x86   :  { %1481 = vmatmul.mubr.bf16.gmra.mrb[44].mxu0 %v2411_v8  ;;  %v2498_v8 = vld [vmem:[%s3503_s0 + $0x320] ss:$16 sps:$4 sm:$0xff]  }
  0x87   :  { %2230 = vmatprep.mubr.msk.bf16.mxu0 %vm974_vm0, %v2415_v9 }
  0x89   :  { %1176 = vmatmul.mubr.bf16.gmra.mrb[36].mxu1 %v2402_v6  ;;  %v131_v6 = vld [vmem:[%s3503_s0 + $0x368] sm:$0xff] }
  0x8a   :  { %1183 = vmatprep.mubr.bf16.mxu1 %v2406_v7  ;;  %v133_v7 = vld [vmem:[%s3503_s0 + $0x378] sm:$0xff] }
  0x8e   :  { %1489 = vmatmul.mubr.bf16.gmra.mrb[48].mxu0 %v2417_v12  ;;  %v2173_v12 = vcombine.low %v131_v6, %v133_v7 }
  0x8f   :  { %2231 = vmatprep.mubr.msk.bf16.mxu0 %vm974_vm0, %v2421_v13 }
  0x91   :  { %1184 = vmatmul.mubr.bf16.gmra.mrb[40].mxu1 %v2408_v10  ;;  %v2502_v10 = vld [vmem:[%s3503_s0 + $0x344] ss:$16 sps:$4 sm:$0xff]  }
  0x92   :  { %1191 = vmatprep.mubr.bf16.mxu1 %v2412_v11 }
  0x96   :  { %1497 = vmatmul.mubr.bf16.gmra.mrb[52].mxu0 %v2423_v16  ;;  %v135_v16 = vld [vmem:[%s3503_s0 + $0x388] sm:$0xff] }
  0x97   :  { %2232 = vmatprep.mubr.msk.bf16.mxu0 %vm974_vm0, %v2427_v17  ;;  %v137_v17 = vld [vmem:[%s3503_s0 + $0x398] sm:$0xff] }
  0x99   :  { %1192 = vmatmul.mubr.bf16.gmra.mrb[44].mxu1 %v2414_v14  ;;  %v2510_v14 = vld [vmem:[%s3503_s0 + $0x38c] ss:$16 sps:$4 sm:$0xff]  }
  0x9a   :  { %1199 = vmatprep.mubr.bf16.mxu1 %v2418_v15 }
  0x9e   :  { %1505 = vmatmul.mubr.bf16.gmra.mrb[56].mxu0 %v2429_v20  ;;  %v2507_v20 = vld [vmem:[%s3503_s0 + $0x364] ss:$16 sps:$4 sm:$0xff]  }
  0x9f   :  { %2233 = vmatprep.mubr.msk.bf16.mxu0 %vm974_vm0, %v2433_v21 }
  0xa1   :  { %1200 = vmatmul.mubr.bf16.gmra.mrb[48].mxu1 %v2420_v18  ;;  %v2504_v18 = vld [vmem:[%s3503_s0 + $0x340] ss:$16 sps:$4 sm:$0xff]  }
  0xa2   :  { %1207 = vmatprep.mubr.bf16.mxu1 %v2424_v19 }
  0xa6   :  { %1513 = vmatmul.mubr.bf16.gmra.mrb[60].mxu0 %v2435_v24  ;;  %v2515_v24 = vld [vmem:[%s3503_s0 + $0x3ac] ss:$16 sps:$4 sm:$0xff]  }
  0xa7   :  { %2234 = vmatprep.mubr.msk.bf16.mxu0 %vm974_vm0, %v2439_v25 }
  0xa9   :  { %1208 = vmatmul.mubr.bf16.gmra.mrb[52].mxu1 %v2426_v22  ;;  %v2177_v22 = vcombine.low %v135_v16, %v137_v17  ;;  %v2519_v17 = vld [vmem:[%s3503_s0 + $0x3a0] ss:$16 sps:$4 sm:$0xff]  }
  0xaa   :  { %1215 = vmatprep.mubr.bf16.mxu1 %v2430_v23 }
  0xae   :  { %1521 = vmatmul.mubr.bf16.gmra.mrb[64].mxu0 %v2441_v28 }
  0xaf   :  { %2235 = vmatprep.mubr.msk.bf16.mxu0 %vm974_vm0, %v2445_v29 }
  0xb1   :  { %1216 = vmatmul.mubr.bf16.gmra.mrb[56].mxu1 %v2432_v26  ;;  %v139_v26 = vld [vmem:[%s3503_s0 + $0x3a8] sm:$0xff] }
  0xb2   :  { %1223 = vmatprep.mubr.bf16.mxu1 %v2436_v27  ;;  %v141_v27 = vld [vmem:[%s3503_s0 + $0x3b8] sm:$0xff] }
  0xb6   :  { %1529 = vmatmul.mubr.bf16.gmra.mrb[68].mxu0 %v2447_v32 }
  0xb7   :  { %2236 = vmatprep.mubr.msk.bf16.mxu0 %vm974_vm0, %v2451_v33 }
  0xb9   :  { %1224 = vmatmul.mubr.bf16.gmra.mrb[60].mxu1 %v2438_v30 }
  0xba   :  { %1231 = vmatprep.mubr.bf16.mxu1 %v2442_v31  ;;  %v2509_v31 = vld [vmem:[%s3503_s0 + $0x360] ss:$16 sps:$4 sm:$0xff]  }
  0xbe   :  { %1537 = vmatmul.mubr.bf16.gmra.mrb[72].mxu0 %v2453_v36  ;;  %v2181_v36 = vcombine.low %v139_v26, %v141_v27 }
  0xbf   :  { %2237 = vmatprep.mubr.msk.bf16.mxu0 %vm974_vm0, %v2457_v37 }
  0xc1   :  { %1232 = vmatmul.mubr.bf16.gmra.mrb[64].mxu1 %v2444_v34  ;;  %v2512_v34 = vld [vmem:[%s3503_s0 + $0x384] ss:$16 sps:$4 sm:$0xff]  }
  0xc2   :  { %1239 = vmatprep.mubr.bf16.mxu1 %v2448_v35 }
  0xc6   :  { %1545 = vmatmul.mubr.bf16.gmra.mrb[76].mxu0 %v2459_v40 }
  0xc7   :  { %2238 = vmatprep.mubr.msk.bf16.mxu0 %vm974_vm0, %v2463_v41  ;;  %v2520_v41 = vld [vmem:[%s3503_s0 + $0x3cc] ss:$16 sps:$4 sm:$0xff]  }
  0xc9   :  { %1240 = vmatmul.mubr.bf16.gmra.mrb[68].mxu1 %v2450_v38 }
  0xca   :  { %1247 = vmatprep.mubr.bf16.mxu1 %v2454_v39 }
  0xce   :  { %1553 = vmatmul.mubr.bf16.gmra.mrb[80].mxu0 %v2465_v44 }
  0xcf   :  { %2239 = vmatprep.mubr.msk.bf16.mxu0 %vm974_vm0, %v2469_v45 }
  0xd1   :  { %1248 = vmatmul.mubr.bf16.gmra.mrb[72].mxu1 %v2456_v42 }
  0xd2   :  { %1255 = vmatprep.mubr.bf16.mxu1 %v2460_v43 }
  0xd6   :  { %1561 = vmatmul.mubr.bf16.gmra.mrb[84].mxu0 %v2471_v48 }
  0xd7   :  { %2240 = vmatprep.mubr.msk.bf16.mxu0 %vm974_vm0, %v2475_v49  ;;  %v143_v49 = vld [vmem:[%s3503_s0 + $0x3c8] sm:$0xff] }
  0xd9   :  { %1256 = vmatmul.mubr.bf16.gmra.mrb[76].mxu1 %v2462_v46 }
  0xda   :  { %1263 = vmatprep.mubr.bf16.mxu1 %v2466_v47 }
  0xde   :  { %1569 = vmatmul.mubr.bf16.gmra.mrb[88].mxu0 %v2477_v52 }
  0xdf   :  { %2241 = vmatprep.mubr.msk.bf16.mxu0 %vm974_vm0, %v2481_v53 }
  0xe1   :  { %1264 = vmatmul.mubr.bf16.gmra.mrb[80].mxu1 %v2468_v50  ;;  %v145_v50 = vld [vmem:[%s3503_s0 + $0x3d8] sm:$0xff] }
  0xe2   :  { %1271 = vmatprep.mubr.bf16.mxu1 %v2472_v51 }
  0xe6   :  { %1577 = vmatmul.mubr.bf16.gmra.mrb[92].mxu0 %v2483_v56 }
  0xe7   :  { %2242 = vmatprep.mubr.msk.bf16.mxu0 %vm974_vm0, %v2487_v57 }
  0xe9   :  { %1272 = vmatmul.mubr.bf16.gmra.mrb[84].mxu1 %v2474_v54 }
  0xea   :  { %1279 = vmatprep.mubr.bf16.mxu1 %v2478_v55  ;;  %v2514_v55 = vld [vmem:[%s3503_s0 + $0x380] ss:$16 sps:$4 sm:$0xff]  }
  0xee   :  { %1585 = vmatmul.mubr.bf16.gmra.mrb[96].mxu0 %v2489_v60  ;;  %v2185_v60 = vcombine.low %v143_v49, %v145_v50 }
  0xef   :  { %2243 = vmatprep.mubr.msk.bf16.mxu0 %vm974_vm0, %v2493_v61 }
  0xf1   :  { %1280 = vmatmul.mubr.bf16.gmra.mrb[88].mxu1 %v2480_v58  ;;  %v2517_v58 = vld [vmem:[%s3503_s0 + $0x3a4] ss:$16 sps:$4 sm:$0xff]  }
  0xf2   :  { %1287 = vmatprep.mubr.bf16.mxu1 %v2484_v59 }
  0xf6   :  { %1593 = vmatmul.mubr.bf16.gmra.mrb[100].mxu0 %v2495_v0 }
  0xf7   :  { %2244 = vmatprep.mubr.msk.bf16.mxu0 %vm974_vm0, %v2499_v1 }
  0xf9   :  { %1288 = vmatmul.mubr.bf16.gmra.mrb[92].mxu1 %v2486_v62 }
  0xfa   :  { %1295 = vmatprep.mubr.bf16.mxu1 %v2490_v63 }
  0xfe   :  { %1601 = vmatmul.mubr.bf16.gmra.mrb[104].mxu0 %v2501_v4 }
  0xff   :  { %2245 = vmatprep.mubr.msk.bf16.mxu0 %vm974_vm0, %v2505_v5 }
 0x101   :  { %1296 = vmatmul.mubr.bf16.gmra.mrb[96].mxu1 %v2492_v2  ;;  %v1394_v9 = vpop.f32.mrb[0].mxu0  ;;  %v2525_v2 = vld [vmem:[%s3503_s0 + $0x3ec] ss:$16 sps:$4 sm:$0xff]  }
 0x102   :  { %1303 = vmatprep.mubr.bf16.mxu1 %v2496_v3  ;;  %v1396_v11 = vpop.f32.mrb[1].mxu0 }
 0x103   :  { %v1397_v13 = vpop.f32.mrb[2].mxu0  ;;  %v147_v11 = vld [vmem:[%s3503_s0 + $0x3e8] sm:$0xff] }
 0x104   :  { %v1399_v15 = vpop.f32.mrb[3].mxu0 }
 0x106   :  { %1609 = vmatmul.mubr.bf16.gmra.mrb[108].mxu0 %v2173_v12  ;;  %v149_v12 = vld [vmem:[%s3503_s0 + $0x3f8] sm:$0xff] }
 0x107   :  { %2246 = vmatprep.mubr.msk.bf16.mxu0 %vm974_vm0, %v2510_v14 }
 0x109   :  { %1304 = vmatmul.mubr.bf16.gmra.mrb[100].mxu1 %v2498_v8  ;;  %v1402_v19 = vpop.f32.mrb[4].mxu0 }
 0x10a   :  { %1311 = vmatprep.mubr.bf16.mxu1 %v2502_v10  ;;  %v1404_v21 = vpop.f32.mrb[5].mxu0 }
 0x10b   :  { %v1405_v23 = vpop.f32.mrb[6].mxu0 }
 0x10c   :  { %v1407_v25 = vpop.f32.mrb[7].mxu0 }
 0x10e   :  { %1617 = vmatmul.mubr.bf16.gmra.mrb[112].mxu0 %v2177_v22  ;;  %v2189_v22 = vcombine.low %v147_v11, %v149_v12 }
 0x10f   :  { %2247 = vmatprep.mubr.msk.bf16.mxu0 %vm974_vm0, %v2515_v24 }
 0x111   :  { %1312 = vmatmul.mubr.bf16.gmra.mrb[104].mxu1 %v2504_v18  ;;  %v1410_v32 = vpop.f32.mrb[8].mxu0 }
 0x112   :  { %1319 = vmatprep.mubr.bf16.mxu1 %v2507_v20  ;;  %v1412_v35 = vpop.f32.mrb[9].mxu0  ;;  %v2522_v20 = vld [vmem:[%s3503_s0 + $0x3c4] ss:$16 sps:$4 sm:$0xff]  }
 0x113   :  { %v1413_v40 = vpop.f32.mrb[10].mxu0 }
 0x114   :  { %v1105_v28 = vpop.f32.mrb[0].mxu1  ;;  %v1415_v42 = vpop.f32.mrb[11].mxu0 }
 0x115   :  { %v1395_v29 = vadd.f32 %v1394_v9, %v1105_v28  ;;  %v1107_v30 = vpop.f32.mrb[1].mxu1 }
 0x116   :  { %v1108_v33 = vpop.f32.mrb[2].mxu1  ;;  %1625 = vmatmul.mubr.bf16.gmra.mrb[116].mxu0 %v2181_v36 }
 0x117   :  { %1650 = vst.msk [vmem:[%s3504_s2] sm:$0xff] %vm1649_vm1, %v1395_v29  ;;  %v1852_v37 = vmul.f32 %v1395_v29, %v1395_v29  ;;  %v1398_v38 = vadd.f32 %v1397_v13, %v1108_v33  ;;  %v1110_v39 = vpop.f32.mrb[3].mxu1  ;;  %v1715_v43 = vsel %vm1649_vm1, %v1395_v29, 0.0  ;;  %2248 = vmatprep.mubr.msk.bf16.mxu0 %vm974_vm0, %v2520_v41 }
 0x119   :  { %1651 = vst.msk [vmem:[%s3504_s2 + $0x8] sm:$0xff] %vm1649_vm1, %v1398_v38  ;;  %v1716_v44 = vsel %vm1649_vm1, %v1398_v38, 0.0  ;;  %v1853_v45 = vmul.f32 %v1398_v38, %v1398_v38  ;;  %1320 = vmatmul.mubr.bf16.gmra.mrb[108].mxu1 %v2509_v31  ;;  %v1916_v47 = vsel %vm1649_vm1, %v1852_v37, 0.0  ;;  %v1418_v56 = vpop.f32.mrb[12].mxu0 }
 0x11a   :  { %v1717_v46 = vadd.f32 %v1716_v44, %v1715_v43  ;;  %1327 = vmatprep.mubr.bf16.mxu1 %v2512_v34  ;;  %v1420_v59 = vpop.f32.mrb[13].mxu0  ;;  %v2527_v43 = vld [vmem:[%s3503_s0 + $0x3e4] ss:$16 sps:$4 sm:$0xff]  }
 0x11b   :  { %v1917_v48 = vsel %vm1649_vm1, %v1853_v45, 0.0  ;;  %v1421_v1 = vpop.f32.mrb[14].mxu0 }
 0x11c   :  { %v1918_v51 = vadd.f32 %v1917_v48, %v1916_v47  ;;  %v1113_v52 = vpop.f32.mrb[4].mxu1  ;;  %v1423_v4 = vpop.f32.mrb[15].mxu0 }
 0x11d   :  { %v1403_v53 = vadd.f32 %v1402_v19, %v1113_v52  ;;  %v1115_v54 = vpop.f32.mrb[5].mxu1 }
 0x11e   :  { %v1116_v57 = vpop.f32.mrb[6].mxu1  ;;  %1633 = vmatmul.mubr.bf16.gmra.mrb[120].mxu0 %v2185_v60 }
 0x11f   :  { %1652 = vst.msk [vmem:[%s3504_s2 + $0x10] sm:$0xff] %vm1649_vm1, %v1403_v53  ;;  %v1718_v61 = vsel %vm1649_vm1, %v1403_v53, 0.0  ;;  %v1854_v62 = vmul.f32 %v1403_v53, %v1403_v53  ;;  %v1406_v63 = vadd.f32 %v1405_v23, %v1116_v57  ;;  %v1118_v0 = vpop.f32.mrb[7].mxu1  ;;  %2249 = vmatprep.mubr.msk.bf16.mxu0 %vm974_vm0, %v2525_v2 }
 0x120   :  { %v1719_v3 = vadd.f32 %v1718_v61, %v1717_v46 }
 0x121   :  { %v1919_v5 = vsel %vm1649_vm1, %v1854_v62, 0.0  ;;  %1653 = vst.msk [vmem:[%s3504_s2 + $0x18] sm:$0xff] %vm1649_vm1, %v1406_v63  ;;  %v1720_v6 = vsel %vm1649_vm1, %v1406_v63, 0.0  ;;  %v1855_v7 = vmul.f32 %v1406_v63, %v1406_v63  ;;  %1328 = vmatmul.mubr.bf16.gmra.mrb[112].mxu1 %v2514_v55  ;;  %v1426_v18 = vpop.f32.mrb[16].mxu0  ;;  %v2529_v62 = vld [vmem:[%s3503_s0 + $0x3e0] ss:$16 sps:$4 sm:$0xff]  }
 0x122   :  { %v1920_v8 = vadd.f32 %v1919_v5, %v1918_v51  ;;  %v1721_v9 = vadd.f32 %v1720_v6, %v1719_v3  ;;  %1335 = vmatprep.mubr.bf16.mxu1 %v2517_v58  ;;  %v1428_v21 = vpop.f32.mrb[17].mxu0 }
 0x123   :  { %v1921_v10 = vsel %vm1649_vm1, %v1855_v7, 0.0  ;;  %v1429_v27 = vpop.f32.mrb[18].mxu0 }
 0x124   :  { %v1922_v13 = vadd.f32 %v1921_v10, %v1920_v8  ;;  %v1121_v14 = vpop.f32.mrb[8].mxu1  ;;  %v1431_v29 = vpop.f32.mrb[19].mxu0 }
 0x125   :  { %v1411_v15 = vadd.f32 %v1410_v32, %v1121_v14  ;;  %v1123_v16 = vpop.f32.mrb[9].mxu1 }
 0x126   :  { %v1124_v19 = vpop.f32.mrb[10].mxu1  ;;  %1641 = vmatmul.mubr.bf16.gmra.mrb[124].mxu0 %v2189_v22 }
 0x127   :  { %1654 = vst.msk [vmem:[%s3504_s2 + $0x20] sm:$0xff] %vm1649_vm1, %v1411_v15  ;;  %v1722_v23 = vsel %vm1649_vm1, %v1411_v15, 0.0  ;;  %v1856_v24 = vmul.f32 %v1411_v15, %v1411_v15  ;;  %v1414_v25 = vadd.f32 %v1413_v40, %v1124_v19  ;;  %v1126_v26 = vpop.f32.mrb[11].mxu1  ;;  %v2524_v40 = vld [vmem:[%s3503_s0 + $0x3c0] ss:$16 sps:$4 sm:$0xff]  }
 0x128   :  { %v1723_v28 = vadd.f32 %v1722_v23, %v1721_v9 }
 0x129   :  { %v1923_v30 = vsel %vm1649_vm1, %v1856_v24, 0.0  ;;  %1655 = vst.msk [vmem:[%s3504_s2 + $0x28] sm:$0xff] %vm1649_vm1, %v1414_v25  ;;  %v1724_v31 = vsel %vm1649_vm1, %v1414_v25, 0.0  ;;  %v1857_v32 = vmul.f32 %v1414_v25, %v1414_v25  ;;  %1336 = vmatmul.mubr.bf16.gmra.mrb[116].mxu1 %v2519_v17  ;;  %v1434_v41 = vpop.f32.mrb[20].mxu0 }
 0x12a   :  { %v1924_v33 = vadd.f32 %v1923_v30, %v1922_v13  ;;  %v1725_v34 = vadd.f32 %v1724_v31, %v1723_v28  ;;  %1343 = vmatprep.mubr.bf16.mxu1 %v2522_v20  ;;  %v1436_v44 = vpop.f32.mrb[21].mxu0 }
 0x12b   :  { %v1925_v35 = vsel %vm1649_vm1, %v1857_v32, 0.0  ;;  %v1437_v49 = vpop.f32.mrb[22].mxu0 }
 0x12c   :  { %v1926_v36 = vadd.f32 %v1925_v35, %v1924_v33  ;;  %v1129_v37 = vpop.f32.mrb[12].mxu1  ;;  %v1439_v51 = vpop.f32.mrb[23].mxu0 }
 0x12d   :  { %v1419_v38 = vadd.f32 %v1418_v56, %v1129_v37  ;;  %v1131_v39 = vpop.f32.mrb[13].mxu1 }
 0x12e   :  { %v1132_v42 = vpop.f32.mrb[14].mxu1 }
 0x12f   :  { %1656 = vst.msk [vmem:[%s3504_s2 + $0x30] sm:$0xff] %vm1649_vm1, %v1419_v38  ;;  %v1726_v45 = vsel %vm1649_vm1, %v1419_v38, 0.0  ;;  %v1858_v46 = vmul.f32 %v1419_v38, %v1419_v38  ;;  %v1422_v47 = vadd.f32 %v1421_v1, %v1132_v42  ;;  %v1134_v48 = vpop.f32.mrb[15].mxu1 }
 0x130   :  { %v1727_v50 = vadd.f32 %v1726_v45, %v1725_v34 }
 0x131   :  { %v1927_v52 = vsel %vm1649_vm1, %v1858_v46, 0.0  ;;  %1657 = vst.msk [vmem:[%s3504_s2 + $0x38] sm:$0xff] %vm1649_vm1, %v1422_v47  ;;  %v1728_v53 = vsel %vm1649_vm1, %v1422_v47, 0.0  ;;  %v1859_v54 = vmul.f32 %v1422_v47, %v1422_v47  ;;  %1344 = vmatmul.mubr.bf16.gmra.mrb[120].mxu1 %v2524_v40  ;;  %v1442_v63 = vpop.f32.mrb[24].mxu0 }
 0x132   :  { %v1928_v55 = vadd.f32 %v1927_v52, %v1926_v36  ;;  %v1729_v56 = vadd.f32 %v1728_v53, %v1727_v50  ;;  %1351 = vmatprep.mubr.bf16.mxu1 %v2527_v43  ;;  %v1444_v1 = vpop.f32.mrb[25].mxu0 }
 0x133   :  { %v1929_v57 = vsel %vm1649_vm1, %v1859_v54, 0.0  ;;  %v1445_v6 = vpop.f32.mrb[26].mxu0 }
 0x134   :  { %v1930_v58 = vadd.f32 %v1929_v57, %v1928_v55  ;;  %v1137_v59 = vpop.f32.mrb[16].mxu1  ;;  %v1447_v8 = vpop.f32.mrb[27].mxu0 }
 0x135   :  { %v1427_v60 = vadd.f32 %v1426_v18, %v1137_v59  ;;  %v1139_v61 = vpop.f32.mrb[17].mxu1 }
 0x136   :  { %v1140_v0 = vpop.f32.mrb[18].mxu1 }
 0x137   :  { %1658 = vst.msk [vmem:[%s3504_s2 + $0x40] sm:$0xff] %vm1649_vm1, %v1427_v60  ;;  %v1730_v2 = vsel %vm1649_vm1, %v1427_v60, 0.0  ;;  %v1860_v3 = vmul.f32 %v1427_v60, %v1427_v60  ;;  %v1430_v4 = vadd.f32 %v1429_v27, %v1140_v0  ;;  %v1142_v5 = vpop.f32.mrb[19].mxu1 }
 0x138   :  { %v1731_v7 = vadd.f32 %v1730_v2, %v1729_v56 }
 0x139   :  { %v1931_v9 = vsel %vm1649_vm1, %v1860_v3, 0.0  ;;  %1659 = vst.msk [vmem:[%s3504_s2 + $0x48] sm:$0xff] %vm1649_vm1, %v1430_v4  ;;  %v1732_v10 = vsel %vm1649_vm1, %v1430_v4, 0.0  ;;  %v1861_v11 = vmul.f32 %v1430_v4, %v1430_v4  ;;  %1352 = vmatmul.mubr.bf16.gmra.mrb[124].mxu1 %v2529_v62  ;;  %v1450_v19 = vpop.f32.mrb[28].mxu0 }
 0x13a   :  { %v1932_v12 = vadd.f32 %v1931_v9, %v1930_v58  ;;  %v1733_v13 = vadd.f32 %v1732_v10, %v1731_v7  ;;  %v1452_v21 = vpop.f32.mrb[29].mxu0 }
 0x13b   :  { %v1933_v14 = vsel %vm1649_vm1, %v1861_v11, 0.0  ;;  %v1453_v26 = vpop.f32.mrb[30].mxu0 }
 0x13c   :  { %v1934_v15 = vadd.f32 %v1933_v14, %v1932_v12  ;;  %v1145_v16 = vpop.f32.mrb[20].mxu1  ;;  %v1455_v28 = vpop.f32.mrb[31].mxu0 }
 0x13d   :  { %v1435_v17 = vadd.f32 %v1434_v41, %v1145_v16  ;;  %v1147_v18 = vpop.f32.mrb[21].mxu1 }
 0x13e   :  { %v1148_v20 = vpop.f32.mrb[22].mxu1 }
 0x13f   :  { %1660 = vst.msk [vmem:[%s3504_s2 + $0x50] sm:$0xff] %vm1649_vm1, %v1435_v17  ;;  %v1734_v22 = vsel %vm1649_vm1, %v1435_v17, 0.0  ;;  %v1862_v23 = vmul.f32 %v1435_v17, %v1435_v17  ;;  %v1438_v24 = vadd.f32 %v1437_v49, %v1148_v20  ;;  %v1150_v25 = vpop.f32.mrb[23].mxu1 }
 0x140   :  { %v1735_v27 = vadd.f32 %v1734_v22, %v1733_v13 }
 0x141   :  { %v1935_v29 = vsel %vm1649_vm1, %v1862_v23, 0.0  ;;  %1661 = vst.msk [vmem:[%s3504_s2 + $0x58] sm:$0xff] %vm1649_vm1, %v1438_v24  ;;  %v1736_v30 = vsel %vm1649_vm1, %v1438_v24, 0.0  ;;  %v1863_v31 = vmul.f32 %v1438_v24, %v1438_v24  ;;  %v1458_v39 = vpop.f32.mrb[32].mxu0 }
 0x142   :  { %v1936_v32 = vadd.f32 %v1935_v29, %v1934_v15  ;;  %v1737_v33 = vadd.f32 %v1736_v30, %v1735_v27  ;;  %v1460_v41 = vpop.f32.mrb[33].mxu0 }
 0x143   :  { %v1937_v34 = vsel %vm1649_vm1, %v1863_v31, 0.0  ;;  %v1461_v46 = vpop.f32.mrb[34].mxu0 }
 0x144   :  { %v1938_v35 = vadd.f32 %v1937_v34, %v1936_v32  ;;  %v1153_v36 = vpop.f32.mrb[24].mxu1  ;;  %v1463_v48 = vpop.f32.mrb[35].mxu0 }
 0x145   :  { %v1443_v37 = vadd.f32 %v1442_v63, %v1153_v36  ;;  %v1155_v38 = vpop.f32.mrb[25].mxu1 }
 0x146   :  { %v1156_v40 = vpop.f32.mrb[26].mxu1 }
 0x147   :  { %1662 = vst.msk [vmem:[%s3504_s2 + $0x60] sm:$0xff] %vm1649_vm1, %v1443_v37  ;;  %v1738_v42 = vsel %vm1649_vm1, %v1443_v37, 0.0  ;;  %v1864_v43 = vmul.f32 %v1443_v37, %v1443_v37  ;;  %v1446_v44 = vadd.f32 %v1445_v6, %v1156_v40  ;;  %v1158_v45 = vpop.f32.mrb[27].mxu1 }
 0x148   :  { %v1739_v47 = vadd.f32 %v1738_v42, %v1737_v33 }
 0x149   :  { %v1939_v49 = vsel %vm1649_vm1, %v1864_v43, 0.0  ;;  %1663 = vst.msk [vmem:[%s3504_s2 + $0x68] sm:$0xff] %vm1649_vm1, %v1446_v44  ;;  %v1740_v50 = vsel %vm1649_vm1, %v1446_v44, 0.0  ;;  %v1865_v51 = vmul.f32 %v1446_v44, %v1446_v44  ;;  %v1466_v59 = vpop.f32.mrb[36].mxu0 }
 0x14a   :  { %v1940_v52 = vadd.f32 %v1939_v49, %v1938_v35  ;;  %v1741_v53 = vadd.f32 %v1740_v50, %v1739_v47  ;;  %v1468_v61 = vpop.f32.mrb[37].mxu0 }
 0x14b   :  { %v1941_v54 = vsel %vm1649_vm1, %v1865_v51, 0.0  ;;  %v1469_v2 = vpop.f32.mrb[38].mxu0 }
 0x14c   :  { %v1942_v55 = vadd.f32 %v1941_v54, %v1940_v52  ;;  %v1161_v56 = vpop.f32.mrb[28].mxu1  ;;  %v1471_v4 = vpop.f32.mrb[39].mxu0 }
 0x14d   :  { %v1451_v57 = vadd.f32 %v1450_v19, %v1161_v56  ;;  %v1163_v58 = vpop.f32.mrb[29].mxu1 }
 0x14e   :  { %v1164_v60 = vpop.f32.mrb[30].mxu1 }
 0x14f   :  { %1664 = vst.msk [vmem:[%s3504_s2 + $0x70] sm:$0xff] %vm1649_vm1, %v1451_v57  ;;  %v1742_v62 = vsel %vm1649_vm1, %v1451_v57, 0.0  ;;  %v1866_v63 = vmul.f32 %v1451_v57, %v1451_v57  ;;  %v1454_v0 = vadd.f32 %v1453_v26, %v1164_v60  ;;  %v1166_v1 = vpop.f32.mrb[31].mxu1 }
 0x150   :  { %v1743_v3 = vadd.f32 %v1742_v62, %v1741_v53 }
 0x151   :  { %v1943_v5 = vsel %vm1649_vm1, %v1866_v63, 0.0  ;;  %1665 = vst.msk [vmem:[%s3504_s2 + $0x78] sm:$0xff] %vm1649_vm1, %v1454_v0  ;;  %v1744_v6 = vsel %vm1649_vm1, %v1454_v0, 0.0  ;;  %v1867_v7 = vmul.f32 %v1454_v0, %v1454_v0  ;;  %v1474_v15 = vpop.f32.mrb[40].mxu0 }
 0x152   :  { %v1944_v8 = vadd.f32 %v1943_v5, %v1942_v55  ;;  %v1745_v9 = vadd.f32 %v1744_v6, %v1743_v3  ;;  %v1476_v17 = vpop.f32.mrb[41].mxu0 }
 0x153   :  { %v1945_v10 = vsel %vm1649_vm1, %v1867_v7, 0.0  ;;  %v1477_v22 = vpop.f32.mrb[42].mxu0 }
 0x154   :  { %v1946_v11 = vadd.f32 %v1945_v10, %v1944_v8  ;;  %v1169_v12 = vpop.f32.mrb[32].mxu1  ;;  %v1479_v24 = vpop.f32.mrb[43].mxu0 }
 0x155   :  { %v1459_v13 = vadd.f32 %v1458_v39, %v1169_v12  ;;  %v1171_v14 = vpop.f32.mrb[33].mxu1 }
 0x156   :  { %v1172_v16 = vpop.f32.mrb[34].mxu1 }
 0x157   :  { %1666 = vst.msk [vmem:[%s3504_s2 + $0x80] sm:$0xff] %vm1649_vm1, %v1459_v13  ;;  %v1746_v18 = vsel %vm1649_vm1, %v1459_v13, 0.0  ;;  %v1868_v19 = vmul.f32 %v1459_v13, %v1459_v13  ;;  %v1462_v20 = vadd.f32 %v1461_v46, %v1172_v16  ;;  %v1174_v21 = vpop.f32.mrb[35].mxu1 }
 0x158   :  { %v1747_v23 = vadd.f32 %v1746_v18, %v1745_v9 }
 0x159   :  { %v1947_v25 = vsel %vm1649_vm1, %v1868_v19, 0.0  ;;  %1667 = vst.msk [vmem:[%s3504_s2 + $0x88] sm:$0xff] %vm1649_vm1, %v1462_v20  ;;  %v1748_v26 = vsel %vm1649_vm1, %v1462_v20, 0.0  ;;  %v1869_v27 = vmul.f32 %v1462_v20, %v1462_v20  ;;  %v1482_v35 = vpop.f32.mrb[44].mxu0 }
 0x15a   :  { %v1948_v28 = vadd.f32 %v1947_v25, %v1946_v11  ;;  %v1749_v29 = vadd.f32 %v1748_v26, %v1747_v23  ;;  %v1484_v37 = vpop.f32.mrb[45].mxu0 }
 0x15b   :  { %v1949_v30 = vsel %vm1649_vm1, %v1869_v27, 0.0  ;;  %v1485_v42 = vpop.f32.mrb[46].mxu0 }
 0x15c   :  { %v1950_v31 = vadd.f32 %v1949_v30, %v1948_v28  ;;  %v1177_v32 = vpop.f32.mrb[36].mxu1  ;;  %v1487_v44 = vpop.f32.mrb[47].mxu0 }
 0x15d   :  { %v1467_v33 = vadd.f32 %v1466_v59, %v1177_v32  ;;  %v1179_v34 = vpop.f32.mrb[37].mxu1 }
 0x15e   :  { %v1180_v36 = vpop.f32.mrb[38].mxu1 }
 0x15f   :  { %1668 = vst.msk [vmem:[%s3504_s2 + $0x90] sm:$0xff] %vm1649_vm1, %v1467_v33  ;;  %v1750_v38 = vsel %vm1649_vm1, %v1467_v33, 0.0  ;;  %v1870_v39 = vmul.f32 %v1467_v33, %v1467_v33  ;;  %v1470_v40 = vadd.f32 %v1469_v2, %v1180_v36  ;;  %v1182_v41 = vpop.f32.mrb[39].mxu1 }
 0x160   :  { %v1751_v43 = vadd.f32 %v1750_v38, %v1749_v29 }
 0x161   :  { %v1951_v45 = vsel %vm1649_vm1, %v1870_v39, 0.0  ;;  %1669 = vst.msk [vmem:[%s3504_s2 + $0x98] sm:$0xff] %vm1649_vm1, %v1470_v40  ;;  %v1752_v46 = vsel %vm1649_vm1, %v1470_v40, 0.0  ;;  %v1871_v47 = vmul.f32 %v1470_v40, %v1470_v40  ;;  %v1490_v55 = vpop.f32.mrb[48].mxu0 }
 0x162   :  { %v1952_v48 = vadd.f32 %v1951_v45, %v1950_v31  ;;  %v1753_v49 = vadd.f32 %v1752_v46, %v1751_v43  ;;  %v1492_v57 = vpop.f32.mrb[49].mxu0 }
 0x163   :  { %v1953_v50 = vsel %vm1649_vm1, %v1871_v47, 0.0  ;;  %v1493_v62 = vpop.f32.mrb[50].mxu0 }
 0x164   :  { %v1954_v51 = vadd.f32 %v1953_v50, %v1952_v48  ;;  %v1185_v52 = vpop.f32.mrb[40].mxu1  ;;  %v1495_v0 = vpop.f32.mrb[51].mxu0 }
 0x165   :  { %v1475_v53 = vadd.f32 %v1474_v15, %v1185_v52  ;;  %v1187_v54 = vpop.f32.mrb[41].mxu1 }
 0x166   :  { %v1188_v56 = vpop.f32.mrb[42].mxu1 }
 0x167   :  { %1670 = vst.msk [vmem:[%s3504_s2 + $0xa0] sm:$0xff] %vm1649_vm1, %v1475_v53  ;;  %v1754_v58 = vsel %vm1649_vm1, %v1475_v53, 0.0  ;;  %v1872_v59 = vmul.f32 %v1475_v53, %v1475_v53  ;;  %v1478_v60 = vadd.f32 %v1477_v22, %v1188_v56  ;;  %v1190_v61 = vpop.f32.mrb[43].mxu1 }
 0x168   :  { %v1755_v63 = vadd.f32 %v1754_v58, %v1753_v49 }
 0x169   :  { %v1955_v1 = vsel %vm1649_vm1, %v1872_v59, 0.0  ;;  %1671 = vst.msk [vmem:[%s3504_s2 + $0xa8] sm:$0xff] %vm1649_vm1, %v1478_v60  ;;  %v1756_v2 = vsel %vm1649_vm1, %v1478_v60, 0.0  ;;  %v1873_v3 = vmul.f32 %v1478_v60, %v1478_v60  ;;  %v1498_v11 = vpop.f32.mrb[52].mxu0 }
 0x16a   :  { %v1956_v4 = vadd.f32 %v1955_v1, %v1954_v51  ;;  %v1757_v5 = vadd.f32 %v1756_v2, %v1755_v63  ;;  %v1500_v13 = vpop.f32.mrb[53].mxu0 }
 0x16b   :  { %v1957_v6 = vsel %vm1649_vm1, %v1873_v3, 0.0  ;;  %v1501_v18 = vpop.f32.mrb[54].mxu0 }
 0x16c   :  { %v1958_v7 = vadd.f32 %v1957_v6, %v1956_v4  ;;  %v1193_v8 = vpop.f32.mrb[44].mxu1  ;;  %v1503_v20 = vpop.f32.mrb[55].mxu0 }
 0x16d   :  { %v1483_v9 = vadd.f32 %v1482_v35, %v1193_v8  ;;  %v1195_v10 = vpop.f32.mrb[45].mxu1 }
 0x16e   :  { %v1196_v12 = vpop.f32.mrb[46].mxu1 }
 0x16f   :  { %1672 = vst.msk [vmem:[%s3504_s2 + $0xb0] sm:$0xff] %vm1649_vm1, %v1483_v9  ;;  %v1758_v14 = vsel %vm1649_vm1, %v1483_v9, 0.0  ;;  %v1874_v15 = vmul.f32 %v1483_v9, %v1483_v9  ;;  %v1486_v16 = vadd.f32 %v1485_v42, %v1196_v12  ;;  %v1198_v17 = vpop.f32.mrb[47].mxu1 }
 0x170   :  { %v1759_v19 = vadd.f32 %v1758_v14, %v1757_v5 }
 0x171   :  { %v1959_v21 = vsel %vm1649_vm1, %v1874_v15, 0.0  ;;  %1673 = vst.msk [vmem:[%s3504_s2 + $0xb8] sm:$0xff] %vm1649_vm1, %v1486_v16  ;;  %v1760_v22 = vsel %vm1649_vm1, %v1486_v16, 0.0  ;;  %v1875_v23 = vmul.f32 %v1486_v16, %v1486_v16  ;;  %v1506_v31 = vpop.f32.mrb[56].mxu0 }
 0x172   :  { %v1960_v24 = vadd.f32 %v1959_v21, %v1958_v7  ;;  %v1761_v25 = vadd.f32 %v1760_v22, %v1759_v19  ;;  %v1508_v33 = vpop.f32.mrb[57].mxu0 }
 0x173   :  { %v1961_v26 = vsel %vm1649_vm1, %v1875_v23, 0.0  ;;  %v1509_v38 = vpop.f32.mrb[58].mxu0 }
 0x174   :  { %v1962_v27 = vadd.f32 %v1961_v26, %v1960_v24  ;;  %v1201_v28 = vpop.f32.mrb[48].mxu1  ;;  %v1511_v40 = vpop.f32.mrb[59].mxu0 }
 0x175   :  { %v1491_v29 = vadd.f32 %v1490_v55, %v1201_v28  ;;  %v1203_v30 = vpop.f32.mrb[49].mxu1 }
 0x176   :  { %v1204_v32 = vpop.f32.mrb[50].mxu1 }
 0x177   :  { %1674 = vst.msk [vmem:[%s3504_s2 + $0xc0] sm:$0xff] %vm1649_vm1, %v1491_v29  ;;  %v1762_v34 = vsel %vm1649_vm1, %v1491_v29, 0.0  ;;  %v1876_v35 = vmul.f32 %v1491_v29, %v1491_v29  ;;  %v1494_v36 = vadd.f32 %v1493_v62, %v1204_v32  ;;  %v1206_v37 = vpop.f32.mrb[51].mxu1 }
 0x178   :  { %v1763_v39 = vadd.f32 %v1762_v34, %v1761_v25 }
 0x179   :  { %v1963_v41 = vsel %vm1649_vm1, %v1876_v35, 0.0  ;;  %1675 = vst.msk [vmem:[%s3504_s2 + $0xc8] sm:$0xff] %vm1649_vm1, %v1494_v36  ;;  %v1764_v42 = vsel %vm1649_vm1, %v1494_v36, 0.0  ;;  %v1877_v43 = vmul.f32 %v1494_v36, %v1494_v36  ;;  %v1514_v51 = vpop.f32.mrb[60].mxu0 }
 0x17a   :  { %v1964_v44 = vadd.f32 %v1963_v41, %v1962_v27  ;;  %v1765_v45 = vadd.f32 %v1764_v42, %v1763_v39  ;;  %v1516_v53 = vpop.f32.mrb[61].mxu0 }
 0x17b   :  { %v1965_v46 = vsel %vm1649_vm1, %v1877_v43, 0.0  ;;  %v1517_v58 = vpop.f32.mrb[62].mxu0  ;;  %v2531_v43 = vmov 0.0  }
 0x17c   :  { %v1966_v47 = vadd.f32 %v1965_v46, %v1964_v44  ;;  %v1209_v48 = vpop.f32.mrb[52].mxu1  ;;  %v1519_v60 = vpop.f32.mrb[63].mxu0  ;;  %20 = vst.msk [vmem:[%s3505_s3] sm:$0x1] %vm19_vm2, %v2531_v43  ;;  %21 = vst.msk [vmem:[%s3506_s4] sm:$0x1] %vm19_vm2, %v2531_v43 }
 0x17d   :  { %v1499_v49 = vadd.f32 %v1498_v11, %v1209_v48  ;;  %v1211_v50 = vpop.f32.mrb[53].mxu1 }
 0x17e   :  { %v1212_v52 = vpop.f32.mrb[54].mxu1 }
 0x17f   :  { %1676 = vst.msk [vmem:[%s3504_s2 + $0xd0] sm:$0xff] %vm1649_vm1, %v1499_v49  ;;  %v1766_v54 = vsel %vm1649_vm1, %v1499_v49, 0.0  ;;  %v1878_v55 = vmul.f32 %v1499_v49, %v1499_v49  ;;  %v1502_v56 = vadd.f32 %v1501_v18, %v1212_v52  ;;  %v1214_v57 = vpop.f32.mrb[55].mxu1 }
 0x180   :  { %v1767_v59 = vadd.f32 %v1766_v54, %v1765_v45 }
 0x181   :  { %v1967_v61 = vsel %vm1649_vm1, %v1878_v55, 0.0  ;;  %1677 = vst.msk [vmem:[%s3504_s2 + $0xd8] sm:$0xff] %vm1649_vm1, %v1502_v56  ;;  %v1768_v62 = vsel %vm1649_vm1, %v1502_v56, 0.0  ;;  %v1879_v63 = vmul.f32 %v1502_v56, %v1502_v56  ;;  %v1522_v7 = vpop.f32.mrb[64].mxu0 }
 0x182   :  { %v1968_v0 = vadd.f32 %v1967_v61, %v1966_v47  ;;  %v1769_v1 = vadd.f32 %v1768_v62, %v1767_v59  ;;  %v1524_v9 = vpop.f32.mrb[65].mxu0 }
 0x183   :  { %v1969_v2 = vsel %vm1649_vm1, %v1879_v63, 0.0  ;;  %v1525_v14 = vpop.f32.mrb[66].mxu0 }
 0x184   :  { %v1970_v3 = vadd.f32 %v1969_v2, %v1968_v0  ;;  %v1217_v4 = vpop.f32.mrb[56].mxu1  ;;  %v1527_v16 = vpop.f32.mrb[67].mxu0 }
 0x185   :  { %v1507_v5 = vadd.f32 %v1506_v31, %v1217_v4  ;;  %v1219_v6 = vpop.f32.mrb[57].mxu1 }
 0x186   :  { %v1220_v8 = vpop.f32.mrb[58].mxu1 }
 0x187   :  { %1678 = vst.msk [vmem:[%s3504_s2 + $0xe0] sm:$0xff] %vm1649_vm1, %v1507_v5  ;;  %v1770_v10 = vsel %vm1649_vm1, %v1507_v5, 0.0  ;;  %v1880_v11 = vmul.f32 %v1507_v5, %v1507_v5  ;;  %v1510_v12 = vadd.f32 %v1509_v38, %v1220_v8  ;;  %v1222_v13 = vpop.f32.mrb[59].mxu1 }
 0x188   :  { %v1771_v15 = vadd.f32 %v1770_v10, %v1769_v1 }
 0x189   :  { %v1971_v17 = vsel %vm1649_vm1, %v1880_v11, 0.0  ;;  %1679 = vst.msk [vmem:[%s3504_s2 + $0xe8] sm:$0xff] %vm1649_vm1, %v1510_v12  ;;  %v1772_v18 = vsel %vm1649_vm1, %v1510_v12, 0.0  ;;  %v1881_v19 = vmul.f32 %v1510_v12, %v1510_v12  ;;  %v1530_v27 = vpop.f32.mrb[68].mxu0 }
 0x18a   :  { %v1972_v20 = vadd.f32 %v1971_v17, %v1970_v3  ;;  %v1773_v21 = vadd.f32 %v1772_v18, %v1771_v15  ;;  %v1532_v29 = vpop.f32.mrb[69].mxu0 }
 0x18b   :  { %v1973_v22 = vsel %vm1649_vm1, %v1881_v19, 0.0  ;;  %v1533_v34 = vpop.f32.mrb[70].mxu0 }
 0x18c   :  { %v1974_v23 = vadd.f32 %v1973_v22, %v1972_v20  ;;  %v1225_v24 = vpop.f32.mrb[60].mxu1  ;;  %v1535_v36 = vpop.f32.mrb[71].mxu0 }
 0x18d   :  { %v1515_v25 = vadd.f32 %v1514_v51, %v1225_v24  ;;  %v1227_v26 = vpop.f32.mrb[61].mxu1 }
 0x18e   :  { %v1228_v28 = vpop.f32.mrb[62].mxu1 }
 0x18f   :  { %1680 = vst.msk [vmem:[%s3504_s2 + $0xf0] sm:$0xff] %vm1649_vm1, %v1515_v25  ;;  %v1774_v30 = vsel %vm1649_vm1, %v1515_v25, 0.0  ;;  %v1882_v31 = vmul.f32 %v1515_v25, %v1515_v25  ;;  %v1518_v32 = vadd.f32 %v1517_v58, %v1228_v28  ;;  %v1230_v33 = vpop.f32.mrb[63].mxu1 }
 0x190   :  { %v1775_v35 = vadd.f32 %v1774_v30, %v1773_v21 }
 0x191   :  { %v1975_v37 = vsel %vm1649_vm1, %v1882_v31, 0.0  ;;  %1681 = vst.msk [vmem:[%s3504_s2 + $0xf8] sm:$0xff] %vm1649_vm1, %v1518_v32  ;;  %v1776_v38 = vsel %vm1649_vm1, %v1518_v32, 0.0  ;;  %v1883_v39 = vmul.f32 %v1518_v32, %v1518_v32  ;;  %v1538_v48 = vpop.f32.mrb[72].mxu0 }
 0x192   :  { %v1976_v40 = vadd.f32 %v1975_v37, %v1974_v23  ;;  %v1777_v41 = vadd.f32 %v1776_v38, %v1775_v35  ;;  %v1540_v50 = vpop.f32.mrb[73].mxu0 }
 0x193   :  { %v1977_v42 = vsel %vm1649_vm1, %v1883_v39, 0.0  ;;  %v1541_v55 = vpop.f32.mrb[74].mxu0 }
 0x194   :  { %v1978_v44 = vadd.f32 %v1977_v42, %v1976_v40  ;;  %v1233_v45 = vpop.f32.mrb[64].mxu1  ;;  %v1543_v57 = vpop.f32.mrb[75].mxu0 }
 0x195   :  { %v1523_v46 = vadd.f32 %v1522_v7, %v1233_v45  ;;  %v1235_v47 = vpop.f32.mrb[65].mxu1 }
 0x196   :  { %v1236_v49 = vpop.f32.mrb[66].mxu1 }
 0x197   :  { %1682 = vst.msk [vmem:[%s3504_s2 + $0x100] sm:$0xff] %vm1649_vm1, %v1523_v46  ;;  %v1778_v51 = vsel %vm1649_vm1, %v1523_v46, 0.0  ;;  %v1884_v52 = vmul.f32 %v1523_v46, %v1523_v46  ;;  %v1526_v53 = vadd.f32 %v1525_v14, %v1236_v49  ;;  %v1238_v54 = vpop.f32.mrb[67].mxu1 }
 0x198   :  { %v1779_v56 = vadd.f32 %v1778_v51, %v1777_v41 }
 0x199   :  { %v1979_v58 = vsel %vm1649_vm1, %v1884_v52, 0.0  ;;  %1683 = vst.msk [vmem:[%s3504_s2 + $0x108] sm:$0xff] %vm1649_vm1, %v1526_v53  ;;  %v1780_v59 = vsel %vm1649_vm1, %v1526_v53, 0.0  ;;  %v1885_v60 = vmul.f32 %v1526_v53, %v1526_v53  ;;  %v1546_v4 = vpop.f32.mrb[76].mxu0 }
 0x19a   :  { %v1980_v61 = vadd.f32 %v1979_v58, %v1978_v44  ;;  %v1781_v62 = vadd.f32 %v1780_v59, %v1779_v56  ;;  %v1548_v6 = vpop.f32.mrb[77].mxu0 }
 0x19b   :  { %v1981_v63 = vsel %vm1649_vm1, %v1885_v60, 0.0  ;;  %v1549_v11 = vpop.f32.mrb[78].mxu0 }
 0x19c   :  { %v1982_v0 = vadd.f32 %v1981_v63, %v1980_v61  ;;  %v1241_v1 = vpop.f32.mrb[68].mxu1  ;;  %v1551_v13 = vpop.f32.mrb[79].mxu0 }
 0x19d   :  { %v1531_v2 = vadd.f32 %v1530_v27, %v1241_v1  ;;  %v1243_v3 = vpop.f32.mrb[69].mxu1 }
 0x19e   :  { %v1244_v5 = vpop.f32.mrb[70].mxu1 }
 0x19f   :  { %1684 = vst.msk [vmem:[%s3504_s2 + $0x110] sm:$0xff] %vm1649_vm1, %v1531_v2  ;;  %v1782_v7 = vsel %vm1649_vm1, %v1531_v2, 0.0  ;;  %v1886_v8 = vmul.f32 %v1531_v2, %v1531_v2  ;;  %v1534_v9 = vadd.f32 %v1533_v34, %v1244_v5  ;;  %v1246_v10 = vpop.f32.mrb[71].mxu1 }
 0x1a0   :  { %v1783_v12 = vadd.f32 %v1782_v7, %v1781_v62 }
 0x1a1   :  { %v1983_v14 = vsel %vm1649_vm1, %v1886_v8, 0.0  ;;  %1685 = vst.msk [vmem:[%s3504_s2 + $0x118] sm:$0xff] %vm1649_vm1, %v1534_v9  ;;  %v1784_v15 = vsel %vm1649_vm1, %v1534_v9, 0.0  ;;  %v1887_v16 = vmul.f32 %v1534_v9, %v1534_v9  ;;  %v1554_v24 = vpop.f32.mrb[80].mxu0 }
 0x1a2   :  { %v1984_v17 = vadd.f32 %v1983_v14, %v1982_v0  ;;  %v1785_v18 = vadd.f32 %v1784_v15, %v1783_v12  ;;  %v1556_v26 = vpop.f32.mrb[81].mxu0 }
 0x1a3   :  { %v1985_v19 = vsel %vm1649_vm1, %v1887_v16, 0.0  ;;  %v1557_v31 = vpop.f32.mrb[82].mxu0 }
 0x1a4   :  { %v1986_v20 = vadd.f32 %v1985_v19, %v1984_v17  ;;  %v1249_v21 = vpop.f32.mrb[72].mxu1  ;;  %v1559_v33 = vpop.f32.mrb[83].mxu0 }
 0x1a5   :  { %v1539_v22 = vadd.f32 %v1538_v48, %v1249_v21  ;;  %v1251_v23 = vpop.f32.mrb[73].mxu1 }
 0x1a6   :  { %v1252_v25 = vpop.f32.mrb[74].mxu1 }
 0x1a7   :  { %1686 = vst.msk [vmem:[%s3504_s2 + $0x120] sm:$0xff] %vm1649_vm1, %v1539_v22  ;;  %v1786_v27 = vsel %vm1649_vm1, %v1539_v22, 0.0  ;;  %v1888_v28 = vmul.f32 %v1539_v22, %v1539_v22  ;;  %v1542_v29 = vadd.f32 %v1541_v55, %v1252_v25  ;;  %v1254_v30 = vpop.f32.mrb[75].mxu1 }
 0x1a8   :  { %v1787_v32 = vadd.f32 %v1786_v27, %v1785_v18 }
 0x1a9   :  { %v1987_v34 = vsel %vm1649_vm1, %v1888_v28, 0.0  ;;  %1687 = vst.msk [vmem:[%s3504_s2 + $0x128] sm:$0xff] %vm1649_vm1, %v1542_v29  ;;  %v1788_v35 = vsel %vm1649_vm1, %v1542_v29, 0.0  ;;  %v1889_v36 = vmul.f32 %v1542_v29, %v1542_v29  ;;  %v1562_v44 = vpop.f32.mrb[84].mxu0 }
 0x1aa   :  { %v1988_v37 = vadd.f32 %v1987_v34, %v1986_v20  ;;  %v1789_v38 = vadd.f32 %v1788_v35, %v1787_v32  ;;  %v1564_v46 = vpop.f32.mrb[85].mxu0 }
 0x1ab   :  { %v1989_v39 = vsel %vm1649_vm1, %v1889_v36, 0.0  ;;  %v1565_v51 = vpop.f32.mrb[86].mxu0 }
 0x1ac   :  { %v1990_v40 = vadd.f32 %v1989_v39, %v1988_v37  ;;  %v1257_v41 = vpop.f32.mrb[76].mxu1  ;;  %v1567_v53 = vpop.f32.mrb[87].mxu0 }
 0x1ad   :  { %v1547_v42 = vadd.f32 %v1546_v4, %v1257_v41  ;;  %v1259_v43 = vpop.f32.mrb[77].mxu1 }
 0x1ae   :  { %v1260_v45 = vpop.f32.mrb[78].mxu1 }
 0x1af   :  { %1688 = vst.msk [vmem:[%s3504_s2 + $0x130] sm:$0xff] %vm1649_vm1, %v1547_v42  ;;  %v1790_v47 = vsel %vm1649_vm1, %v1547_v42, 0.0  ;;  %v1890_v48 = vmul.f32 %v1547_v42, %v1547_v42  ;;  %v1550_v49 = vadd.f32 %v1549_v11, %v1260_v45  ;;  %v1262_v50 = vpop.f32.mrb[79].mxu1 }
 0x1b0   :  { %v1791_v52 = vadd.f32 %v1790_v47, %v1789_v38 }
 0x1b1   :  { %v1991_v54 = vsel %vm1649_vm1, %v1890_v48, 0.0  ;;  %1689 = vst.msk [vmem:[%s3504_s2 + $0x138] sm:$0xff] %vm1649_vm1, %v1550_v49  ;;  %v1792_v55 = vsel %vm1649_vm1, %v1550_v49, 0.0  ;;  %v1891_v56 = vmul.f32 %v1550_v49, %v1550_v49  ;;  %v1570_v0 = vpop.f32.mrb[88].mxu0 }
 0x1b2   :  { %v1992_v57 = vadd.f32 %v1991_v54, %v1990_v40  ;;  %v1793_v58 = vadd.f32 %v1792_v55, %v1791_v52  ;;  %v1572_v2 = vpop.f32.mrb[89].mxu0 }
 0x1b3   :  { %v1993_v59 = vsel %vm1649_vm1, %v1891_v56, 0.0  ;;  %v1573_v7 = vpop.f32.mrb[90].mxu0 }
 0x1b4   :  { %v1994_v60 = vadd.f32 %v1993_v59, %v1992_v57  ;;  %v1265_v61 = vpop.f32.mrb[80].mxu1  ;;  %v1575_v9 = vpop.f32.mrb[91].mxu0 }
 0x1b5   :  { %v1555_v62 = vadd.f32 %v1554_v24, %v1265_v61  ;;  %v1267_v63 = vpop.f32.mrb[81].mxu1 }
 0x1b6   :  { %v1268_v1 = vpop.f32.mrb[82].mxu1 }
 0x1b7   :  { %1690 = vst.msk [vmem:[%s3504_s2 + $0x140] sm:$0xff] %vm1649_vm1, %v1555_v62  ;;  %v1794_v3 = vsel %vm1649_vm1, %v1555_v62, 0.0  ;;  %v1892_v4 = vmul.f32 %v1555_v62, %v1555_v62  ;;  %v1558_v5 = vadd.f32 %v1557_v31, %v1268_v1  ;;  %v1270_v6 = vpop.f32.mrb[83].mxu1 }
 0x1b8   :  { %v1795_v8 = vadd.f32 %v1794_v3, %v1793_v58 }
 0x1b9   :  { %v1995_v10 = vsel %vm1649_vm1, %v1892_v4, 0.0  ;;  %1691 = vst.msk [vmem:[%s3504_s2 + $0x148] sm:$0xff] %vm1649_vm1, %v1558_v5  ;;  %v1796_v11 = vsel %vm1649_vm1, %v1558_v5, 0.0  ;;  %v1893_v12 = vmul.f32 %v1558_v5, %v1558_v5  ;;  %v1578_v20 = vpop.f32.mrb[92].mxu0 }
 0x1ba   :  { %v1996_v13 = vadd.f32 %v1995_v10, %v1994_v60  ;;  %v1797_v14 = vadd.f32 %v1796_v11, %v1795_v8  ;;  %v1580_v22 = vpop.f32.mrb[93].mxu0 }
 0x1bb   :  { %v1997_v15 = vsel %vm1649_vm1, %v1893_v12, 0.0  ;;  %v1581_v27 = vpop.f32.mrb[94].mxu0 }
 0x1bc   :  { %v1998_v16 = vadd.f32 %v1997_v15, %v1996_v13  ;;  %v1273_v17 = vpop.f32.mrb[84].mxu1  ;;  %v1583_v29 = vpop.f32.mrb[95].mxu0 }
 0x1bd   :  { %v1563_v18 = vadd.f32 %v1562_v44, %v1273_v17  ;;  %v1275_v19 = vpop.f32.mrb[85].mxu1 }
 0x1be   :  { %v1276_v21 = vpop.f32.mrb[86].mxu1 }
 0x1bf   :  { %1692 = vst.msk [vmem:[%s3504_s2 + $0x150] sm:$0xff] %vm1649_vm1, %v1563_v18  ;;  %v1798_v23 = vsel %vm1649_vm1, %v1563_v18, 0.0  ;;  %v1894_v24 = vmul.f32 %v1563_v18, %v1563_v18  ;;  %v1566_v25 = vadd.f32 %v1565_v51, %v1276_v21  ;;  %v1278_v26 = vpop.f32.mrb[87].mxu1 }
 0x1c0   :  { %v1799_v28 = vadd.f32 %v1798_v23, %v1797_v14 }
 0x1c1   :  { %v1999_v30 = vsel %vm1649_vm1, %v1894_v24, 0.0  ;;  %1693 = vst.msk [vmem:[%s3504_s2 + $0x158] sm:$0xff] %vm1649_vm1, %v1566_v25  ;;  %v1800_v31 = vsel %vm1649_vm1, %v1566_v25, 0.0  ;;  %v1895_v32 = vmul.f32 %v1566_v25, %v1566_v25  ;;  %v1586_v40 = vpop.f32.mrb[96].mxu0 }
 0x1c2   :  { %v2000_v33 = vadd.f32 %v1999_v30, %v1998_v16  ;;  %v1801_v34 = vadd.f32 %v1800_v31, %v1799_v28  ;;  %v1588_v42 = vpop.f32.mrb[97].mxu0 }
 0x1c3   :  { %v2001_v35 = vsel %vm1649_vm1, %v1895_v32, 0.0  ;;  %v1589_v47 = vpop.f32.mrb[98].mxu0 }
 0x1c4   :  { %v2002_v36 = vadd.f32 %v2001_v35, %v2000_v33  ;;  %v1281_v37 = vpop.f32.mrb[88].mxu1  ;;  %v1591_v49 = vpop.f32.mrb[99].mxu0 }
 0x1c5   :  { %v1571_v38 = vadd.f32 %v1570_v0, %v1281_v37  ;;  %v1283_v39 = vpop.f32.mrb[89].mxu1 }
 0x1c6   :  { %v1284_v41 = vpop.f32.mrb[90].mxu1 }
 0x1c7   :  { %1694 = vst.msk [vmem:[%s3504_s2 + $0x160] sm:$0xff] %vm1649_vm1, %v1571_v38  ;;  %v1802_v43 = vsel %vm1649_vm1, %v1571_v38, 0.0  ;;  %v1896_v44 = vmul.f32 %v1571_v38, %v1571_v38  ;;  %v1574_v45 = vadd.f32 %v1573_v7, %v1284_v41  ;;  %v1286_v46 = vpop.f32.mrb[91].mxu1 }
 0x1c8   :  { %v1803_v48 = vadd.f32 %v1802_v43, %v1801_v34 }
 0x1c9   :  { %v2003_v50 = vsel %vm1649_vm1, %v1896_v44, 0.0  ;;  %1695 = vst.msk [vmem:[%s3504_s2 + $0x168] sm:$0xff] %vm1649_vm1, %v1574_v45  ;;  %v1804_v51 = vsel %vm1649_vm1, %v1574_v45, 0.0  ;;  %v1897_v52 = vmul.f32 %v1574_v45, %v1574_v45  ;;  %v1594_v60 = vpop.f32.mrb[100].mxu0 }
 0x1ca   :  { %v2004_v53 = vadd.f32 %v2003_v50, %v2002_v36  ;;  %v1805_v54 = vadd.f32 %v1804_v51, %v1803_v48  ;;  %v1596_v62 = vpop.f32.mrb[101].mxu0 }
 0x1cb   :  { %v2005_v55 = vsel %vm1649_vm1, %v1897_v52, 0.0  ;;  %v1597_v3 = vpop.f32.mrb[102].mxu0 }
 0x1cc   :  { %v2006_v56 = vadd.f32 %v2005_v55, %v2004_v53  ;;  %v1289_v57 = vpop.f32.mrb[92].mxu1  ;;  %v1599_v5 = vpop.f32.mrb[103].mxu0 }
 0x1cd   :  { %v1579_v58 = vadd.f32 %v1578_v20, %v1289_v57  ;;  %v1291_v59 = vpop.f32.mrb[93].mxu1 }
 0x1ce   :  { %v1292_v61 = vpop.f32.mrb[94].mxu1 }
 0x1cf   :  { %1696 = vst.msk [vmem:[%s3504_s2 + $0x170] sm:$0xff] %vm1649_vm1, %v1579_v58  ;;  %v1806_v63 = vsel %vm1649_vm1, %v1579_v58, 0.0  ;;  %v1898_v0 = vmul.f32 %v1579_v58, %v1579_v58  ;;  %v1582_v1 = vadd.f32 %v1581_v27, %v1292_v61  ;;  %v1294_v2 = vpop.f32.mrb[95].mxu1 }
 0x1d0   :  { %v1807_v4 = vadd.f32 %v1806_v63, %v1805_v54 }
 0x1d1   :  { %v2007_v6 = vsel %vm1649_vm1, %v1898_v0, 0.0  ;;  %1697 = vst.msk [vmem:[%s3504_s2 + $0x178] sm:$0xff] %vm1649_vm1, %v1582_v1  ;;  %v1808_v7 = vsel %vm1649_vm1, %v1582_v1, 0.0  ;;  %v1899_v8 = vmul.f32 %v1582_v1, %v1582_v1  ;;  %v1602_v16 = vpop.f32.mrb[104].mxu0 }
 0x1d2   :  { %v2008_v9 = vadd.f32 %v2007_v6, %v2006_v56  ;;  %v1809_v10 = vadd.f32 %v1808_v7, %v1807_v4  ;;  %v1604_v18 = vpop.f32.mrb[105].mxu0 }
 0x1d3   :  { %v2009_v11 = vsel %vm1649_vm1, %v1899_v8, 0.0  ;;  %v1605_v23 = vpop.f32.mrb[106].mxu0 }
 0x1d4   :  { %v2010_v12 = vadd.f32 %v2009_v11, %v2008_v9  ;;  %v1297_v13 = vpop.f32.mrb[96].mxu1  ;;  %v1607_v25 = vpop.f32.mrb[107].mxu0 }
 0x1d5   :  { %v1587_v14 = vadd.f32 %v1586_v40, %v1297_v13  ;;  %v1299_v15 = vpop.f32.mrb[97].mxu1 }
 0x1d6   :  { %v1300_v17 = vpop.f32.mrb[98].mxu1 }
 0x1d7   :  { %1698 = vst.msk [vmem:[%s3504_s2 + $0x180] sm:$0xff] %vm1649_vm1, %v1587_v14  ;;  %v1810_v19 = vsel %vm1649_vm1, %v1587_v14, 0.0  ;;  %v1900_v20 = vmul.f32 %v1587_v14, %v1587_v14  ;;  %v1590_v21 = vadd.f32 %v1589_v47, %v1300_v17  ;;  %v1302_v22 = vpop.f32.mrb[99].mxu1 }
 0x1d8   :  { %v1811_v24 = vadd.f32 %v1810_v19, %v1809_v10 }
 0x1d9   :  { %v2011_v26 = vsel %vm1649_vm1, %v1900_v20, 0.0  ;;  %1699 = vst.msk [vmem:[%s3504_s2 + $0x188] sm:$0xff] %vm1649_vm1, %v1590_v21  ;;  %v1812_v27 = vsel %vm1649_vm1, %v1590_v21, 0.0  ;;  %v1901_v28 = vmul.f32 %v1590_v21, %v1590_v21  ;;  %v1610_v36 = vpop.f32.mrb[108].mxu0 }
 0x1da   :  { %v2012_v29 = vadd.f32 %v2011_v26, %v2010_v12  ;;  %v1813_v30 = vadd.f32 %v1812_v27, %v1811_v24  ;;  %v1612_v38 = vpop.f32.mrb[109].mxu0 }
 0x1db   :  { %v2013_v31 = vsel %vm1649_vm1, %v1901_v28, 0.0  ;;  %v1613_v43 = vpop.f32.mrb[110].mxu0 }
 0x1dc   :  { %v2014_v32 = vadd.f32 %v2013_v31, %v2012_v29  ;;  %v1305_v33 = vpop.f32.mrb[100].mxu1  ;;  %v1615_v45 = vpop.f32.mrb[111].mxu0 }
 0x1dd   :  { %v1595_v34 = vadd.f32 %v1594_v60, %v1305_v33  ;;  %v1307_v35 = vpop.f32.mrb[101].mxu1 }
 0x1de   :  { %v1308_v37 = vpop.f32.mrb[102].mxu1 }
 0x1df   :  { %1700 = vst.msk [vmem:[%s3504_s2 + $0x190] sm:$0xff] %vm1649_vm1, %v1595_v34  ;;  %v1814_v39 = vsel %vm1649_vm1, %v1595_v34, 0.0  ;;  %v1902_v40 = vmul.f32 %v1595_v34, %v1595_v34  ;;  %v1598_v41 = vadd.f32 %v1597_v3, %v1308_v37  ;;  %v1310_v42 = vpop.f32.mrb[103].mxu1 }
 0x1e0   :  { %v1815_v44 = vadd.f32 %v1814_v39, %v1813_v30 }
 0x1e1   :  { %v2015_v46 = vsel %vm1649_vm1, %v1902_v40, 0.0  ;;  %1701 = vst.msk [vmem:[%s3504_s2 + $0x198] sm:$0xff] %vm1649_vm1, %v1598_v41  ;;  %v1816_v47 = vsel %vm1649_vm1, %v1598_v41, 0.0  ;;  %v1903_v48 = vmul.f32 %v1598_v41, %v1598_v41  ;;  %v1618_v56 = vpop.f32.mrb[112].mxu0 }
 0x1e2   :  { %v2016_v49 = vadd.f32 %v2015_v46, %v2014_v32  ;;  %v1817_v50 = vadd.f32 %v1816_v47, %v1815_v44  ;;  %v1620_v58 = vpop.f32.mrb[113].mxu0 }
 0x1e3   :  { %v2017_v51 = vsel %vm1649_vm1, %v1903_v48, 0.0  ;;  %v1621_v63 = vpop.f32.mrb[114].mxu0 }
 0x1e4   :  { %v2018_v52 = vadd.f32 %v2017_v51, %v2016_v49  ;;  %v1313_v53 = vpop.f32.mrb[104].mxu1  ;;  %v1623_v1 = vpop.f32.mrb[115].mxu0 }
 0x1e5   :  { %v1603_v54 = vadd.f32 %v1602_v16, %v1313_v53  ;;  %v1315_v55 = vpop.f32.mrb[105].mxu1 }
 0x1e6   :  { %v1316_v57 = vpop.f32.mrb[106].mxu1 }
 0x1e7   :  { %1702 = vst.msk [vmem:[%s3504_s2 + $0x1a0] sm:$0xff] %vm1649_vm1, %v1603_v54  ;;  %v1818_v59 = vsel %vm1649_vm1, %v1603_v54, 0.0  ;;  %v1904_v60 = vmul.f32 %v1603_v54, %v1603_v54  ;;  %v1606_v61 = vadd.f32 %v1605_v23, %v1316_v57  ;;  %v1318_v62 = vpop.f32.mrb[107].mxu1 }
 0x1e8   :  { %v1819_v0 = vadd.f32 %v1818_v59, %v1817_v50 }
 0x1e9   :  { %v2019_v2 = vsel %vm1649_vm1, %v1904_v60, 0.0  ;;  %1703 = vst.msk [vmem:[%s3504_s2 + $0x1a8] sm:$0xff] %vm1649_vm1, %v1606_v61  ;;  %v1820_v3 = vsel %vm1649_vm1, %v1606_v61, 0.0  ;;  %v1905_v4 = vmul.f32 %v1606_v61, %v1606_v61  ;;  %v1626_v12 = vpop.f32.mrb[116].mxu0 }
 0x1ea   :  { %v2020_v5 = vadd.f32 %v2019_v2, %v2018_v52  ;;  %v1821_v6 = vadd.f32 %v1820_v3, %v1819_v0  ;;  %v1628_v14 = vpop.f32.mrb[117].mxu0 }
 0x1eb   :  { %v2021_v7 = vsel %vm1649_vm1, %v1905_v4, 0.0  ;;  %v1629_v19 = vpop.f32.mrb[118].mxu0 }
 0x1ec   :  { %v2022_v8 = vadd.f32 %v2021_v7, %v2020_v5  ;;  %v1321_v9 = vpop.f32.mrb[108].mxu1  ;;  %v1631_v21 = vpop.f32.mrb[119].mxu0 }
 0x1ed   :  { %v1611_v10 = vadd.f32 %v1610_v36, %v1321_v9  ;;  %v1323_v11 = vpop.f32.mrb[109].mxu1 }
 0x1ee   :  { %v1324_v13 = vpop.f32.mrb[110].mxu1 }
 0x1ef   :  { %1704 = vst.msk [vmem:[%s3504_s2 + $0x1b0] sm:$0xff] %vm1649_vm1, %v1611_v10  ;;  %v1822_v15 = vsel %vm1649_vm1, %v1611_v10, 0.0  ;;  %v1906_v16 = vmul.f32 %v1611_v10, %v1611_v10  ;;  %v1614_v17 = vadd.f32 %v1613_v43, %v1324_v13  ;;  %v1326_v18 = vpop.f32.mrb[111].mxu1 }
 0x1f0   :  { %v1823_v20 = vadd.f32 %v1822_v15, %v1821_v6 }
 0x1f1   :  { %v2023_v22 = vsel %vm1649_vm1, %v1906_v16, 0.0  ;;  %1705 = vst.msk [vmem:[%s3504_s2 + $0x1b8] sm:$0xff] %vm1649_vm1, %v1614_v17  ;;  %v1824_v23 = vsel %vm1649_vm1, %v1614_v17, 0.0  ;;  %v1907_v24 = vmul.f32 %v1614_v17, %v1614_v17  ;;  %v1634_v32 = vpop.f32.mrb[120].mxu0 }
 0x1f2   :  { %v2024_v25 = vadd.f32 %v2023_v22, %v2022_v8  ;;  %v1825_v26 = vadd.f32 %v1824_v23, %v1823_v20  ;;  %v1636_v34 = vpop.f32.mrb[121].mxu0 }
 0x1f3   :  { %v2025_v27 = vsel %vm1649_vm1, %v1907_v24, 0.0  ;;  %v1637_v39 = vpop.f32.mrb[122].mxu0 }
 0x1f4   :  { %v2026_v28 = vadd.f32 %v2025_v27, %v2024_v25  ;;  %v1329_v29 = vpop.f32.mrb[112].mxu1  ;;  %v1639_v41 = vpop.f32.mrb[123].mxu0 }
 0x1f5   :  { %v1619_v30 = vadd.f32 %v1618_v56, %v1329_v29  ;;  %v1331_v31 = vpop.f32.mrb[113].mxu1 }
 0x1f6   :  { %v1332_v33 = vpop.f32.mrb[114].mxu1 }
 0x1f7   :  { %1706 = vst.msk [vmem:[%s3504_s2 + $0x1c0] sm:$0xff] %vm1649_vm1, %v1619_v30  ;;  %v1826_v35 = vsel %vm1649_vm1, %v1619_v30, 0.0  ;;  %v1908_v36 = vmul.f32 %v1619_v30, %v1619_v30  ;;  %v1622_v37 = vadd.f32 %v1621_v63, %v1332_v33  ;;  %v1334_v38 = vpop.f32.mrb[115].mxu1 }
 0x1f8   :  { %v1827_v40 = vadd.f32 %v1826_v35, %v1825_v26 }
 0x1f9   :  { %v2027_v42 = vsel %vm1649_vm1, %v1908_v36, 0.0  ;;  %1707 = vst.msk [vmem:[%s3504_s2 + $0x1c8] sm:$0xff] %vm1649_vm1, %v1622_v37  ;;  %v1828_v43 = vsel %vm1649_vm1, %v1622_v37, 0.0  ;;  %v1909_v44 = vmul.f32 %v1622_v37, %v1622_v37  ;;  %v1642_v52 = vpop.f32.mrb[124].mxu0 }
 0x1fa   :  { %v2028_v45 = vadd.f32 %v2027_v42, %v2026_v28  ;;  %v1829_v46 = vadd.f32 %v1828_v43, %v1827_v40  ;;  %v1644_v54 = vpop.f32.mrb[125].mxu0 }
 0x1fb   :  { %v2029_v47 = vsel %vm1649_vm1, %v1909_v44, 0.0  ;;  %v1645_v59 = vpop.f32.mrb[126].mxu0 }
 0x1fc   :  { %v2030_v48 = vadd.f32 %v2029_v47, %v2028_v45  ;;  %v1337_v49 = vpop.f32.mrb[116].mxu1  ;;  %v1647_v61 = vpop.f32.mrb[127].mxu0 }
 0x1fd   :  { %v1627_v50 = vadd.f32 %v1626_v12, %v1337_v49  ;;  %v1339_v51 = vpop.f32.mrb[117].mxu1  ;;  %v1851_v49 = vld [vmem:[%s3506_s4] sm:$0x1] }
 0x1fe   :  { %v1340_v53 = vpop.f32.mrb[118].mxu1 }
 0x1ff   :  { %1708 = vst.msk [vmem:[%s3504_s2 + $0x1d0] sm:$0xff] %vm1649_vm1, %v1627_v50  ;;  %v1830_v55 = vsel %vm1649_vm1, %v1627_v50, 0.0  ;;  %v1910_v56 = vmul.f32 %v1627_v50, %v1627_v50  ;;  %v1630_v57 = vadd.f32 %v1629_v19, %v1340_v53  ;;  %v1342_v58 = vpop.f32.mrb[119].mxu1 }
 0x200   :  { %v1831_v60 = vadd.f32 %v1830_v55, %v1829_v46  ;;  %v1714_v46 = vld [vmem:[%s3505_s3] sm:$0x1] }
 0x201   :  { %v2031_v62 = vsel %vm1649_vm1, %v1910_v56, 0.0  ;;  %1709 = vst.msk [vmem:[%s3504_s2 + $0x1d8] sm:$0xff] %vm1649_vm1, %v1630_v57  ;;  %v1832_v63 = vsel %vm1649_vm1, %v1630_v57, 0.0  ;;  %v1911_v0 = vmul.f32 %v1630_v57, %v1630_v57 }
 0x202   :  { %v2032_v1 = vadd.f32 %v2031_v62, %v2030_v48  ;;  %v1833_v2 = vadd.f32 %v1832_v63, %v1831_v60 }
 0x203   :  { %v2033_v3 = vsel %vm1649_vm1, %v1911_v0, 0.0 }
 0x204   :  { %v2034_v4 = vadd.f32 %v2033_v3, %v2032_v1  ;;  %v1345_v5 = vpop.f32.mrb[120].mxu1 }
 0x205   :  { %v1635_v6 = vadd.f32 %v1634_v32, %v1345_v5  ;;  %v1347_v7 = vpop.f32.mrb[121].mxu1 }
 0x206   :  { %v1348_v8 = vpop.f32.mrb[122].mxu1 }
 0x207   :  { %1710 = vst.msk [vmem:[%s3504_s2 + $0x1e0] sm:$0xff] %vm1649_vm1, %v1635_v6  ;;  %v1834_v9 = vsel %vm1649_vm1, %v1635_v6, 0.0  ;;  %v1912_v10 = vmul.f32 %v1635_v6, %v1635_v6  ;;  %v1638_v11 = vadd.f32 %v1637_v39, %v1348_v8  ;;  %v1350_v12 = vpop.f32.mrb[123].mxu1 }
 0x208   :  { %v1835_v13 = vadd.f32 %v1834_v9, %v1833_v2 }
 0x209   :  { %v2035_v14 = vsel %vm1649_vm1, %v1912_v10, 0.0  ;;  %1711 = vst.msk [vmem:[%s3504_s2 + $0x1e8] sm:$0xff] %vm1649_vm1, %v1638_v11  ;;  %v1836_v15 = vsel %vm1649_vm1, %v1638_v11, 0.0  ;;  %v1913_v16 = vmul.f32 %v1638_v11, %v1638_v11 }
 0x20a   :  { %v2036_v17 = vadd.f32 %v2035_v14, %v2034_v4  ;;  %v1837_v18 = vadd.f32 %v1836_v15, %v1835_v13 }
 0x20b   :  { %v2037_v19 = vsel %vm1649_vm1, %v1913_v16, 0.0 }
 0x20c   :  { %v2038_v20 = vadd.f32 %v2037_v19, %v2036_v17  ;;  %v1353_v21 = vpop.f32.mrb[124].mxu1 }
 0x20d   :  { %v1643_v22 = vadd.f32 %v1642_v52, %v1353_v21  ;;  %v1355_v23 = vpop.f32.mrb[125].mxu1 }
 0x20e   :  { %v1356_v24 = vpop.f32.mrb[126].mxu1 }
 0x20f   :  { %1712 = vst.msk [vmem:[%s3504_s2 + $0x1f0] sm:$0xff] %vm1649_vm1, %v1643_v22  ;;  %v1838_v25 = vsel %vm1649_vm1, %v1643_v22, 0.0  ;;  %v1914_v26 = vmul.f32 %v1643_v22, %v1643_v22  ;;  %v1646_v27 = vadd.f32 %v1645_v59, %v1356_v24  ;;  %v1358_v28 = vpop.f32.mrb[127].mxu1 }
 0x210   :  { %v1839_v29 = vadd.f32 %v1838_v25, %v1837_v18 }
 0x211   :  { %v2039_v30 = vsel %vm1649_vm1, %v1914_v26, 0.0  ;;  %1713 = vst.msk [vmem:[%s3504_s2 + $0x1f8] sm:$0xff] %vm1649_vm1, %v1646_v27  ;;  %v1840_v31 = vsel %vm1649_vm1, %v1646_v27, 0.0  ;;  %v1915_v32 = vmul.f32 %v1646_v27, %v1646_v27 }
 0x212   :  { %v2040_v33 = vadd.f32 %v2039_v30, %v2038_v20  ;;  %v1841_v34 = vadd.f32 %v1840_v31, %v1839_v29 }
 0x213   :  { %v2041_v35 = vsel %vm1649_vm1, %v1915_v32, 0.0 }
 0x214   :  { %v1842_v36 = vrot.slane %v1841_v34, 4  ;;  %v2042_v37 = vadd.f32 %v2041_v35, %v2040_v33 }
 0x216   :  { %v1843_v38 = vadd.f32 %v1842_v36, %v1841_v34  ;;  %v2043_v39 = vrot.slane %v2042_v37, 4 }
 0x218   :  { %v1844_v40 = vrot.slane %v1843_v38, 2  ;;  %v2044_v41 = vadd.f32 %v2043_v39, %v2042_v37 }
 0x21a   :  { %v1845_v42 = vadd.f32 %v1844_v40, %v1843_v38  ;;  %v2045_v43 = vrot.slane %v2044_v41, 2 }
 0x21c   :  { %v1846_v44 = vrot.slane %v1845_v42, 1  ;;  %v2046_v45 = vadd.f32 %v2045_v43, %v2044_v41 }
 0x21e   :  { %v1847_v47 = vadd.f32 %v1846_v44, %v1845_v42  ;;  %v2047_v48 = vrot.slane %v2046_v45, 1 }
 0x220   :  { %v1848_v50 = vadd.f32 %v1847_v47, %v1714_v46  ;;  %v2048_v51 = vadd.f32 %v2047_v48, %v2046_v45 }
 0x222   :  { %1850 = vst.msk [vmem:[%s3505_s3] sm:$0x1] %vm19_vm2, %v1848_v50  ;;  %v2049_v52 = vadd.f32 %v2048_v51, %v1851_v49 }
 0x224   :  { %2050 = vst.msk [vmem:[%s3506_s4] sm:$0x1] %vm19_vm2, %v2049_v52 }

// kernel: hourglass_forward.14
= control target key start
LH: loop header
LB: loop body
LE: loop exit
PB: predicated region body
PF: predicated region fallthrough
CT: control target
= control target key end

     0   :  { %v4521_v0 = vmov 0   ;;  %vm1830_vm0 = vcmask 785408   ;;  %vm3083_vm1 = vcmask 261120   ;;  %vm19_vm2 = vcmask 253952   ;;  %s6318_s1 = inlined_call_operand.vmem [shape: bf16[864,32], index: 1, kind: input, shape index: {}]   ;;  %s6319_s0 = inlined_call_operand.vmem [shape: bf16[512,864], index: 0, kind: input, shape index: {}]   ;;  %s6320_s2 = inlined_call_operand.vmem [shape: f32[512,32], index: 2, kind: output, shape index: {0}]   ;;  %s6321_s3 = inlined_call_operand.vmem [shape: f32[1,32], index: 3, kind: output, shape index: {1}]   ;;  %s6322_s4 = inlined_call_operand.vmem [shape: f32[1,32], index: 4, kind: output, shape index: {2}]  }
   0x1   :  { %1927 = vmatprep.subr.bf16.mxu1 %v4521_v0  ;;  %2216 = vmatprep.subr.bf16.mxu0 %v4521_v0  ;;  %v4147_v1 = vld [vmem:[%s6318_s1] sm:$0xff]   ;;  %v4149_v3 = vld [vmem:[%s6318_s1 + $0x8] sm:$0xff]   ;;  %v4151_v5 = vld [vmem:[%s6318_s1 + $0x10] sm:$0xff]  }
   0x2   :  { %v4556_v2 = vld [vmem:[%s6318_s1 + $0x80] sm:$0xff]   ;;  %1928 = vmatpush1.bf16.msra.mxu1 %v4147_v1  ;;  %v4566_v4 = vld [vmem:[%s6318_s1 + $0x88] sm:$0xff]   ;;  %v4577_v6 = vld [vmem:[%s6318_s1 + $0x90] sm:$0xff]  }
   0x3   :  { %2217 = vmatpush1.bf16.msra.mxu0 %v4556_v2  ;;  %1929 = vmatprep.subr.bf16.mxu1 %v4521_v0  ;;  %v4153_v7 = vld [vmem:[%s6318_s1 + $0x18] sm:$0xff]   ;;  %v4155_v9 = vld [vmem:[%s6318_s1 + $0x20] sm:$0xff]   ;;  %v4157_v11 = vld [vmem:[%s6318_s1 + $0x28] sm:$0xff]  }
   0x4   :  { %2218 = vmatprep.subr.bf16.mxu0 %v4521_v0  ;;  %v4588_v8 = vld [vmem:[%s6318_s1 + $0x98] sm:$0xff]   ;;  %v4599_v10 = vld [vmem:[%s6318_s1 + $0xa0] sm:$0xff]   ;;  %v4610_v12 = vld [vmem:[%s6318_s1 + $0xa8] sm:$0xff]  }
   0x5   :  { %v4159_v13 = vld [vmem:[%s6318_s1 + $0x30] sm:$0xff]   ;;  %v4161_v15 = vld [vmem:[%s6318_s1 + $0x38] sm:$0xff]   ;;  %v4163_v17 = vld [vmem:[%s6318_s1 + $0x40] sm:$0xff]  }
   0x6   :  { %1930 = vmatpush1.bf16.msra.mxu1 %v4149_v3  ;;  %v4621_v14 = vld [vmem:[%s6318_s1 + $0xb0] sm:$0xff]   ;;  %v4632_v16 = vld [vmem:[%s6318_s1 + $0xb8] sm:$0xff]   ;;  %v4643_v18 = vld [vmem:[%s6318_s1 + $0xc0] sm:$0xff]  }
   0x7   :  { %2219 = vmatpush1.bf16.msra.mxu0 %v4566_v4  ;;  %1931 = vmatprep.subr.bf16.mxu1 %v4521_v0  ;;  %v4181_v19 = vld [vmem:[%s6319_s0 + $0x4] ss:$28 sps:$4 sm:$0xff]   ;;  %v4165_v20 = vld [vmem:[%s6318_s1 + $0x48] sm:$0xff]   ;;  %v4167_v23 = vld [vmem:[%s6318_s1 + $0x50] sm:$0xff]  }
   0x8   :  { %2220 = vmatprep.subr.bf16.mxu0 %v4521_v0  ;;  %v4184_v21 = vld [vmem:[%s6319_s0 + $0xc] ss:$28 sps:$4 sm:$0xff]   ;;  %1959 = vmatprep.mubr.bf16.mxu1 %v4181_v19  ;;  %v4671_v24 = vld [vmem:[%s6318_s1 + $0xd0] sm:$0xff]   ;;  %v4169_v25 = vld [vmem:[%s6318_s1 + $0x58] sm:$0xff]  }
   0x9   :  { %v4660_v22 = vld [vmem:[%s6318_s1 + $0xc8] sm:$0xff]   ;;  %2248 = vmatprep.mubr.bf16.mxu0 %v4184_v21  ;;  %v4682_v26 = vld [vmem:[%s6318_s1 + $0xd8] sm:$0xff]   ;;  %v4171_v27 = vld [vmem:[%s6318_s1 + $0x60] sm:$0xff]  }
   0xa   :  { %1932 = vmatpush1.bf16.msra.mxu1 %v4151_v5  ;;  %v4693_v28 = vld [vmem:[%s6318_s1 + $0xe0] sm:$0xff]   ;;  %v4173_v29 = vld [vmem:[%s6318_s1 + $0x68] sm:$0xff]   ;;  %v4175_v31 = vld [vmem:[%s6318_s1 + $0x70] sm:$0xff]  }
   0xb   :  { %2221 = vmatpush1.bf16.msra.mxu0 %v4577_v6  ;;  %1933 = vmatprep.subr.bf16.mxu1 %v4521_v0  ;;  %v4704_v30 = vld [vmem:[%s6318_s1 + $0xe8] sm:$0xff]   ;;  %v4715_v32 = vld [vmem:[%s6318_s1 + $0xf0] sm:$0xff]   ;;  %v4177_v33 = vld [vmem:[%s6318_s1 + $0x78] sm:$0xff]  }
   0xc   :  { %2222 = vmatprep.subr.bf16.mxu0 %v4521_v0  ;;  %v4726_v34 = vld [vmem:[%s6318_s1 + $0xf8] sm:$0xff]   ;;  %v4182_v36 = vld [vmem:[%s6319_s0 + $0x8] ss:$28 sps:$4 sm:$0xff]   ;;  %v4192_v43 = vld [vmem:[%s6319_s0 + $0x74] ss:$28 sps:$4 sm:$0xff]  }
   0xd   :  { %v4179_v35 = vld [vmem:[%s6319_s0] ss:$28 sps:$4 sm:$0xff]   ;;  %v4198_v40 = vld [vmem:[%s6318_s1 + $0x108] sm:$0xff]   ;;  %v4190_v41 = vld [vmem:[%s6319_s0 + $0x38] ss:$28 sps:$4 sm:$0xff]  }
   0xe   :  { %1934 = vmatpush1.bf16.msra.mxu1 %v4153_v7  ;;  %v4185_v37 = vld [vmem:[%s6318_s1 + $0x100] sm:$0xff]   ;;  %v4186_v38 = vld [vmem:[%s6319_s0 + $0x3c] ss:$28 sps:$4 sm:$0xff]   ;;  %v4205_v45 = vld [vmem:[%s6318_s1 + $0x110] sm:$0xff]  }
   0xf   :  { %2223 = vmatpush1.bf16.msra.mxu0 %v4588_v8  ;;  %1935 = vmatprep.subr.bf16.mxu1 %v4521_v0  ;;  %v4188_v39 = vld [vmem:[%s6319_s0 + $0x44] ss:$28 sps:$4 sm:$0xff]   ;;  %v4194_v44 = vld [vmem:[%s6319_s0 + $0x7c] ss:$28 sps:$4 sm:$0xff]   ;;  %v4196_v47 = vld [vmem:[%s6319_s0 + $0x70] ss:$28 sps:$4 sm:$0xff]  }
  0x10   :  { %2224 = vmatprep.subr.bf16.mxu0 %v4521_v0  ;;  %v4191_v42 = vld [vmem:[%s6319_s0 + $0x40] ss:$28 sps:$4 sm:$0xff]   ;;  %v4197_v48 = vld [vmem:[%s6319_s0 + $0x78] ss:$28 sps:$4 sm:$0xff]   ;;  %v4199_v49 = vld [vmem:[%s6319_s0 + $0xac] ss:$28 sps:$4 sm:$0xff]  }
  0x11   :  { %v4218_v46 = vld [vmem:[%s6318_s1 + $0x118] sm:$0xff]   ;;  %v4201_v50 = vld [vmem:[%s6319_s0 + $0xb4] ss:$28 sps:$4 sm:$0xff]   ;;  %v4225_v51 = vld [vmem:[%s6318_s1 + $0x120] sm:$0xff]  }
  0x12   :  { %1936 = vmatpush1.bf16.msra.mxu1 %v4155_v9  ;;  %v4238_v52 = vld [vmem:[%s6318_s1 + $0x128] sm:$0xff]   ;;  %v4206_v55 = vld [vmem:[%s6319_s0 + $0xe4] ss:$28 sps:$4 sm:$0xff]   ;;  %v4245_v57 = vld [vmem:[%s6318_s1 + $0x130] sm:$0xff]  }
  0x13   :  { %2225 = vmatpush1.bf16.msra.mxu0 %v4599_v10  ;;  %1937 = vmatprep.subr.bf16.mxu1 %v4521_v0  ;;  %v4203_v53 = vld [vmem:[%s6319_s0 + $0xa8] ss:$28 sps:$4 sm:$0xff]   ;;  %v4204_v54 = vld [vmem:[%s6319_s0 + $0xb0] ss:$28 sps:$4 sm:$0xff]   ;;  %v4258_v58 = vld [vmem:[%s6318_s1 + $0x138] sm:$0xff]  }
  0x14   :  { %2226 = vmatprep.subr.bf16.mxu0 %v4521_v0  ;;  %v4208_v56 = vld [vmem:[%s6319_s0 + $0xec] ss:$28 sps:$4 sm:$0xff]   ;;  %v4210_v59 = vld [vmem:[%s6319_s0 + $0xe0] ss:$28 sps:$4 sm:$0xff]   ;;  %v4224_v9 = vld [vmem:[%s6319_s0 + $0x158] ss:$28 sps:$4 sm:$0xff]  }
  0x15   :  { %v4211_v60 = vld [vmem:[%s6319_s0 + $0xe8] ss:$28 sps:$4 sm:$0xff]   ;;  %v4212_v61 = vld [vmem:[%s6319_s0 + $0x11c] ss:$28 sps:$4 sm:$0xff]   ;;  %v4223_v7 = vld [vmem:[%s6319_s0 + $0x150] ss:$28 sps:$4 sm:$0xff]  }
  0x16   :  { %1938 = vmatpush1.bf16.msra.mxu1 %v4157_v11  ;;  %v4214_v62 = vld [vmem:[%s6319_s0 + $0x124] ss:$28 sps:$4 sm:$0xff]   ;;  %v4278_v1 = vld [vmem:[%s6318_s1 + $0x148] sm:$0xff]   ;;  %v4221_v5 = vld [vmem:[%s6319_s0 + $0x15c] ss:$28 sps:$4 sm:$0xff]  }
  0x17   :  { %2227 = vmatpush1.bf16.msra.mxu0 %v4610_v12  ;;  %1939 = vmatprep.subr.bf16.mxu1 %v4521_v0  ;;  %v4265_v63 = vld [vmem:[%s6318_s1 + $0x140] sm:$0xff]   ;;  %v4228_v11 = vld [vmem:[%s6319_s0 + $0x194] ss:$28 sps:$4 sm:$0xff]  }
  0x18   :  { %2228 = vmatprep.subr.bf16.mxu0 %v4521_v0  ;;  %v4217_v3 = vld [vmem:[%s6319_s0 + $0x120] ss:$28 sps:$4 sm:$0xff]   ;;  %v4237_v21 = vld [vmem:[%s6319_s0 + $0x1c8] ss:$28 sps:$4 sm:$0xff]  }
  0x19   :  { %v4236_v19 = vld [vmem:[%s6319_s0 + $0x1c0] ss:$28 sps:$4 sm:$0xff]  }
  0x1a   :  { %1940 = vmatpush1.bf16.msra.mxu1 %v4159_v13  ;;  %v4230_v13 = vld [vmem:[%s6319_s0 + $0x188] ss:$28 sps:$4 sm:$0xff]  }
  0x1b   :  { %2229 = vmatpush1.bf16.msra.mxu0 %v4621_v14  ;;  %1941 = vmatprep.subr.bf16.mxu1 %v4521_v0 }
  0x1c   :  { %2230 = vmatprep.subr.bf16.mxu0 %v4521_v0 }
  0x1e   :  { %1942 = vmatpush1.bf16.msra.mxu1 %v4161_v15  ;;  %v4231_v15 = vld [vmem:[%s6319_s0 + $0x190] ss:$28 sps:$4 sm:$0xff]  }
  0x1f   :  { %2231 = vmatpush1.bf16.msra.mxu0 %v4632_v16  ;;  %1943 = vmatprep.subr.bf16.mxu1 %v4521_v0 }
  0x20   :  { %2232 = vmatprep.subr.bf16.mxu0 %v4521_v0 }
  0x22   :  { %1944 = vmatpush1.bf16.msra.mxu1 %v4163_v17  ;;  %v4234_v17 = vld [vmem:[%s6319_s0 + $0x1cc] ss:$28 sps:$4 sm:$0xff]  }
  0x23   :  { %2233 = vmatpush1.bf16.msra.mxu0 %v4643_v18  ;;  %1945 = vmatprep.subr.bf16.mxu1 %v4521_v0 }
  0x24   :  { %2234 = vmatprep.subr.bf16.mxu0 %v4521_v0 }
  0x26   :  { %1946 = vmatpush1.bf16.msra.mxu1 %v4165_v20  ;;  %v4338_v20 = vld [vmem:[%s6318_s1 + $0x178] sm:$0xff]  }
  0x27   :  { %2235 = vmatpush1.bf16.msra.mxu0 %v4660_v22  ;;  %1947 = vmatprep.subr.bf16.mxu1 %v4521_v0 }
  0x28   :  { %2236 = vmatprep.subr.bf16.mxu0 %v4521_v0 }
  0x2a   :  { %1948 = vmatpush1.bf16.msra.mxu1 %v4167_v23  ;;  %v4241_v23 = vld [vmem:[%s6319_s0 + $0x204] ss:$28 sps:$4 sm:$0xff]  }
  0x2b   :  { %2237 = vmatpush1.bf16.msra.mxu0 %v4671_v24  ;;  %1949 = vmatprep.subr.bf16.mxu1 %v4521_v0 }
  0x2c   :  { %2238 = vmatprep.subr.bf16.mxu0 %v4521_v0 }
  0x2e   :  { %1950 = vmatpush1.bf16.msra.mxu1 %v4169_v25  ;;  %v4244_v25 = vld [vmem:[%s6319_s0 + $0x200] ss:$28 sps:$4 sm:$0xff]  }
  0x2f   :  { %2239 = vmatpush1.bf16.msra.mxu0 %v4682_v26  ;;  %1951 = vmatprep.subr.bf16.mxu1 %v4521_v0 }
  0x30   :  { %2240 = vmatprep.subr.bf16.mxu0 %v4521_v0 }
  0x32   :  { %1952 = vmatpush1.bf16.msra.mxu1 %v4171_v27  ;;  %v4250_v27 = vld [vmem:[%s6319_s0 + $0x230] ss:$28 sps:$4 sm:$0xff]  }
  0x33   :  { %2241 = vmatpush1.bf16.msra.mxu0 %v4693_v28  ;;  %1953 = vmatprep.subr.bf16.mxu1 %v4521_v0 }
  0x34   :  { %2242 = vmatprep.subr.bf16.mxu0 %v4521_v0 }
  0x36   :  { %1954 = vmatpush1.bf16.msra.mxu1 %v4173_v29  ;;  %v4252_v29 = vld [vmem:[%s6319_s0 + $0x26c] ss:$28 sps:$4 sm:$0xff]  }
  0x37   :  { %2243 = vmatpush1.bf16.msra.mxu0 %v4704_v30  ;;  %1955 = vmatprep.subr.bf16.mxu1 %v4521_v0 }
  0x38   :  { %2244 = vmatprep.subr.bf16.mxu0 %v4521_v0 }
  0x3a   :  { %1956 = vmatpush1.bf16.msra.mxu1 %v4175_v31  ;;  %v4256_v31 = vld [vmem:[%s6319_s0 + $0x268] ss:$28 sps:$4 sm:$0xff]  }
  0x3b   :  { %2245 = vmatpush1.bf16.msra.mxu0 %v4715_v32  ;;  %1957 = vmatprep.subr.bf16.mxu1 %v4521_v0 }
  0x3c   :  { %2246 = vmatprep.subr.bf16.mxu0 %v4521_v0 }
  0x3e   :  { %1958 = vmatpush1.bf16.msra.mxu1 %v4177_v33  ;;  %v4259_v33 = vld [vmem:[%s6319_s0 + $0x2a4] ss:$28 sps:$4 sm:$0xff]  }
  0x3f   :  { %2247 = vmatpush1.bf16.msra.mxu0 %v4726_v34  ;;  %3921 = vmatprep.subr.bf16.mxu1 %v4521_v0 }
  0x40   :  { %2505 = vmatprep.subr.bf16.mxu0 %v4521_v0 }
  0x41   :  { %1960 = vmatmul.mubr.bf16.vlgmr.msra.gmra.mrb[0].mxu1 %v4179_v35  ;;  %v4263_v35 = vld [vmem:[%s6319_s0 + $0x2a0] ss:$28 sps:$4 sm:$0xff]  }
  0x42   :  { %2249 = vmatmul.mubr.bf16.vlgmr.msra.gmra.mrb[0].mxu0 %v4182_v36  ;;  %3937 = vmatpush1.bf16.msra.mxu1 %v4556_v2  ;;  %v4216_v2 = vld [vmem:[%s6319_s0 + $0x118] ss:$28 sps:$4 sm:$0xff]   ;;  %v4264_v36 = vld [vmem:[%s6319_s0 + $0x2a8] ss:$28 sps:$4 sm:$0xff]  }
  0x43   :  { %2506 = vmatpush1.bf16.msra.mxu0 %v4185_v37  ;;  %1967 = vmatprep.mubr.bf16.mxu1 %v4186_v38  ;;  %v4266_v37 = vld [vmem:[%s6319_s0 + $0x2dc] ss:$28 sps:$4 sm:$0xff]   ;;  %v4268_v38 = vld [vmem:[%s6319_s0 + $0x2e4] ss:$28 sps:$4 sm:$0xff]  }
  0x44   :  { %2256 = vmatprep.mubr.bf16.mxu0 %v4188_v39  ;;  %2507 = vmatprep.subr.bf16.mxu0 %v4521_v0  ;;  %v4270_v39 = vld [vmem:[%s6319_s0 + $0x2d8] ss:$28 sps:$4 sm:$0xff]  }
  0x45   :  { %3922 = vmatprep.subr.bf16.mxu1 %v4521_v0 }
  0x46   :  { %3938 = vmatpush1.bf16.msra.mxu1 %v4566_v4  ;;  %v4219_v4 = vld [vmem:[%s6319_s0 + $0x154] ss:$28 sps:$4 sm:$0xff]  }
  0x47   :  { %2508 = vmatpush1.bf16.msra.mxu0 %v4198_v40  ;;  %3923 = vmatprep.subr.bf16.mxu1 %v4521_v0  ;;  %v4271_v40 = vld [vmem:[%s6319_s0 + $0x2e0] ss:$28 sps:$4 sm:$0xff]  }
  0x48   :  { %2509 = vmatprep.subr.bf16.mxu0 %v4521_v0 }
  0x49   :  { %1968 = vmatmul.mubr.bf16.gmra.mrb[4].mxu1 %v4190_v41  ;;  %v4272_v41 = vld [vmem:[%s6319_s0 + $0x314] ss:$28 sps:$4 sm:$0xff]  }
  0x4a   :  { %2257 = vmatmul.mubr.bf16.gmra.mrb[4].mxu0 %v4191_v42  ;;  %1975 = vmatprep.mubr.bf16.mxu1 %v4192_v43  ;;  %v4274_v42 = vld [vmem:[%s6319_s0 + $0x31c] ss:$28 sps:$4 sm:$0xff]   ;;  %v4276_v43 = vld [vmem:[%s6319_s0 + $0x310] ss:$28 sps:$4 sm:$0xff]  }
  0x4b   :  { %2264 = vmatprep.mubr.bf16.mxu0 %v4194_v44  ;;  %2510 = vmatpush1.bf16.msra.mxu0 %v4205_v45  ;;  %v4277_v44 = vld [vmem:[%s6319_s0 + $0x318] ss:$28 sps:$4 sm:$0xff]   ;;  %v4279_v45 = vld [vmem:[%s6319_s0 + $0x34c] ss:$28 sps:$4 sm:$0xff]  }
  0x4c   :  { %3939 = vmatpush1.bf16.msra.mxu1 %v4577_v6  ;;  %2511 = vmatprep.subr.bf16.mxu0 %v4521_v0  ;;  %v4285_v6 = vld [vmem:[%s6318_s1 + $0x150] sm:$0xff]  }
  0x4d   :  { %3924 = vmatprep.subr.bf16.mxu1 %v4521_v0 }
  0x4f   :  { %2512 = vmatpush1.bf16.msra.mxu0 %v4218_v46  ;;  %v4281_v46 = vld [vmem:[%s6319_s0 + $0x354] ss:$28 sps:$4 sm:$0xff]  }
  0x50   :  { %3940 = vmatpush1.bf16.msra.mxu1 %v4588_v8  ;;  %2513 = vmatprep.subr.bf16.mxu0 %v4521_v0  ;;  %v4298_v8 = vld [vmem:[%s6318_s1 + $0x158] sm:$0xff]  }
  0x51   :  { %1976 = vmatmul.mubr.bf16.gmra.mrb[8].mxu1 %v4196_v47  ;;  %3925 = vmatprep.subr.bf16.mxu1 %v4521_v0  ;;  %v4283_v47 = vld [vmem:[%s6319_s0 + $0x348] ss:$28 sps:$4 sm:$0xff]  }
  0x52   :  { %2265 = vmatmul.mubr.bf16.gmra.mrb[8].mxu0 %v4197_v48  ;;  %1983 = vmatprep.mubr.bf16.mxu1 %v4199_v49  ;;  %v4284_v48 = vld [vmem:[%s6319_s0 + $0x350] ss:$28 sps:$4 sm:$0xff]   ;;  %v4286_v49 = vld [vmem:[%s6319_s0 + $0x384] ss:$28 sps:$4 sm:$0xff]  }
  0x53   :  { %2272 = vmatprep.mubr.bf16.mxu0 %v4201_v50  ;;  %2514 = vmatpush1.bf16.msra.mxu0 %v4225_v51  ;;  %v4288_v50 = vld [vmem:[%s6319_s0 + $0x38c] ss:$28 sps:$4 sm:$0xff]   ;;  %v4290_v51 = vld [vmem:[%s6319_s0 + $0x380] ss:$28 sps:$4 sm:$0xff]  }
  0x54   :  { %2515 = vmatprep.subr.bf16.mxu0 %v4521_v0  ;;  %3941 = vmatpush1.bf16.msra.mxu1 %v4599_v10  ;;  %v4226_v10 = vld [vmem:[%s6319_s0 + $0x18c] ss:$28 sps:$4 sm:$0xff]  }
  0x55   :  { %3926 = vmatprep.subr.bf16.mxu1 %v4521_v0 }
  0x57   :  { %2516 = vmatpush1.bf16.msra.mxu0 %v4238_v52  ;;  %v4291_v52 = vld [vmem:[%s6319_s0 + $0x388] ss:$28 sps:$4 sm:$0xff]  }
  0x58   :  { %2517 = vmatprep.subr.bf16.mxu0 %v4521_v0  ;;  %3942 = vmatpush1.bf16.msra.mxu1 %v4610_v12  ;;  %v4305_v12 = vld [vmem:[%s6318_s1 + $0x160] sm:$0xff]  }
  0x59   :  { %1984 = vmatmul.mubr.bf16.gmra.mrb[12].mxu1 %v4203_v53  ;;  %3927 = vmatprep.subr.bf16.mxu1 %v4521_v0  ;;  %v4292_v53 = vld [vmem:[%s6319_s0 + $0x3bc] ss:$28 sps:$4 sm:$0xff]  }
  0x5a   :  { %2273 = vmatmul.mubr.bf16.gmra.mrb[12].mxu0 %v4204_v54  ;;  %1991 = vmatprep.mubr.bf16.mxu1 %v4206_v55  ;;  %v4294_v54 = vld [vmem:[%s6319_s0 + $0x3c4] ss:$28 sps:$4 sm:$0xff]  }
  0x5b   :  { %2280 = vmatprep.mubr.bf16.mxu0 %v4208_v56  ;;  %2518 = vmatpush1.bf16.msra.mxu0 %v4245_v57  ;;  %v5033_v55 = vld [vmem:[%s6318_s1 + $0x180] sm:$0xff]   ;;  %v4296_v56 = vld [vmem:[%s6319_s0 + $0x3b8] ss:$28 sps:$4 sm:$0xff]  }
  0x5c   :  { %2519 = vmatprep.subr.bf16.mxu0 %v4521_v0  ;;  %3943 = vmatpush1.bf16.msra.mxu1 %v4621_v14  ;;  %v4318_v14 = vld [vmem:[%s6318_s1 + $0x168] sm:$0xff]   ;;  %v4297_v57 = vld [vmem:[%s6319_s0 + $0x3c0] ss:$28 sps:$4 sm:$0xff]  }
  0x5d   :  { %3928 = vmatprep.subr.bf16.mxu1 %v4521_v0 }
  0x5f   :  { %2520 = vmatpush1.bf16.msra.mxu0 %v4258_v58  ;;  %v4299_v58 = vld [vmem:[%s6319_s0 + $0x3f4] ss:$28 sps:$4 sm:$0xff]  }
  0x60   :  { %2521 = vmatprep.subr.bf16.mxu0 %v4521_v0  ;;  %3944 = vmatpush1.bf16.msra.mxu1 %v4632_v16  ;;  %v4232_v16 = vld [vmem:[%s6319_s0 + $0x1c4] ss:$28 sps:$4 sm:$0xff]  }
  0x61   :  { %1992 = vmatmul.mubr.bf16.gmra.mrb[16].mxu1 %v4210_v59  ;;  %3929 = vmatprep.subr.bf16.mxu1 %v4521_v0  ;;  %v4301_v59 = vld [vmem:[%s6319_s0 + $0x3fc] ss:$28 sps:$4 sm:$0xff]  }
  0x62   :  { %2281 = vmatmul.mubr.bf16.gmra.mrb[16].mxu0 %v4211_v60  ;;  %1999 = vmatprep.mubr.bf16.mxu1 %v4212_v61  ;;  %v4303_v60 = vld [vmem:[%s6319_s0 + $0x3f0] ss:$28 sps:$4 sm:$0xff]   ;;  %v4304_v61 = vld [vmem:[%s6319_s0 + $0x3f8] ss:$28 sps:$4 sm:$0xff]  }
  0x63   :  { %2288 = vmatprep.mubr.bf16.mxu0 %v4214_v62  ;;  %2522 = vmatpush1.bf16.msra.mxu0 %v4265_v63  ;;  %v4306_v62 = vld [vmem:[%s6319_s0 + $0x42c] ss:$28 sps:$4 sm:$0xff]   ;;  %v4308_v63 = vld [vmem:[%s6319_s0 + $0x434] ss:$28 sps:$4 sm:$0xff]  }
  0x64   :  { %2523 = vmatprep.subr.bf16.mxu0 %v4521_v0  ;;  %3945 = vmatpush1.bf16.msra.mxu1 %v4643_v18  ;;  %v4325_v18 = vld [vmem:[%s6318_s1 + $0x170] sm:$0xff]  }
  0x65   :  { %3930 = vmatprep.subr.bf16.mxu1 %v4521_v0 }
  0x67   :  { %2524 = vmatpush1.bf16.msra.mxu0 %v4278_v1  ;;  %v4310_v1 = vld [vmem:[%s6319_s0 + $0x428] ss:$28 sps:$4 sm:$0xff]  }
  0x68   :  { %2525 = vmatprep.subr.bf16.mxu0 %v4521_v0  ;;  %3946 = vmatpush1.bf16.msra.mxu1 %v4660_v22  ;;  %v4239_v22 = vld [vmem:[%s6319_s0 + $0x1fc] ss:$28 sps:$4 sm:$0xff]  }
  0x69   :  { %2000 = vmatmul.mubr.bf16.gmra.mrb[20].mxu1 %v4216_v2  ;;  %3931 = vmatprep.subr.bf16.mxu1 %v4521_v0  ;;  %v4311_v2 = vld [vmem:[%s6319_s0 + $0x430] ss:$28 sps:$4 sm:$0xff]  }
  0x6a   :  { %2289 = vmatmul.mubr.bf16.gmra.mrb[20].mxu0 %v4217_v3  ;;  %2007 = vmatprep.mubr.bf16.mxu1 %v4219_v4  ;;  %v4312_v3 = vld [vmem:[%s6319_s0 + $0x464] ss:$28 sps:$4 sm:$0xff]   ;;  %v4314_v4 = vld [vmem:[%s6319_s0 + $0x46c] ss:$28 sps:$4 sm:$0xff]  }
  0x6b   :  { %2296 = vmatprep.mubr.bf16.mxu0 %v4221_v5  ;;  %2526 = vmatpush1.bf16.msra.mxu0 %v4285_v6  ;;  %v4316_v5 = vld [vmem:[%s6319_s0 + $0x460] ss:$28 sps:$4 sm:$0xff]   ;;  %v4317_v6 = vld [vmem:[%s6319_s0 + $0x468] ss:$28 sps:$4 sm:$0xff]  }
  0x6c   :  { %2527 = vmatprep.subr.bf16.mxu0 %v4521_v0  ;;  %3947 = vmatpush1.bf16.msra.mxu1 %v4671_v24  ;;  %v4243_v24 = vld [vmem:[%s6319_s0 + $0x1f8] ss:$28 sps:$4 sm:$0xff]  }
  0x6d   :  { %3932 = vmatprep.subr.bf16.mxu1 %v4521_v0 }
  0x6f   :  { %2528 = vmatpush1.bf16.msra.mxu0 %v4298_v8  ;;  %v4321_v8 = vld [vmem:[%s6319_s0 + $0x4a4] ss:$28 sps:$4 sm:$0xff]  }
  0x70   :  { %2529 = vmatprep.subr.bf16.mxu0 %v4521_v0  ;;  %3948 = vmatpush1.bf16.msra.mxu1 %v4682_v26  ;;  %v4246_v26 = vld [vmem:[%s6319_s0 + $0x234] ss:$28 sps:$4 sm:$0xff]  }
  0x71   :  { %2008 = vmatmul.mubr.bf16.gmra.mrb[24].mxu1 %v4223_v7  ;;  %3933 = vmatprep.subr.bf16.mxu1 %v4521_v0  ;;  %v4319_v7 = vld [vmem:[%s6319_s0 + $0x49c] ss:$28 sps:$4 sm:$0xff]  }
  0x72   :  { %2297 = vmatmul.mubr.bf16.gmra.mrb[24].mxu0 %v4224_v9  ;;  %2015 = vmatprep.mubr.bf16.mxu1 %v4226_v10  ;;  %v4323_v9 = vld [vmem:[%s6319_s0 + $0x498] ss:$28 sps:$4 sm:$0xff]   ;;  %v4324_v10 = vld [vmem:[%s6319_s0 + $0x4a0] ss:$28 sps:$4 sm:$0xff]  }
  0x73   :  { %2304 = vmatprep.mubr.bf16.mxu0 %v4228_v11  ;;  %2530 = vmatpush1.bf16.msra.mxu0 %v4305_v12  ;;  %v4326_v11 = vld [vmem:[%s6319_s0 + $0x4d4] ss:$28 sps:$4 sm:$0xff]   ;;  %v4328_v12 = vld [vmem:[%s6319_s0 + $0x4dc] ss:$28 sps:$4 sm:$0xff]  }
  0x74   :  { %2531 = vmatprep.subr.bf16.mxu0 %v4521_v0  ;;  %3949 = vmatpush1.bf16.msra.mxu1 %v4693_v28  ;;  %v4251_v28 = vld [vmem:[%s6319_s0 + $0x238] ss:$28 sps:$4 sm:$0xff]  }
  0x75   :  { %3934 = vmatprep.subr.bf16.mxu1 %v4521_v0 }
  0x77   :  { %2532 = vmatpush1.bf16.msra.mxu0 %v4318_v14  ;;  %v4331_v14 = vld [vmem:[%s6319_s0 + $0x4d8] ss:$28 sps:$4 sm:$0xff]  }
  0x78   :  { %2533 = vmatprep.subr.bf16.mxu0 %v4521_v0  ;;  %3950 = vmatpush1.bf16.msra.mxu1 %v4704_v30  ;;  %v4254_v30 = vld [vmem:[%s6319_s0 + $0x274] ss:$28 sps:$4 sm:$0xff]  }
  0x79   :  { %2016 = vmatmul.mubr.bf16.gmra.mrb[28].mxu1 %v4230_v13  ;;  %3935 = vmatprep.subr.bf16.mxu1 %v4521_v0  ;;  %v4330_v13 = vld [vmem:[%s6319_s0 + $0x4d0] ss:$28 sps:$4 sm:$0xff]  }
  0x7a   :  { %2305 = vmatmul.mubr.bf16.gmra.mrb[28].mxu0 %v4231_v15  ;;  %2023 = vmatprep.mubr.bf16.mxu1 %v4232_v16  ;;  %v4332_v15 = vld [vmem:[%s6319_s0 + $0x50c] ss:$28 sps:$4 sm:$0xff]   ;;  %v4334_v16 = vld [vmem:[%s6319_s0 + $0x514] ss:$28 sps:$4 sm:$0xff]  }
  0x7b   :  { %2312 = vmatprep.mubr.bf16.mxu0 %v4234_v17  ;;  %2534 = vmatpush1.bf16.msra.mxu0 %v4325_v18  ;;  %v4336_v17 = vld [vmem:[%s6319_s0 + $0x508] ss:$28 sps:$4 sm:$0xff]   ;;  %v4337_v18 = vld [vmem:[%s6319_s0 + $0x510] ss:$28 sps:$4 sm:$0xff]  }
  0x7c   :  { %2535 = vmatprep.subr.bf16.mxu0 %v4521_v0  ;;  %3951 = vmatpush1.bf16.msra.mxu1 %v4715_v32  ;;  %v4257_v32 = vld [vmem:[%s6319_s0 + $0x270] ss:$28 sps:$4 sm:$0xff]  }
  0x7d   :  { %3936 = vmatprep.subr.bf16.mxu1 %v4521_v0  ;;  %v4248_v0 = vld [vmem:[%s6319_s0 + $0x23c] ss:$28 sps:$4 sm:$0xff]  }
  0x7f   :  { %2536 = vmatpush1.bf16.msra.mxu0 %v4338_v20  ;;  %v4343_v20 = vld [vmem:[%s6319_s0 + $0x14] ss:$28 sps:$4 sm:$0xff]  }
  0x80   :  { %3952 = vmatpush1.bf16.msra.mxu1 %v4726_v34  ;;  %v4261_v34 = vld [vmem:[%s6319_s0 + $0x2ac] ss:$28 sps:$4 sm:$0xff]  }
  0x81   :  { %2024 = vmatmul.mubr.bf16.gmra.mrb[32].mxu1 %v4236_v19  ;;  %3845 = vmatprep.subr.bf16.mxu1 %v5033_v55  ;;  %v4339_v19 = vld [vmem:[%s6319_s0 + $0x544] ss:$28 sps:$4 sm:$0xff]  }
  0x82   :  { %2313 = vmatmul.mubr.bf16.gmra.mrb[32].mxu0 %v4237_v21  ;;  %2031 = vmatprep.mubr.bf16.mxu1 %v4239_v22  ;;  %v4344_v21 = vld [vmem:[%s6319_s0 + $0x540] ss:$28 sps:$4 sm:$0xff]   ;;  %v4341_v22 = vld [vmem:[%s6319_s0 + $0x10] ss:$28 sps:$4 sm:$0xff]  }
  0x83   :  { %2320 = vmatprep.mubr.bf16.mxu0 %v4241_v23  ;;  %v4345_v23 = vld [vmem:[%s6319_s0 + $0x57c] ss:$28 sps:$4 sm:$0xff]  }
  0x89   :  { %2032 = vmatmul.mubr.bf16.gmra.mrb[36].mxu1 %v4243_v24  ;;  %v4347_v24 = vld [vmem:[%s6319_s0 + $0x4c] ss:$28 sps:$4 sm:$0xff]  }
  0x8a   :  { %2321 = vmatmul.mubr.bf16.gmra.mrb[36].mxu0 %v4244_v25  ;;  %2039 = vmatprep.mubr.bf16.mxu1 %v4246_v26  ;;  %v4349_v25 = vld [vmem:[%s6319_s0 + $0x578] ss:$28 sps:$4 sm:$0xff]   ;;  %v4350_v26 = vld [vmem:[%s6319_s0 + $0x48] ss:$28 sps:$4 sm:$0xff]  }
  0x8b   :  { %2328 = vmatprep.mubr.bf16.mxu0 %v4248_v0  ;;  %v4351_v0 = vld [vmem:[%s6319_s0 + $0x5b4] ss:$28 sps:$4 sm:$0xff]  }
  0x91   :  { %2040 = vmatmul.mubr.bf16.gmra.mrb[40].mxu1 %v4250_v27  ;;  %v4353_v27 = vld [vmem:[%s6319_s0 + $0x84] ss:$28 sps:$4 sm:$0xff]  }
  0x92   :  { %2329 = vmatmul.mubr.bf16.gmra.mrb[40].mxu0 %v4251_v28  ;;  %2047 = vmatprep.mubr.bf16.mxu1 %v4252_v29  ;;  %v4355_v28 = vld [vmem:[%s6319_s0 + $0x5b0] ss:$28 sps:$4 sm:$0xff]   ;;  %v4356_v29 = vld [vmem:[%s6319_s0 + $0x80] ss:$28 sps:$4 sm:$0xff]  }
  0x93   :  { %2336 = vmatprep.mubr.bf16.mxu0 %v4254_v30  ;;  %v4357_v30 = vld [vmem:[%s6319_s0 + $0x5ec] ss:$28 sps:$4 sm:$0xff]  }
  0x99   :  { %2048 = vmatmul.mubr.bf16.gmra.mrb[44].mxu1 %v4256_v31  ;;  %v4359_v31 = vld [vmem:[%s6319_s0 + $0xbc] ss:$28 sps:$4 sm:$0xff]  }
  0x9a   :  { %2337 = vmatmul.mubr.bf16.gmra.mrb[44].mxu0 %v4257_v32  ;;  %2055 = vmatprep.mubr.bf16.mxu1 %v4259_v33 }
  0x9b   :  { %2344 = vmatprep.mubr.bf16.mxu0 %v4261_v34  ;;  %v4361_v34 = vld [vmem:[%s6319_s0 + $0x5e8] ss:$28 sps:$4 sm:$0xff]  }
  0xa1   :  { %2056 = vmatmul.mubr.bf16.gmra.mrb[48].mxu1 %v4263_v35 }
  0xa2   :  { %2345 = vmatmul.mubr.bf16.gmra.mrb[48].mxu0 %v4264_v36  ;;  %2063 = vmatprep.mubr.bf16.mxu1 %v4266_v37  ;;  %v4362_v36 = vld [vmem:[%s6319_s0 + $0xb8] ss:$28 sps:$4 sm:$0xff]   ;;  %v4363_v37 = vld [vmem:[%s6319_s0 + $0x624] ss:$28 sps:$4 sm:$0xff]  }
  0xa3   :  { %2352 = vmatprep.mubr.bf16.mxu0 %v4268_v38 }
  0xa9   :  { %2064 = vmatmul.mubr.bf16.gmra.mrb[52].mxu1 %v4270_v39  ;;  %v4365_v39 = vld [vmem:[%s6319_s0 + $0xf4] ss:$28 sps:$4 sm:$0xff]  }
  0xaa   :  { %2353 = vmatmul.mubr.bf16.gmra.mrb[52].mxu0 %v4271_v40  ;;  %2071 = vmatprep.mubr.bf16.mxu1 %v4272_v41 }
  0xab   :  { %2360 = vmatprep.mubr.bf16.mxu0 %v4274_v42  ;;  %v4367_v42 = vld [vmem:[%s6319_s0 + $0x620] ss:$28 sps:$4 sm:$0xff]  }
  0xb1   :  { %2072 = vmatmul.mubr.bf16.gmra.mrb[56].mxu1 %v4276_v43 }
  0xb2   :  { %2361 = vmatmul.mubr.bf16.gmra.mrb[56].mxu0 %v4277_v44  ;;  %2079 = vmatprep.mubr.bf16.mxu1 %v4279_v45  ;;  %v4368_v44 = vld [vmem:[%s6319_s0 + $0xf0] ss:$28 sps:$4 sm:$0xff]   ;;  %v4369_v45 = vld [vmem:[%s6319_s0 + $0x65c] ss:$28 sps:$4 sm:$0xff]  }
  0xb3   :  { %2368 = vmatprep.mubr.bf16.mxu0 %v4281_v46 }
  0xb9   :  { %2080 = vmatmul.mubr.bf16.gmra.mrb[60].mxu1 %v4283_v47  ;;  %v4371_v47 = vld [vmem:[%s6319_s0 + $0x12c] ss:$28 sps:$4 sm:$0xff]  }
  0xba   :  { %2369 = vmatmul.mubr.bf16.gmra.mrb[60].mxu0 %v4284_v48  ;;  %2087 = vmatprep.mubr.bf16.mxu1 %v4286_v49 }
  0xbb   :  { %2376 = vmatprep.mubr.bf16.mxu0 %v4288_v50  ;;  %v4373_v50 = vld [vmem:[%s6319_s0 + $0x658] ss:$28 sps:$4 sm:$0xff]  }
  0xc1   :  { %2088 = vmatmul.mubr.bf16.gmra.mrb[64].mxu1 %v4290_v51 }
  0xc2   :  { %2377 = vmatmul.mubr.bf16.gmra.mrb[64].mxu0 %v4291_v52  ;;  %2095 = vmatprep.mubr.bf16.mxu1 %v4292_v53  ;;  %v4374_v52 = vld [vmem:[%s6319_s0 + $0x128] ss:$28 sps:$4 sm:$0xff]   ;;  %v4375_v53 = vld [vmem:[%s6319_s0 + $0x694] ss:$28 sps:$4 sm:$0xff]  }
  0xc3   :  { %2384 = vmatprep.mubr.bf16.mxu0 %v4294_v54 }
  0xc9   :  { %2096 = vmatmul.mubr.bf16.gmra.mrb[68].mxu1 %v4296_v56  ;;  %v4377_v56 = vld [vmem:[%s6319_s0 + $0x164] ss:$28 sps:$4 sm:$0xff]  }
  0xca   :  { %2385 = vmatmul.mubr.bf16.gmra.mrb[68].mxu0 %v4297_v57  ;;  %2103 = vmatprep.mubr.bf16.mxu1 %v4299_v58 }
  0xcb   :  { %2392 = vmatprep.mubr.bf16.mxu0 %v4301_v59  ;;  %v4379_v59 = vld [vmem:[%s6319_s0 + $0x690] ss:$28 sps:$4 sm:$0xff]  }
  0xd1   :  { %2104 = vmatmul.mubr.bf16.gmra.mrb[72].mxu1 %v4303_v60 }
  0xd2   :  { %2393 = vmatmul.mubr.bf16.gmra.mrb[72].mxu0 %v4304_v61  ;;  %2111 = vmatprep.mubr.bf16.mxu1 %v4306_v62  ;;  %v4380_v61 = vld [vmem:[%s6319_s0 + $0x160] ss:$28 sps:$4 sm:$0xff]   ;;  %v4381_v62 = vld [vmem:[%s6319_s0 + $0x6cc] ss:$28 sps:$4 sm:$0xff]  }
  0xd3   :  { %2400 = vmatprep.mubr.bf16.mxu0 %v4308_v63 }
  0xd9   :  { %2112 = vmatmul.mubr.bf16.gmra.mrb[76].mxu1 %v4310_v1  ;;  %v4383_v1 = vld [vmem:[%s6319_s0 + $0x19c] ss:$28 sps:$4 sm:$0xff]  }
  0xda   :  { %2401 = vmatmul.mubr.bf16.gmra.mrb[76].mxu0 %v4311_v2  ;;  %2119 = vmatprep.mubr.bf16.mxu1 %v4312_v3 }
  0xdb   :  { %2408 = vmatprep.mubr.bf16.mxu0 %v4314_v4  ;;  %v4385_v4 = vld [vmem:[%s6319_s0 + $0x6c8] ss:$28 sps:$4 sm:$0xff]  }
  0xe1   :  { %2120 = vmatmul.mubr.bf16.gmra.mrb[80].mxu1 %v4316_v5 }
  0xe2   :  { %2409 = vmatmul.mubr.bf16.gmra.mrb[80].mxu0 %v4317_v6  ;;  %2127 = vmatprep.mubr.bf16.mxu1 %v4319_v7  ;;  %v4386_v6 = vld [vmem:[%s6319_s0 + $0x198] ss:$28 sps:$4 sm:$0xff]   ;;  %v4389_v7 = vld [vmem:[%s6319_s0 + $0x54c] ss:$28 sps:$4 sm:$0xff]  }
  0xe3   :  { %2416 = vmatprep.mubr.bf16.mxu0 %v4321_v8 }
  0xe9   :  { %2128 = vmatmul.mubr.bf16.gmra.mrb[84].mxu1 %v4323_v9  ;;  %v4390_v9 = vld [vmem:[%s6319_s0 + $0x1d4] ss:$28 sps:$4 sm:$0xff]  }
  0xea   :  { %2417 = vmatmul.mubr.bf16.gmra.mrb[84].mxu0 %v4324_v10  ;;  %2135 = vmatprep.mubr.bf16.mxu1 %v4326_v11 }
  0xeb   :  { %2424 = vmatprep.mubr.bf16.mxu0 %v4328_v12  ;;  %v4387_v12 = vld [vmem:[%s6319_s0 + $0x548] ss:$28 sps:$4 sm:$0xff]  }
  0xf1   :  { %2136 = vmatmul.mubr.bf16.gmra.mrb[88].mxu1 %v4330_v13 }
  0xf2   :  { %2425 = vmatmul.mubr.bf16.gmra.mrb[88].mxu0 %v4331_v14  ;;  %2143 = vmatprep.mubr.bf16.mxu1 %v4332_v15  ;;  %v4392_v14 = vld [vmem:[%s6319_s0 + $0x1d0] ss:$28 sps:$4 sm:$0xff]  }
  0xf3   :  { %2432 = vmatprep.mubr.bf16.mxu0 %v4334_v16  ;;  %v4394_v16 = vld [vmem:[%s6319_s0 + $0x584] ss:$28 sps:$4 sm:$0xff]  }
  0xf9   :  { %2144 = vmatmul.mubr.bf16.gmra.mrb[92].mxu1 %v4336_v17  ;;  %v4396_v17 = vld [vmem:[%s6319_s0 + $0x20c] ss:$28 sps:$4 sm:$0xff]  }
  0xfa   :  { %2433 = vmatmul.mubr.bf16.gmra.mrb[92].mxu0 %v4337_v18  ;;  %2151 = vmatprep.mubr.bf16.mxu1 %v4339_v19  ;;  %v4400_v18 = vld [vmem:[%s6318_s1 + $0x188] sm:$0xff]   ;;  %v4407_v19 = vld [vmem:[%s6318_s1 + $0x190] sm:$0xff]  }
  0xfb   :  { %2537 = vmatprep.mubr.bf16.mxu0 %v4343_v20 }
 0x101   :  { %2152 = vmatmul.mubr.bf16.gmra.mrb[96].mxu1 %v4344_v21 }
 0x102   :  { %2538 = vmatmul.mubr.bf16.vlgmr.msra.gmra.mrb[0].mxu0 %v4341_v22  ;;  %2159 = vmatprep.mubr.bf16.mxu1 %v4345_v23  ;;  %v4398_v22 = vld [vmem:[%s6319_s0 + $0x580] ss:$28 sps:$4 sm:$0xff]  }
 0x103   :  { %2545 = vmatprep.mubr.bf16.mxu0 %v4347_v24  ;;  %v4401_v24 = vld [vmem:[%s6319_s0 + $0x5bc] ss:$28 sps:$4 sm:$0xff]  }
 0x109   :  { %2160 = vmatmul.mubr.bf16.gmra.mrb[100].mxu1 %v4349_v25 }
 0x10a   :  { %2546 = vmatmul.mubr.bf16.gmra.mrb[4].mxu0 %v4350_v26  ;;  %2167 = vmatprep.mubr.bf16.mxu1 %v4351_v0  ;;  %v4403_v26 = vld [vmem:[%s6319_s0 + $0x244] ss:$28 sps:$4 sm:$0xff]   ;;  %v4420_v0 = vld [vmem:[%s6318_s1 + $0x198] sm:$0xff]  }
 0x10b   :  { %2553 = vmatprep.mubr.bf16.mxu0 %v4353_v27 }
 0x111   :  { %2168 = vmatmul.mubr.bf16.gmra.mrb[104].mxu1 %v4355_v28  ;;  %v4427_v28 = vld [vmem:[%s6318_s1 + $0x1a0] sm:$0xff]  }
 0x112   :  { %2554 = vmatmul.mubr.bf16.gmra.mrb[8].mxu0 %v4356_v29  ;;  %2175 = vmatprep.mubr.bf16.mxu1 %v4357_v30  ;;  %v4405_v30 = vld [vmem:[%s6319_s0 + $0x5b8] ss:$28 sps:$4 sm:$0xff]  }
 0x113   :  { %2561 = vmatprep.mubr.bf16.mxu0 %v4359_v31 }
 0x114   :  { %v5156_v32 = vpop.f32.mrb[0].mxu1 }
 0x115   :  { %v1963_v33 = vpop.f32.mrb[1].mxu1 }
 0x116   :  { %v5161_v35 = vpop.f32.mrb[2].mxu1  ;;  %v4406_v33 = vld [vmem:[%s6319_s0 + $0x240] ss:$28 sps:$4 sm:$0xff]  }
 0x117   :  { %v1966_v38 = vpop.f32.mrb[3].mxu1 }
 0x118   :  { %v4434_v38 = vld [vmem:[%s6318_s1 + $0x1a8] sm:$0xff]  }
 0x119   :  { %2176 = vmatmul.mubr.bf16.gmra.mrb[108].mxu1 %v4361_v34  ;;  %v4408_v34 = vld [vmem:[%s6319_s0 + $0x5f4] ss:$28 sps:$4 sm:$0xff]  }
 0x11a   :  { %2562 = vmatmul.mubr.bf16.gmra.mrb[12].mxu0 %v4362_v36  ;;  %2183 = vmatprep.mubr.bf16.mxu1 %v4363_v37  ;;  %v4410_v37 = vld [vmem:[%s6319_s0 + $0x27c] ss:$28 sps:$4 sm:$0xff]  }
 0x11b   :  { %2569 = vmatprep.mubr.bf16.mxu0 %v4365_v39 }
 0x11c   :  { %v5172_v40 = vpop.f32.mrb[4].mxu1 }
 0x11d   :  { %v1971_v41 = vpop.f32.mrb[5].mxu1 }
 0x11e   :  { %v5177_v43 = vpop.f32.mrb[6].mxu1 }
 0x11f   :  { %v1974_v46 = vpop.f32.mrb[7].mxu1 }
 0x120   :  { %v4414_v46 = vld [vmem:[%s6319_s0 + $0x62c] ss:$28 sps:$4 sm:$0xff]  }
 0x121   :  { %2184 = vmatmul.mubr.bf16.gmra.mrb[112].mxu1 %v4367_v42  ;;  %v4412_v42 = vld [vmem:[%s6319_s0 + $0x5f0] ss:$28 sps:$4 sm:$0xff]  }
 0x122   :  { %2570 = vmatmul.mubr.bf16.gmra.mrb[16].mxu0 %v4368_v44  ;;  %2191 = vmatprep.mubr.bf16.mxu1 %v4369_v45  ;;  %v4413_v45 = vld [vmem:[%s6319_s0 + $0x278] ss:$28 sps:$4 sm:$0xff]  }
 0x123   :  { %2577 = vmatprep.mubr.bf16.mxu0 %v4371_v47 }
 0x124   :  { %v5188_v48 = vpop.f32.mrb[8].mxu1 }
 0x125   :  { %v1979_v49 = vpop.f32.mrb[9].mxu1 }
 0x126   :  { %v5193_v51 = vpop.f32.mrb[10].mxu1  ;;  %v4416_v49 = vld [vmem:[%s6319_s0 + $0x2b4] ss:$28 sps:$4 sm:$0xff]  }
 0x127   :  { %v1982_v54 = vpop.f32.mrb[11].mxu1 }
 0x129   :  { %2192 = vmatmul.mubr.bf16.gmra.mrb[116].mxu1 %v4373_v50 }
 0x12a   :  { %2578 = vmatmul.mubr.bf16.gmra.mrb[20].mxu0 %v4374_v52  ;;  %2199 = vmatprep.mubr.bf16.mxu1 %v4375_v53  ;;  %v4418_v53 = vld [vmem:[%s6319_s0 + $0x628] ss:$28 sps:$4 sm:$0xff]  }
 0x12b   :  { %2585 = vmatprep.mubr.bf16.mxu0 %v4377_v56  ;;  %v4419_v56 = vld [vmem:[%s6319_s0 + $0x2b0] ss:$28 sps:$4 sm:$0xff]  }
 0x12c   :  { %v5204_v57 = vpop.f32.mrb[12].mxu1 }
 0x12d   :  { %v1987_v58 = vpop.f32.mrb[13].mxu1 }
 0x12e   :  { %v5209_v60 = vpop.f32.mrb[14].mxu1  ;;  %v4421_v58 = vld [vmem:[%s6319_s0 + $0x664] ss:$28 sps:$4 sm:$0xff]  }
 0x12f   :  { %v1990_v63 = vpop.f32.mrb[15].mxu1 }
 0x131   :  { %2200 = vmatmul.mubr.bf16.gmra.mrb[120].mxu1 %v4379_v59 }
 0x132   :  { %2586 = vmatmul.mubr.bf16.gmra.mrb[24].mxu0 %v4380_v61  ;;  %2207 = vmatprep.mubr.bf16.mxu1 %v4381_v62  ;;  %v4423_v61 = vld [vmem:[%s6319_s0 + $0x2ec] ss:$28 sps:$4 sm:$0xff]  }
 0x133   :  { %2593 = vmatprep.mubr.bf16.mxu0 %v4383_v1  ;;  %v4425_v1 = vld [vmem:[%s6319_s0 + $0x660] ss:$28 sps:$4 sm:$0xff]  }
 0x134   :  { %v5220_v2 = vpop.f32.mrb[16].mxu1 }
 0x135   :  { %v1995_v3 = vpop.f32.mrb[17].mxu1 }
 0x136   :  { %v5225_v5 = vpop.f32.mrb[18].mxu1 }
 0x137   :  { %v1998_v8 = vpop.f32.mrb[19].mxu1 }
 0x138   :  { %v4430_v8 = vld [vmem:[%s6319_s0 + $0x324] ss:$28 sps:$4 sm:$0xff]  }
 0x139   :  { %2208 = vmatmul.mubr.bf16.gmra.mrb[124].mxu1 %v4385_v4  ;;  %v4426_v4 = vld [vmem:[%s6319_s0 + $0x2e8] ss:$28 sps:$4 sm:$0xff]  }
 0x13a   :  { %2594 = vmatmul.mubr.bf16.gmra.mrb[28].mxu0 %v4386_v6  ;;  %2440 = vmatprep.mubr.bf16.mxu1 %v4389_v7  ;;  %v4428_v6 = vld [vmem:[%s6319_s0 + $0x69c] ss:$28 sps:$4 sm:$0xff]  }
 0x13b   :  { %2601 = vmatprep.mubr.bf16.mxu0 %v4390_v9 }
 0x13c   :  { %v5236_v10 = vpop.f32.mrb[20].mxu1 }
 0x13d   :  { %v2003_v11 = vpop.f32.mrb[21].mxu1 }
 0x13e   :  { %v5241_v13 = vpop.f32.mrb[22].mxu1 }
 0x13f   :  { %v2006_v15 = vpop.f32.mrb[23].mxu1 }
 0x140   :  { %v4433_v15 = vld [vmem:[%s6319_s0 + $0x320] ss:$28 sps:$4 sm:$0xff]  }
 0x141   :  { %2441 = vmatmul.mubr.bf16.vlgmr.msra.gmra.mrb[96].mxu1 %v4387_v12  ;;  %v4432_v12 = vld [vmem:[%s6319_s0 + $0x698] ss:$28 sps:$4 sm:$0xff]  }
 0x142   :  { %2602 = vmatmul.mubr.bf16.gmra.mrb[32].mxu0 %v4392_v14  ;;  %3846 = vmatpush3.bf16.msra.mxu1 %v5033_v55  ;;  %v4399_v55 = vld [vmem:[%s6319_s0 + $0x208] ss:$28 sps:$4 sm:$0xff]  }
 0x143   :  { %2448 = vmatprep.mubr.bf16.mxu1 %v4394_v16  ;;  %2609 = vmatprep.mubr.bf16.mxu0 %v4396_v17  ;;  %v4435_v16 = vld [vmem:[%s6319_s0 + $0x6d4] ss:$28 sps:$4 sm:$0xff]  }
 0x144   :  { %v5259_v20 = vpop.f32.mrb[24].mxu1  ;;  %3847 = vmatprep.subr.bf16.mxu1 %v4400_v18 }
 0x145   :  { %v2011_v21 = vpop.f32.mrb[25].mxu1 }
 0x146   :  { %v5264_v23 = vpop.f32.mrb[26].mxu1  ;;  %3848 = vmatpush3.bf16.msra.mxu1 %v4400_v18  ;;  %v4437_v18 = vld [vmem:[%s6319_s0 + $0x35c] ss:$28 sps:$4 sm:$0xff]  }
 0x147   :  { %v2014_v25 = vpop.f32.mrb[27].mxu1  ;;  %3849 = vmatprep.subr.bf16.mxu1 %v4407_v19 }
 0x148   :  { %v4443_v25 = vld [vmem:[%s6319_s0 + $0x18] ss:$28 sps:$4 sm:$0xff]  }
 0x149   :  { %2449 = vmatmul.mubr.bf16.gmra.mrb[100].mxu1 %v4398_v22  ;;  %v4439_v22 = vld [vmem:[%s6319_s0 + $0x6d0] ss:$28 sps:$4 sm:$0xff]  }
 0x14a   :  { %2610 = vmatmul.mubr.bf16.gmra.mrb[36].mxu0 %v4399_v55  ;;  %2456 = vmatprep.mubr.bf16.mxu1 %v4401_v24  ;;  %v4440_v24 = vld [vmem:[%s6319_s0 + $0x358] ss:$28 sps:$4 sm:$0xff]  }
 0x14b   :  { %2617 = vmatprep.mubr.bf16.mxu0 %v4403_v26  ;;  %3850 = vmatpush3.bf16.msra.mxu1 %v4407_v19 }
 0x14c   :  { %v5278_v27 = vpop.f32.mrb[28].mxu1  ;;  %3851 = vmatprep.subr.bf16.mxu1 %v4420_v0 }
 0x14d   :  { %v2019_v29 = vpop.f32.mrb[29].mxu1 }
 0x14e   :  { %v5286_v31 = vpop.f32.mrb[30].mxu1 }
 0x14f   :  { %v2022_v36 = vpop.f32.mrb[31].mxu1  ;;  %3852 = vmatpush3.bf16.msra.mxu1 %v4420_v0  ;;  %v4441_v0 = vld [vmem:[%s6319_s0 + $0x394] ss:$28 sps:$4 sm:$0xff]  }
 0x150   :  { %3853 = vmatprep.subr.bf16.mxu1 %v4427_v28  ;;  %v4448_v36 = vld [vmem:[%s6319_s0 + $0x88] ss:$28 sps:$4 sm:$0xff]  }
 0x151   :  { %2457 = vmatmul.mubr.bf16.gmra.mrb[104].mxu1 %v4405_v30  ;;  %v4445_v30 = vld [vmem:[%s6319_s0 + $0x50] ss:$28 sps:$4 sm:$0xff]  }
 0x152   :  { %2618 = vmatmul.mubr.bf16.gmra.mrb[40].mxu0 %v4406_v33  ;;  %2464 = vmatprep.mubr.bf16.mxu1 %v4408_v34  ;;  %v4444_v34 = vld [vmem:[%s6319_s0 + $0x390] ss:$28 sps:$4 sm:$0xff]  }
 0x153   :  { %2625 = vmatprep.mubr.bf16.mxu0 %v4410_v37  ;;  %3854 = vmatpush3.bf16.msra.mxu1 %v4427_v28 }
 0x154   :  { %v5300_v39 = vpop.f32.mrb[32].mxu1  ;;  %3855 = vmatprep.subr.bf16.mxu1 %v4434_v38 }
 0x155   :  { %v2027_v41 = vpop.f32.mrb[33].mxu1 }
 0x156   :  { %v5305_v44 = vpop.f32.mrb[34].mxu1 }
 0x157   :  { %v2030_v47 = vpop.f32.mrb[35].mxu1  ;;  %3856 = vmatpush3.bf16.msra.mxu1 %v4434_v38  ;;  %v4446_v38 = vld [vmem:[%s6319_s0 + $0x3cc] ss:$28 sps:$4 sm:$0xff]  }
 0x158   :  { %v4449_v47 = vld [vmem:[%s6319_s0 + $0x3c8] ss:$28 sps:$4 sm:$0xff]  }
 0x159   :  { %2465 = vmatmul.mubr.bf16.gmra.mrb[108].mxu1 %v4412_v42 }
 0x15a   :  { %2626 = vmatmul.mubr.bf16.gmra.mrb[44].mxu0 %v4413_v45  ;;  %2472 = vmatprep.mubr.bf16.mxu1 %v4414_v46  ;;  %v4450_v45 = vld [vmem:[%s6319_s0 + $0xc0] ss:$28 sps:$4 sm:$0xff]  }
 0x15b   :  { %2633 = vmatprep.mubr.bf16.mxu0 %v4416_v49  ;;  %v4453_v49 = vld [vmem:[%s6319_s0 + $0xf8] ss:$28 sps:$4 sm:$0xff]  }
 0x15c   :  { %v5316_v50 = vpop.f32.mrb[36].mxu1 }
 0x15d   :  { %v2035_v52 = vpop.f32.mrb[37].mxu1 }
 0x15e   :  { %v5321_v54 = vpop.f32.mrb[38].mxu1 }
 0x15f   :  { %v2038_v59 = vpop.f32.mrb[39].mxu1 }
 0x160   :  { %v4455_v59 = vld [vmem:[%s6319_s0 + $0x130] ss:$28 sps:$4 sm:$0xff]  }
 0x161   :  { %2473 = vmatmul.mubr.bf16.gmra.mrb[112].mxu1 %v4418_v53  ;;  %v4451_v53 = vld [vmem:[%s6319_s0 + $0x404] ss:$28 sps:$4 sm:$0xff]  }
 0x162   :  { %2634 = vmatmul.mubr.bf16.gmra.mrb[48].mxu0 %v4419_v56  ;;  %2480 = vmatprep.mubr.bf16.mxu1 %v4421_v58 }
 0x163   :  { %2641 = vmatprep.mubr.bf16.mxu0 %v4423_v61 }
 0x164   :  { %v5332_v62 = vpop.f32.mrb[40].mxu1 }
 0x165   :  { %v2043_v63 = vpop.f32.mrb[41].mxu1 }
 0x166   :  { %v5337_v3 = vpop.f32.mrb[42].mxu1  ;;  %v4454_v63 = vld [vmem:[%s6319_s0 + $0x400] ss:$28 sps:$4 sm:$0xff]  }
 0x167   :  { %v2046_v7 = vpop.f32.mrb[43].mxu1 }
 0x169   :  { %2481 = vmatmul.mubr.bf16.gmra.mrb[116].mxu1 %v4425_v1  ;;  %v4458_v1 = vld [vmem:[%s6319_s0 + $0x168] ss:$28 sps:$4 sm:$0xff]  }
 0x16a   :  { %2642 = vmatmul.mubr.bf16.gmra.mrb[52].mxu0 %v4426_v4  ;;  %2488 = vmatprep.mubr.bf16.mxu1 %v4428_v6  ;;  %v4456_v6 = vld [vmem:[%s6319_s0 + $0x43c] ss:$28 sps:$4 sm:$0xff]  }
 0x16b   :  { %2649 = vmatprep.mubr.bf16.mxu0 %v4430_v8 }
 0x16c   :  { %v5348_v9 = vpop.f32.mrb[44].mxu1 }
 0x16d   :  { %v2051_v11 = vpop.f32.mrb[45].mxu1 }
 0x16e   :  { %v5353_v14 = vpop.f32.mrb[46].mxu1  ;;  %v4460_v11 = vld [vmem:[%s6319_s0 + $0x1a0] ss:$28 sps:$4 sm:$0xff]  }
 0x16f   :  { %v2054_v17 = vpop.f32.mrb[47].mxu1 }
 0x171   :  { %2489 = vmatmul.mubr.bf16.gmra.mrb[120].mxu1 %v4432_v12 }
 0x172   :  { %2650 = vmatmul.mubr.bf16.gmra.mrb[56].mxu0 %v4433_v15  ;;  %2496 = vmatprep.mubr.bf16.mxu1 %v4435_v16  ;;  %v4459_v15 = vld [vmem:[%s6319_s0 + $0x438] ss:$28 sps:$4 sm:$0xff]  }
 0x173   :  { %2657 = vmatprep.mubr.bf16.mxu0 %v4437_v18  ;;  %v4463_v16 = vld [vmem:[%s6319_s0 + $0x1d8] ss:$28 sps:$4 sm:$0xff]  }
 0x174   :  { %v5364_v19 = vpop.f32.mrb[48].mxu1  ;;  %v4461_v18 = vld [vmem:[%s6319_s0 + $0x474] ss:$28 sps:$4 sm:$0xff]  }
 0x175   :  { %v2059_v21 = vpop.f32.mrb[49].mxu1 }
 0x176   :  { %v5369_v55 = vpop.f32.mrb[50].mxu1 }
 0x177   :  { %v2062_v26 = vpop.f32.mrb[51].mxu1 }
 0x178   :  { %v4464_v26 = vld [vmem:[%s6319_s0 + $0x470] ss:$28 sps:$4 sm:$0xff]  }
 0x179   :  { %2497 = vmatmul.mubr.bf16.gmra.mrb[124].mxu1 %v4439_v22 }
 0x17a   :  { %2658 = vmatmul.mubr.bf16.gmra.mrb[60].mxu0 %v4440_v24  ;;  %3857 = vmatprep.mubr.msk.bf16.mxu1 %vm1830_vm0, %v4443_v25  ;;  %v4465_v24 = vld [vmem:[%s6319_s0 + $0x210] ss:$28 sps:$4 sm:$0xff]  }
 0x17b   :  { %2665 = vmatprep.mubr.bf16.mxu0 %v4441_v0  ;;  %v4468_v0 = vld [vmem:[%s6319_s0 + $0x248] ss:$28 sps:$4 sm:$0xff]  }
 0x17c   :  { %v5381_v28 = vpop.f32.mrb[52].mxu1 }
 0x17d   :  { %v2067_v29 = vpop.f32.mrb[53].mxu1 }
 0x17e   :  { %v5386_v33 = vpop.f32.mrb[54].mxu1 }
 0x17f   :  { %v2070_v37 = vpop.f32.mrb[55].mxu1 }
 0x180   :  { %v4470_v37 = vld [vmem:[%s6319_s0 + $0x280] ss:$28 sps:$4 sm:$0xff]  }
 0x181   :  { %3858 = vmatmul.mubr.msk.bf16.vlgmr.msra.gmra.mrb[128].mxu1 %vm1830_vm0, %v4445_v30  ;;  %v4466_v30 = vld [vmem:[%s6319_s0 + $0x4ac] ss:$28 sps:$4 sm:$0xff]  }
 0x182   :  { %2666 = vmatmul.mubr.bf16.gmra.mrb[64].mxu0 %v4444_v34  ;;  %3861 = vmatprep.mubr.msk.bf16.mxu1 %vm1830_vm0, %v4448_v36 }
 0x183   :  { %2673 = vmatprep.mubr.bf16.mxu0 %v4446_v38 }
 0x184   :  { %v5399_v41 = vpop.f32.mrb[56].mxu1 }
 0x185   :  { %v2075_v42 = vpop.f32.mrb[57].mxu1 }
 0x186   :  { %v5404_v46 = vpop.f32.mrb[58].mxu1  ;;  %v4469_v42 = vld [vmem:[%s6319_s0 + $0x4a8] ss:$28 sps:$4 sm:$0xff]  }
 0x187   :  { %v2078_v52 = vpop.f32.mrb[59].mxu1 }
 0x189   :  { %3862 = vmatmul.mubr.msk.bf16.gmra.mrb[132].mxu1 %vm1830_vm0, %v4450_v45  ;;  %v4473_v45 = vld [vmem:[%s6319_s0 + $0x2b8] ss:$28 sps:$4 sm:$0xff]  }
 0x18a   :  { %2674 = vmatmul.mubr.bf16.gmra.mrb[68].mxu0 %v4449_v47  ;;  %3865 = vmatprep.mubr.msk.bf16.mxu1 %vm1830_vm0, %v4453_v49  ;;  %v4471_v49 = vld [vmem:[%s6319_s0 + $0x4e4] ss:$28 sps:$4 sm:$0xff]  }
 0x18b   :  { %2681 = vmatprep.mubr.bf16.mxu0 %v4451_v53 }
 0x18c   :  { %v5417_v56 = vpop.f32.mrb[60].mxu1 }
 0x18d   :  { %v2083_v58 = vpop.f32.mrb[61].mxu1 }
 0x18e   :  { %v5422_v61 = vpop.f32.mrb[62].mxu1  ;;  %v4475_v58 = vld [vmem:[%s6319_s0 + $0x2f0] ss:$28 sps:$4 sm:$0xff]  }
 0x18f   :  { %v2086_v4 = vpop.f32.mrb[63].mxu1 }
 0x191   :  { %3866 = vmatmul.mubr.msk.bf16.gmra.mrb[136].mxu1 %vm1830_vm0, %v4455_v59 }
 0x192   :  { %2682 = vmatmul.mubr.bf16.gmra.mrb[72].mxu0 %v4454_v63  ;;  %3869 = vmatprep.mubr.msk.bf16.mxu1 %vm1830_vm0, %v4458_v1  ;;  %v4474_v63 = vld [vmem:[%s6319_s0 + $0x4e0] ss:$28 sps:$4 sm:$0xff]   ;;  %v4478_v1 = vld [vmem:[%s6319_s0 + $0x328] ss:$28 sps:$4 sm:$0xff]  }
 0x193   :  { %2689 = vmatprep.mubr.bf16.mxu0 %v4456_v6  ;;  %v4476_v6 = vld [vmem:[%s6319_s0 + $0x51c] ss:$28 sps:$4 sm:$0xff]  }
 0x194   :  { %v5435_v7 = vpop.f32.mrb[64].mxu1 }
 0x195   :  { %v2091_v8 = vpop.f32.mrb[65].mxu1 }
 0x196   :  { %v5440_v12 = vpop.f32.mrb[66].mxu1 }
 0x197   :  { %v2094_v17 = vpop.f32.mrb[67].mxu1 }
 0x198   :  { %v4479_v17 = vld [vmem:[%s6319_s0 + $0x518] ss:$28 sps:$4 sm:$0xff]  }
 0x199   :  { %3870 = vmatmul.mubr.msk.bf16.gmra.mrb[140].mxu1 %vm1830_vm0, %v4460_v11 }
 0x19a   :  { %2690 = vmatmul.mubr.bf16.gmra.mrb[76].mxu0 %v4459_v15  ;;  %3873 = vmatprep.mubr.msk.bf16.mxu1 %vm1830_vm0, %v4463_v16  ;;  %v4480_v15 = vld [vmem:[%s6319_s0 + $0x360] ss:$28 sps:$4 sm:$0xff]  }
 0x19b   :  { %2697 = vmatprep.mubr.bf16.mxu0 %v4461_v18  ;;  %v4483_v18 = vld [vmem:[%s6319_s0 + $0x398] ss:$28 sps:$4 sm:$0xff]  }
 0x19c   :  { %v5453_v21 = vpop.f32.mrb[68].mxu1 }
 0x19d   :  { %v2099_v22 = vpop.f32.mrb[69].mxu1 }
 0x19e   :  { %v5458_v25 = vpop.f32.mrb[70].mxu1 }
 0x19f   :  { %v2102_v29 = vpop.f32.mrb[71].mxu1 }
 0x1a0   :  { %v4485_v29 = vld [vmem:[%s6319_s0 + $0x3d0] ss:$28 sps:$4 sm:$0xff]  }
 0x1a1   :  { %3874 = vmatmul.mubr.msk.bf16.gmra.mrb[144].mxu1 %vm1830_vm0, %v4465_v24  ;;  %v4481_v24 = vld [vmem:[%s6319_s0 + $0x554] ss:$28 sps:$4 sm:$0xff]  }
 0x1a2   :  { %2698 = vmatmul.mubr.bf16.gmra.mrb[80].mxu0 %v4464_v26  ;;  %3877 = vmatprep.mubr.msk.bf16.mxu1 %vm1830_vm0, %v4468_v0 }
 0x1a3   :  { %2705 = vmatprep.mubr.bf16.mxu0 %v4466_v30 }
 0x1a4   :  { %v5471_v34 = vpop.f32.mrb[72].mxu1 }
 0x1a5   :  { %v2107_v36 = vpop.f32.mrb[73].mxu1 }
 0x1a6   :  { %v5476_v38 = vpop.f32.mrb[74].mxu1  ;;  %v4484_v36 = vld [vmem:[%s6319_s0 + $0x550] ss:$28 sps:$4 sm:$0xff]  }
 0x1a7   :  { %v2110_v47 = vpop.f32.mrb[75].mxu1 }
 0x1a9   :  { %3878 = vmatmul.mubr.msk.bf16.gmra.mrb[148].mxu1 %vm1830_vm0, %v4470_v37  ;;  %v4488_v37 = vld [vmem:[%s6319_s0 + $0x408] ss:$28 sps:$4 sm:$0xff]  }
 0x1aa   :  { %2706 = vmatmul.mubr.bf16.gmra.mrb[84].mxu0 %v4469_v42  ;;  %3881 = vmatprep.mubr.msk.bf16.mxu1 %vm1830_vm0, %v4473_v45  ;;  %v4486_v45 = vld [vmem:[%s6319_s0 + $0x58c] ss:$28 sps:$4 sm:$0xff]  }
 0x1ab   :  { %2713 = vmatprep.mubr.bf16.mxu0 %v4471_v49 }
 0x1ac   :  { %v5489_v52 = vpop.f32.mrb[76].mxu1 }
 0x1ad   :  { %v2115_v53 = vpop.f32.mrb[77].mxu1 }
 0x1ae   :  { %v5494_v59 = vpop.f32.mrb[78].mxu1  ;;  %v4490_v53 = vld [vmem:[%s6319_s0 + $0x440] ss:$28 sps:$4 sm:$0xff]  }
 0x1af   :  { %v2118_v4 = vpop.f32.mrb[79].mxu1 }
 0x1b1   :  { %3882 = vmatmul.mubr.msk.bf16.gmra.mrb[152].mxu1 %vm1830_vm0, %v4475_v58 }
 0x1b2   :  { %2714 = vmatmul.mubr.bf16.gmra.mrb[88].mxu0 %v4474_v63  ;;  %3885 = vmatprep.mubr.msk.bf16.mxu1 %vm1830_vm0, %v4478_v1  ;;  %v4489_v63 = vld [vmem:[%s6319_s0 + $0x588] ss:$28 sps:$4 sm:$0xff]   ;;  %v4493_v1 = vld [vmem:[%s6319_s0 + $0x478] ss:$28 sps:$4 sm:$0xff]  }
 0x1b3   :  { %2721 = vmatprep.mubr.bf16.mxu0 %v4476_v6  ;;  %v4491_v6 = vld [vmem:[%s6319_s0 + $0x5c4] ss:$28 sps:$4 sm:$0xff]  }
 0x1b4   :  { %v5507_v8 = vpop.f32.mrb[80].mxu1 }
 0x1b5   :  { %v2123_v11 = vpop.f32.mrb[81].mxu1 }
 0x1b6   :  { %v5512_v16 = vpop.f32.mrb[82].mxu1 }
 0x1b7   :  { %v2126_v22 = vpop.f32.mrb[83].mxu1 }
 0x1b8   :  { %v4494_v22 = vld [vmem:[%s6319_s0 + $0x5c0] ss:$28 sps:$4 sm:$0xff]  }
 0x1b9   :  { %3886 = vmatmul.mubr.msk.bf16.gmra.mrb[156].mxu1 %vm1830_vm0, %v4480_v15 }
 0x1ba   :  { %2722 = vmatmul.mubr.bf16.gmra.mrb[92].mxu0 %v4479_v17  ;;  %3889 = vmatprep.mubr.msk.bf16.mxu1 %vm1830_vm0, %v4483_v18  ;;  %v4495_v17 = vld [vmem:[%s6319_s0 + $0x4b0] ss:$28 sps:$4 sm:$0xff]  }
 0x1bb   :  { %2729 = vmatprep.mubr.bf16.mxu0 %v4481_v24  ;;  %v4498_v24 = vld [vmem:[%s6319_s0 + $0x4e8] ss:$28 sps:$4 sm:$0xff]  }
 0x1bc   :  { %v5525_v26 = vpop.f32.mrb[84].mxu1 }
 0x1bd   :  { %v2131_v0 = vpop.f32.mrb[85].mxu1 }
 0x1be   :  { %v5530_v30 = vpop.f32.mrb[86].mxu1 }
 0x1bf   :  { %v2134_v42 = vpop.f32.mrb[87].mxu1 }
 0x1c1   :  { %3890 = vmatmul.mubr.msk.bf16.gmra.mrb[160].mxu1 %vm1830_vm0, %v4485_v29  ;;  %v4496_v29 = vld [vmem:[%s6319_s0 + $0x5fc] ss:$28 sps:$4 sm:$0xff]  }
 0x1c2   :  { %2730 = vmatmul.mubr.bf16.gmra.mrb[96].mxu0 %v4484_v36  ;;  %3893 = vmatprep.mubr.msk.bf16.mxu1 %vm1830_vm0, %v4488_v37  ;;  %v4500_v37 = vld [vmem:[%s6319_s0 + $0x520] ss:$28 sps:$4 sm:$0xff]  }
 0x1c3   :  { %2737 = vmatprep.mubr.bf16.mxu0 %v4486_v45 }
 0x1c4   :  { %v5543_v47 = vpop.f32.mrb[88].mxu1 }
 0x1c5   :  { %v2139_v49 = vpop.f32.mrb[89].mxu1 }
 0x1c6   :  { %v5548_v58 = vpop.f32.mrb[90].mxu1  ;;  %v4499_v49 = vld [vmem:[%s6319_s0 + $0x5f8] ss:$28 sps:$4 sm:$0xff]  }
 0x1c7   :  { %v2142_v4 = vpop.f32.mrb[91].mxu1 }
 0x1c9   :  { %3894 = vmatmul.mubr.msk.bf16.gmra.mrb[164].mxu1 %vm1830_vm0, %v4490_v53  ;;  %v4503_v53 = vld [vmem:[%s6319_s0 + $0x558] ss:$28 sps:$4 sm:$0xff]  }
 0x1ca   :  { %2738 = vmatmul.mubr.bf16.gmra.mrb[100].mxu0 %v4489_v63  ;;  %3897 = vmatprep.mubr.msk.bf16.mxu1 %vm1830_vm0, %v4493_v1  ;;  %v4501_v1 = vld [vmem:[%s6319_s0 + $0x634] ss:$28 sps:$4 sm:$0xff]  }
 0x1cb   :  { %2745 = vmatprep.mubr.bf16.mxu0 %v4491_v6 }
 0x1cc   :  { %v5561_v11 = vpop.f32.mrb[92].mxu1 }
 0x1cd   :  { %v2147_v15 = vpop.f32.mrb[93].mxu1 }
 0x1ce   :  { %v5566_v18 = vpop.f32.mrb[94].mxu1  ;;  %v4505_v15 = vld [vmem:[%s6319_s0 + $0x590] ss:$28 sps:$4 sm:$0xff]  }
 0x1cf   :  { %v2150_v0 = vpop.f32.mrb[95].mxu1 }
 0x1d1   :  { %3898 = vmatmul.mubr.msk.bf16.gmra.mrb[168].mxu1 %vm1830_vm0, %v4495_v17 }
 0x1d2   :  { %2746 = vmatmul.mubr.bf16.gmra.mrb[104].mxu0 %v4494_v22  ;;  %3901 = vmatprep.mubr.msk.bf16.mxu1 %vm1830_vm0, %v4498_v24  ;;  %v4508_v24 = vld [vmem:[%s6319_s0 + $0x5c8] ss:$28 sps:$4 sm:$0xff]  }
 0x1d3   :  { %2753 = vmatprep.mubr.bf16.mxu0 %v4496_v29  ;;  %v4506_v29 = vld [vmem:[%s6319_s0 + $0x66c] ss:$28 sps:$4 sm:$0xff]  }
 0x1d5   :  { %v2539_v36 = vpop.f32.mrb[0].mxu0 }
 0x1d6   :  { %v5583_v42 = vadd.f32 %v2539_v36, %v5156_v32  ;;  %v2541_v45 = vpop.f32.mrb[1].mxu0 }
 0x1d7   :  { %v2542_v63 = vpop.f32.mrb[2].mxu0  ;;  %v4510_v45 = vld [vmem:[%s6319_s0 + $0x600] ss:$28 sps:$4 sm:$0xff]  }
 0x1d8   :  { %v5595_v4 = vadd.f32 %v2542_v63, %v5161_v35  ;;  %v2544_v6 = vpop.f32.mrb[3].mxu0  ;;  %v4504_v35 = vld [vmem:[%s6319_s0 + $0x630] ss:$28 sps:$4 sm:$0xff]   ;;  %v4513_v63 = vld [vmem:[%s6319_s0 + $0x638] ss:$28 sps:$4 sm:$0xff]  }
 0x1d9   :  { %3902 = vmatmul.mubr.msk.bf16.gmra.mrb[172].mxu1 %vm1830_vm0, %v4500_v37  ;;  %v4511_v6 = vld [vmem:[%s6319_s0 + $0x6a4] ss:$28 sps:$4 sm:$0xff]  }
 0x1da   :  { %2754 = vmatmul.mubr.bf16.gmra.mrb[108].mxu0 %v4499_v49  ;;  %3905 = vmatprep.mubr.msk.bf16.mxu1 %vm1830_vm0, %v4503_v53 }
 0x1db   :  { %2761 = vmatprep.mubr.bf16.mxu0 %v4501_v1 }
 0x1dd   :  { %v2547_v32 = vpop.f32.mrb[4].mxu0 }
 0x1de   :  { %v5603_v17 = vadd.f32 %v2547_v32, %v5172_v40  ;;  %v2549_v22 = vpop.f32.mrb[5].mxu0 }
 0x1df   :  { %v2550_v0 = vpop.f32.mrb[6].mxu0  ;;  %v4515_v22 = vld [vmem:[%s6319_s0 + $0x670] ss:$28 sps:$4 sm:$0xff]  }
 0x1e0   :  { %v5615_v36 = vadd.f32 %v2550_v0, %v5177_v43  ;;  %v2552_v37 = vpop.f32.mrb[7].mxu0  ;;  %v4509_v43 = vld [vmem:[%s6319_s0 + $0x668] ss:$28 sps:$4 sm:$0xff]  }
 0x1e1   :  { %3906 = vmatmul.mubr.msk.bf16.gmra.mrb[176].mxu1 %vm1830_vm0, %v4505_v15  ;;  %v4518_v0 = vld [vmem:[%s6319_s0 + $0x6a8] ss:$28 sps:$4 sm:$0xff]   ;;  %v4516_v37 = vld [vmem:[%s6319_s0 + $0x6dc] ss:$28 sps:$4 sm:$0xff]  }
 0x1e2   :  { %2762 = vmatmul.mubr.bf16.gmra.mrb[112].mxu0 %v4504_v35  ;;  %3909 = vmatprep.mubr.msk.bf16.mxu1 %vm1830_vm0, %v4508_v24 }
 0x1e3   :  { %2769 = vmatprep.mubr.bf16.mxu0 %v4506_v29 }
 0x1e5   :  { %v2555_v40 = vpop.f32.mrb[8].mxu0 }
 0x1e6   :  { %v5623_v49 = vadd.f32 %v2555_v40, %v5188_v48  ;;  %v2557_v53 = vpop.f32.mrb[9].mxu0 }
 0x1e7   :  { %v2558_v1 = vpop.f32.mrb[10].mxu0  ;;  %v4520_v53 = vld [vmem:[%s6319_s0 + $0x6e0] ss:$28 sps:$4 sm:$0xff]  }
 0x1e8   :  { %v5635_v32 = vadd.f32 %v2558_v1, %v5193_v51  ;;  %v2560_v15 = vpop.f32.mrb[11].mxu0  ;;  %v4514_v51 = vld [vmem:[%s6319_s0 + $0x6a0] ss:$28 sps:$4 sm:$0xff]  }
 0x1e9   :  { %3910 = vmatmul.mubr.msk.bf16.gmra.mrb[180].mxu1 %vm1830_vm0, %v4510_v45 }
 0x1ea   :  { %2770 = vmatmul.mubr.bf16.gmra.mrb[116].mxu0 %v4509_v43  ;;  %3913 = vmatprep.mubr.msk.bf16.mxu1 %vm1830_vm0, %v4513_v63 }
 0x1eb   :  { %2777 = vmatprep.mubr.bf16.mxu0 %v4511_v6 }
 0x1ed   :  { %v2563_v48 = vpop.f32.mrb[12].mxu0 }
 0x1ee   :  { %v5643_v35 = vadd.f32 %v2563_v48, %v5204_v57  ;;  %v2565_v24 = vpop.f32.mrb[13].mxu0 }
 0x1ef   :  { %v2566_v29 = vpop.f32.mrb[14].mxu0 }
 0x1f0   :  { %v5655_v40 = vadd.f32 %v2566_v29, %v5209_v60  ;;  %v2568_v45 = vpop.f32.mrb[15].mxu0  ;;  %v4519_v60 = vld [vmem:[%s6319_s0 + $0x6d8] ss:$28 sps:$4 sm:$0xff]  }
 0x1f1   :  { %3914 = vmatmul.mubr.msk.bf16.gmra.mrb[184].mxu1 %vm1830_vm0, %v4515_v22 }
 0x1f2   :  { %2778 = vmatmul.mubr.bf16.gmra.mrb[120].mxu0 %v4514_v51  ;;  %3917 = vmatprep.mubr.msk.bf16.mxu1 %vm1830_vm0, %v4518_v0 }
 0x1f3   :  { %2785 = vmatprep.mubr.bf16.mxu0 %v4516_v37 }
 0x1f5   :  { %v2571_v57 = vpop.f32.mrb[16].mxu0 }
 0x1f6   :  { %v5663_v43 = vadd.f32 %v2571_v57, %v5220_v2  ;;  %v2573_v63 = vpop.f32.mrb[17].mxu0 }
 0x1f7   :  { %v2574_v1 = vpop.f32.mrb[18].mxu0 }
 0x1f8   :  { %v5669_v6 = vadd.f32 %v2574_v1, %v5225_v5  ;;  %v2576_v15 = vpop.f32.mrb[19].mxu0 }
 0x1f9   :  { %3918 = vmatmul.mubr.msk.bf16.gmra.mrb[188].mxu1 %vm1830_vm0, %v4520_v53 }
 0x1fa   :  { %2786 = vmatmul.mubr.bf16.gmra.mrb[124].mxu0 %v4519_v60 }
 0x1fd   :  { %v2579_v48 = vpop.f32.mrb[20].mxu0 }
 0x1fe   :  { %v5673_v22 = vadd.f32 %v2579_v48, %v5236_v10  ;;  %v2581_v24 = vpop.f32.mrb[21].mxu0 }
 0x1ff   :  { %v2582_v2 = vpop.f32.mrb[22].mxu0 }
 0x200   :  { %v5676_v51 = vadd.f32 %v2582_v2, %v5241_v13  ;;  %v2584_v0 = vpop.f32.mrb[23].mxu0 }
 0x205   :  { %v2587_v29 = vpop.f32.mrb[24].mxu0 }
 0x206   :  { %v5679_v37 = vadd.f32 %v2587_v29, %v5259_v20  ;;  %v2589_v5 = vpop.f32.mrb[25].mxu0 }
 0x207   :  { %v2590_v45 = vpop.f32.mrb[26].mxu0 }
 0x208   :  { %v5682_v57 = vadd.f32 %v2590_v45, %v5264_v23  ;;  %v2592_v53 = vpop.f32.mrb[27].mxu0 }
 0x20d   :  { %v2595_v63 = vpop.f32.mrb[28].mxu0 }
 0x20e   :  { %v5685_v10 = vadd.f32 %v2595_v63, %v5278_v27  ;;  %v2597_v60 = vpop.f32.mrb[29].mxu0 }
 0x20f   :  { %v2598_v1 = vpop.f32.mrb[30].mxu0 }
 0x210   :  { %v5688_v13 = vadd.f32 %v2598_v1, %v5286_v31  ;;  %v2600_v15 = vpop.f32.mrb[31].mxu0 }
 0x214   :  { %v5690_v48 = vpop.f32.mrb[96].mxu1 }
 0x215   :  { %v2603_v20 = vpop.f32.mrb[32].mxu0  ;;  %v2444_v24 = vpop.f32.mrb[97].mxu1 }
 0x216   :  { %v5693_v2 = vadd.f32 %v2603_v20, %v5300_v39  ;;  %v2605_v23 = vpop.f32.mrb[33].mxu0  ;;  %v5695_v0 = vpop.f32.mrb[98].mxu1 }
 0x217   :  { %6323 = vst [vmem:[#allocation2_spill] sm:$0xff] %v5695_v0  ;;  %v2606_v29 = vpop.f32.mrb[34].mxu0  ;;  %v2447_v5 = vpop.f32.mrb[99].mxu1 }
 0x218   :  { %v5698_v27 = vadd.f32 %v2606_v29, %v5305_v44  ;;  %v2608_v45 = vpop.f32.mrb[35].mxu0 }
 0x21c   :  { %v5700_v53 = vpop.f32.mrb[100].mxu1 }
 0x21d   :  { %6324 = vst [vmem:[#allocation3_spill] sm:$0xff] %v5700_v53  ;;  %v2611_v31 = vpop.f32.mrb[36].mxu0  ;;  %v2452_v63 = vpop.f32.mrb[101].mxu1 }
 0x21e   :  { %v5703_v60 = vadd.f32 %v2611_v31, %v5316_v50  ;;  %v2613_v1 = vpop.f32.mrb[37].mxu0  ;;  %v5705_v15 = vpop.f32.mrb[102].mxu1 }
 0x21f   :  { %6325 = vst [vmem:[#allocation4_spill] sm:$0xff] %v5705_v15  ;;  %v2614_v39 = vpop.f32.mrb[38].mxu0  ;;  %v2455_v20 = vpop.f32.mrb[103].mxu1 }
 0x220   :  { %v5708_v24 = vadd.f32 %v2614_v39, %v5321_v54  ;;  %v2616_v23 = vpop.f32.mrb[39].mxu0 }
 0x224   :  { %v5710_v5 = vpop.f32.mrb[104].mxu1 }
 0x225   :  { %6326 = vst [vmem:[#allocation5_spill] sm:$0xff] %v5710_v5  ;;  %v2619_v44 = vpop.f32.mrb[40].mxu0  ;;  %v2460_v29 = vpop.f32.mrb[105].mxu1 }
 0x226   :  { %v5713_v45 = vadd.f32 %v2619_v44, %v5332_v62  ;;  %v2621_v63 = vpop.f32.mrb[41].mxu0  ;;  %v5715_v53 = vpop.f32.mrb[106].mxu1 }
 0x227   :  { %6327 = vst [vmem:[#allocation6_spill] sm:$0xff] %v5715_v53  ;;  %v2622_v50 = vpop.f32.mrb[42].mxu0  ;;  %v2463_v31 = vpop.f32.mrb[107].mxu1 }
 0x228   :  { %v5718_v1 = vadd.f32 %v2622_v50, %v5337_v3  ;;  %v2624_v20 = vpop.f32.mrb[43].mxu0 }
 0x22c   :  { %v5720_v15 = vpop.f32.mrb[108].mxu1 }
 0x22d   :  { %6328 = vst [vmem:[#allocation7_spill] sm:$0xff] %v5720_v15  ;;  %v2627_v54 = vpop.f32.mrb[44].mxu0  ;;  %v2468_v39 = vpop.f32.mrb[109].mxu1 }
 0x22e   :  { %v5723_v23 = vadd.f32 %v2627_v54, %v5348_v9  ;;  %v2629_v29 = vpop.f32.mrb[45].mxu0  ;;  %v5725_v5 = vpop.f32.mrb[110].mxu1 }
 0x22f   :  { %6329 = vst [vmem:[#allocation8_spill] sm:$0xff] %v5725_v5  ;;  %v2630_v62 = vpop.f32.mrb[46].mxu0  ;;  %v2471_v44 = vpop.f32.mrb[111].mxu1 }
 0x230   :  { %v5728_v63 = vadd.f32 %v2630_v62, %v5353_v14  ;;  %v2632_v31 = vpop.f32.mrb[47].mxu0 }
 0x234   :  { %v5730_v53 = vpop.f32.mrb[112].mxu1 }
 0x235   :  { %6330 = vst [vmem:[#allocation9_spill] sm:$0xff] %v5730_v53  ;;  %v2635_v3 = vpop.f32.mrb[48].mxu0  ;;  %v2476_v50 = vpop.f32.mrb[113].mxu1 }
 0x236   :  { %v5733_v20 = vadd.f32 %v2635_v3, %v5364_v19  ;;  %v2637_v39 = vpop.f32.mrb[49].mxu0  ;;  %v5735_v15 = vpop.f32.mrb[114].mxu1 }
 0x237   :  { %6331 = vst [vmem:[#allocation10_spill] sm:$0xff] %v5735_v15  ;;  %v2638_v9 = vpop.f32.mrb[50].mxu0  ;;  %v2479_v54 = vpop.f32.mrb[115].mxu1 }
 0x238   :  { %v5738_v29 = vadd.f32 %v2638_v9, %v5369_v55  ;;  %v2640_v44 = vpop.f32.mrb[51].mxu0 }
 0x23c   :  { %v5740_v5 = vpop.f32.mrb[116].mxu1 }
 0x23d   :  { %6332 = vst [vmem:[#allocation11_spill] sm:$0xff] %v5740_v5  ;;  %v2643_v14 = vpop.f32.mrb[52].mxu0  ;;  %v2484_v62 = vpop.f32.mrb[117].mxu1 }
 0x23e   :  { %v5743_v31 = vadd.f32 %v2643_v14, %v5381_v28  ;;  %v2645_v50 = vpop.f32.mrb[53].mxu0  ;;  %v5745_v53 = vpop.f32.mrb[118].mxu1 }
 0x23f   :  { %6333 = vst [vmem:[#allocation12_spill] sm:$0xff] %v5745_v53  ;;  %v2646_v19 = vpop.f32.mrb[54].mxu0  ;;  %v2487_v3 = vpop.f32.mrb[119].mxu1 }
 0x240   :  { %v5748_v39 = vadd.f32 %v2646_v19, %v5386_v33  ;;  %v2648_v54 = vpop.f32.mrb[55].mxu0 }
 0x244   :  { %v5750_v15 = vpop.f32.mrb[120].mxu1 }
 0x245   :  { %6334 = vst [vmem:[#allocation13_spill] sm:$0xff] %v5750_v15  ;;  %v2651_v55 = vpop.f32.mrb[56].mxu0  ;;  %v2492_v9 = vpop.f32.mrb[121].mxu1 }
 0x246   :  { %v5753_v44 = vadd.f32 %v2651_v55, %v5399_v41  ;;  %v2653_v62 = vpop.f32.mrb[57].mxu0  ;;  %v5755_v5 = vpop.f32.mrb[122].mxu1 }
 0x247   :  { %6335 = vst [vmem:[#allocation14_spill] sm:$0xff] %v5755_v5  ;;  %v2654_v28 = vpop.f32.mrb[58].mxu0  ;;  %v2495_v14 = vpop.f32.mrb[123].mxu1 }
 0x248   :  { %v5758_v50 = vadd.f32 %v2654_v28, %v5404_v46  ;;  %v2656_v3 = vpop.f32.mrb[59].mxu0 }
 0x24c   :  { %v5760_v53 = vpop.f32.mrb[124].mxu1 }
 0x24d   :  { %6336 = vst [vmem:[#allocation15_spill] sm:$0xff] %v5760_v53  ;;  %v2659_v33 = vpop.f32.mrb[60].mxu0  ;;  %v2500_v19 = vpop.f32.mrb[125].mxu1 }
 0x24e   :  { %v5763_v54 = vadd.f32 %v2659_v33, %v5417_v56  ;;  %v2661_v9 = vpop.f32.mrb[61].mxu0  ;;  %v5765_v15 = vpop.f32.mrb[126].mxu1 }
 0x24f   :  { %6337 = vst [vmem:[#allocation16_spill] sm:$0xff] %v5765_v15  ;;  %v2662_v41 = vpop.f32.mrb[62].mxu0  ;;  %v2503_v55 = vpop.f32.mrb[127].mxu1 }
 0x250   :  { %v5768_v62 = vadd.f32 %v2662_v41, %v5422_v61  ;;  %v2664_v14 = vpop.f32.mrb[63].mxu0 }
 0x251   :  { %v4522_v14 = vmov 0.0  }
 0x252   :  { %20 = vst.msk [vmem:[%s6321_s3] sm:$0x1] %vm19_vm2, %v4522_v14  ;;  %21 = vst.msk [vmem:[%s6322_s4] sm:$0x1] %vm19_vm2, %v4522_v14 }
 0x254   :  { %v3859_v5 = vpop.f32.mrb[128].mxu1 }
 0x255   :  { %v2667_v46 = vpop.f32.mrb[64].mxu0  ;;  %v2837_v28 = vadd.f32 %v5603_v17, %v3859_v5  ;;  %v2828_v3 = vpop.f32.mrb[129].mxu1 }
 0x256   :  { %v5772_v19 = vadd.f32 %v2667_v46, %v5435_v7  ;;  %v2669_v56 = vpop.f32.mrb[65].mxu0  ;;  %v2829_v33 = vadd.f32 %v5583_v42, %v2828_v3  ;;  %v3860_v9 = vpop.f32.mrb[130].mxu1 }
 0x257   :  { %3086 = vst.msk [vmem:[%s6320_s2 + $0x10] sm:$0xff] %vm3083_vm1, %v2837_v28  ;;  %v2670_v61 = vpop.f32.mrb[66].mxu0  ;;  %v2840_v41 = vadd.f32 %v5615_v36, %v3860_v9  ;;  %v2831_v55 = vpop.f32.mrb[131].mxu1  ;;  %v3288_v5 = vmul.f32 %v2837_v28, %v2837_v28 }
 0x258   :  { %6338 = vst [vmem:[#allocation17_spill] sm:$0xff] %v5772_v19  ;;  %3084 = vst.msk [vmem:[%s6320_s2] sm:$0xff] %vm3083_vm1, %v2829_v33  ;;  %v3286_v7 = vmul.f32 %v2829_v33, %v2829_v33  ;;  %v5793_v42 = vadd.f32 %v2670_v61, %v5440_v12  ;;  %v2672_v17 = vpop.f32.mrb[67].mxu0  ;;  %v2832_v36 = vadd.f32 %v5595_v4, %v2831_v55  ;;  %v3149_v46 = vsel %vm3083_vm1, %v2829_v33, 0.0 }
 0x259   :  { %3087 = vst.msk [vmem:[%s6320_s2 + $0x18] sm:$0xff] %vm3083_vm1, %v2840_v41  ;;  %v3289_v56 = vmul.f32 %v2840_v41, %v2840_v41  ;;  %v3152_v4 = vsel %vm3083_vm1, %v2837_v28, 0.0  ;;  %v3353_v0 = vsel %vm3083_vm1, %v3288_v5, 0.0  ;;  %v3154_v19 = vsel %vm3083_vm1, %v2840_v41, 0.0 }
 0x25a   :  { %6339 = vst [vmem:[#allocation18_spill] sm:$0xff] %v5793_v42  ;;  %3085 = vst.msk [vmem:[%s6320_s2 + $0x8] sm:$0xff] %vm3083_vm1, %v2832_v36  ;;  %v3150_v3 = vsel %vm3083_vm1, %v2832_v36, 0.0  ;;  %v3287_v12 = vmul.f32 %v2832_v36, %v2832_v36  ;;  %v3350_v61 = vsel %vm3083_vm1, %v3286_v7, 0.0 }
 0x25b   :  { %v3151_v9 = vadd.f32 %v3150_v3, %v3149_v46  ;;  %v3355_v3 = vsel %vm3083_vm1, %v3289_v56, 0.0 }
 0x25c   :  { %v3351_v55 = vsel %vm3083_vm1, %v3287_v12, 0.0  ;;  %v3863_v14 = vpop.f32.mrb[132].mxu1 }
 0x25d   :  { %v3153_v17 = vadd.f32 %v3152_v4, %v3151_v9  ;;  %v3352_v15 = vadd.f32 %v3351_v55, %v3350_v61  ;;  %v2675_v33 = vpop.f32.mrb[68].mxu0  ;;  %v2853_v53 = vadd.f32 %v5643_v35, %v3863_v14  ;;  %v2844_v42 = vpop.f32.mrb[133].mxu1 }
 0x25e   :  { %v5813_v36 = vadd.f32 %v2675_v33, %v5453_v21  ;;  %v2677_v46 = vpop.f32.mrb[69].mxu0  ;;  %v2845_v28 = vadd.f32 %v5623_v49, %v2844_v42  ;;  %v3864_v7 = vpop.f32.mrb[134].mxu1 }
 0x25f   :  { %v3354_v12 = vadd.f32 %v3353_v0, %v3352_v15  ;;  %3090 = vst.msk [vmem:[%s6320_s2 + $0x30] sm:$0xff] %vm3083_vm1, %v2853_v53  ;;  %v3155_v35 = vadd.f32 %v3154_v19, %v3153_v17  ;;  %v2678_v9 = vpop.f32.mrb[70].mxu0  ;;  %v2847_v5 = vpop.f32.mrb[135].mxu1  ;;  %v2856_v0 = vadd.f32 %v5655_v40, %v3864_v7  ;;  %v3292_v61 = vmul.f32 %v2853_v53, %v2853_v53 }
 0x260   :  { %3088 = vst.msk [vmem:[%s6320_s2 + $0x20] sm:$0xff] %vm3083_vm1, %v2845_v28  ;;  %v3156_v21 = vsel %vm3083_vm1, %v2845_v28, 0.0  ;;  %v3290_v49 = vmul.f32 %v2845_v28, %v2845_v28  ;;  %v5827_v41 = vadd.f32 %v2678_v9, %v5458_v25  ;;  %v2680_v15 = vpop.f32.mrb[71].mxu0  ;;  %v2848_v19 = vadd.f32 %v5635_v32, %v2847_v5 }
 0x261   :  { %v3157_v42 = vadd.f32 %v3156_v21, %v3155_v35  ;;  %v3356_v56 = vadd.f32 %v3355_v3, %v3354_v12  ;;  %3091 = vst.msk [vmem:[%s6320_s2 + $0x38] sm:$0xff] %vm3083_vm1, %v2856_v0  ;;  %v3160_v32 = vsel %vm3083_vm1, %v2853_v53, 0.0  ;;  %v3293_v33 = vmul.f32 %v2856_v0, %v2856_v0 }
 0x262   :  { %v3357_v4 = vsel %vm3083_vm1, %v3290_v49, 0.0  ;;  %3089 = vst.msk [vmem:[%s6320_s2 + $0x28] sm:$0xff] %vm3083_vm1, %v2848_v19  ;;  %v3158_v25 = vsel %vm3083_vm1, %v2848_v19, 0.0  ;;  %v3291_v40 = vmul.f32 %v2848_v19, %v2848_v19  ;;  %v3361_v15 = vsel %vm3083_vm1, %v3292_v61, 0.0 }
 0x263   :  { %v3358_v55 = vadd.f32 %v3357_v4, %v3356_v56  ;;  %v3159_v14 = vadd.f32 %v3158_v25, %v3157_v42  ;;  %v3162_v53 = vsel %vm3083_vm1, %v2856_v0, 0.0  ;;  %v3363_v61 = vsel %vm3083_vm1, %v3293_v33, 0.0 }
 0x264   :  { %v3867_v17 = vpop.f32.mrb[136].mxu1  ;;  %v3359_v46 = vsel %vm3083_vm1, %v3291_v40, 0.0 }
 0x265   :  { %v2683_v28 = vpop.f32.mrb[72].mxu0  ;;  %v2869_v7 = vadd.f32 %v5673_v22, %v3867_v17  ;;  %v2860_v3 = vpop.f32.mrb[137].mxu1  ;;  %v3161_v12 = vadd.f32 %v3160_v32, %v3159_v14  ;;  %v3360_v35 = vadd.f32 %v3359_v46, %v3358_v55 }
 0x266   :  { %v5845_v9 = vadd.f32 %v2683_v28, %v5471_v34  ;;  %v2685_v5 = vpop.f32.mrb[73].mxu0  ;;  %v2861_v21 = vadd.f32 %v5663_v43, %v2860_v3  ;;  %v3868_v49 = vpop.f32.mrb[138].mxu1 }
 0x267   :  { %3094 = vst.msk [vmem:[%s6320_s2 + $0x50] sm:$0xff] %vm3083_vm1, %v2869_v7  ;;  %v2686_v22 = vpop.f32.mrb[74].mxu0  ;;  %v2872_v42 = vadd.f32 %v5676_v51, %v3868_v49  ;;  %v2863_v56 = vpop.f32.mrb[139].mxu1  ;;  %v3362_v19 = vadd.f32 %v3361_v15, %v3360_v35  ;;  %v3163_v34 = vadd.f32 %v3162_v53, %v3161_v12  ;;  %v3296_v17 = vmul.f32 %v2869_v7, %v2869_v7 }
 0x268   :  { %3092 = vst.msk [vmem:[%s6320_s2 + $0x40] sm:$0xff] %vm3083_vm1, %v2861_v21  ;;  %v3164_v43 = vsel %vm3083_vm1, %v2861_v21, 0.0  ;;  %v3294_v4 = vmul.f32 %v2861_v21, %v2861_v21  ;;  %v2688_v0 = vpop.f32.mrb[75].mxu0  ;;  %v5862_v55 = vadd.f32 %v2686_v22, %v5476_v38  ;;  %v2864_v14 = vadd.f32 %v5669_v6, %v2863_v56 }
 0x269   :  { %3095 = vst.msk [vmem:[%s6320_s2 + $0x58] sm:$0xff] %vm3083_vm1, %v2872_v42  ;;  %v3165_v51 = vadd.f32 %v3164_v43, %v3163_v34  ;;  %v3364_v25 = vadd.f32 %v3363_v61, %v3362_v19  ;;  %v3168_v28 = vsel %vm3083_vm1, %v2869_v7, 0.0  ;;  %v3297_v21 = vmul.f32 %v2872_v42, %v2872_v42 }
 0x26a   :  { %v3365_v40 = vsel %vm3083_vm1, %v3294_v4, 0.0  ;;  %3093 = vst.msk [vmem:[%s6320_s2 + $0x48] sm:$0xff] %vm3083_vm1, %v2864_v14  ;;  %v3166_v38 = vsel %vm3083_vm1, %v2864_v14, 0.0  ;;  %v3295_v33 = vmul.f32 %v2864_v14, %v2864_v14  ;;  %v3369_v56 = vsel %vm3083_vm1, %v3296_v17, 0.0 }
 0x26b   :  { %v3366_v32 = vadd.f32 %v3365_v40, %v3364_v25  ;;  %v3167_v3 = vadd.f32 %v3166_v38, %v3165_v51  ;;  %v3170_v19 = vsel %vm3083_vm1, %v2872_v42, 0.0  ;;  %v3371_v40 = vsel %vm3083_vm1, %v3297_v21, 0.0 }
 0x26c   :  { %v3871_v46 = vpop.f32.mrb[140].mxu1  ;;  %v3367_v6 = vsel %vm3083_vm1, %v3295_v33, 0.0 }
 0x26d   :  { %v2691_v12 = vpop.f32.mrb[76].mxu0  ;;  %v2885_v35 = vadd.f32 %v5685_v10, %v3871_v46  ;;  %v2876_v5 = vpop.f32.mrb[141].mxu1  ;;  %v3169_v7 = vadd.f32 %v3168_v28, %v3167_v3  ;;  %v3368_v34 = vadd.f32 %v3367_v6, %v3366_v32 }
 0x26e   :  { %v5879_v49 = vadd.f32 %v2691_v12, %v5489_v52  ;;  %v2693_v15 = vpop.f32.mrb[77].mxu0  ;;  %v2877_v53 = vadd.f32 %v5679_v37, %v2876_v5  ;;  %v3872_v22 = vpop.f32.mrb[142].mxu1 }
 0x26f   :  { %3098 = vst.msk [vmem:[%s6320_s2 + $0x70] sm:$0xff] %vm3083_vm1, %v2885_v35  ;;  %v2694_v10 = vpop.f32.mrb[78].mxu0  ;;  %v2879_v43 = vpop.f32.mrb[143].mxu1  ;;  %v2888_v42 = vadd.f32 %v5688_v13, %v3872_v22  ;;  %v3370_v61 = vadd.f32 %v3369_v56, %v3368_v34  ;;  %v3171_v51 = vadd.f32 %v3170_v19, %v3169_v7  ;;  %v3300_v14 = vmul.f32 %v2885_v35, %v2885_v35 }
 0x270   :  { %3096 = vst.msk [vmem:[%s6320_s2 + $0x60] sm:$0xff] %vm3083_vm1, %v2877_v53  ;;  %v3172_v52 = vsel %vm3083_vm1, %v2877_v53, 0.0  ;;  %v3298_v37 = vmul.f32 %v2877_v53, %v2877_v53  ;;  %v5894_v4 = vadd.f32 %v2694_v10, %v5494_v59  ;;  %v2696_v0 = vpop.f32.mrb[79].mxu0  ;;  %v2880_v25 = vadd.f32 %v5682_v57, %v2879_v43 }
 0x271   :  { %3099 = vst.msk [vmem:[%s6320_s2 + $0x78] sm:$0xff] %vm3083_vm1, %v2888_v42  ;;  %v3173_v32 = vadd.f32 %v3172_v52, %v3171_v51  ;;  %v3372_v59 = vadd.f32 %v3371_v40, %v3370_v61  ;;  %v3176_v21 = vsel %vm3083_vm1, %v2885_v35, 0.0  ;;  %v3301_v6 = vmul.f32 %v2888_v42, %v2888_v42 }
 0x272   :  { %v3373_v17 = vsel %vm3083_vm1, %v3298_v37, 0.0  ;;  %3097 = vst.msk [vmem:[%s6320_s2 + $0x68] sm:$0xff] %vm3083_vm1, %v2880_v25  ;;  %v3174_v13 = vsel %vm3083_vm1, %v2880_v25, 0.0  ;;  %v3299_v57 = vmul.f32 %v2880_v25, %v2880_v25  ;;  %v3377_v19 = vsel %vm3083_vm1, %v3300_v14, 0.0 }
 0x273   :  { %v3374_v33 = vadd.f32 %v3373_v17, %v3372_v59  ;;  %v3175_v46 = vadd.f32 %v3174_v13, %v3173_v32  ;;  %v3178_v7 = vsel %vm3083_vm1, %v2888_v42, 0.0  ;;  %v3379_v51 = vsel %vm3083_vm1, %v3301_v6, 0.0 }
 0x274   :  { %v3875_v38 = vpop.f32.mrb[144].mxu1  ;;  %v3375_v28 = vsel %vm3083_vm1, %v3299_v57, 0.0 }
 0x275   :  { %v2699_v3 = vpop.f32.mrb[80].mxu0  ;;  %v2901_v12 = vadd.f32 %v5703_v60, %v3875_v38  ;;  %v2892_v5 = vpop.f32.mrb[145].mxu1  ;;  %v3177_v34 = vadd.f32 %v3176_v21, %v3175_v46  ;;  %v3376_v10 = vadd.f32 %v3375_v28, %v3374_v33 }
 0x276   :  { %v5913_v15 = vadd.f32 %v2699_v3, %v5507_v8  ;;  %v2701_v53 = vpop.f32.mrb[81].mxu0  ;;  %v2893_v22 = vadd.f32 %v5693_v2, %v2892_v5  ;;  %v3876_v56 = vpop.f32.mrb[146].mxu1 }
 0x277   :  { %3102 = vst.msk [vmem:[%s6320_s2 + $0x90] sm:$0xff] %vm3083_vm1, %v2901_v12  ;;  %v2702_v60 = vpop.f32.mrb[82].mxu0  ;;  %v2895_v35 = vpop.f32.mrb[147].mxu1  ;;  %v2904_v52 = vadd.f32 %v5708_v24, %v3876_v56  ;;  %v3378_v42 = vadd.f32 %v3377_v19, %v3376_v10  ;;  %v3179_v0 = vadd.f32 %v3178_v7, %v3177_v34  ;;  %v3304_v25 = vmul.f32 %v2901_v12, %v2901_v12 }
 0x278   :  { %3100 = vst.msk [vmem:[%s6320_s2 + $0x80] sm:$0xff] %vm3083_vm1, %v2893_v22  ;;  %v3180_v8 = vsel %vm3083_vm1, %v2893_v22, 0.0  ;;  %v3302_v2 = vmul.f32 %v2893_v22, %v2893_v22  ;;  %v5928_v43 = vadd.f32 %v2702_v60, %v5512_v16  ;;  %v2704_v37 = vpop.f32.mrb[83].mxu0  ;;  %v2896_v61 = vadd.f32 %v5698_v27, %v2895_v35 }
 0x279   :  { %3103 = vst.msk [vmem:[%s6320_s2 + $0x98] sm:$0xff] %vm3083_vm1, %v2904_v52  ;;  %v3181_v14 = vadd.f32 %v3180_v8, %v3179_v0  ;;  %v3380_v16 = vadd.f32 %v3379_v51, %v3378_v42  ;;  %v3184_v46 = vsel %vm3083_vm1, %v2901_v12, 0.0  ;;  %v3305_v28 = vmul.f32 %v2904_v52, %v2904_v52 }
 0x27a   :  { %v3381_v40 = vsel %vm3083_vm1, %v3302_v2, 0.0  ;;  %3101 = vst.msk [vmem:[%s6320_s2 + $0x88] sm:$0xff] %vm3083_vm1, %v2896_v61  ;;  %v3182_v24 = vsel %vm3083_vm1, %v2896_v61, 0.0  ;;  %v3303_v27 = vmul.f32 %v2896_v61, %v2896_v61  ;;  %v3385_v53 = vsel %vm3083_vm1, %v3304_v25, 0.0 }
 0x27b   :  { %v3382_v32 = vadd.f32 %v3381_v40, %v3380_v16  ;;  %v3183_v59 = vadd.f32 %v3182_v24, %v3181_v14  ;;  %v3186_v22 = vsel %vm3083_vm1, %v2904_v52, 0.0  ;;  %v3387_v2 = vsel %vm3083_vm1, %v3305_v28, 0.0 }
 0x27c   :  { %v3879_v17 = vpop.f32.mrb[148].mxu1  ;;  %v3383_v13 = vsel %vm3083_vm1, %v3303_v27, 0.0 }
 0x27d   :  { %v2707_v57 = vpop.f32.mrb[84].mxu0  ;;  %v2917_v38 = vadd.f32 %v5723_v23, %v3879_v17  ;;  %v2908_v33 = vpop.f32.mrb[149].mxu1  ;;  %v3185_v56 = vadd.f32 %v3184_v46, %v3183_v59  ;;  %v3384_v19 = vadd.f32 %v3383_v13, %v3382_v32 }
 0x27e   :  { %v5947_v3 = vadd.f32 %v2707_v57, %v5525_v26  ;;  %v2709_v5 = vpop.f32.mrb[85].mxu0  ;;  %v2909_v21 = vadd.f32 %v5713_v45, %v2908_v33  ;;  %v3880_v6 = vpop.f32.mrb[150].mxu1 }
 0x27f   :  { %3106 = vst.msk [vmem:[%s6320_s2 + $0xb0] sm:$0xff] %vm3083_vm1, %v2917_v38  ;;  %v2710_v23 = vpop.f32.mrb[86].mxu0  ;;  %v2911_v12 = vpop.f32.mrb[151].mxu1  ;;  %v2920_v34 = vadd.f32 %v5728_v63, %v3880_v6  ;;  %v3386_v60 = vadd.f32 %v3385_v53, %v3384_v19  ;;  %v3187_v35 = vadd.f32 %v3186_v22, %v3185_v56  ;;  %v3308_v52 = vmul.f32 %v2917_v38, %v2917_v38 }
 0x280   :  { %3104 = vst.msk [vmem:[%s6320_s2 + $0xa0] sm:$0xff] %vm3083_vm1, %v2909_v21  ;;  %v3188_v26 = vsel %vm3083_vm1, %v2909_v21, 0.0  ;;  %v3306_v45 = vmul.f32 %v2909_v21, %v2909_v21  ;;  %v5962_v7 = vadd.f32 %v2710_v23, %v5530_v30  ;;  %v2712_v10 = vpop.f32.mrb[87].mxu0  ;;  %v2912_v8 = vadd.f32 %v5718_v1, %v2911_v12 }
 0x281   :  { %3107 = vst.msk [vmem:[%s6320_s2 + $0xb8] sm:$0xff] %vm3083_vm1, %v2920_v34  ;;  %v3189_v42 = vadd.f32 %v3188_v26, %v3187_v35  ;;  %v3388_v30 = vadd.f32 %v3387_v2, %v3386_v60  ;;  %v3192_v24 = vsel %vm3083_vm1, %v2917_v38, 0.0  ;;  %v3309_v27 = vmul.f32 %v2920_v34, %v2920_v34 }
 0x282   :  { %v3389_v37 = vsel %vm3083_vm1, %v3306_v45, 0.0  ;;  %3105 = vst.msk [vmem:[%s6320_s2 + $0xa8] sm:$0xff] %vm3083_vm1, %v2912_v8  ;;  %v3190_v63 = vsel %vm3083_vm1, %v2912_v8, 0.0  ;;  %v3307_v1 = vmul.f32 %v2912_v8, %v2912_v8  ;;  %v3393_v57 = vsel %vm3083_vm1, %v3308_v52, 0.0 }
 0x283   :  { %v3390_v61 = vadd.f32 %v3389_v37, %v3388_v30  ;;  %v3191_v51 = vadd.f32 %v3190_v63, %v3189_v42  ;;  %v3194_v33 = vsel %vm3083_vm1, %v2920_v34, 0.0  ;;  %v3395_v19 = vsel %vm3083_vm1, %v3309_v27, 0.0 }
 0x284   :  { %v3883_v0 = vpop.f32.mrb[152].mxu1  ;;  %v3391_v25 = vsel %vm3083_vm1, %v3307_v1, 0.0 }
 0x285   :  { %v2715_v40 = vpop.f32.mrb[88].mxu0  ;;  %v2933_v14 = vadd.f32 %v5743_v31, %v3883_v0  ;;  %v2924_v16 = vpop.f32.mrb[153].mxu1  ;;  %v3193_v46 = vadd.f32 %v3192_v24, %v3191_v51  ;;  %v3392_v28 = vadd.f32 %v3391_v25, %v3390_v61 }
 0x286   :  { %v5981_v17 = vadd.f32 %v2715_v40, %v5543_v47  ;;  %v2717_v32 = vpop.f32.mrb[89].mxu0  ;;  %v2925_v59 = vadd.f32 %v5733_v20, %v2924_v16  ;;  %v3884_v13 = vpop.f32.mrb[154].mxu1 }
 0x287   :  { %3110 = vst.msk [vmem:[%s6320_s2 + $0xd0] sm:$0xff] %vm3083_vm1, %v2933_v14  ;;  %v2718_v31 = vpop.f32.mrb[90].mxu0  ;;  %v2927_v38 = vpop.f32.mrb[155].mxu1  ;;  %v2936_v21 = vadd.f32 %v5748_v39, %v3884_v13  ;;  %v3394_v53 = vadd.f32 %v3393_v57, %v3392_v28  ;;  %v3195_v22 = vadd.f32 %v3194_v33, %v3193_v46  ;;  %v3312_v23 = vmul.f32 %v2933_v14, %v2933_v14 }
 0x288   :  { %3108 = vst.msk [vmem:[%s6320_s2 + $0xc0] sm:$0xff] %vm3083_vm1, %v2925_v59  ;;  %v3196_v47 = vsel %vm3083_vm1, %v2925_v59, 0.0  ;;  %v3310_v20 = vmul.f32 %v2925_v59, %v2925_v59  ;;  %v5996_v5 = vadd.f32 %v2718_v31, %v5548_v58  ;;  %v2720_v6 = vpop.f32.mrb[91].mxu0  ;;  %v2928_v56 = vadd.f32 %v5738_v29, %v2927_v38 }
 0x289   :  { %3111 = vst.msk [vmem:[%s6320_s2 + $0xd8] sm:$0xff] %vm3083_vm1, %v2936_v21  ;;  %v3197_v26 = vadd.f32 %v3196_v47, %v3195_v22  ;;  %v3396_v58 = vadd.f32 %v3395_v19, %v3394_v53  ;;  %v3200_v52 = vsel %vm3083_vm1, %v2933_v14, 0.0  ;;  %v3313_v37 = vmul.f32 %v2936_v21, %v2936_v21 }
 0x28a   :  { %v3397_v12 = vsel %vm3083_vm1, %v3310_v20, 0.0  ;;  %3109 = vst.msk [vmem:[%s6320_s2 + $0xc8] sm:$0xff] %vm3083_vm1, %v2928_v56  ;;  %v3198_v39 = vsel %vm3083_vm1, %v2928_v56, 0.0  ;;  %v3311_v29 = vmul.f32 %v2928_v56, %v2928_v56  ;;  %v3401_v0 = vsel %vm3083_vm1, %v3312_v23, 0.0  ;;  %v6340_v23 = vld [vmem:[#allocation17_spill] sm:$0xff] }
 0x28b   :  { %v3398_v34 = vadd.f32 %v3397_v12, %v3396_v58  ;;  %v3199_v10 = vadd.f32 %v3198_v39, %v3197_v26  ;;  %v3202_v61 = vsel %vm3083_vm1, %v2936_v21, 0.0  ;;  %v3403_v13 = vsel %vm3083_vm1, %v3313_v37, 0.0 }
 0x28c   :  { %v3887_v45 = vpop.f32.mrb[156].mxu1  ;;  %v3399_v60 = vsel %vm3083_vm1, %v3311_v29, 0.0 }
 0x28d   :  { %v2723_v35 = vpop.f32.mrb[92].mxu0  ;;  %v2949_v8 = vadd.f32 %v5763_v54, %v3887_v45  ;;  %v2940_v2 = vpop.f32.mrb[157].mxu1  ;;  %v3201_v51 = vadd.f32 %v3200_v52, %v3199_v10  ;;  %v3400_v25 = vadd.f32 %v3399_v60, %v3398_v34  ;;  %v6341_v60 = vld [vmem:[#allocation2_spill] sm:$0xff] }
 0x28e   :  { %v6015_v42 = vadd.f32 %v2723_v35, %v5561_v11  ;;  %v2725_v30 = vpop.f32.mrb[93].mxu0  ;;  %v2941_v63 = vadd.f32 %v5753_v44, %v2940_v2  ;;  %v3888_v1 = vpop.f32.mrb[158].mxu1 }
 0x28f   :  { %3114 = vst.msk [vmem:[%s6320_s2 + $0xf0] sm:$0xff] %vm3083_vm1, %v2949_v8  ;;  %v2726_v54 = vpop.f32.mrb[94].mxu0  ;;  %v2943_v40 = vpop.f32.mrb[159].mxu1  ;;  %v2952_v16 = vadd.f32 %v5768_v62, %v3888_v1  ;;  %v3402_v27 = vadd.f32 %v3401_v0, %v3400_v25  ;;  %v3203_v32 = vadd.f32 %v3202_v61, %v3201_v51  ;;  %v3316_v57 = vmul.f32 %v2949_v8, %v2949_v8  ;;  %v6342_v30 = vld [vmem:[#allocation18_spill] sm:$0xff] }
 0x290   :  { %3112 = vst.msk [vmem:[%s6320_s2 + $0xe0] sm:$0xff] %vm3083_vm1, %v2941_v63  ;;  %v3204_v11 = vsel %vm3083_vm1, %v2941_v63, 0.0  ;;  %v3314_v44 = vmul.f32 %v2941_v63, %v2941_v63  ;;  %v6030_v14 = vadd.f32 %v2726_v54, %v5566_v18  ;;  %v2728_v24 = vpop.f32.mrb[95].mxu0  ;;  %v2944_v59 = vadd.f32 %v5758_v50, %v2943_v40 }
 0x291   :  { %3115 = vst.msk [vmem:[%s6320_s2 + $0xf8] sm:$0xff] %vm3083_vm1, %v2952_v16  ;;  %v3205_v46 = vadd.f32 %v3204_v11, %v3203_v32  ;;  %v3404_v18 = vadd.f32 %v3403_v13, %v3402_v27  ;;  %v3208_v53 = vsel %vm3083_vm1, %v2949_v8, 0.0  ;;  %v3317_v22 = vmul.f32 %v2952_v16, %v2952_v16 }
 0x292   :  { %v3405_v33 = vsel %vm3083_vm1, %v3314_v44, 0.0  ;;  %3113 = vst.msk [vmem:[%s6320_s2 + $0xe8] sm:$0xff] %vm3083_vm1, %v2944_v59  ;;  %v3206_v62 = vsel %vm3083_vm1, %v2944_v59, 0.0  ;;  %v3315_v50 = vmul.f32 %v2944_v59, %v2944_v59  ;;  %v3409_v58 = vsel %vm3083_vm1, %v3316_v57, 0.0  ;;  %v6343_v57 = vld [vmem:[#allocation3_spill] sm:$0xff] }
 0x293   :  { %v3406_v31 = vadd.f32 %v3405_v33, %v3404_v18  ;;  %v3207_v38 = vadd.f32 %v3206_v62, %v3205_v46  ;;  %v3210_v39 = vsel %vm3083_vm1, %v2952_v16, 0.0  ;;  %v3411_v1 = vsel %vm3083_vm1, %v3317_v22, 0.0 }
 0x294   :  { %v3891_v28 = vpop.f32.mrb[160].mxu1  ;;  %v3407_v47 = vsel %vm3083_vm1, %v3315_v50, 0.0 }
 0x295   :  { %v2731_v20 = vpop.f32.mrb[96].mxu0  ;;  %v2965_v21 = vadd.f32 %v5813_v36, %v3891_v28  ;;  %v2956_v6 = vpop.f32.mrb[161].mxu1  ;;  %v3209_v29 = vadd.f32 %v3208_v53, %v3207_v38  ;;  %v3408_v45 = vadd.f32 %v3407_v47, %v3406_v31 }
 0x296   :  { %v6049_v56 = vadd.f32 %v2731_v20, %v5690_v48  ;;  %v2733_v19 = vpop.f32.mrb[97].mxu0  ;;  %v2957_v12 = vadd.f32 %v6340_v23, %v2956_v6  ;;  %v3892_v26 = vpop.f32.mrb[162].mxu1 }
 0x297   :  { %3118 = vst.msk [vmem:[%s6320_s2 + $0x110] sm:$0xff] %vm3083_vm1, %v2965_v21  ;;  %v2734_v36 = vpop.f32.mrb[98].mxu0  ;;  %v2959_v34 = vpop.f32.mrb[163].mxu1  ;;  %v2968_v8 = vadd.f32 %v5827_v41, %v3892_v26  ;;  %v3410_v52 = vadd.f32 %v3409_v58, %v3408_v45  ;;  %v3211_v37 = vadd.f32 %v3210_v39, %v3209_v29  ;;  %v3320_v0 = vmul.f32 %v2965_v21, %v2965_v21 }
 0x298   :  { %3116 = vst.msk [vmem:[%s6320_s2 + $0x100] sm:$0xff] %vm3083_vm1, %v2957_v12  ;;  %v3212_v48 = vsel %vm3083_vm1, %v2957_v12, 0.0  ;;  %v3318_v10 = vmul.f32 %v2957_v12, %v2957_v12  ;;  %v6064_v35 = vadd.f32 %v2734_v36, %v6341_v60  ;;  %v2736_v2 = vpop.f32.mrb[99].mxu0  ;;  %v2960_v63 = vadd.f32 %v6342_v30, %v2959_v34  ;;  %v6345_v30 = vld [vmem:[#allocation5_spill] sm:$0xff] }
 0x299   :  { %3119 = vst.msk [vmem:[%s6320_s2 + $0x118] sm:$0xff] %vm3083_vm1, %v2968_v8  ;;  %v3213_v51 = vadd.f32 %v3212_v48, %v3211_v37  ;;  %v3412_v25 = vadd.f32 %v3411_v1, %v3410_v52  ;;  %v3216_v59 = vsel %vm3083_vm1, %v2965_v21, 0.0  ;;  %v3321_v13 = vmul.f32 %v2968_v8, %v2968_v8  ;;  %v6344_v21 = vld [vmem:[#allocation4_spill] sm:$0xff] }
 0x29a   :  { %v3413_v61 = vsel %vm3083_vm1, %v3318_v10, 0.0  ;;  %3117 = vst.msk [vmem:[%s6320_s2 + $0x108] sm:$0xff] %vm3083_vm1, %v2960_v63  ;;  %v3214_v41 = vsel %vm3083_vm1, %v2960_v63, 0.0  ;;  %v3319_v54 = vmul.f32 %v2960_v63, %v2960_v63  ;;  %v3417_v50 = vsel %vm3083_vm1, %v3320_v0, 0.0 }
 0x29b   :  { %v3414_v11 = vadd.f32 %v3413_v61, %v3412_v25  ;;  %v3215_v44 = vadd.f32 %v3214_v41, %v3213_v51  ;;  %v3218_v28 = vsel %vm3083_vm1, %v2968_v8, 0.0  ;;  %v3419_v26 = vsel %vm3083_vm1, %v3321_v13, 0.0 }
 0x29c   :  { %v3895_v40 = vpop.f32.mrb[164].mxu1  ;;  %v3415_v16 = vsel %vm3083_vm1, %v3319_v54, 0.0 }
 0x29d   :  { %v2739_v24 = vpop.f32.mrb[100].mxu0  ;;  %v2981_v27 = vadd.f32 %v5879_v49, %v3895_v40  ;;  %v2972_v32 = vpop.f32.mrb[165].mxu1  ;;  %v3217_v31 = vadd.f32 %v3216_v59, %v3215_v44  ;;  %v3416_v38 = vadd.f32 %v3415_v16, %v3414_v11  ;;  %v6346_v44 = vld [vmem:[#allocation6_spill] sm:$0xff] }
 0x29e   :  { %v6083_v33 = vadd.f32 %v2739_v24, %v6343_v57  ;;  %v2741_v46 = vpop.f32.mrb[101].mxu0  ;;  %v2973_v18 = vadd.f32 %v5845_v9, %v2972_v32  ;;  %v3896_v62 = vpop.f32.mrb[166].mxu1 }
 0x29f   :  { %3122 = vst.msk [vmem:[%s6320_s2 + $0x130] sm:$0xff] %vm3083_vm1, %v2981_v27  ;;  %v2742_v49 = vpop.f32.mrb[102].mxu0  ;;  %v2975_v47 = vpop.f32.mrb[167].mxu1  ;;  %v2984_v53 = vadd.f32 %v5894_v4, %v3896_v62  ;;  %v3418_v19 = vadd.f32 %v3417_v50, %v3416_v38  ;;  %v3219_v23 = vadd.f32 %v3218_v28, %v3217_v31  ;;  %v3324_v58 = vmul.f32 %v2981_v27, %v2981_v27 }
 0x2a0   :  { %3120 = vst.msk [vmem:[%s6320_s2 + $0x120] sm:$0xff] %vm3083_vm1, %v2973_v18  ;;  %v3220_v9 = vsel %vm3083_vm1, %v2973_v18, 0.0  ;;  %v3322_v20 = vmul.f32 %v2973_v18, %v2973_v18  ;;  %v6098_v6 = vadd.f32 %v2742_v49, %v6344_v21  ;;  %v2744_v22 = vpop.f32.mrb[103].mxu0  ;;  %v2976_v12 = vadd.f32 %v5862_v55, %v2975_v47 }
 0x2a1   :  { %3123 = vst.msk [vmem:[%s6320_s2 + $0x138] sm:$0xff] %vm3083_vm1, %v2984_v53  ;;  %v3221_v29 = vadd.f32 %v3220_v9, %v3219_v23  ;;  %v3420_v45 = vadd.f32 %v3419_v26, %v3418_v19  ;;  %v3224_v52 = vsel %vm3083_vm1, %v2981_v27, 0.0  ;;  %v3325_v37 = vmul.f32 %v2984_v53, %v2984_v53  ;;  %v6347_v22 = vld [vmem:[#allocation7_spill] sm:$0xff] }
 0x2a2   :  { %v3421_v39 = vsel %vm3083_vm1, %v3322_v20, 0.0  ;;  %3121 = vst.msk [vmem:[%s6320_s2 + $0x128] sm:$0xff] %vm3083_vm1, %v2976_v12  ;;  %v3222_v4 = vsel %vm3083_vm1, %v2976_v12, 0.0  ;;  %v3323_v55 = vmul.f32 %v2976_v12, %v2976_v12  ;;  %v3425_v51 = vsel %vm3083_vm1, %v3324_v58, 0.0 }
 0x2a3   :  { %v3422_v34 = vadd.f32 %v3421_v39, %v3420_v45  ;;  %v3223_v48 = vadd.f32 %v3222_v4, %v3221_v29  ;;  %v3226_v25 = vsel %vm3083_vm1, %v2984_v53, 0.0  ;;  %v3427_v57 = vsel %vm3083_vm1, %v3325_v37, 0.0 }
 0x2a4   :  { %v3899_v36 = vpop.f32.mrb[168].mxu1  ;;  %v3423_v10 = vsel %vm3083_vm1, %v3323_v55, 0.0 }
 0x2a5   :  { %v2747_v60 = vpop.f32.mrb[104].mxu0  ;;  %v2997_v8 = vadd.f32 %v5947_v3, %v3899_v36  ;;  %v2988_v2 = vpop.f32.mrb[169].mxu1  ;;  %v3225_v41 = vadd.f32 %v3224_v52, %v3223_v48  ;;  %v3424_v54 = vadd.f32 %v3423_v10, %v3422_v34  ;;  %v6348_v36 = vld [vmem:[#allocation8_spill] sm:$0xff] }
 0x2a6   :  { %v6117_v63 = vadd.f32 %v2747_v60, %v6345_v30  ;;  %v2749_v1 = vpop.f32.mrb[105].mxu0  ;;  %v2989_v0 = vadd.f32 %v5913_v15, %v2988_v2  ;;  %v3900_v61 = vpop.f32.mrb[170].mxu1 }
 0x2a7   :  { %3126 = vst.msk [vmem:[%s6320_s2 + $0x150] sm:$0xff] %vm3083_vm1, %v2997_v8  ;;  %v2750_v3 = vpop.f32.mrb[106].mxu0  ;;  %v2991_v40 = vpop.f32.mrb[171].mxu1  ;;  %v3000_v24 = vadd.f32 %v5962_v7, %v3900_v61  ;;  %v3426_v32 = vadd.f32 %v3425_v51, %v3424_v54  ;;  %v3227_v59 = vadd.f32 %v3226_v25, %v3225_v41  ;;  %v3328_v46 = vmul.f32 %v2997_v8, %v2997_v8 }
 0x2a8   :  { %3124 = vst.msk [vmem:[%s6320_s2 + $0x140] sm:$0xff] %vm3083_vm1, %v2989_v0  ;;  %v3228_v15 = vsel %vm3083_vm1, %v2989_v0, 0.0  ;;  %v3326_v11 = vmul.f32 %v2989_v0, %v2989_v0  ;;  %v6132_v16 = vadd.f32 %v2750_v3, %v6346_v44  ;;  %v2752_v27 = vpop.f32.mrb[107].mxu0  ;;  %v2992_v13 = vadd.f32 %v5928_v43, %v2991_v40  ;;  %v6349_v44 = vld [vmem:[#allocation9_spill] sm:$0xff] }
 0x2a9   :  { %3127 = vst.msk [vmem:[%s6320_s2 + $0x158] sm:$0xff] %vm3083_vm1, %v3000_v24  ;;  %v3229_v62 = vadd.f32 %v3228_v15, %v3227_v59  ;;  %v3428_v50 = vadd.f32 %v3427_v57, %v3426_v32  ;;  %v3232_v21 = vsel %vm3083_vm1, %v2997_v8, 0.0  ;;  %v3329_v53 = vmul.f32 %v3000_v24, %v3000_v24 }
 0x2aa   :  { %v3429_v18 = vsel %vm3083_vm1, %v3326_v11, 0.0  ;;  %3125 = vst.msk [vmem:[%s6320_s2 + $0x148] sm:$0xff] %vm3083_vm1, %v2992_v13  ;;  %v3230_v7 = vsel %vm3083_vm1, %v2992_v13, 0.0  ;;  %v3327_v43 = vmul.f32 %v2992_v13, %v2992_v13  ;;  %v3433_v58 = vsel %vm3083_vm1, %v3328_v46, 0.0 }
 0x2ab   :  { %v3430_v31 = vadd.f32 %v3429_v18, %v3428_v50  ;;  %v3231_v38 = vadd.f32 %v3230_v7, %v3229_v62  ;;  %v3234_v39 = vsel %vm3083_vm1, %v3000_v24, 0.0  ;;  %v3435_v52 = vsel %vm3083_vm1, %v3329_v53, 0.0  ;;  %v6350_v7 = vld [vmem:[#allocation10_spill] sm:$0xff] }
 0x2ac   :  { %v3903_v28 = vpop.f32.mrb[172].mxu1  ;;  %v3431_v49 = vsel %vm3083_vm1, %v3327_v43, 0.0 }
 0x2ad   :  { %v2755_v47 = vpop.f32.mrb[108].mxu0  ;;  %v3013_v9 = vadd.f32 %v6015_v42, %v3903_v28  ;;  %v3004_v20 = vpop.f32.mrb[173].mxu1  ;;  %v3233_v29 = vadd.f32 %v3232_v21, %v3231_v38  ;;  %v3432_v45 = vadd.f32 %v3431_v49, %v3430_v31 }
 0x2ae   :  { %v6151_v19 = vadd.f32 %v2755_v47, %v6347_v22  ;;  %v2757_v23 = vpop.f32.mrb[109].mxu0  ;;  %v3005_v12 = vadd.f32 %v5981_v17, %v3004_v20  ;;  %v3904_v26 = vpop.f32.mrb[174].mxu1 }
 0x2af   :  { %3130 = vst.msk [vmem:[%s6320_s2 + $0x170] sm:$0xff] %vm3083_vm1, %v3013_v9  ;;  %v2758_v42 = vpop.f32.mrb[110].mxu0  ;;  %v3007_v4 = vpop.f32.mrb[175].mxu1  ;;  %v3016_v48 = vadd.f32 %v6030_v14, %v3904_v26  ;;  %v3434_v60 = vadd.f32 %v3433_v58, %v3432_v45  ;;  %v3235_v8 = vadd.f32 %v3234_v39, %v3233_v29  ;;  %v3332_v37 = vmul.f32 %v3013_v9, %v3013_v9 }
 0x2b0   :  { %3128 = vst.msk [vmem:[%s6320_s2 + $0x160] sm:$0xff] %vm3083_vm1, %v3005_v12  ;;  %v3236_v17 = vsel %vm3083_vm1, %v3005_v12, 0.0  ;;  %v3330_v55 = vmul.f32 %v3005_v12, %v3005_v12  ;;  %v6166_v34 = vadd.f32 %v2758_v42, %v6348_v36  ;;  %v2760_v10 = vpop.f32.mrb[111].mxu0  ;;  %v3008_v2 = vadd.f32 %v5996_v5, %v3007_v4 }
 0x2b1   :  { %3131 = vst.msk [vmem:[%s6320_s2 + $0x178] sm:$0xff] %vm3083_vm1, %v3016_v48  ;;  %v3237_v1 = vadd.f32 %v3236_v17, %v3235_v8  ;;  %v3436_v0 = vadd.f32 %v3435_v52, %v3434_v60  ;;  %v3240_v15 = vsel %vm3083_vm1, %v3013_v9, 0.0  ;;  %v3333_v11 = vmul.f32 %v3016_v48, %v3016_v48  ;;  %v6351_v17 = vld [vmem:[#allocation11_spill] sm:$0xff] }
 0x2b2   :  { %v3437_v30 = vsel %vm3083_vm1, %v3330_v55, 0.0  ;;  %3129 = vst.msk [vmem:[%s6320_s2 + $0x168] sm:$0xff] %vm3083_vm1, %v3008_v2  ;;  %v3238_v14 = vsel %vm3083_vm1, %v3008_v2, 0.0  ;;  %v3331_v5 = vmul.f32 %v3008_v2, %v3008_v2  ;;  %v3441_v13 = vsel %vm3083_vm1, %v3332_v37, 0.0 }
 0x2b3   :  { %v3438_v51 = vadd.f32 %v3437_v30, %v3436_v0  ;;  %v3239_v25 = vadd.f32 %v3238_v14, %v3237_v1  ;;  %v3242_v57 = vsel %vm3083_vm1, %v3016_v48, 0.0  ;;  %v3443_v9 = vsel %vm3083_vm1, %v3333_v11, 0.0  ;;  %v6352_v1 = vld [vmem:[#allocation12_spill] sm:$0xff] }
 0x2b4   :  { %v3907_v61 = vpop.f32.mrb[176].mxu1  ;;  %v3439_v41 = vsel %vm3083_vm1, %v3331_v5, 0.0 }
 0x2b5   :  { %v2763_v54 = vpop.f32.mrb[112].mxu0  ;;  %v3029_v3 = vadd.f32 %v6083_v33, %v3907_v61  ;;  %v3020_v40 = vpop.f32.mrb[177].mxu1  ;;  %v3241_v46 = vadd.f32 %v3240_v15, %v3239_v25  ;;  %v3440_v18 = vadd.f32 %v3439_v41, %v3438_v51 }
 0x2b6   :  { %v6185_v24 = vadd.f32 %v2763_v54, %v6349_v44  ;;  %v2765_v27 = vpop.f32.mrb[113].mxu0  ;;  %v3021_v32 = vadd.f32 %v6049_v56, %v3020_v40  ;;  %v3908_v59 = vpop.f32.mrb[178].mxu1 }
 0x2b7   :  { %3134 = vst.msk [vmem:[%s6320_s2 + $0x190] sm:$0xff] %vm3083_vm1, %v3029_v3  ;;  %v2766_v33 = vpop.f32.mrb[114].mxu0  ;;  %v3023_v62 = vpop.f32.mrb[179].mxu1  ;;  %v3032_v28 = vadd.f32 %v6098_v6, %v3908_v59  ;;  %v3442_v38 = vadd.f32 %v3441_v13, %v3440_v18  ;;  %v3243_v49 = vadd.f32 %v3242_v57, %v3241_v46  ;;  %v3336_v20 = vmul.f32 %v3029_v3, %v3029_v3 }
 0x2b8   :  { %3132 = vst.msk [vmem:[%s6320_s2 + $0x180] sm:$0xff] %vm3083_vm1, %v3021_v32  ;;  %v3244_v56 = vsel %vm3083_vm1, %v3021_v32, 0.0  ;;  %v3334_v50 = vmul.f32 %v3021_v32, %v3021_v32  ;;  %v6200_v43 = vadd.f32 %v2766_v33, %v6350_v7  ;;  %v2768_v31 = vpop.f32.mrb[115].mxu0  ;;  %v3024_v47 = vadd.f32 %v6064_v35, %v3023_v62  ;;  %v6353_v33 = vld [vmem:[#allocation13_spill] sm:$0xff] }
 0x2b9   :  { %3135 = vst.msk [vmem:[%s6320_s2 + $0x198] sm:$0xff] %vm3083_vm1, %v3032_v28  ;;  %v3245_v53 = vadd.f32 %v3244_v56, %v3243_v49  ;;  %v3444_v22 = vadd.f32 %v3443_v9, %v3442_v38  ;;  %v3248_v42 = vsel %vm3083_vm1, %v3029_v3, 0.0  ;;  %v3337_v4 = vmul.f32 %v3032_v28, %v3032_v28 }
 0x2ba   :  { %v3445_v21 = vsel %vm3083_vm1, %v3334_v50, 0.0  ;;  %3133 = vst.msk [vmem:[%s6320_s2 + $0x188] sm:$0xff] %vm3083_vm1, %v3024_v47  ;;  %v3246_v6 = vsel %vm3083_vm1, %v3024_v47, 0.0  ;;  %v3335_v35 = vmul.f32 %v3024_v47, %v3024_v47  ;;  %v3449_v60 = vsel %vm3083_vm1, %v3336_v20, 0.0 }
 0x2bb   :  { %v3446_v12 = vadd.f32 %v3445_v21, %v3444_v22  ;;  %v3247_v26 = vadd.f32 %v3246_v6, %v3245_v53  ;;  %v3250_v8 = vsel %vm3083_vm1, %v3032_v28, 0.0  ;;  %v3451_v41 = vsel %vm3083_vm1, %v3337_v4, 0.0  ;;  %v6354_v21 = vld [vmem:[#allocation14_spill] sm:$0xff] }
 0x2bc   :  { %v3911_v23 = vpop.f32.mrb[180].mxu1  ;;  %v3447_v58 = vsel %vm3083_vm1, %v3335_v35, 0.0 }
 0x2bd   :  { %v2771_v39 = vpop.f32.mrb[116].mxu0  ;;  %v3045_v29 = vadd.f32 %v6151_v19, %v3911_v23  ;;  %v3036_v45 = vpop.f32.mrb[181].mxu1  ;;  %v3249_v2 = vadd.f32 %v3248_v42, %v3247_v26  ;;  %v3448_v52 = vadd.f32 %v3447_v58, %v3446_v12 }
 0x2be   :  { %v4011_v55 = vadd.f32 %v2771_v39, %v6351_v17  ;;  %v2773_v36 = vpop.f32.mrb[117].mxu0  ;;  %v3037_v48 = vadd.f32 %v6117_v63, %v3036_v45  ;;  %v3912_v10 = vpop.f32.mrb[182].mxu1 }
 0x2bf   :  { %3138 = vst.msk [vmem:[%s6320_s2 + $0x1b0] sm:$0xff] %vm3083_vm1, %v3045_v29  ;;  %v2774_v19 = vpop.f32.mrb[118].mxu0  ;;  %v3039_v37 = vpop.f32.mrb[183].mxu1  ;;  %v3048_v14 = vadd.f32 %v6166_v34, %v3912_v10  ;;  %v3450_v61 = vadd.f32 %v3449_v60, %v3448_v52  ;;  %v3251_v51 = vadd.f32 %v3250_v8, %v3249_v2  ;;  %v3340_v54 = vmul.f32 %v3045_v29, %v3045_v29  ;;  %v6355_v2 = vld [vmem:[#allocation15_spill] sm:$0xff] }
 0x2c0   :  { %3136 = vst.msk [vmem:[%s6320_s2 + $0x1a0] sm:$0xff] %vm3083_vm1, %v3037_v48  ;;  %v3252_v63 = vsel %vm3083_vm1, %v3037_v48, 0.0  ;;  %v3338_v30 = vmul.f32 %v3037_v48, %v3037_v48  ;;  %v4012_v0 = vadd.f32 %v2774_v19, %v6352_v1  ;;  %v2776_v5 = vpop.f32.mrb[119].mxu0  ;;  %v3040_v25 = vadd.f32 %v6132_v16, %v3039_v37 }
 0x2c1   :  { %3139 = vst.msk [vmem:[%s6320_s2 + $0x1b8] sm:$0xff] %vm3083_vm1, %v3048_v14  ;;  %v3253_v40 = vadd.f32 %v3252_v63, %v3251_v51  ;;  %v3452_v15 = vadd.f32 %v3451_v41, %v3450_v61  ;;  %v3256_v46 = vsel %vm3083_vm1, %v3045_v29, 0.0  ;;  %v3341_v18 = vmul.f32 %v3048_v14, %v3048_v14 }
 0x2c2   :  { %v3453_v3 = vsel %vm3083_vm1, %v3338_v30, 0.0  ;;  %3137 = vst.msk [vmem:[%s6320_s2 + $0x1a8] sm:$0xff] %vm3083_vm1, %v3040_v25  ;;  %v3254_v34 = vsel %vm3083_vm1, %v3040_v25, 0.0  ;;  %v3339_v16 = vmul.f32 %v3040_v25, %v3040_v25  ;;  %v3457_v28 = vsel %vm3083_vm1, %v3340_v54, 0.0  ;;  %v6356_v54 = vld [vmem:[#allocation16_spill] sm:$0xff] }
 0x2c3   :  { %v3454_v44 = vadd.f32 %v3453_v3, %v3452_v15  ;;  %v3255_v27 = vadd.f32 %v3254_v34, %v3253_v40  ;;  %v3258_v31 = vsel %vm3083_vm1, %v3048_v14, 0.0  ;;  %v3459_v26 = vsel %vm3083_vm1, %v3341_v18, 0.0 }
 0x2c4   :  { %v3915_v11 = vpop.f32.mrb[184].mxu1  ;;  %v3455_v32 = vsel %vm3083_vm1, %v3339_v16, 0.0 }
 0x2c5   :  { %v2779_v59 = vpop.f32.mrb[120].mxu0  ;;  %v3061_v13 = vadd.f32 %v4011_v55, %v3915_v11  ;;  %v3052_v57 = vpop.f32.mrb[185].mxu1  ;;  %v3257_v38 = vadd.f32 %v3256_v46, %v3255_v27  ;;  %v3456_v49 = vadd.f32 %v3455_v32, %v3454_v44 }
 0x2c6   :  { %v4013_v62 = vadd.f32 %v2779_v59, %v6353_v33  ;;  %v2781_v56 = vpop.f32.mrb[121].mxu0  ;;  %v3053_v50 = vadd.f32 %v6185_v24, %v3052_v57  ;;  %v3916_v7 = vpop.f32.mrb[186].mxu1 }
 0x2c7   :  { %3142 = vst.msk [vmem:[%s6320_s2 + $0x1d0] sm:$0xff] %vm3083_vm1, %v3061_v13  ;;  %v2782_v47 = vpop.f32.mrb[122].mxu0  ;;  %v3055_v9 = vpop.f32.mrb[187].mxu1  ;;  %v3064_v22 = vadd.f32 %v4012_v0, %v3916_v7  ;;  %v3458_v35 = vadd.f32 %v3457_v28, %v3456_v49  ;;  %v3259_v23 = vadd.f32 %v3258_v31, %v3257_v38  ;;  %v3344_v58 = vmul.f32 %v3061_v13, %v3061_v13 }
 0x2c8   :  { %3140 = vst.msk [vmem:[%s6320_s2 + $0x1c0] sm:$0xff] %vm3083_vm1, %v3053_v50  ;;  %v3260_v24 = vsel %vm3083_vm1, %v3053_v50, 0.0  ;;  %v3342_v20 = vmul.f32 %v3053_v50, %v3053_v50  ;;  %v4014_v53 = vadd.f32 %v2782_v47, %v6354_v21  ;;  %v2784_v6 = vpop.f32.mrb[123].mxu0  ;;  %v3056_v12 = vadd.f32 %v6200_v43, %v3055_v9 }
 0x2c9   :  { %3143 = vst.msk [vmem:[%s6320_s2 + $0x1d8] sm:$0xff] %vm3083_vm1, %v3064_v22  ;;  %v3261_v29 = vadd.f32 %v3260_v24, %v3259_v23  ;;  %v3460_v45 = vadd.f32 %v3459_v26, %v3458_v35  ;;  %v3264_v60 = vsel %vm3083_vm1, %v3061_v13, 0.0  ;;  %v3345_v8 = vmul.f32 %v3064_v22, %v3064_v22 }
 0x2ca   :  { %v3461_v39 = vsel %vm3083_vm1, %v3342_v20, 0.0  ;;  %3141 = vst.msk [vmem:[%s6320_s2 + $0x1c8] sm:$0xff] %vm3083_vm1, %v3056_v12  ;;  %v3262_v42 = vsel %vm3083_vm1, %v3056_v12, 0.0  ;;  %v3343_v43 = vmul.f32 %v3056_v12, %v3056_v12  ;;  %v3465_v30 = vsel %vm3083_vm1, %v3344_v58, 0.0  ;;  %v3148_v58 = vld [vmem:[%s6321_s3] sm:$0x1] }
 0x2cb   :  { %v3462_v17 = vadd.f32 %v3461_v39, %v3460_v45  ;;  %v3263_v55 = vadd.f32 %v3262_v42, %v3261_v29  ;;  %v3266_v1 = vsel %vm3083_vm1, %v3064_v22, 0.0  ;;  %v3467_v11 = vsel %vm3083_vm1, %v3345_v8, 0.0  ;;  %v3285_v45 = vld [vmem:[%s6322_s4] sm:$0x1] }
 0x2cc   :  { %v3919_v4 = vpop.f32.mrb[188].mxu1  ;;  %v3463_v36 = vsel %vm3083_vm1, %v3343_v43, 0.0 }
 0x2cd   :  { %v2787_v48 = vpop.f32.mrb[124].mxu0  ;;  %v3068_v10 = vpop.f32.mrb[189].mxu1  ;;  %v3265_v0 = vadd.f32 %v3264_v60, %v3263_v55  ;;  %v3464_v14 = vadd.f32 %v3463_v36, %v3462_v17 }
 0x2ce   :  { %v4015_v52 = vadd.f32 %v2787_v48, %v6355_v2  ;;  %v2789_v19 = vpop.f32.mrb[125].mxu0  ;;  %v3069_v37 = vadd.f32 %v4013_v62, %v3068_v10  ;;  %v3920_v63 = vpop.f32.mrb[190].mxu1 }
 0x2cf   :  { %v2790_v5 = vpop.f32.mrb[126].mxu0  ;;  %v3071_v61 = vpop.f32.mrb[191].mxu1  ;;  %v3466_v15 = vadd.f32 %v3465_v30, %v3464_v14  ;;  %v3267_v34 = vadd.f32 %v3266_v1, %v3265_v0 }
 0x2d0   :  { %v3077_v51 = vadd.f32 %v4015_v52, %v3919_v4  ;;  %3144 = vst.msk [vmem:[%s6320_s2 + $0x1e0] sm:$0xff] %vm3083_vm1, %v3069_v37  ;;  %v3268_v25 = vsel %vm3083_vm1, %v3069_v37, 0.0  ;;  %v3346_v41 = vmul.f32 %v3069_v37, %v3069_v37  ;;  %v4016_v3 = vadd.f32 %v2790_v5, %v6356_v54  ;;  %v2792_v40 = vpop.f32.mrb[127].mxu0 }
 0x2d1   :  { %v3072_v16 = vadd.f32 %v4014_v53, %v3071_v61  ;;  %v3269_v32 = vadd.f32 %v3268_v25, %v3267_v34  ;;  %v3468_v59 = vadd.f32 %v3467_v11, %v3466_v15 }
 0x2d2   :  { %3146 = vst.msk [vmem:[%s6320_s2 + $0x1f0] sm:$0xff] %vm3083_vm1, %v3077_v51  ;;  %v3469_v44 = vsel %vm3083_vm1, %v3346_v41, 0.0  ;;  %v3080_v27 = vadd.f32 %v4016_v3, %v3920_v63  ;;  %v3348_v46 = vmul.f32 %v3077_v51, %v3077_v51  ;;  %v3272_v56 = vsel %vm3083_vm1, %v3077_v51, 0.0 }
 0x2d3   :  { %3145 = vst.msk [vmem:[%s6320_s2 + $0x1e8] sm:$0xff] %vm3083_vm1, %v3072_v16  ;;  %v3270_v13 = vsel %vm3083_vm1, %v3072_v16, 0.0  ;;  %v3347_v57 = vmul.f32 %v3072_v16, %v3072_v16  ;;  %v3470_v18 = vadd.f32 %v3469_v44, %v3468_v59 }
 0x2d4   :  { %3147 = vst.msk [vmem:[%s6320_s2 + $0x1f8] sm:$0xff] %vm3083_vm1, %v3080_v27  ;;  %v3271_v33 = vadd.f32 %v3270_v13, %v3269_v32  ;;  %v3349_v50 = vmul.f32 %v3080_v27, %v3080_v27  ;;  %v3473_v31 = vsel %vm3083_vm1, %v3348_v46, 0.0  ;;  %v3274_v38 = vsel %vm3083_vm1, %v3080_v27, 0.0 }
 0x2d5   :  { %v3471_v62 = vsel %vm3083_vm1, %v3347_v57, 0.0 }
 0x2d6   :  { %v3273_v7 = vadd.f32 %v3272_v56, %v3271_v33  ;;  %v3472_v28 = vadd.f32 %v3471_v62, %v3470_v18  ;;  %v3475_v9 = vsel %vm3083_vm1, %v3349_v50, 0.0 }
 0x2d8   :  { %v3275_v49 = vadd.f32 %v3274_v38, %v3273_v7  ;;  %v3474_v47 = vadd.f32 %v3473_v31, %v3472_v28 }
 0x2da   :  { %v3276_v24 = vrot.slane %v3275_v49, 4  ;;  %v3476_v20 = vadd.f32 %v3475_v9, %v3474_v47 }
 0x2dc   :  { %v3277_v21 = vadd.f32 %v3276_v24, %v3275_v49  ;;  %v3477_v53 = vrot.slane %v3476_v20, 4 }
 0x2de   :  { %v3278_v22 = vrot.slane %v3277_v21, 2  ;;  %v3478_v6 = vadd.f32 %v3477_v53, %v3476_v20 }
 0x2e0   :  { %v3279_v35 = vadd.f32 %v3278_v22, %v3277_v21  ;;  %v3479_v23 = vrot.slane %v3478_v6, 2 }
 0x2e2   :  { %v3280_v12 = vrot.slane %v3279_v35, 1  ;;  %v3480_v26 = vadd.f32 %v3479_v23, %v3478_v6 }
 0x2e4   :  { %v3281_v39 = vadd.f32 %v3280_v12, %v3279_v35  ;;  %v3481_v29 = vrot.slane %v3480_v26, 1 }
 0x2e6   :  { %v3282_v42 = vadd.f32 %v3281_v39, %v3148_v58  ;;  %v3482_v43 = vadd.f32 %v3481_v29, %v3480_v26 }
 0x2e8   :  { %3284 = vst.msk [vmem:[%s6321_s3] sm:$0x1] %vm19_vm2, %v3282_v42  ;;  %v3483_v4 = vadd.f32 %v3482_v43, %v3285_v45 }
 0x2ea   :  { %3484 = vst.msk [vmem:[%s6322_s4] sm:$0x1] %vm19_vm2, %v3483_v4 }

// kernel: hourglass_forward.17
= control target key start
LH: loop header
LB: loop body
LE: loop exit
PB: predicated region body
PF: predicated region fallthrough
CT: control target
= control target key end

     0   :  { %vm60_vm0 = vcmask 261120   ;;  %s157_s0 = inlined_call_operand.vmem [shape: f32[64,32], index: 0, kind: input, shape index: {}]   ;;  %s158_s1 = inlined_call_operand.vmem [shape: f32[1,32], index: 1, kind: input, shape index: {}]   ;;  %s159_s2 = inlined_call_operand.vmem [shape: f32[1,32], index: 2, kind: input, shape index: {}]   ;;  %s160_s3 = inlined_call_operand.vmem [shape: f32[64,32], index: 3, kind: output, shape index: {}]  }
   0x1   :  { %v14_v0 = vld [vmem:[%s157_s0] sm:$0xff]  ;;  %v15_v4 = vld [vmem:[%s157_s0 + $0x8] sm:$0xff]  ;;  %v16_v5 = vld [vmem:[%s157_s0 + $0x10] sm:$0xff] }
   0x2   :  { %v73_v1 = vld [vmem:[%s158_s1] ss:$0 sm:$0xff]  ;;  %v17_v6 = vld [vmem:[%s157_s0 + $0x18] sm:$0xff]  ;;  %v19_v11 = vld [vmem:[%s157_s0 + $0x28] sm:$0xff] }
   0x3   :  { %v74_v2 = vld [vmem:[%s159_s2] ss:$0 sm:$0xff]  ;;  %v29_v3 = vmul.f32 %v73_v1, %v14_v0  ;;  %v30_v7 = vmul.f32 %v73_v1, %v15_v4  ;;  %v31_v8 = vmul.f32 %v73_v1, %v16_v5  ;;  %v32_v9 = vmul.f32 %v73_v1, %v17_v6  ;;  %v20_v12 = vld [vmem:[%s157_s0 + $0x30] sm:$0xff]  ;;  %v21_v17 = vld [vmem:[%s157_s0 + $0x38] sm:$0xff] }
   0x4   :  { %v18_v10 = vld [vmem:[%s157_s0 + $0x20] sm:$0xff]  ;;  %v34_v15 = vmul.f32 %v73_v1, %v19_v11  ;;  %v35_v16 = vmul.f32 %v73_v1, %v20_v12  ;;  %v36_v21 = vmul.f32 %v73_v1, %v21_v17 }
   0x5   :  { %v44_v13 = vadd.f32 %v74_v2, %v29_v3  ;;  %v33_v14 = vmul.f32 %v73_v1, %v18_v10  ;;  %v45_v18 = vadd.f32 %v74_v2, %v30_v7  ;;  %v46_v19 = vadd.f32 %v74_v2, %v31_v8 }
   0x6   :  { %v47_v20 = vadd.f32 %v74_v2, %v32_v9  ;;  %v49_v24 = vadd.f32 %v74_v2, %v34_v15  ;;  %v50_v25 = vadd.f32 %v74_v2, %v35_v16  ;;  %v51_v29 = vadd.f32 %v74_v2, %v36_v21 }
   0x7   :  { %v52_v22 = vmax.f32 %v44_v13, 0.0  ;;  %v48_v23 = vadd.f32 %v74_v2, %v33_v14  ;;  %v53_v26 = vmax.f32 %v45_v18, 0.0  ;;  %v54_v27 = vmax.f32 %v46_v19, 0.0 }
   0x8   :  { %v55_v28 = vmax.f32 %v47_v20, 0.0  ;;  %v57_v31 = vmax.f32 %v49_v24, 0.0  ;;  %v58_v32 = vmax.f32 %v50_v25, 0.0  ;;  %v59_v33 = vmax.f32 %v51_v29, 0.0 }
   0x9   :  { %61 = vst.msk [vmem:[%s160_s3] sm:$0xff] %vm60_vm0, %v52_v22  ;;  %v56_v30 = vmax.f32 %v48_v23, 0.0  ;;  %62 = vst.msk [vmem:[%s160_s3 + $0x8] sm:$0xff] %vm60_vm0, %v53_v26 }
   0xa   :  { %63 = vst.msk [vmem:[%s160_s3 + $0x10] sm:$0xff] %vm60_vm0, %v54_v27  ;;  %64 = vst.msk [vmem:[%s160_s3 + $0x18] sm:$0xff] %vm60_vm0, %v55_v28 }
   0xb   :  { %65 = vst.msk [vmem:[%s160_s3 + $0x20] sm:$0xff] %vm60_vm0, %v56_v30  ;;  %66 = vst.msk [vmem:[%s160_s3 + $0x28] sm:$0xff] %vm60_vm0, %v57_v31 }
   0xc   :  { %67 = vst.msk [vmem:[%s160_s3 + $0x30] sm:$0xff] %vm60_vm0, %v58_v32  ;;  %68 = vst.msk [vmem:[%s160_s3 + $0x38] sm:$0xff] %vm60_vm0, %v59_v33 }

// kernel: hourglass_forward.16
= control target key start
LH: loop header
LB: loop body
LE: loop exit
PB: predicated region body
PF: predicated region fallthrough
CT: control target
= control target key end

     0   :  { %vm626_vm0 = vcmask 785408   ;;  %vm19_vm1 = vcmask 253952   ;;  %vm899_vm2 = vcmask 261120   ;;  %s1669_s1 = inlined_call_operand.vmem [shape: bf16[864,32], index: 1, kind: input, shape index: {}]   ;;  %s1670_s0 = inlined_call_operand.vmem [shape: bf16[64,864], index: 0, kind: input, shape index: {}]   ;;  %s1671_s3 = inlined_call_operand.vmem [shape: f32[1,32], index: 3, kind: output, shape index: {1}]   ;;  %s1672_s4 = inlined_call_operand.vmem [shape: f32[1,32], index: 4, kind: output, shape index: {2}]   ;;  %s1673_s2 = inlined_call_operand.vmem [shape: f32[64,32], index: 2, kind: output, shape index: {0}]  }
   0x1   :  { %v1214_v0 = vld [vmem:[%s1669_s1 + $0x40] sm:$0xff]   ;;  %v1218_v4 = vld [vmem:[%s1669_s1 + $0x48] sm:$0xff]   ;;  %v1222_v8 = vld [vmem:[%s1669_s1 + $0x50] sm:$0xff]  }
   0x2   :  { %v1215_v1 = vld [vmem:[%s1669_s1 + $0xc0] sm:$0xff]   ;;  %1063 = vmatprep.subr.bf16.mxu0 %v1214_v0  ;;  %v1219_v5 = vld [vmem:[%s1669_s1 + $0xc8] sm:$0xff]   ;;  %v1223_v9 = vld [vmem:[%s1669_s1 + $0xd0] sm:$0xff]  }
   0x3   :  { %v1216_v2 = vld [vmem:[%s1669_s1] sm:$0xff]   ;;  %1103 = vmatprep.subr.bf16.mxu1 %v1215_v1  ;;  %v1220_v6 = vld [vmem:[%s1669_s1 + $0x8] sm:$0xff]   ;;  %v1224_v10 = vld [vmem:[%s1669_s1 + $0x10] sm:$0xff]  }
   0x4   :  { %v1217_v3 = vld [vmem:[%s1669_s1 + $0x80] sm:$0xff]   ;;  %1064 = vmatpush3.bf16.msra.mxu0 %v1216_v2  ;;  %v1221_v7 = vld [vmem:[%s1669_s1 + $0x88] sm:$0xff]   ;;  %v1225_v11 = vld [vmem:[%s1669_s1 + $0x90] sm:$0xff]  }
   0x5   :  { %1104 = vmatpush3.bf16.msra.mxu1 %v1217_v3  ;;  %1065 = vmatprep.subr.bf16.mxu0 %v1218_v4  ;;  %v1226_v12 = vld [vmem:[%s1669_s1 + $0x58] sm:$0xff]   ;;  %v1230_v16 = vld [vmem:[%s1669_s1 + $0x60] sm:$0xff]   ;;  %v1234_v20 = vld [vmem:[%s1669_s1 + $0x68] sm:$0xff]  }
   0x6   :  { %1105 = vmatprep.subr.bf16.mxu1 %v1219_v5  ;;  %v1227_v13 = vld [vmem:[%s1669_s1 + $0xd8] sm:$0xff]   ;;  %v1231_v17 = vld [vmem:[%s1669_s1 + $0xe0] sm:$0xff]   ;;  %v1235_v21 = vld [vmem:[%s1669_s1 + $0xe8] sm:$0xff]  }
   0x7   :  { %v1228_v14 = vld [vmem:[%s1669_s1 + $0x18] sm:$0xff]   ;;  %v1232_v18 = vld [vmem:[%s1669_s1 + $0x20] sm:$0xff]   ;;  %v1236_v22 = vld [vmem:[%s1669_s1 + $0x28] sm:$0xff]  }
   0x8   :  { %1066 = vmatpush3.bf16.msra.mxu0 %v1220_v6  ;;  %v1229_v15 = vld [vmem:[%s1669_s1 + $0x98] sm:$0xff]   ;;  %v1233_v19 = vld [vmem:[%s1669_s1 + $0xa0] sm:$0xff]   ;;  %v1237_v23 = vld [vmem:[%s1669_s1 + $0xa8] sm:$0xff]  }
   0x9   :  { %1106 = vmatpush3.bf16.msra.mxu1 %v1221_v7  ;;  %1067 = vmatprep.subr.bf16.mxu0 %v1222_v8  ;;  %v1238_v24 = vld [vmem:[%s1669_s1 + $0x70] sm:$0xff]   ;;  %v1242_v28 = vld [vmem:[%s1669_s1 + $0x78] sm:$0xff]   ;;  %v1248_v33 = vld [vmem:[%s1670_s0 + $0x4] ss:$28 sps:$4 sm:$0xff]  }
   0xa   :  { %1107 = vmatprep.subr.bf16.mxu1 %v1223_v9  ;;  %v1239_v25 = vld [vmem:[%s1669_s1 + $0xf0] sm:$0xff]   ;;  %v1243_v29 = vld [vmem:[%s1669_s1 + $0xf8] sm:$0xff]   ;;  %v1249_v34 = vld [vmem:[%s1670_s0 + $0x8] ss:$28 sps:$4 sm:$0xff]   ;;  %671 = vmatprep.mubr.bf16.mxu0 %v1248_v33 }
   0xb   :  { %v1240_v26 = vld [vmem:[%s1669_s1 + $0x30] sm:$0xff]   ;;  %v1244_v30 = vld [vmem:[%s1669_s1 + $0x38] sm:$0xff]   ;;  %v1251_v35 = vld [vmem:[%s1670_s0 + $0xc] ss:$28 sps:$4 sm:$0xff]  }
   0xc   :  { %1068 = vmatpush3.bf16.msra.mxu0 %v1224_v10  ;;  %v1241_v27 = vld [vmem:[%s1669_s1 + $0xb0] sm:$0xff]   ;;  %v1245_v31 = vld [vmem:[%s1669_s1 + $0xb8] sm:$0xff]   ;;  %v1252_v36 = vld [vmem:[%s1669_s1 + $0x140] sm:$0xff]   ;;  %736 = vmatprep.mubr.bf16.mxu1 %v1251_v35 }
   0xd   :  { %1108 = vmatpush3.bf16.msra.mxu1 %v1225_v11  ;;  %1069 = vmatprep.subr.bf16.mxu0 %v1226_v12  ;;  %v1246_v32 = vld [vmem:[%s1670_s0] ss:$28 sps:$4 sm:$0xff]   ;;  %v1254_v38 = vld [vmem:[%s1669_s1 + $0x148] sm:$0xff]   ;;  %v1260_v42 = vld [vmem:[%s1670_s0 + $0x38] ss:$28 sps:$4 sm:$0xff]  }
   0xe   :  { %1109 = vmatprep.subr.bf16.mxu1 %v1227_v13  ;;  %v1253_v37 = vld [vmem:[%s1669_s1 + $0x100] sm:$0xff]   ;;  %v1255_v39 = vld [vmem:[%s1669_s1 + $0x108] sm:$0xff]   ;;  %v1256_v40 = vld [vmem:[%s1670_s0 + $0x3c] ss:$28 sps:$4 sm:$0xff]  }
   0xf   :  { %v1258_v41 = vld [vmem:[%s1670_s0 + $0x44] ss:$28 sps:$4 sm:$0xff]   ;;  %v1262_v44 = vld [vmem:[%s1669_s1 + $0x150] sm:$0xff]   ;;  %v1264_v46 = vld [vmem:[%s1669_s1 + $0x158] sm:$0xff]  }
  0x10   :  { %1070 = vmatpush3.bf16.msra.mxu0 %v1228_v14  ;;  %v1261_v43 = vld [vmem:[%s1670_s0 + $0x40] ss:$28 sps:$4 sm:$0xff]   ;;  %v1263_v45 = vld [vmem:[%s1669_s1 + $0x110] sm:$0xff]   ;;  %v1274_v54 = vld [vmem:[%s1669_s1 + $0x188] sm:$0xff]  }
  0x11   :  { %1110 = vmatpush3.bf16.msra.mxu1 %v1229_v15  ;;  %1071 = vmatprep.subr.bf16.mxu0 %v1230_v16  ;;  %v1265_v47 = vld [vmem:[%s1669_s1 + $0x180] sm:$0xff]   ;;  %v1266_v48 = vld [vmem:[%s1669_s1 + $0x118] sm:$0xff]   ;;  %v1267_v49 = vld [vmem:[%s1670_s0 + $0x74] ss:$28 sps:$4 sm:$0xff]  }
  0x12   :  { %1111 = vmatprep.subr.bf16.mxu1 %v1231_v17  ;;  %v1269_v50 = vld [vmem:[%s1670_s0 + $0x7c] ss:$28 sps:$4 sm:$0xff]   ;;  %v1271_v51 = vld [vmem:[%s1670_s0 + $0x70] ss:$28 sps:$4 sm:$0xff]   ;;  %v1273_v53 = vld [vmem:[%s1669_s1 + $0x160] sm:$0xff]  }
  0x13   :  { %v1272_v52 = vld [vmem:[%s1670_s0 + $0x78] ss:$28 sps:$4 sm:$0xff]   ;;  %v1275_v55 = vld [vmem:[%s1669_s1 + $0x120] sm:$0xff]   ;;  %v1276_v56 = vld [vmem:[%s1669_s1 + $0x168] sm:$0xff]  }
  0x14   :  { %1072 = vmatpush3.bf16.msra.mxu0 %v1232_v18  ;;  %v1277_v57 = vld [vmem:[%s1669_s1 + $0x190] sm:$0xff]   ;;  %v1278_v58 = vld [vmem:[%s1669_s1 + $0x128] sm:$0xff]   ;;  %v1286_v0 = vld [vmem:[%s1669_s1 + $0x198] sm:$0xff]   ;;  %v1308_v18 = vmov 0.0  }
  0x15   :  { %1112 = vmatpush3.bf16.msra.mxu1 %v1233_v19  ;;  %1073 = vmatprep.subr.bf16.mxu0 %v1234_v20  ;;  %v1279_v59 = vld [vmem:[%s1670_s0 + $0xac] ss:$28 sps:$4 sm:$0xff]   ;;  %v1281_v60 = vld [vmem:[%s1670_s0 + $0xb4] ss:$28 sps:$4 sm:$0xff]   ;;  %v1288_v2 = vld [vmem:[%s1669_s1 + $0x178] sm:$0xff]  }
  0x16   :  { %1113 = vmatprep.subr.bf16.mxu1 %v1235_v21  ;;  %v1283_v61 = vld [vmem:[%s1670_s0 + $0xa8] ss:$28 sps:$4 sm:$0xff]   ;;  %v1284_v62 = vld [vmem:[%s1670_s0 + $0xb0] ss:$28 sps:$4 sm:$0xff]   ;;  %v1290_v4 = vld [vmem:[%s1669_s1 + $0x138] sm:$0xff]  }
  0x17   :  { %v1285_v63 = vld [vmem:[%s1669_s1 + $0x170] sm:$0xff]   ;;  %v1289_v3 = vld [vmem:[%s1669_s1 + $0x1a0] sm:$0xff]   ;;  %v1294_v7 = vld [vmem:[%s1669_s1 + $0x1a8] sm:$0xff]   ;;  %20 = vst.msk [vmem:[%s1671_s3] sm:$0x1] %vm19_vm1, %v1308_v18 }
  0x18   :  { %1074 = vmatpush3.bf16.msra.mxu0 %v1236_v22  ;;  %v1287_v1 = vld [vmem:[%s1669_s1 + $0x130] sm:$0xff]   ;;  %v1297_v9 = vld [vmem:[%s1670_s0 + $0x4c] ss:$28 sps:$4 sm:$0xff]   ;;  %v1300_v13 = vld [vmem:[%s1670_s0 + $0x84] ss:$28 sps:$4 sm:$0xff]  }
  0x19   :  { %1114 = vmatpush3.bf16.msra.mxu1 %v1237_v23  ;;  %1075 = vmatprep.subr.bf16.mxu0 %v1238_v24  ;;  %v1291_v5 = vld [vmem:[%s1670_s0 + $0x10] ss:$28 sps:$4 sm:$0xff]   ;;  %v1295_v8 = vld [vmem:[%s1670_s0 + $0x18] ss:$28 sps:$4 sm:$0xff]   ;;  %v1303_v11 = vld [vmem:[%s1670_s0 + $0x88] ss:$28 sps:$4 sm:$0xff]  }
  0x1a   :  { %1115 = vmatprep.subr.bf16.mxu1 %v1239_v25  ;;  %v1293_v6 = vld [vmem:[%s1670_s0 + $0x14] ss:$28 sps:$4 sm:$0xff]   ;;  %v1299_v12 = vld [vmem:[%s1670_s0 + $0x48] ss:$28 sps:$4 sm:$0xff]   ;;  %v1304_v14 = vld [vmem:[%s1670_s0 + $0xc0] ss:$28 sps:$4 sm:$0xff]  }
  0x1b   :  { %v1296_v10 = vld [vmem:[%s1670_s0 + $0x50] ss:$28 sps:$4 sm:$0xff]   ;;  %v1302_v15 = vld [vmem:[%s1670_s0 + $0x80] ss:$28 sps:$4 sm:$0xff]   ;;  %v1307_v17 = vld [vmem:[%s1670_s0 + $0xb8] ss:$28 sps:$4 sm:$0xff]  }
  0x1c   :  { %1076 = vmatpush3.bf16.msra.mxu0 %v1240_v26  ;;  %v1305_v16 = vld [vmem:[%s1670_s0 + $0xbc] ss:$28 sps:$4 sm:$0xff]   ;;  %21 = vst.msk [vmem:[%s1672_s4] sm:$0x1] %vm19_vm1, %v1308_v18 }
  0x1d   :  { %1116 = vmatpush3.bf16.msra.mxu1 %v1241_v27  ;;  %1077 = vmatprep.subr.bf16.mxu0 %v1242_v28 }
  0x1e   :  { %1117 = vmatprep.subr.bf16.mxu1 %v1243_v29 }
  0x20   :  { %1078 = vmatpush3.bf16.msra.mxu0 %v1244_v30 }
  0x21   :  { %1118 = vmatpush3.bf16.msra.mxu1 %v1245_v31  ;;  %1143 = vmatprep.subr.bf16.mxu0 %v1252_v36 }
  0x22   :  { %1193 = vmatprep.subr.bf16.mxu1 %v1265_v47 }
  0x23   :  { %672 = vmatmul.mubr.bf16.vlgmr.msra.gmra.mrb[0].mxu0 %v1246_v32 }
  0x24   :  { %737 = vmatmul.mubr.bf16.vlgmr.msra.gmra.mrb[0].mxu1 %v1249_v34  ;;  %1144 = vmatpush3.bf16.msra.mxu0 %v1253_v37 }
  0x25   :  { %1145 = vmatprep.subr.bf16.mxu0 %v1254_v38  ;;  %679 = vmatprep.mubr.bf16.mxu0 %v1256_v40 }
  0x26   :  { %744 = vmatprep.mubr.bf16.mxu1 %v1258_v41  ;;  %1194 = vmatpush3.bf16.msra.mxu1 %v1265_v47 }
  0x27   :  { %1195 = vmatprep.subr.bf16.mxu1 %v1274_v54 }
  0x28   :  { %1146 = vmatpush3.bf16.msra.mxu0 %v1255_v39 }
  0x29   :  { %1147 = vmatprep.subr.bf16.mxu0 %v1262_v44 }
  0x2a   :  { %1196 = vmatpush3.bf16.msra.mxu1 %v1274_v54 }
  0x2b   :  { %680 = vmatmul.mubr.bf16.gmra.mrb[4].mxu0 %v1260_v42  ;;  %1197 = vmatprep.subr.bf16.mxu1 %v1277_v57 }
  0x2c   :  { %745 = vmatmul.mubr.bf16.gmra.mrb[4].mxu1 %v1261_v43  ;;  %1148 = vmatpush3.bf16.msra.mxu0 %v1263_v45 }
  0x2d   :  { %1149 = vmatprep.subr.bf16.mxu0 %v1264_v46  ;;  %687 = vmatprep.mubr.bf16.mxu0 %v1267_v49 }
  0x2e   :  { %752 = vmatprep.mubr.bf16.mxu1 %v1269_v50  ;;  %1198 = vmatpush3.bf16.msra.mxu1 %v1277_v57 }
  0x2f   :  { %1199 = vmatprep.subr.bf16.mxu1 %v1286_v0 }
  0x30   :  { %1150 = vmatpush3.bf16.msra.mxu0 %v1266_v48 }
  0x31   :  { %1151 = vmatprep.subr.bf16.mxu0 %v1273_v53 }
  0x32   :  { %1200 = vmatpush3.bf16.msra.mxu1 %v1286_v0 }
  0x33   :  { %688 = vmatmul.mubr.bf16.gmra.mrb[8].mxu0 %v1271_v51  ;;  %1201 = vmatprep.subr.bf16.mxu1 %v1289_v3 }
  0x34   :  { %753 = vmatmul.mubr.bf16.gmra.mrb[8].mxu1 %v1272_v52  ;;  %1152 = vmatpush3.bf16.msra.mxu0 %v1275_v55 }
  0x35   :  { %1153 = vmatprep.subr.bf16.mxu0 %v1276_v56  ;;  %695 = vmatprep.mubr.bf16.mxu0 %v1279_v59 }
  0x36   :  { %760 = vmatprep.mubr.bf16.mxu1 %v1281_v60  ;;  %1202 = vmatpush3.bf16.msra.mxu1 %v1289_v3 }
  0x37   :  { %1203 = vmatprep.subr.bf16.mxu1 %v1294_v7 }
  0x38   :  { %1154 = vmatpush3.bf16.msra.mxu0 %v1278_v58 }
  0x39   :  { %1155 = vmatprep.subr.bf16.mxu0 %v1285_v63 }
  0x3a   :  { %1204 = vmatpush3.bf16.msra.mxu1 %v1294_v7 }
  0x3b   :  { %696 = vmatmul.mubr.bf16.gmra.mrb[12].mxu0 %v1283_v61 }
  0x3c   :  { %761 = vmatmul.mubr.bf16.gmra.mrb[12].mxu1 %v1284_v62  ;;  %1156 = vmatpush3.bf16.msra.mxu0 %v1287_v1 }
  0x3d   :  { %1157 = vmatprep.subr.bf16.mxu0 %v1288_v2  ;;  %801 = vmatprep.mubr.bf16.mxu0 %v1293_v6 }
  0x3e   :  { %1205 = vmatprep.mubr.msk.bf16.mxu1 %vm626_vm0, %v1295_v8 }
  0x40   :  { %1158 = vmatpush3.bf16.msra.mxu0 %v1290_v4 }
  0x43   :  { %802 = vmatmul.mubr.bf16.vlgmr.msra.gmra.mrb[16].mxu0 %v1291_v5 }
  0x44   :  { %809 = vmatprep.mubr.bf16.mxu0 %v1297_v9  ;;  %1206 = vmatmul.mubr.msk.bf16.vlgmr.msra.gmra.mrb[16].mxu1 %vm626_vm0, %v1296_v10 }
  0x45   :  { %1209 = vmatprep.mubr.msk.bf16.mxu1 %vm626_vm0, %v1303_v11 }
  0x4b   :  { %810 = vmatmul.mubr.bf16.gmra.mrb[20].mxu0 %v1299_v12 }
  0x4c   :  { %817 = vmatprep.mubr.bf16.mxu0 %v1300_v13  ;;  %1210 = vmatmul.mubr.msk.bf16.gmra.mrb[20].mxu1 %vm626_vm0, %v1304_v14 }
  0x53   :  { %818 = vmatmul.mubr.bf16.gmra.mrb[24].mxu0 %v1302_v15 }
  0x54   :  { %825 = vmatprep.mubr.bf16.mxu0 %v1305_v16 }
  0x5b   :  { %826 = vmatmul.mubr.bf16.gmra.mrb[28].mxu0 %v1307_v17 }
  0xf6   :  { %v1079_v19 = vpop.f32.mrb[0].mxu0 }
  0xf7   :  { %v1119_v20 = vpop.f32.mrb[0].mxu1  ;;  %v1080_v21 = vpop.f32.mrb[1].mxu0 }
  0xf8   :  { %v1081_v22 = vadd.f32 %v1080_v21, %v1079_v19  ;;  %v1120_v23 = vpop.f32.mrb[1].mxu1  ;;  %v1082_v24 = vpop.f32.mrb[2].mxu0 }
  0xf9   :  { %v1121_v25 = vadd.f32 %v1120_v23, %v1119_v20  ;;  %v1122_v26 = vpop.f32.mrb[2].mxu1  ;;  %v1083_v27 = vpop.f32.mrb[3].mxu0 }
  0xfa   :  { %v1084_v28 = vadd.f32 %v1083_v27, %v1082_v24  ;;  %v1123_v29 = vpop.f32.mrb[3].mxu1 }
  0xfb   :  { %v739_v30 = vadd.f32 %v1121_v25, %v1081_v22  ;;  %v1124_v31 = vadd.f32 %v1123_v29, %v1122_v26 }
  0xfd   :  { %v742_v32 = vadd.f32 %v1124_v31, %v1084_v28 }
  0xfe   :  { %v1085_v33 = vpop.f32.mrb[4].mxu0 }
  0xff   :  { %v1125_v34 = vpop.f32.mrb[4].mxu1  ;;  %v1086_v35 = vpop.f32.mrb[5].mxu0 }
 0x100   :  { %v1087_v36 = vadd.f32 %v1086_v35, %v1085_v33  ;;  %v1126_v37 = vpop.f32.mrb[5].mxu1  ;;  %v1088_v38 = vpop.f32.mrb[6].mxu0 }
 0x101   :  { %v1127_v39 = vadd.f32 %v1126_v37, %v1125_v34  ;;  %v1128_v40 = vpop.f32.mrb[6].mxu1  ;;  %v1089_v41 = vpop.f32.mrb[7].mxu0 }
 0x102   :  { %v1090_v42 = vadd.f32 %v1089_v41, %v1088_v38  ;;  %v1129_v43 = vpop.f32.mrb[7].mxu1 }
 0x103   :  { %v747_v44 = vadd.f32 %v1127_v39, %v1087_v36  ;;  %v1130_v45 = vadd.f32 %v1129_v43, %v1128_v40 }
 0x105   :  { %v1592_v46 = vadd.f32 %v1130_v45, %v1090_v42 }
 0x106   :  { %v1091_v47 = vpop.f32.mrb[8].mxu0 }
 0x107   :  { %v1131_v48 = vpop.f32.mrb[8].mxu1  ;;  %v1092_v49 = vpop.f32.mrb[9].mxu0 }
 0x108   :  { %v1093_v50 = vadd.f32 %v1092_v49, %v1091_v47  ;;  %v1132_v51 = vpop.f32.mrb[9].mxu1  ;;  %v1094_v52 = vpop.f32.mrb[10].mxu0 }
 0x109   :  { %v1133_v53 = vadd.f32 %v1132_v51, %v1131_v48  ;;  %v1134_v54 = vpop.f32.mrb[10].mxu1  ;;  %v1095_v55 = vpop.f32.mrb[11].mxu0 }
 0x10a   :  { %v1096_v56 = vadd.f32 %v1095_v55, %v1094_v52  ;;  %v1135_v57 = vpop.f32.mrb[11].mxu1 }
 0x10b   :  { %v1594_v58 = vadd.f32 %v1133_v53, %v1093_v50  ;;  %v1136_v59 = vadd.f32 %v1135_v57, %v1134_v54 }
 0x10d   :  { %v1596_v60 = vadd.f32 %v1136_v59, %v1096_v56 }
 0x10e   :  { %v1097_v61 = vpop.f32.mrb[12].mxu0 }
 0x10f   :  { %v1137_v62 = vpop.f32.mrb[12].mxu1  ;;  %v1098_v63 = vpop.f32.mrb[13].mxu0 }
 0x110   :  { %v1099_v0 = vadd.f32 %v1098_v63, %v1097_v61  ;;  %v1138_v1 = vpop.f32.mrb[13].mxu1  ;;  %v1100_v2 = vpop.f32.mrb[14].mxu0 }
 0x111   :  { %v1139_v3 = vadd.f32 %v1138_v1, %v1137_v62  ;;  %v1140_v4 = vpop.f32.mrb[14].mxu1  ;;  %v1101_v5 = vpop.f32.mrb[15].mxu0 }
 0x112   :  { %v1102_v6 = vadd.f32 %v1101_v5, %v1100_v2  ;;  %v1141_v7 = vpop.f32.mrb[15].mxu1 }
 0x113   :  { %v1598_v8 = vadd.f32 %v1139_v3, %v1099_v0  ;;  %v1142_v9 = vadd.f32 %v1141_v7, %v1140_v4 }
 0x115   :  { %v1600_v10 = vadd.f32 %v1142_v9, %v1102_v6 }
 0x116   :  { %v1159_v11 = vpop.f32.mrb[16].mxu0 }
 0x117   :  { %v1160_v12 = vpop.f32.mrb[17].mxu0  ;;  %v1207_v17 = vpop.f32.mrb[16].mxu1 }
 0x118   :  { %v1161_v13 = vadd.f32 %v1160_v12, %v1159_v11  ;;  %v1162_v14 = vpop.f32.mrb[18].mxu0  ;;  %v868_v19 = vpop.f32.mrb[17].mxu1 }
 0x119   :  { %v1163_v15 = vpop.f32.mrb[19].mxu0  ;;  %v1208_v21 = vpop.f32.mrb[18].mxu1 }
 0x11a   :  { %v1164_v16 = vadd.f32 %v1163_v15, %v1162_v14  ;;  %v804_v18 = vadd.f32 %v1161_v13, %v739_v30  ;;  %v871_v23 = vpop.f32.mrb[19].mxu1 }
 0x11c   :  { %v869_v20 = vadd.f32 %v868_v19, %v804_v18  ;;  %v807_v22 = vadd.f32 %v1164_v16, %v742_v32 }
 0x11e   :  { %900 = vst.msk [vmem:[%s1673_s2] sm:$0xff] %vm899_vm2, %v869_v20  ;;  %v934_v24 = vmul.f32 %v869_v20, %v869_v20  ;;  %v872_v25 = vadd.f32 %v871_v23, %v807_v22  ;;  %v1165_v26 = vpop.f32.mrb[20].mxu0  ;;  %v909_v28 = vsel %vm899_vm2, %v869_v20, 0.0 }
 0x11f   :  { %v1166_v27 = vpop.f32.mrb[21].mxu0  ;;  %v1211_v39 = vpop.f32.mrb[20].mxu1 }
 0x120   :  { %901 = vst.msk [vmem:[%s1673_s2 + $0x8] sm:$0xff] %vm899_vm2, %v872_v25  ;;  %v910_v29 = vsel %vm899_vm2, %v872_v25, 0.0  ;;  %v935_v30 = vmul.f32 %v872_v25, %v872_v25  ;;  %v1167_v31 = vadd.f32 %v1166_v27, %v1165_v26  ;;  %v1168_v32 = vpop.f32.mrb[22].mxu0  ;;  %v942_v35 = vsel %vm899_vm2, %v934_v24, 0.0  ;;  %v884_v41 = vpop.f32.mrb[21].mxu1 }
 0x121   :  { %v911_v33 = vadd.f32 %v910_v29, %v909_v28  ;;  %v1169_v34 = vpop.f32.mrb[23].mxu0  ;;  %v1212_v45 = vpop.f32.mrb[22].mxu1 }
 0x122   :  { %v943_v36 = vsel %vm899_vm2, %v935_v30, 0.0  ;;  %v812_v37 = vadd.f32 %v1167_v31, %v747_v44  ;;  %v1170_v38 = vadd.f32 %v1169_v34, %v1168_v32  ;;  %v887_v47 = vpop.f32.mrb[23].mxu1 }
 0x123   :  { %v944_v40 = vadd.f32 %v943_v36, %v942_v35 }
 0x124   :  { %v877_v42 = vadd.f32 %v1207_v17, %v812_v37  ;;  %v815_v43 = vadd.f32 %v1170_v38, %v1592_v46 }
 0x126   :  { %902 = vst.msk [vmem:[%s1673_s2 + $0x10] sm:$0xff] %vm899_vm2, %v877_v42  ;;  %v912_v48 = vsel %vm899_vm2, %v877_v42, 0.0  ;;  %v936_v49 = vmul.f32 %v877_v42, %v877_v42  ;;  %v880_v50 = vadd.f32 %v1208_v21, %v815_v43  ;;  %v1171_v51 = vpop.f32.mrb[24].mxu0  ;;  %v908_v42 = vld [vmem:[%s1671_s3] sm:$0x1] }
 0x127   :  { %v1172_v44 = vpop.f32.mrb[25].mxu0  ;;  %v913_v52 = vadd.f32 %v912_v48, %v911_v33 }
 0x128   :  { %v945_v53 = vsel %vm899_vm2, %v936_v49, 0.0  ;;  %903 = vst.msk [vmem:[%s1673_s2 + $0x18] sm:$0xff] %vm899_vm2, %v880_v50  ;;  %v937_v46 = vmul.f32 %v880_v50, %v880_v50  ;;  %v1173_v54 = vadd.f32 %v1172_v44, %v1171_v51  ;;  %v1174_v55 = vpop.f32.mrb[26].mxu0  ;;  %v914_v56 = vsel %vm899_vm2, %v880_v50, 0.0 }
 0x129   :  { %v1175_v57 = vpop.f32.mrb[27].mxu0  ;;  %v915_v59 = vadd.f32 %v914_v56, %v913_v52  ;;  %v946_v61 = vadd.f32 %v945_v53, %v944_v40 }
 0x12a   :  { %v1176_v62 = vadd.f32 %v1175_v57, %v1174_v55  ;;  %v820_v63 = vadd.f32 %v1173_v54, %v1594_v58  ;;  %v947_v0 = vsel %vm899_vm2, %v937_v46, 0.0 }
 0x12b   :  { %v948_v1 = vadd.f32 %v947_v0, %v946_v61 }
 0x12c   :  { %v885_v2 = vadd.f32 %v884_v41, %v820_v63  ;;  %v823_v3 = vadd.f32 %v1176_v62, %v1596_v60 }
 0x12e   :  { %904 = vst.msk [vmem:[%s1673_s2 + $0x20] sm:$0xff] %vm899_vm2, %v885_v2  ;;  %v916_v4 = vsel %vm899_vm2, %v885_v2, 0.0  ;;  %v938_v5 = vmul.f32 %v885_v2, %v885_v2  ;;  %v888_v6 = vadd.f32 %v887_v47, %v823_v3  ;;  %v1177_v7 = vpop.f32.mrb[28].mxu0  ;;  %v933_v47 = vld [vmem:[%s1672_s4] sm:$0x1] }
 0x12f   :  { %v917_v9 = vadd.f32 %v916_v4, %v915_v59  ;;  %v1178_v11 = vpop.f32.mrb[29].mxu0 }
 0x130   :  { %v949_v58 = vsel %vm899_vm2, %v938_v5, 0.0  ;;  %905 = vst.msk [vmem:[%s1673_s2 + $0x28] sm:$0xff] %vm899_vm2, %v888_v6  ;;  %v918_v60 = vsel %vm899_vm2, %v888_v6, 0.0  ;;  %v939_v12 = vmul.f32 %v888_v6, %v888_v6  ;;  %v1179_v13 = vadd.f32 %v1178_v11, %v1177_v7  ;;  %v1180_v14 = vpop.f32.mrb[30].mxu0 }
 0x131   :  { %v950_v15 = vadd.f32 %v949_v58, %v948_v1  ;;  %v919_v16 = vadd.f32 %v918_v60, %v917_v9  ;;  %v1181_v17 = vpop.f32.mrb[31].mxu0 }
 0x132   :  { %v951_v18 = vsel %vm899_vm2, %v939_v12, 0.0  ;;  %v828_v19 = vadd.f32 %v1179_v13, %v1598_v8  ;;  %v1182_v20 = vadd.f32 %v1181_v17, %v1180_v14 }
 0x133   :  { %v952_v21 = vadd.f32 %v951_v18, %v950_v15 }
 0x134   :  { %v893_v22 = vadd.f32 %v1211_v39, %v828_v19  ;;  %v831_v23 = vadd.f32 %v1182_v20, %v1600_v10 }
 0x136   :  { %906 = vst.msk [vmem:[%s1673_s2 + $0x30] sm:$0xff] %vm899_vm2, %v893_v22  ;;  %v920_v24 = vsel %vm899_vm2, %v893_v22, 0.0  ;;  %v940_v25 = vmul.f32 %v893_v22, %v893_v22  ;;  %v896_v26 = vadd.f32 %v1212_v45, %v831_v23 }
 0x137   :  { %v921_v27 = vadd.f32 %v920_v24, %v919_v16 }
 0x138   :  { %v953_v28 = vsel %vm899_vm2, %v940_v25, 0.0  ;;  %907 = vst.msk [vmem:[%s1673_s2 + $0x38] sm:$0xff] %vm899_vm2, %v896_v26  ;;  %v922_v8 = vsel %vm899_vm2, %v896_v26, 0.0  ;;  %v941_v10 = vmul.f32 %v896_v26, %v896_v26 }
 0x139   :  { %v954_v29 = vadd.f32 %v953_v28, %v952_v21  ;;  %v923_v30 = vadd.f32 %v922_v8, %v921_v27 }
 0x13a   :  { %v955_v31 = vsel %vm899_vm2, %v941_v10, 0.0 }
 0x13b   :  { %v924_v32 = vrot.slane %v923_v30, 4  ;;  %v956_v33 = vadd.f32 %v955_v31, %v954_v29 }
 0x13d   :  { %v925_v34 = vadd.f32 %v924_v32, %v923_v30  ;;  %v957_v35 = vrot.slane %v956_v33, 4 }
 0x13f   :  { %v926_v36 = vrot.slane %v925_v34, 2  ;;  %v958_v37 = vadd.f32 %v957_v35, %v956_v33 }
 0x141   :  { %v927_v38 = vadd.f32 %v926_v36, %v925_v34  ;;  %v959_v39 = vrot.slane %v958_v37, 2 }
 0x143   :  { %v928_v40 = vrot.slane %v927_v38, 1  ;;  %v960_v41 = vadd.f32 %v959_v39, %v958_v37 }
 0x145   :  { %v929_v43 = vadd.f32 %v928_v40, %v927_v38  ;;  %v961_v45 = vrot.slane %v960_v41, 1 }
 0x147   :  { %v930_v48 = vadd.f32 %v929_v43, %v908_v42  ;;  %v962_v49 = vadd.f32 %v961_v45, %v960_v41 }
 0x149   :  { %932 = vst.msk [vmem:[%s1671_s3] sm:$0x1] %vm19_vm1, %v930_v48  ;;  %v963_v50 = vadd.f32 %v962_v49, %v933_v47 }
 0x14b   :  { %964 = vst.msk [vmem:[%s1672_s4] sm:$0x1] %vm19_vm1, %v963_v50 }

// kernel: tile.23
= control target key start
LH: loop header
LB: loop body
LE: loop exit
PB: predicated region body
PF: predicated region fallthrough
CT: control target
= control target key end

     0   :  { %s22_s0 = inlined_call_operand.vmem [shape: f32[32], index: 0, kind: input, shape index: {}]   ;;  %s23_s1 = inlined_call_operand.vmem [shape: f32[8,32], index: 1, kind: output, shape index: {}]  }
   0x1   :  { %v4_v0 = vld [vmem:[%s22_s0] ss:$0 sm:$0xff] }
   0x2   :  { %5 = vst [vmem:[%s23_s1] sm:$0xff] %v4_v0 }

// kernel: tile.28
= control target key start
LH: loop header
LB: loop body
LE: loop exit
PB: predicated region body
PF: predicated region fallthrough
CT: control target
= control target key end

     0   :  { %s7_s6 = smov 3  ;;  %s14_s9 = smov 3  ;;  %vm4_vm0 = vcmask 261120   ;;  %vm11_vm1 = vcmask 1048320   ;;  %vm18_vm2 = vcmask 785920   ;;  %vm25_vm3 = vcmask 523520   ;;  %s76_s0 = inlined_call_operand.vmem [shape: f32[8,32], index: 0, kind: input, shape index: {}]   ;;  %s77_s1 = inlined_call_operand.vmem [shape: f32[1,256], index: 1, kind: output, shape index: {}]  }
   0x1   :  { %v38_v0 = vld [vmem:[%s76_s0 + $0x3] ss:$4 sm:%s7_s6]   ;;  %s45_s10 = smov 96   ;;  %s21_s11 = smov 3  ;;  %v39_v1 = vld [vmem:[%s76_s0 + $0x2] ss:$4 sm:%s14_s9]  }
   0x2   :  { %9 = vrot.lane.b32.xlu0 %v38_v0, %s45_s10  ;;  %v40_v2 = vld [vmem:[%s76_s0 + $0x1] ss:$4 sm:%s21_s11]   ;;  %s2_s16 = smov 3  ;;  %s46_s17 = smov 32  }
   0x3   :  { %23 = vrot.lane.b32.xlu1 %v40_v2, %s46_s17  ;;  %v3_v3 = vld [vmem:[%s76_s0] ss:$4 sm:%s2_s16]   ;;  %s47_s0 = smov 64  }
   0x4   :  { %5 = vst.msk [vmem:[#allocation0] ss:$8 sm:$0x3] %vm4_vm0, %v3_v3  }
   0x6   :  { %16 = vrot.lane.b32.xlu0 %v39_v1, %s47_s0 }
  0x74   :  { %v10_v4 = vpop.permute.xlu0 %9  }
  0x75   :  { %12 = vst.msk [vmem:[#allocation0] ss:$8 sm:$0x3] %vm11_vm1, %v10_v4   ;;  %v24_v5 = vpop.permute.xlu1 %23  }
  0x78   :  { %v17_v6 = vpop.permute.xlu0 %16  }
  0x79   :  { %19 = vst.msk [vmem:[#allocation0] ss:$8 sm:$0x3] %vm18_vm2, %v17_v6  }
  0x7a   :  { %26 = vst.msk [vmem:[#allocation0] ss:$8 sm:$0x3] %vm25_vm3, %v24_v5  }
  0x81   :  { %v30_v7 = vld [vmem:[#allocation0] sm:$0x1]  ;;  %v34_v8 = vld [vmem:[#allocation0 + $0x8] sm:$0x1] }
  0x82   :  { %32 = vst [vmem:[%s77_s1] sm:$0x1] %v30_v7  ;;  %41 = vst [vmem:[%s77_s1 + $0x1] sm:$0x1] %v34_v8 }

// kernel: hourglass_forward.20
= control target key start
LH: loop header
LB: loop body
LE: loop exit
PB: predicated region body
PF: predicated region fallthrough
CT: control target
= control target key end

     0   :  { %v18_v40 = vlaneseq  ;;  %v613_v42 = vmov 0.0   ;;  %s840_s1 = inlined_call_operand.vmem [shape: bf16[256,256], index: 1, kind: input, shape index: {}]   ;;  %s841_s0 = inlined_call_operand.vmem [shape: bf16[64,256], index: 0, kind: input, shape index: {}]   ;;  %s842_s3 = inlined_call_operand.vmem [shape: f32[1,256], index: 3, kind: output, shape index: {1}]   ;;  %s843_s4 = inlined_call_operand.vmem [shape: f32[1,256], index: 4, kind: output, shape index: {2}]   ;;  %s844_s2 = inlined_call_operand.vmem [shape: f32[64,256], index: 2, kind: output, shape index: {0}]  }
   0x1   :  { %v553_v0 = vld [vmem:[%s840_s1 + $0x4] ss:$8 sps:$4 sm:$0xff]   ;;  %v555_v1 = vld [vmem:[%s840_s1] ss:$8 sps:$4 sm:$0xff]   ;;  %v556_v2 = vld [vmem:[%s840_s1 + $0x14] ss:$8 sps:$4 sm:$0xff]  }
   0x2   :  { %264 = vmatprep.subr.bf16.mxu0 %v553_v0  ;;  %519 = vmatprep.subr.bf16.mxu1 %v553_v0  ;;  %v558_v3 = vld [vmem:[%s840_s1 + $0x10] ss:$8 sps:$4 sm:$0xff]   ;;  %v559_v4 = vld [vmem:[%s840_s1 + $0x24] ss:$8 sps:$4 sm:$0xff]   ;;  %v561_v5 = vld [vmem:[%s840_s1 + $0x20] ss:$8 sps:$4 sm:$0xff]  }
   0x3   :  { %265 = vmatpush1.bf16.msra.mxu0 %v555_v1  ;;  %535 = vmatpush1.bf16.msra.mxu1 %v555_v1  ;;  %v562_v6 = vld [vmem:[%s840_s1 + $0x34] ss:$8 sps:$4 sm:$0xff]   ;;  %v564_v7 = vld [vmem:[%s840_s1 + $0x30] ss:$8 sps:$4 sm:$0xff]   ;;  %v565_v8 = vld [vmem:[%s840_s1 + $0x44] ss:$8 sps:$4 sm:$0xff]  }
   0x4   :  { %266 = vmatprep.subr.bf16.mxu0 %v556_v2  ;;  %520 = vmatprep.subr.bf16.mxu1 %v556_v2  ;;  %v567_v9 = vld [vmem:[%s840_s1 + $0x40] ss:$8 sps:$4 sm:$0xff]   ;;  %v568_v10 = vld [vmem:[%s840_s1 + $0x54] ss:$8 sps:$4 sm:$0xff]   ;;  %v570_v11 = vld [vmem:[%s840_s1 + $0x50] ss:$8 sps:$4 sm:$0xff]  }
   0x5   :  { %v571_v12 = vld [vmem:[%s840_s1 + $0x64] ss:$8 sps:$4 sm:$0xff]   ;;  %v573_v14 = vld [vmem:[%s840_s1 + $0x60] ss:$8 sps:$4 sm:$0xff]   ;;  %v574_v16 = vld [vmem:[%s840_s1 + $0x74] ss:$8 sps:$4 sm:$0xff]  }
   0x6   :  { %v603_v13 = vld [vmem:[%s841_s0 + $0x4] ss:$8 sps:$4 sm:$0xff]   ;;  %v576_v17 = vld [vmem:[%s840_s1 + $0x70] ss:$8 sps:$4 sm:$0xff]   ;;  %v579_v19 = vld [vmem:[%s840_s1 + $0x80] ss:$8 sps:$4 sm:$0xff]  }
   0x7   :  { %267 = vmatpush1.bf16.msra.mxu0 %v558_v3  ;;  %536 = vmatpush1.bf16.msra.mxu1 %v558_v3  ;;  %v606_v15 = vld [vmem:[%s841_s0 + $0x24] ss:$8 sps:$4 sm:$0xff]   ;;  %v580_v20 = vld [vmem:[%s840_s1 + $0x94] ss:$8 sps:$4 sm:$0xff]   ;;  %v582_v21 = vld [vmem:[%s840_s1 + $0x90] ss:$8 sps:$4 sm:$0xff]  }
   0x8   :  { %268 = vmatprep.subr.bf16.mxu0 %v559_v4  ;;  %521 = vmatprep.subr.bf16.mxu1 %v559_v4  ;;  %v577_v18 = vld [vmem:[%s840_s1 + $0x84] ss:$8 sps:$4 sm:$0xff]   ;;  %v585_v23 = vld [vmem:[%s840_s1 + $0xa0] ss:$8 sps:$4 sm:$0xff]   ;;  %v586_v24 = vld [vmem:[%s840_s1 + $0xb4] ss:$8 sps:$4 sm:$0xff]  }
   0x9   :  { %296 = vmatprep.mubr.bf16.mxu0 %v603_v13  ;;  %316 = vmatprep.mubr.bf16.mxu1 %v606_v15  ;;  %v583_v22 = vld [vmem:[%s840_s1 + $0xa4] ss:$8 sps:$4 sm:$0xff]   ;;  %v588_v25 = vld [vmem:[%s840_s1 + $0xb0] ss:$8 sps:$4 sm:$0xff]   ;;  %v591_v27 = vld [vmem:[%s840_s1 + $0xc0] ss:$8 sps:$4 sm:$0xff]  }
   0xa   :  { %v589_v26 = vld [vmem:[%s840_s1 + $0xc4] ss:$8 sps:$4 sm:$0xff]   ;;  %v592_v28 = vld [vmem:[%s840_s1 + $0xd4] ss:$8 sps:$4 sm:$0xff]   ;;  %v594_v29 = vld [vmem:[%s840_s1 + $0xd0] ss:$8 sps:$4 sm:$0xff]  }
   0xb   :  { %269 = vmatpush1.bf16.msra.mxu0 %v561_v5  ;;  %537 = vmatpush1.bf16.msra.mxu1 %v561_v5  ;;  %v595_v30 = vld [vmem:[%s840_s1 + $0xe4] ss:$8 sps:$4 sm:$0xff]   ;;  %v597_v31 = vld [vmem:[%s840_s1 + $0xe0] ss:$8 sps:$4 sm:$0xff]   ;;  %v598_v32 = vld [vmem:[%s840_s1 + $0xf4] ss:$8 sps:$4 sm:$0xff]  }
   0xc   :  { %270 = vmatprep.subr.bf16.mxu0 %v562_v6  ;;  %522 = vmatprep.subr.bf16.mxu1 %v562_v6  ;;  %v600_v33 = vld [vmem:[%s840_s1 + $0xf0] ss:$8 sps:$4 sm:$0xff]   ;;  %v601_v34 = vld [vmem:[%s841_s0] ss:$8 sps:$4 sm:$0xff]   ;;  %v607_v36 = vld [vmem:[%s841_s0 + $0x14] ss:$8 sps:$4 sm:$0xff]  }
   0xd   :  { %v604_v35 = vld [vmem:[%s841_s0 + $0x20] ss:$8 sps:$4 sm:$0xff]   ;;  %v610_v37 = vld [vmem:[%s841_s0 + $0x34] ss:$8 sps:$4 sm:$0xff]   ;;  %v609_v38 = vld [vmem:[%s841_s0 + $0x10] ss:$8 sps:$4 sm:$0xff]  }
   0xe   :  { %v612_v39 = vld [vmem:[%s841_s0 + $0x30] ss:$8 sps:$4 sm:$0xff]   ;;  %vm761_vm0 = vcmp.lt.s32.totalorder %v18_v40, 256 }
   0xf   :  { %271 = vmatpush1.bf16.msra.mxu0 %v564_v7  ;;  %538 = vmatpush1.bf16.msra.mxu1 %v564_v7  ;;  %22 = vst.msk [vmem:[%s842_s3] sm:$0x3] %vm761_vm0, %v613_v42  ;;  %23 = vst.msk [vmem:[%s843_s4] sm:$0x3] %vm761_vm0, %v613_v42 }
  0x10   :  { %272 = vmatprep.subr.bf16.mxu0 %v565_v8  ;;  %523 = vmatprep.subr.bf16.mxu1 %v565_v8 }
  0x13   :  { %273 = vmatpush1.bf16.msra.mxu0 %v567_v9  ;;  %539 = vmatpush1.bf16.msra.mxu1 %v567_v9 }
  0x14   :  { %274 = vmatprep.subr.bf16.mxu0 %v568_v10  ;;  %524 = vmatprep.subr.bf16.mxu1 %v568_v10 }
  0x17   :  { %275 = vmatpush1.bf16.msra.mxu0 %v570_v11  ;;  %540 = vmatpush1.bf16.msra.mxu1 %v570_v11 }
  0x18   :  { %276 = vmatprep.subr.bf16.mxu0 %v571_v12  ;;  %525 = vmatprep.subr.bf16.mxu1 %v571_v12 }
  0x1b   :  { %277 = vmatpush1.bf16.msra.mxu0 %v573_v14  ;;  %541 = vmatpush1.bf16.msra.mxu1 %v573_v14 }
  0x1c   :  { %278 = vmatprep.subr.bf16.mxu0 %v574_v16  ;;  %526 = vmatprep.subr.bf16.mxu1 %v574_v16 }
  0x1f   :  { %279 = vmatpush1.bf16.msra.mxu0 %v576_v17  ;;  %542 = vmatpush1.bf16.msra.mxu1 %v576_v17 }
  0x20   :  { %280 = vmatprep.subr.bf16.mxu0 %v577_v18  ;;  %527 = vmatprep.subr.bf16.mxu1 %v577_v18 }
  0x23   :  { %281 = vmatpush1.bf16.msra.mxu0 %v579_v19  ;;  %543 = vmatpush1.bf16.msra.mxu1 %v579_v19 }
  0x24   :  { %282 = vmatprep.subr.bf16.mxu0 %v580_v20  ;;  %528 = vmatprep.subr.bf16.mxu1 %v580_v20 }
  0x27   :  { %283 = vmatpush1.bf16.msra.mxu0 %v582_v21  ;;  %544 = vmatpush1.bf16.msra.mxu1 %v582_v21 }
  0x28   :  { %284 = vmatprep.subr.bf16.mxu0 %v583_v22  ;;  %529 = vmatprep.subr.bf16.mxu1 %v583_v22 }
  0x2b   :  { %285 = vmatpush1.bf16.msra.mxu0 %v585_v23  ;;  %545 = vmatpush1.bf16.msra.mxu1 %v585_v23 }
  0x2c   :  { %286 = vmatprep.subr.bf16.mxu0 %v586_v24  ;;  %530 = vmatprep.subr.bf16.mxu1 %v586_v24 }
  0x2f   :  { %287 = vmatpush1.bf16.msra.mxu0 %v588_v25  ;;  %546 = vmatpush1.bf16.msra.mxu1 %v588_v25 }
  0x30   :  { %288 = vmatprep.subr.bf16.mxu0 %v589_v26  ;;  %531 = vmatprep.subr.bf16.mxu1 %v589_v26 }
  0x33   :  { %289 = vmatpush1.bf16.msra.mxu0 %v591_v27  ;;  %547 = vmatpush1.bf16.msra.mxu1 %v591_v27 }
  0x34   :  { %290 = vmatprep.subr.bf16.mxu0 %v592_v28  ;;  %532 = vmatprep.subr.bf16.mxu1 %v592_v28 }
  0x37   :  { %291 = vmatpush1.bf16.msra.mxu0 %v594_v29  ;;  %548 = vmatpush1.bf16.msra.mxu1 %v594_v29 }
  0x38   :  { %292 = vmatprep.subr.bf16.mxu0 %v595_v30  ;;  %533 = vmatprep.subr.bf16.mxu1 %v595_v30 }
  0x3b   :  { %293 = vmatpush1.bf16.msra.mxu0 %v597_v31  ;;  %549 = vmatpush1.bf16.msra.mxu1 %v597_v31 }
  0x3c   :  { %294 = vmatprep.subr.bf16.mxu0 %v598_v32  ;;  %534 = vmatprep.subr.bf16.mxu1 %v598_v32 }
  0x3f   :  { %295 = vmatpush1.bf16.msra.mxu0 %v600_v33  ;;  %550 = vmatpush1.bf16.msra.mxu1 %v600_v33 }
  0x42   :  { %297 = vmatmul.mubr.bf16.vlgmr.msra.gmra.mrb[0].mxu0 %v601_v34  ;;  %317 = vmatmul.mubr.bf16.vlgmr.msra.gmra.mrb[0].mxu1 %v604_v35 }
  0x43   :  { %306 = vmatprep.mubr.bf16.mxu0 %v607_v36  ;;  %326 = vmatprep.mubr.bf16.mxu1 %v610_v37 }
  0x4a   :  { %307 = vmatmul.mubr.bf16.gmra.mrb[4].mxu0 %v609_v38  ;;  %327 = vmatmul.mubr.bf16.gmra.mrb[4].mxu1 %v612_v39 }
 0x115   :  { %v298_v43 = vpop.f32.mrb[0].mxu0  ;;  %v318_v44 = vpop.f32.mrb[0].mxu1 }
 0x116   :  { %337 = vst [vmem:[%s844_s2] sm:$0xff] %v298_v43  ;;  %v300_v45 = vpop.f32.mrb[1].mxu0  ;;  %345 = vst [vmem:[%s844_s2 + $0x40] sm:$0xff] %v318_v44  ;;  %v320_v46 = vpop.f32.mrb[1].mxu1  ;;  %v405_v49 = vmul.f32 %v298_v43, %v298_v43  ;;  %v413_v13 = vmul.f32 %v318_v44, %v318_v44 }
 0x117   :  { %338 = vst [vmem:[%s844_s2 + $0x8] sm:$0xff] %v300_v45  ;;  %v302_v47 = vpop.f32.mrb[2].mxu0  ;;  %346 = vst [vmem:[%s844_s2 + $0x48] sm:$0xff] %v320_v46  ;;  %v322_v48 = vpop.f32.mrb[2].mxu1  ;;  %v406_v54 = vmul.f32 %v300_v45, %v300_v45  ;;  %v414_v16 = vmul.f32 %v320_v46, %v320_v46 }
 0x118   :  { %339 = vst [vmem:[%s844_s2 + $0x10] sm:$0xff] %v302_v47  ;;  %v354_v50 = vadd.f32 %v302_v47, %v298_v43  ;;  %v407_v51 = vmul.f32 %v302_v47, %v302_v47  ;;  %v304_v52 = vpop.f32.mrb[3].mxu0  ;;  %347 = vst [vmem:[%s844_s2 + $0x50] sm:$0xff] %v322_v48  ;;  %v324_v53 = vpop.f32.mrb[3].mxu1  ;;  %v415_v19 = vmul.f32 %v322_v48, %v322_v48 }
 0x119   :  { %340 = vst [vmem:[%s844_s2 + $0x18] sm:$0xff] %v304_v52  ;;  %v367_v55 = vadd.f32 %v304_v52, %v300_v45  ;;  %v408_v56 = vmul.f32 %v304_v52, %v304_v52  ;;  %348 = vst [vmem:[%s844_s2 + $0x58] sm:$0xff] %v324_v53  ;;  %v416_v23 = vmul.f32 %v324_v53, %v324_v53 }
 0x11a   :  { %v421_v57 = vadd.f32 %v407_v51, %v405_v49 }
 0x11b   :  { %v434_v58 = vadd.f32 %v408_v56, %v406_v54 }
 0x11d   :  { %v308_v59 = vpop.f32.mrb[4].mxu0  ;;  %v328_v60 = vpop.f32.mrb[4].mxu1 }
 0x11e   :  { %341 = vst [vmem:[%s844_s2 + $0x20] sm:$0xff] %v308_v59  ;;  %v355_v61 = vadd.f32 %v354_v50, %v308_v59  ;;  %v409_v62 = vmul.f32 %v308_v59, %v308_v59  ;;  %v310_v63 = vpop.f32.mrb[5].mxu0  ;;  %349 = vst [vmem:[%s844_s2 + $0x60] sm:$0xff] %v328_v60  ;;  %v330_v0 = vpop.f32.mrb[5].mxu1  ;;  %v417_v22 = vmul.f32 %v328_v60, %v328_v60 }
 0x11f   :  { %342 = vst [vmem:[%s844_s2 + $0x28] sm:$0xff] %v310_v63  ;;  %v368_v1 = vadd.f32 %v367_v55, %v310_v63  ;;  %v410_v2 = vmul.f32 %v310_v63, %v310_v63  ;;  %v312_v3 = vpop.f32.mrb[6].mxu0  ;;  %350 = vst [vmem:[%s844_s2 + $0x68] sm:$0xff] %v330_v0  ;;  %v332_v4 = vpop.f32.mrb[6].mxu1  ;;  %v418_v26 = vmul.f32 %v330_v0, %v330_v0 }
 0x120   :  { %v422_v5 = vadd.f32 %v421_v57, %v409_v62  ;;  %343 = vst [vmem:[%s844_s2 + $0x30] sm:$0xff] %v312_v3  ;;  %v356_v6 = vadd.f32 %v355_v61, %v312_v3  ;;  %v411_v7 = vmul.f32 %v312_v3, %v312_v3  ;;  %v314_v8 = vpop.f32.mrb[7].mxu0  ;;  %351 = vst [vmem:[%s844_s2 + $0x70] sm:$0xff] %v332_v4  ;;  %v334_v9 = vpop.f32.mrb[7].mxu1  ;;  %v387_v57 = vshrl.u32 %v18_v40, 7 }
 0x121   :  { %v435_v10 = vadd.f32 %v434_v58, %v410_v2  ;;  %344 = vst [vmem:[%s844_s2 + $0x38] sm:$0xff] %v314_v8  ;;  %v369_v11 = vadd.f32 %v368_v1, %v314_v8  ;;  %v412_v12 = vmul.f32 %v314_v8, %v314_v8  ;;  %352 = vst [vmem:[%s844_s2 + $0x78] sm:$0xff] %v334_v9 }
 0x122   :  { %v357_v14 = vadd.f32 %v356_v6, %v318_v44  ;;  %v423_v15 = vadd.f32 %v422_v5, %v411_v7  ;;  %v419_v33 = vmul.f32 %v332_v4, %v332_v4  ;;  %v420_v36 = vmul.f32 %v334_v9, %v334_v9 }
 0x123   :  { %v370_v17 = vadd.f32 %v369_v11, %v320_v46  ;;  %v436_v18 = vadd.f32 %v435_v10, %v412_v12  ;;  %v614_v46 = vmov 1966171168   ;;  %v404_v11 = vld [vmem:[%s843_s4] sm:$0x3] }
 0x124   :  { %v424_v20 = vadd.f32 %v423_v15, %v413_v13  ;;  %v358_v21 = vadd.f32 %v357_v14, %v322_v48  ;;  %v384_v47 = vunpack.c.l.s4 %v614_v46 }
 0x125   :  { %v437_v24 = vadd.f32 %v436_v18, %v414_v16  ;;  %v371_v25 = vadd.f32 %v370_v17, %v324_v53 }
 0x126   :  { %v359_v27 = vadd.f32 %v358_v21, %v328_v60  ;;  %v425_v28 = vadd.f32 %v424_v20, %v415_v19  ;;  %v385_v56 = vunpack.c.0.s8 %v384_v47 }
 0x127   :  { %v372_v29 = vadd.f32 %v371_v25, %v330_v0  ;;  %v438_v30 = vadd.f32 %v437_v24, %v416_v23 }
 0x128   :  { %v426_v31 = vadd.f32 %v425_v28, %v417_v22  ;;  %v360_v32 = vadd.f32 %v359_v27, %v332_v4  ;;  %v388_v2 = vsub.s32 %v385_v56, %v387_v57 }
 0x129   :  { %v439_v34 = vadd.f32 %v438_v30, %v418_v26  ;;  %v373_v35 = vadd.f32 %v372_v29, %v334_v9  ;;  %v353_v9 = vld [vmem:[%s842_s3] sm:$0x3] }
 0x12a   :  { %v361_v37 = vrot.slane %v360_v32, 4  ;;  %v427_v38 = vadd.f32 %v426_v31, %v419_v33 }
 0x12b   :  { %v374_v39 = vrot.slane %v373_v35, 4  ;;  %v440_v42 = vadd.f32 %v439_v34, %v420_v36 }
 0x12c   :  { %v362_v43 = vadd.f32 %v361_v37, %v360_v32  ;;  %v428_v44 = vrot.slane %v427_v38, 4 }
 0x12d   :  { %v375_v45 = vadd.f32 %v374_v39, %v373_v35  ;;  %v441_v48 = vrot.slane %v440_v42, 4 }
 0x12e   :  { %v363_v49 = vrot.slane %v362_v43, 2  ;;  %v429_v50 = vadd.f32 %v428_v44, %v427_v38 }
 0x12f   :  { %v376_v51 = vrot.slane %v375_v45, 2  ;;  %v442_v52 = vadd.f32 %v441_v48, %v440_v42 }
 0x130   :  { %v364_v53 = vadd.f32 %v363_v49, %v362_v43  ;;  %v430_v54 = vrot.slane %v429_v50, 2 }
 0x131   :  { %v377_v55 = vadd.f32 %v376_v51, %v375_v45  ;;  %v443_v58 = vrot.slane %v442_v52, 2 }
 0x132   :  { %v365_v59 = vrot.slane %v364_v53, 1  ;;  %v431_v60 = vadd.f32 %v430_v54, %v429_v50 }
 0x133   :  { %v378_v61 = vrot.slane %v377_v55, 1  ;;  %v444_v62 = vadd.f32 %v443_v58, %v442_v52 }
 0x134   :  { %v366_v63 = vadd.f32 %v365_v59, %v364_v53  ;;  %v432_v0 = vrot.slane %v431_v60, 1 }
 0x135   :  { %v379_v1 = vadd.f32 %v378_v61, %v377_v55  ;;  %v445_v3 = vrot.slane %v444_v62, 1 }
 0x136   :  { %v433_v4 = vadd.f32 %v432_v0, %v431_v60 }
 0x137   :  { %v382_v5 = vcombine.low %v366_v63, %v379_v1  ;;  %v446_v6 = vadd.f32 %v445_v3, %v444_v62 }
 0x139   :  { %v389_v7 = vrot.slane %v382_v5, %v388_v2  ;;  %v449_v8 = vcombine.low %v433_v4, %v446_v6 }
 0x13b   :  { %v396_v40 = vrot.slane %v389_v7, %v388_v2  ;;  %v456_v10 = vrot.slane %v449_v8, %v388_v2 }
 0x13d   :  { %v398_v12 = vadd.f32 %v396_v40, %v353_v9  ;;  %v463_v13 = vrot.slane %v456_v10, %v388_v2 }
 0x13f   :  { %403 = vst.msk [vmem:[%s842_s3] sm:$0x3] %vm761_vm0, %v398_v12  ;;  %v465_v14 = vadd.f32 %v463_v13, %v404_v11 }
 0x141   :  { %466 = vst.msk [vmem:[%s843_s4] sm:$0x3] %vm761_vm0, %v465_v14 }

// kernel: hourglass_forward.21
= control target key start
LH: loop header
LB: loop body
LE: loop exit
PB: predicated region body
PF: predicated region fallthrough
CT: control target
= control target key end

     0   :  { %v35_v0 = vlaneseq  ;;  %s372_s1 = inlined_call_operand.vmem [shape: f32[1,256], index: 1, kind: input, shape index: {}]   ;;  %s373_s2 = inlined_call_operand.vmem [shape: f32[1,256], index: 2, kind: input, shape index: {}]   ;;  %s374_s0 = inlined_call_operand.vmem [shape: f32[64,256], index: 0, kind: input, shape index: {}]   ;;  %s375_s3 = inlined_call_operand.vmem [shape: f32[64,256], index: 3, kind: input, shape index: {}]   ;;  %s376_s4 = inlined_call_operand.vmem [shape: f32[64,256], index: 4, kind: output, shape index: {}]  }
   0x1   :  { %v33_v2 = vld [vmem:[%s372_s1] sm:$0x3]  ;;  %v18_v6 = vld [vmem:[%s374_s0 + $0x8] sm:$0xff]  ;;  %v19_v8 = vld [vmem:[%s374_s0 + $0x10] sm:$0xff] }
   0x2   :  { %v36_v1 = vshrl.u32 %v35_v0, 7  ;;  %v61_v3 = vld [vmem:[%s373_s2] sm:$0x3]  ;;  %v20_v9 = vld [vmem:[%s374_s0 + $0x18] sm:$0xff]  ;;  %v22_v15 = vld [vmem:[%s374_s0 + $0x28] sm:$0xff] }
   0x3   :  { %v17_v4 = vld [vmem:[%s374_s0] sm:$0xff]  ;;  %v23_v16 = vld [vmem:[%s374_s0 + $0x30] sm:$0xff]  ;;  %v24_v17 = vld [vmem:[%s374_s0 + $0x38] sm:$0xff] }
   0x4   :  { %v37_v5 = vsub.s32 0, %v36_v1  ;;  %v41_v7 = vsub.s32 1, %v36_v1  ;;  %v21_v10 = vld [vmem:[%s374_s0 + $0x20] sm:$0xff]  ;;  %v90_v21 = vld [vmem:[%s375_s3 + $0x8] sm:$0xff]  ;;  %v91_v24 = vld [vmem:[%s375_s3 + $0x10] sm:$0xff] }
   0x5   :  { %v89_v19 = vld [vmem:[%s375_s3] sm:$0xff]  ;;  %v92_v25 = vld [vmem:[%s375_s3 + $0x18] sm:$0xff]  ;;  %v94_v35 = vld [vmem:[%s375_s3 + $0x28] sm:$0xff] }
   0x6   :  { %v203_v11 = vrot.slane %v33_v2, %v37_v5  ;;  %v205_v12 = vrot.slane %v61_v3, %v37_v5  ;;  %v207_v13 = vrot.slane %v33_v2, %v41_v7  ;;  %v209_v14 = vrot.slane %v61_v3, %v41_v7  ;;  %v93_v27 = vld [vmem:[%s375_s3 + $0x20] sm:$0xff]  ;;  %v95_v36 = vld [vmem:[%s375_s3 + $0x30] sm:$0xff]  ;;  %v96_v37 = vld [vmem:[%s375_s3 + $0x38] sm:$0xff] }
   0x7   :  { %v25_v46 = vld [vmem:[%s374_s0 + $0x40] sm:$0xff]  ;;  %v26_v47 = vld [vmem:[%s374_s0 + $0x48] sm:$0xff]  ;;  %v27_v48 = vld [vmem:[%s374_s0 + $0x50] sm:$0xff] }
   0x8   :  { %v45_v18 = vmul.f32 %v203_v11, %v17_v4  ;;  %v46_v20 = vmul.f32 %v207_v13, %v18_v6  ;;  %v47_v22 = vmul.f32 %v203_v11, %v19_v8  ;;  %v48_v23 = vmul.f32 %v207_v13, %v20_v9  ;;  %v28_v53 = vld [vmem:[%s374_s0 + $0x58] sm:$0xff]  ;;  %v29_v54 = vld [vmem:[%s374_s0 + $0x60] sm:$0xff]  ;;  %v30_v55 = vld [vmem:[%s374_s0 + $0x68] sm:$0xff] }
   0x9   :  { %v49_v26 = vmul.f32 %v203_v11, %v21_v10  ;;  %v50_v28 = vmul.f32 %v207_v13, %v22_v15  ;;  %v51_v29 = vmul.f32 %v203_v11, %v23_v16  ;;  %v52_v30 = vmul.f32 %v207_v13, %v24_v17  ;;  %v31_v60 = vld [vmem:[%s374_s0 + $0x70] sm:$0xff]  ;;  %v32_v61 = vld [vmem:[%s374_s0 + $0x78] sm:$0xff]  ;;  %v97_v3 = vld [vmem:[%s375_s3 + $0x40] sm:$0xff] }
   0xa   :  { %v73_v31 = vadd.f32 %v205_v12, %v45_v18  ;;  %v74_v32 = vadd.f32 %v209_v14, %v46_v20  ;;  %v75_v33 = vadd.f32 %v205_v12, %v47_v22  ;;  %v76_v34 = vadd.f32 %v209_v14, %v48_v23  ;;  %v98_v5 = vld [vmem:[%s375_s3 + $0x48] sm:$0xff]  ;;  %v99_v8 = vld [vmem:[%s375_s3 + $0x50] sm:$0xff]  ;;  %v100_v9 = vld [vmem:[%s375_s3 + $0x58] sm:$0xff] }
   0xb   :  { %v77_v38 = vadd.f32 %v205_v12, %v49_v26  ;;  %v78_v39 = vadd.f32 %v209_v14, %v50_v28  ;;  %v79_v40 = vadd.f32 %v205_v12, %v51_v29  ;;  %v80_v41 = vadd.f32 %v209_v14, %v52_v30  ;;  %v101_v15 = vld [vmem:[%s375_s3 + $0x60] sm:$0xff]  ;;  %v102_v23 = vld [vmem:[%s375_s3 + $0x68] sm:$0xff] }
   0xc   :  { %v105_v42 = vadd.f32 %v89_v19, %v73_v31  ;;  %v106_v43 = vadd.f32 %v90_v21, %v74_v32  ;;  %v107_v44 = vadd.f32 %v91_v24, %v75_v33  ;;  %v108_v45 = vadd.f32 %v92_v25, %v76_v34  ;;  %v103_v24 = vld [vmem:[%s375_s3 + $0x70] sm:$0xff] }
   0xd   :  { %v109_v49 = vadd.f32 %v93_v27, %v77_v38  ;;  %v110_v50 = vadd.f32 %v94_v35, %v78_v39  ;;  %v111_v51 = vadd.f32 %v95_v36, %v79_v40  ;;  %v112_v52 = vadd.f32 %v96_v37, %v80_v41 }
   0xe   :  { %v121_v56 = vmax.f32 %v105_v42, 0.0  ;;  %v122_v57 = vmax.f32 %v106_v43, 0.0  ;;  %v123_v58 = vmax.f32 %v107_v44, 0.0  ;;  %v124_v59 = vmax.f32 %v108_v45, 0.0 }
   0xf   :  { %v125_v62 = vmax.f32 %v109_v49, 0.0  ;;  %v126_v63 = vmax.f32 %v110_v50, 0.0  ;;  %v127_v0 = vmax.f32 %v111_v51, 0.0  ;;  %v128_v1 = vmax.f32 %v112_v52, 0.0 }
  0x10   :  { %137 = vst [vmem:[%s376_s4] sm:$0xff] %v121_v56  ;;  %138 = vst [vmem:[%s376_s4 + $0x8] sm:$0xff] %v122_v57  ;;  %v53_v2 = vmul.f32 %v203_v11, %v25_v46  ;;  %v54_v4 = vmul.f32 %v207_v13, %v26_v47  ;;  %v55_v6 = vmul.f32 %v203_v11, %v27_v48 }
  0x11   :  { %139 = vst [vmem:[%s376_s4 + $0x10] sm:$0xff] %v123_v58  ;;  %140 = vst [vmem:[%s376_s4 + $0x18] sm:$0xff] %v124_v59  ;;  %v56_v7 = vmul.f32 %v207_v13, %v28_v53  ;;  %v57_v10 = vmul.f32 %v203_v11, %v29_v54  ;;  %v58_v16 = vmul.f32 %v207_v13, %v30_v55 }
  0x12   :  { %141 = vst [vmem:[%s376_s4 + $0x20] sm:$0xff] %v125_v62  ;;  %142 = vst [vmem:[%s376_s4 + $0x28] sm:$0xff] %v126_v63  ;;  %v59_v17 = vmul.f32 %v203_v11, %v31_v60  ;;  %v60_v18 = vmul.f32 %v207_v13, %v32_v61  ;;  %v81_v19 = vadd.f32 %v205_v12, %v53_v2  ;;  %v104_v11 = vld [vmem:[%s375_s3 + $0x78] sm:$0xff] }
  0x13   :  { %143 = vst [vmem:[%s376_s4 + $0x30] sm:$0xff] %v127_v0  ;;  %144 = vst [vmem:[%s376_s4 + $0x38] sm:$0xff] %v128_v1  ;;  %v82_v20 = vadd.f32 %v209_v14, %v54_v4  ;;  %v83_v21 = vadd.f32 %v205_v12, %v55_v6  ;;  %v84_v22 = vadd.f32 %v209_v14, %v56_v7 }
  0x14   :  { %v85_v13 = vadd.f32 %v205_v12, %v57_v10  ;;  %v86_v25 = vadd.f32 %v209_v14, %v58_v16  ;;  %v87_v26 = vadd.f32 %v205_v12, %v59_v17  ;;  %v88_v27 = vadd.f32 %v209_v14, %v60_v18 }
  0x15   :  { %v113_v28 = vadd.f32 %v97_v3, %v81_v19  ;;  %v114_v29 = vadd.f32 %v98_v5, %v82_v20  ;;  %v115_v30 = vadd.f32 %v99_v8, %v83_v21  ;;  %v116_v31 = vadd.f32 %v100_v9, %v84_v22 }
  0x16   :  { %v117_v32 = vadd.f32 %v101_v15, %v85_v13  ;;  %v118_v33 = vadd.f32 %v102_v23, %v86_v25  ;;  %v119_v34 = vadd.f32 %v103_v24, %v87_v26  ;;  %v120_v35 = vadd.f32 %v104_v11, %v88_v27 }
  0x17   :  { %v129_v36 = vmax.f32 %v113_v28, 0.0  ;;  %v130_v37 = vmax.f32 %v114_v29, 0.0  ;;  %v131_v38 = vmax.f32 %v115_v30, 0.0  ;;  %v132_v39 = vmax.f32 %v116_v31, 0.0 }
  0x18   :  { %v133_v40 = vmax.f32 %v117_v32, 0.0  ;;  %v134_v41 = vmax.f32 %v118_v33, 0.0  ;;  %v135_v42 = vmax.f32 %v119_v34, 0.0  ;;  %v136_v43 = vmax.f32 %v120_v35, 0.0 }
  0x19   :  { %145 = vst [vmem:[%s376_s4 + $0x40] sm:$0xff] %v129_v36  ;;  %146 = vst [vmem:[%s376_s4 + $0x48] sm:$0xff] %v130_v37 }
  0x1a   :  { %147 = vst [vmem:[%s376_s4 + $0x50] sm:$0xff] %v131_v38  ;;  %148 = vst [vmem:[%s376_s4 + $0x58] sm:$0xff] %v132_v39 }
  0x1b   :  { %149 = vst [vmem:[%s376_s4 + $0x60] sm:$0xff] %v133_v40  ;;  %150 = vst [vmem:[%s376_s4 + $0x68] sm:$0xff] %v134_v41 }
  0x1c   :  { %151 = vst [vmem:[%s376_s4 + $0x70] sm:$0xff] %v135_v42  ;;  %152 = vst [vmem:[%s376_s4 + $0x78] sm:$0xff] %v136_v43 }

// kernel: tile.33
= control target key start
LH: loop header
LB: loop body
LE: loop exit
PB: predicated region body
PF: predicated region fallthrough
CT: control target
= control target key end

     0   :  { %s22_s0 = inlined_call_operand.vmem [shape: f32[16], index: 0, kind: input, shape index: {}]   ;;  %s23_s1 = inlined_call_operand.vmem [shape: f32[8,16], index: 1, kind: output, shape index: {}]  }
   0x1   :  { %v4_v0 = vld [vmem:[%s22_s0] ss:$0 sm:$0xff] }
   0x2   :  { %5 = vst [vmem:[%s23_s1] sm:$0xff] %v4_v0 }

// kernel: tile.38
= control target key start
LH: loop header
LB: loop body
LE: loop exit
PB: predicated region body
PF: predicated region fallthrough
CT: control target
= control target key end

     0   :  { %s67_s10 = smov 112   ;;  %s68_s11 = smov 80   ;;  %vm3_vm0 = vcmask 130048   ;;  %vm9_vm1 = vcmask 1048448   ;;  %vm15_vm2 = vcmask 917248   ;;  %vm21_vm3 = vcmask 786048   ;;  %s111_s0 = inlined_call_operand.vmem [shape: f32[8,16], index: 0, kind: input, shape index: {}]   ;;  %s112_s1 = inlined_call_operand.vmem [shape: f32[1,128], index: 1, kind: output, shape index: {}]  }
   0x1   :  { %v53_v0 = vld [vmem:[%s111_s0 + $0x7] sm:$0x1]   ;;  %v55_v1 = vld [vmem:[%s111_s0 + $0x5] sm:$0x1]   ;;  %v54_v2 = vld [vmem:[%s111_s0 + $0x6] sm:$0x1]  }
   0x2   :  { %7 = vrot.lane.b32.xlu0 %v53_v0, %s67_s10  ;;  %19 = vrot.lane.b32.xlu1 %v55_v1, %s68_s11  ;;  %v56_v3 = vld [vmem:[%s111_s0 + $0x4] sm:$0x1]   ;;  %v2_v4 = vld [vmem:[%s111_s0] sm:$0x1]   ;;  %s69_s18 = smov 96   ;;  %s70_s19 = smov 64  }
   0x3   :  { %4 = vst.msk [vmem:[#allocation0] sm:$0x1] %vm3_vm0, %v2_v4   ;;  %v57_v5 = vld [vmem:[%s111_s0 + $0x3] sm:$0x1]   ;;  %v58_v6 = vld [vmem:[%s111_s0 + $0x2] sm:$0x1]  }
   0x4   :  { %s71_s24 = smov 48   ;;  %s72_s25 = smov 32   ;;  %v59_v7 = vld [vmem:[%s111_s0 + $0x1] sm:$0x1]   ;;  %vm27_vm4 = vcmask 654848   ;;  %vm33_vm5 = vcmask 523648  }
   0x5   :  { %s73_s0 = smov 16   ;;  %vm39_vm6 = vcmask 392448   ;;  %vm45_vm7 = vcmask 261248  }
   0x6   :  { %13 = vrot.lane.b32.xlu0 %v54_v2, %s69_s18  ;;  %25 = vrot.lane.b32.xlu1 %v56_v3, %s70_s19 }
   0xa   :  { %31 = vrot.lane.b32.xlu0 %v57_v5, %s71_s24  ;;  %37 = vrot.lane.b32.xlu1 %v58_v6, %s72_s25 }
   0xe   :  { %43 = vrot.lane.b32.xlu0 %v59_v7, %s73_s0 }
  0x74   :  { %v8_v8 = vpop.permute.xlu0 %7   ;;  %v20_v9 = vpop.permute.xlu1 %19  }
  0x75   :  { %10 = vst.msk [vmem:[#allocation0] sm:$0x1] %vm9_vm1, %v8_v8  }
  0x78   :  { %v14_v10 = vpop.permute.xlu0 %13   ;;  %v26_v11 = vpop.permute.xlu1 %25  }
  0x79   :  { %16 = vst.msk [vmem:[#allocation0] sm:$0x1] %vm15_vm2, %v14_v10  }
  0x7a   :  { %22 = vst.msk [vmem:[#allocation0] sm:$0x1] %vm21_vm3, %v20_v9  }
  0x7b   :  { %28 = vst.msk [vmem:[#allocation0] sm:$0x1] %vm27_vm4, %v26_v11  }
  0x7c   :  { %v32_v12 = vpop.permute.xlu0 %31   ;;  %v38_v13 = vpop.permute.xlu1 %37  }
  0x7d   :  { %34 = vst.msk [vmem:[#allocation0] sm:$0x1] %vm33_vm5, %v32_v12  }
  0x7e   :  { %40 = vst.msk [vmem:[#allocation0] sm:$0x1] %vm39_vm6, %v38_v13  }
  0x80   :  { %v44_v14 = vpop.permute.xlu0 %43  }
  0x81   :  { %46 = vst.msk [vmem:[#allocation0] sm:$0x1] %vm45_vm7, %v44_v14  }
  0x88   :  { %v50_v15 = vld [vmem:[#allocation0] sm:$0x1] }
  0x89   :  { %52 = vst [vmem:[%s112_s1] sm:$0x1] %v50_v15 }

// kernel: hourglass_forward.23
= control target key start
LH: loop header
LB: loop body
LE: loop exit
PB: predicated region body
PF: predicated region fallthrough
CT: control target
= control target key end

     0   :  { %s832_s0 = inlined_call_operand.vmem [shape: f32[512,128], index: 0, kind: input, shape index: {}]   ;;  %s833_s1 = inlined_call_operand.vmem [shape: f32[1,128], index: 1, kind: input, shape index: {}]   ;;  %s834_s2 = inlined_call_operand.vmem [shape: f32[1,128], index: 2, kind: input, shape index: {}]   ;;  %s835_s3 = inlined_call_operand.vmem [shape: f32[512,128], index: 3, kind: output, shape index: {}]  }
   0x1   :  { %v14_v0 = vld [vmem:[%s832_s0] sm:$0xff]  ;;  %v15_v4 = vld [vmem:[%s832_s0 + $0x8] sm:$0xff]  ;;  %v16_v5 = vld [vmem:[%s832_s0 + $0x10] sm:$0xff] }
   0x2   :  { %v316_v1 = vld [vmem:[%s833_s1] ss:$0 sm:$0xff]  ;;  %v17_v6 = vld [vmem:[%s832_s0 + $0x18] sm:$0xff]  ;;  %v19_v11 = vld [vmem:[%s832_s0 + $0x28] sm:$0xff] }
   0x3   :  { %v321_v2 = vld [vmem:[%s834_s2] ss:$0 sm:$0xff]  ;;  %v85_v3 = vmul.f32 %v316_v1, %v14_v0  ;;  %v86_v7 = vmul.f32 %v316_v1, %v15_v4  ;;  %v87_v8 = vmul.f32 %v316_v1, %v16_v5  ;;  %v88_v9 = vmul.f32 %v316_v1, %v17_v6  ;;  %v20_v12 = vld [vmem:[%s832_s0 + $0x30] sm:$0xff]  ;;  %v21_v17 = vld [vmem:[%s832_s0 + $0x38] sm:$0xff] }
   0x4   :  { %v18_v10 = vld [vmem:[%s832_s0 + $0x20] sm:$0xff]  ;;  %v90_v15 = vmul.f32 %v316_v1, %v19_v11  ;;  %v91_v16 = vmul.f32 %v316_v1, %v20_v12  ;;  %v23_v19 = vld [vmem:[%s832_s0 + $0x48] sm:$0xff]  ;;  %v92_v23 = vmul.f32 %v316_v1, %v21_v17  ;;  %v24_v24 = vld [vmem:[%s832_s0 + $0x50] sm:$0xff] }
   0x5   :  { %v156_v13 = vadd.f32 %v321_v2, %v85_v3  ;;  %v89_v14 = vmul.f32 %v316_v1, %v18_v10  ;;  %v22_v18 = vld [vmem:[%s832_s0 + $0x40] sm:$0xff]  ;;  %v157_v20 = vadd.f32 %v321_v2, %v86_v7  ;;  %v158_v21 = vadd.f32 %v321_v2, %v87_v8  ;;  %v25_v25 = vld [vmem:[%s832_s0 + $0x58] sm:$0xff]  ;;  %v27_v31 = vld [vmem:[%s832_s0 + $0x68] sm:$0xff] }
   0x6   :  { %v159_v22 = vadd.f32 %v321_v2, %v88_v9  ;;  %v26_v26 = vld [vmem:[%s832_s0 + $0x60] sm:$0xff]  ;;  %v161_v28 = vadd.f32 %v321_v2, %v90_v15  ;;  %v162_v29 = vadd.f32 %v321_v2, %v91_v16  ;;  %v93_v30 = vmul.f32 %v316_v1, %v22_v18  ;;  %v28_v32 = vld [vmem:[%s832_s0 + $0x70] sm:$0xff]  ;;  %v29_v33 = vld [vmem:[%s832_s0 + $0x78] sm:$0xff] }
   0x7   :  { %220 = vst [vmem:[%s835_s3] sm:$0xff] %v156_v13  ;;  %v160_v27 = vadd.f32 %v321_v2, %v89_v14  ;;  %221 = vst [vmem:[%s835_s3 + $0x8] sm:$0xff] %v157_v20  ;;  %v163_v34 = vadd.f32 %v321_v2, %v92_v23  ;;  %v94_v35 = vmul.f32 %v316_v1, %v23_v19  ;;  %v30_v38 = vld [vmem:[%s832_s0 + $0x80] sm:$0xff]  ;;  %v31_v43 = vld [vmem:[%s832_s0 + $0x88] sm:$0xff] }
   0x8   :  { %222 = vst [vmem:[%s835_s3 + $0x10] sm:$0xff] %v158_v21  ;;  %223 = vst [vmem:[%s835_s3 + $0x18] sm:$0xff] %v159_v22  ;;  %v95_v36 = vmul.f32 %v316_v1, %v24_v24  ;;  %v96_v37 = vmul.f32 %v316_v1, %v25_v25  ;;  %v164_v39 = vadd.f32 %v321_v2, %v93_v30  ;;  %v32_v44 = vld [vmem:[%s832_s0 + $0x90] sm:$0xff]  ;;  %v33_v45 = vld [vmem:[%s832_s0 + $0x98] sm:$0xff] }
   0x9   :  { %224 = vst [vmem:[%s835_s3 + $0x20] sm:$0xff] %v160_v27  ;;  %225 = vst [vmem:[%s835_s3 + $0x28] sm:$0xff] %v161_v28  ;;  %v97_v40 = vmul.f32 %v316_v1, %v26_v26  ;;  %v98_v41 = vmul.f32 %v316_v1, %v27_v31  ;;  %v99_v42 = vmul.f32 %v316_v1, %v28_v32  ;;  %v34_v50 = vld [vmem:[%s832_s0 + $0xa0] sm:$0xff]  ;;  %v35_v51 = vld [vmem:[%s832_s0 + $0xa8] sm:$0xff] }
   0xa   :  { %226 = vst [vmem:[%s835_s3 + $0x30] sm:$0xff] %v162_v29  ;;  %227 = vst [vmem:[%s835_s3 + $0x38] sm:$0xff] %v163_v34  ;;  %v165_v46 = vadd.f32 %v321_v2, %v94_v35  ;;  %v166_v47 = vadd.f32 %v321_v2, %v95_v36  ;;  %v167_v48 = vadd.f32 %v321_v2, %v96_v37  ;;  %v36_v52 = vld [vmem:[%s832_s0 + $0xb0] sm:$0xff]  ;;  %v37_v57 = vld [vmem:[%s832_s0 + $0xb8] sm:$0xff] }
   0xb   :  { %v100_v49 = vmul.f32 %v316_v1, %v29_v33  ;;  %228 = vst [vmem:[%s835_s3 + $0x40] sm:$0xff] %v164_v39  ;;  %v168_v53 = vadd.f32 %v321_v2, %v97_v40  ;;  %v169_v54 = vadd.f32 %v321_v2, %v98_v41  ;;  %v170_v55 = vadd.f32 %v321_v2, %v99_v42  ;;  %v38_v62 = vld [vmem:[%s832_s0 + $0xc0] sm:$0xff]  ;;  %v39_v5 = vld [vmem:[%s832_s0 + $0xc8] sm:$0xff]  ;;  %v40_v6 = vld [vmem:[%s832_s0 + $0xd0] sm:$0xff] }
   0xc   :  { %v101_v56 = vmul.f32 %v316_v1, %v30_v38  ;;  %229 = vst [vmem:[%s835_s3 + $0x48] sm:$0xff] %v165_v46  ;;  %230 = vst [vmem:[%s835_s3 + $0x50] sm:$0xff] %v166_v47  ;;  %v102_v59 = vmul.f32 %v316_v1, %v31_v43  ;;  %v103_v60 = vmul.f32 %v316_v1, %v32_v44  ;;  %v41_v7 = vld [vmem:[%s832_s0 + $0xd8] sm:$0xff]  ;;  %v42_v12 = vld [vmem:[%s832_s0 + $0xe0] sm:$0xff] }
   0xd   :  { %231 = vst [vmem:[%s835_s3 + $0x58] sm:$0xff] %v167_v48  ;;  %v171_v58 = vadd.f32 %v321_v2, %v100_v49  ;;  %v104_v61 = vmul.f32 %v316_v1, %v33_v45  ;;  %232 = vst [vmem:[%s835_s3 + $0x60] sm:$0xff] %v168_v53  ;;  %v105_v0 = vmul.f32 %v316_v1, %v34_v50  ;;  %v43_v13 = vld [vmem:[%s832_s0 + $0xe8] sm:$0xff]  ;;  %v44_v14 = vld [vmem:[%s832_s0 + $0xf0] sm:$0xff] }
   0xe   :  { %233 = vst [vmem:[%s835_s3 + $0x68] sm:$0xff] %v169_v54  ;;  %234 = vst [vmem:[%s835_s3 + $0x70] sm:$0xff] %v170_v55  ;;  %v172_v63 = vadd.f32 %v321_v2, %v101_v56  ;;  %v106_v3 = vmul.f32 %v316_v1, %v35_v51  ;;  %v107_v4 = vmul.f32 %v316_v1, %v36_v52  ;;  %v45_v19 = vld [vmem:[%s832_s0 + $0xf8] sm:$0xff]  ;;  %v46_v24 = vld [vmem:[%s832_s0 + $0x100] sm:$0xff] }
   0xf   :  { %235 = vst [vmem:[%s835_s3 + $0x78] sm:$0xff] %v171_v58  ;;  %v173_v8 = vadd.f32 %v321_v2, %v102_v59  ;;  %v174_v9 = vadd.f32 %v321_v2, %v103_v60  ;;  %v175_v10 = vadd.f32 %v321_v2, %v104_v61  ;;  %v108_v11 = vmul.f32 %v316_v1, %v37_v57  ;;  %v47_v29 = vld [vmem:[%s832_s0 + $0x108] sm:$0xff]  ;;  %v48_v30 = vld [vmem:[%s832_s0 + $0x110] sm:$0xff]  ;;  %v49_v31 = vld [vmem:[%s832_s0 + $0x118] sm:$0xff] }
  0x10   :  { %236 = vst [vmem:[%s835_s3 + $0x80] sm:$0xff] %v172_v63  ;;  %v176_v15 = vadd.f32 %v321_v2, %v105_v0  ;;  %v177_v16 = vadd.f32 %v321_v2, %v106_v3  ;;  %v178_v17 = vadd.f32 %v321_v2, %v107_v4  ;;  %v109_v18 = vmul.f32 %v316_v1, %v38_v62  ;;  %v50_v36 = vld [vmem:[%s832_s0 + $0x120] sm:$0xff]  ;;  %v51_v37 = vld [vmem:[%s832_s0 + $0x128] sm:$0xff]  ;;  %v52_v38 = vld [vmem:[%s832_s0 + $0x130] sm:$0xff] }
  0x11   :  { %237 = vst [vmem:[%s835_s3 + $0x88] sm:$0xff] %v173_v8  ;;  %238 = vst [vmem:[%s835_s3 + $0x90] sm:$0xff] %v174_v9  ;;  %v179_v20 = vadd.f32 %v321_v2, %v108_v11  ;;  %v110_v21 = vmul.f32 %v316_v1, %v39_v5  ;;  %v111_v22 = vmul.f32 %v316_v1, %v40_v6  ;;  %v53_v43 = vld [vmem:[%s832_s0 + $0x138] sm:$0xff]  ;;  %v54_v48 = vld [vmem:[%s832_s0 + $0x140] sm:$0xff] }
  0x12   :  { %239 = vst [vmem:[%s835_s3 + $0x98] sm:$0xff] %v175_v10  ;;  %v112_v23 = vmul.f32 %v316_v1, %v41_v7  ;;  %240 = vst [vmem:[%s835_s3 + $0xa0] sm:$0xff] %v176_v15  ;;  %v180_v25 = vadd.f32 %v321_v2, %v109_v18  ;;  %v113_v26 = vmul.f32 %v316_v1, %v42_v12  ;;  %v55_v53 = vld [vmem:[%s832_s0 + $0x148] sm:$0xff]  ;;  %v56_v54 = vld [vmem:[%s832_s0 + $0x150] sm:$0xff] }
  0x13   :  { %241 = vst [vmem:[%s835_s3 + $0xa8] sm:$0xff] %v177_v16  ;;  %242 = vst [vmem:[%s835_s3 + $0xb0] sm:$0xff] %v178_v17  ;;  %v114_v27 = vmul.f32 %v316_v1, %v43_v13  ;;  %v115_v28 = vmul.f32 %v316_v1, %v44_v14  ;;  %v181_v32 = vadd.f32 %v321_v2, %v110_v21  ;;  %v57_v55 = vld [vmem:[%s832_s0 + $0x158] sm:$0xff]  ;;  %v58_v60 = vld [vmem:[%s832_s0 + $0x160] sm:$0xff] }
  0x14   :  { %243 = vst [vmem:[%s835_s3 + $0xb8] sm:$0xff] %v179_v20  ;;  %v182_v33 = vadd.f32 %v321_v2, %v111_v22  ;;  %v183_v34 = vadd.f32 %v321_v2, %v112_v23  ;;  %v116_v35 = vmul.f32 %v316_v1, %v45_v19  ;;  %244 = vst [vmem:[%s835_s3 + $0xc0] sm:$0xff] %v180_v25  ;;  %v59_v61 = vld [vmem:[%s832_s0 + $0x168] sm:$0xff]  ;;  %v60_v62 = vld [vmem:[%s832_s0 + $0x170] sm:$0xff] }
  0x15   :  { %v184_v39 = vadd.f32 %v321_v2, %v113_v26  ;;  %v185_v40 = vadd.f32 %v321_v2, %v114_v27  ;;  %v186_v41 = vadd.f32 %v321_v2, %v115_v28  ;;  %v117_v42 = vmul.f32 %v316_v1, %v46_v24  ;;  %245 = vst [vmem:[%s835_s3 + $0xc8] sm:$0xff] %v181_v32  ;;  %v61_v5 = vld [vmem:[%s832_s0 + $0x178] sm:$0xff]  ;;  %v62_v10 = vld [vmem:[%s832_s0 + $0x180] sm:$0xff]  ;;  %v63_v15 = vld [vmem:[%s832_s0 + $0x188] sm:$0xff] }
  0x16   :  { %246 = vst [vmem:[%s835_s3 + $0xd0] sm:$0xff] %v182_v33  ;;  %247 = vst [vmem:[%s835_s3 + $0xd8] sm:$0xff] %v183_v34  ;;  %v187_v44 = vadd.f32 %v321_v2, %v116_v35  ;;  %v118_v45 = vmul.f32 %v316_v1, %v47_v29  ;;  %v119_v46 = vmul.f32 %v316_v1, %v48_v30  ;;  %v64_v16 = vld [vmem:[%s832_s0 + $0x190] sm:$0xff]  ;;  %v65_v17 = vld [vmem:[%s832_s0 + $0x198] sm:$0xff] }
  0x17   :  { %v120_v47 = vmul.f32 %v316_v1, %v49_v31  ;;  %248 = vst [vmem:[%s835_s3 + $0xe0] sm:$0xff] %v184_v39  ;;  %249 = vst [vmem:[%s835_s3 + $0xe8] sm:$0xff] %v185_v40  ;;  %v188_v49 = vadd.f32 %v321_v2, %v117_v42  ;;  %v121_v50 = vmul.f32 %v316_v1, %v50_v36  ;;  %v66_v22 = vld [vmem:[%s832_s0 + $0x1a0] sm:$0xff]  ;;  %v67_v23 = vld [vmem:[%s832_s0 + $0x1a8] sm:$0xff] }
  0x18   :  { %250 = vst [vmem:[%s835_s3 + $0xf0] sm:$0xff] %v186_v41  ;;  %v122_v51 = vmul.f32 %v316_v1, %v51_v37  ;;  %v123_v52 = vmul.f32 %v316_v1, %v52_v38  ;;  %251 = vst [vmem:[%s835_s3 + $0xf8] sm:$0xff] %v187_v44  ;;  %v189_v56 = vadd.f32 %v321_v2, %v118_v45  ;;  %v68_v24 = vld [vmem:[%s832_s0 + $0x1b0] sm:$0xff]  ;;  %v69_v29 = vld [vmem:[%s832_s0 + $0x1b8] sm:$0xff] }
  0x19   :  { %v190_v57 = vadd.f32 %v321_v2, %v119_v46  ;;  %v191_v58 = vadd.f32 %v321_v2, %v120_v47  ;;  %v124_v59 = vmul.f32 %v316_v1, %v53_v43  ;;  %252 = vst [vmem:[%s835_s3 + $0x100] sm:$0xff] %v188_v49  ;;  %v192_v63 = vadd.f32 %v321_v2, %v121_v50  ;;  %v70_v34 = vld [vmem:[%s832_s0 + $0x1c0] sm:$0xff]  ;;  %v71_v39 = vld [vmem:[%s832_s0 + $0x1c8] sm:$0xff]  ;;  %v72_v40 = vld [vmem:[%s832_s0 + $0x1d0] sm:$0xff] }
  0x1a   :  { %v193_v0 = vadd.f32 %v321_v2, %v122_v51  ;;  %v194_v3 = vadd.f32 %v321_v2, %v123_v52  ;;  %v125_v4 = vmul.f32 %v316_v1, %v54_v48  ;;  %253 = vst [vmem:[%s835_s3 + $0x108] sm:$0xff] %v189_v56  ;;  %v126_v7 = vmul.f32 %v316_v1, %v55_v53  ;;  %v73_v41 = vld [vmem:[%s832_s0 + $0x1d8] sm:$0xff]  ;;  %v74_v46 = vld [vmem:[%s832_s0 + $0x1e0] sm:$0xff]  ;;  %v75_v47 = vld [vmem:[%s832_s0 + $0x1e8] sm:$0xff] }
  0x1b   :  { %254 = vst [vmem:[%s835_s3 + $0x110] sm:$0xff] %v190_v57  ;;  %255 = vst [vmem:[%s835_s3 + $0x118] sm:$0xff] %v191_v58  ;;  %v195_v6 = vadd.f32 %v321_v2, %v124_v59  ;;  %v127_v8 = vmul.f32 %v316_v1, %v56_v54  ;;  %v128_v9 = vmul.f32 %v316_v1, %v57_v55  ;;  %v76_v48 = vld [vmem:[%s832_s0 + $0x1f0] sm:$0xff]  ;;  %v77_v53 = vld [vmem:[%s832_s0 + $0x1f8] sm:$0xff] }
  0x1c   :  { %256 = vst [vmem:[%s835_s3 + $0x120] sm:$0xff] %v192_v63  ;;  %257 = vst [vmem:[%s835_s3 + $0x128] sm:$0xff] %v193_v0  ;;  %v196_v11 = vadd.f32 %v321_v2, %v125_v4  ;;  %v129_v12 = vmul.f32 %v316_v1, %v58_v60  ;;  %v130_v13 = vmul.f32 %v316_v1, %v59_v61 }
  0x1d   :  { %258 = vst [vmem:[%s835_s3 + $0x130] sm:$0xff] %v194_v3  ;;  %v131_v14 = vmul.f32 %v316_v1, %v60_v62  ;;  %259 = vst [vmem:[%s835_s3 + $0x138] sm:$0xff] %v195_v6  ;;  %v197_v18 = vadd.f32 %v321_v2, %v126_v7  ;;  %v198_v19 = vadd.f32 %v321_v2, %v127_v8 }
  0x1e   :  { %v199_v20 = vadd.f32 %v321_v2, %v128_v9  ;;  %v132_v21 = vmul.f32 %v316_v1, %v61_v5  ;;  %260 = vst [vmem:[%s835_s3 + $0x140] sm:$0xff] %v196_v11  ;;  %v200_v25 = vadd.f32 %v321_v2, %v129_v12  ;;  %v201_v26 = vadd.f32 %v321_v2, %v130_v13 }
  0x1f   :  { %v202_v27 = vadd.f32 %v321_v2, %v131_v14  ;;  %v133_v28 = vmul.f32 %v316_v1, %v62_v10  ;;  %261 = vst [vmem:[%s835_s3 + $0x148] sm:$0xff] %v197_v18  ;;  %262 = vst [vmem:[%s835_s3 + $0x150] sm:$0xff] %v198_v19  ;;  %v134_v31 = vmul.f32 %v316_v1, %v63_v15 }
  0x20   :  { %263 = vst [vmem:[%s835_s3 + $0x158] sm:$0xff] %v199_v20  ;;  %v203_v30 = vadd.f32 %v321_v2, %v132_v21  ;;  %v135_v32 = vmul.f32 %v316_v1, %v64_v16  ;;  %v136_v33 = vmul.f32 %v316_v1, %v65_v17  ;;  %264 = vst [vmem:[%s835_s3 + $0x160] sm:$0xff] %v200_v25 }
  0x21   :  { %265 = vst [vmem:[%s835_s3 + $0x168] sm:$0xff] %v201_v26  ;;  %266 = vst [vmem:[%s835_s3 + $0x170] sm:$0xff] %v202_v27  ;;  %v204_v35 = vadd.f32 %v321_v2, %v133_v28  ;;  %v137_v36 = vmul.f32 %v316_v1, %v66_v22  ;;  %v138_v37 = vmul.f32 %v316_v1, %v67_v23 }
  0x22   :  { %v139_v38 = vmul.f32 %v316_v1, %v68_v24  ;;  %267 = vst [vmem:[%s835_s3 + $0x178] sm:$0xff] %v203_v30  ;;  %v205_v42 = vadd.f32 %v321_v2, %v134_v31  ;;  %v206_v43 = vadd.f32 %v321_v2, %v135_v32  ;;  %v207_v44 = vadd.f32 %v321_v2, %v136_v33 }
  0x23   :  { %v140_v45 = vmul.f32 %v316_v1, %v69_v29  ;;  %268 = vst [vmem:[%s835_s3 + $0x180] sm:$0xff] %v204_v35  ;;  %v208_v49 = vadd.f32 %v321_v2, %v137_v36  ;;  %v209_v50 = vadd.f32 %v321_v2, %v138_v37  ;;  %v141_v52 = vmul.f32 %v316_v1, %v70_v34 }
  0x24   :  { %v210_v51 = vadd.f32 %v321_v2, %v139_v38  ;;  %269 = vst [vmem:[%s835_s3 + $0x188] sm:$0xff] %v205_v42  ;;  %270 = vst [vmem:[%s835_s3 + $0x190] sm:$0xff] %v206_v43  ;;  %v142_v55 = vmul.f32 %v316_v1, %v71_v39  ;;  %v143_v56 = vmul.f32 %v316_v1, %v72_v40 }
  0x25   :  { %271 = vst [vmem:[%s835_s3 + $0x198] sm:$0xff] %v207_v44  ;;  %v211_v54 = vadd.f32 %v321_v2, %v140_v45  ;;  %v144_v57 = vmul.f32 %v316_v1, %v73_v41  ;;  %272 = vst [vmem:[%s835_s3 + $0x1a0] sm:$0xff] %v208_v49  ;;  %v212_v58 = vadd.f32 %v321_v2, %v141_v52 }
  0x26   :  { %273 = vst [vmem:[%s835_s3 + $0x1a8] sm:$0xff] %v209_v50  ;;  %274 = vst [vmem:[%s835_s3 + $0x1b0] sm:$0xff] %v210_v51  ;;  %v145_v59 = vmul.f32 %v316_v1, %v74_v46  ;;  %v146_v60 = vmul.f32 %v316_v1, %v75_v47  ;;  %v147_v61 = vmul.f32 %v316_v1, %v76_v48 }
  0x27   :  { %275 = vst [vmem:[%s835_s3 + $0x1b8] sm:$0xff] %v211_v54  ;;  %v213_v62 = vadd.f32 %v321_v2, %v142_v55  ;;  %v214_v63 = vadd.f32 %v321_v2, %v143_v56  ;;  %v215_v0 = vadd.f32 %v321_v2, %v144_v57  ;;  %v148_v3 = vmul.f32 %v316_v1, %v77_v53 }
  0x28   :  { %276 = vst [vmem:[%s835_s3 + $0x1c0] sm:$0xff] %v212_v58  ;;  %v216_v4 = vadd.f32 %v321_v2, %v145_v59  ;;  %v217_v5 = vadd.f32 %v321_v2, %v146_v60  ;;  %v218_v6 = vadd.f32 %v321_v2, %v147_v61 }
  0x29   :  { %277 = vst [vmem:[%s835_s3 + $0x1c8] sm:$0xff] %v213_v62  ;;  %278 = vst [vmem:[%s835_s3 + $0x1d0] sm:$0xff] %v214_v63  ;;  %v219_v1 = vadd.f32 %v321_v2, %v148_v3 }
  0x2a   :  { %279 = vst [vmem:[%s835_s3 + $0x1d8] sm:$0xff] %v215_v0  ;;  %280 = vst [vmem:[%s835_s3 + $0x1e0] sm:$0xff] %v216_v4 }
  0x2b   :  { %281 = vst [vmem:[%s835_s3 + $0x1e8] sm:$0xff] %v217_v5  ;;  %282 = vst [vmem:[%s835_s3 + $0x1f0] sm:$0xff] %v218_v6 }
  0x2c   :  { %283 = vst [vmem:[%s835_s3 + $0x1f8] sm:$0xff] %v219_v1 }

// kernel: hourglass_forward.22
= control target key start
LH: loop header
LB: loop body
LE: loop exit
PB: predicated region body
PF: predicated region fallthrough
CT: control target
= control target key end

     0   :  { %v1332_v0 = vmov 0   ;;  %s2033_s1 = inlined_call_operand.vmem [shape: bf16[256,128], index: 1, kind: input, shape index: {}]   ;;  %s2034_s0 = inlined_call_operand.vmem [shape: bf16[512,256], index: 0, kind: input, shape index: {}]   ;;  %s2035_s2 = inlined_call_operand.vmem [shape: f32[512,128], index: 2, kind: output, shape index: {0}]   ;;  %s2036_s3 = inlined_call_operand.vmem [shape: f32[1,128], index: 3, kind: output, shape index: {1}]   ;;  %s2037_s4 = inlined_call_operand.vmem [shape: f32[1,128], index: 4, kind: output, shape index: {2}]  }
   0x1   :  { %533 = vmatprep.subr.bf16.mxu0 %v1332_v0  ;;  %v1220_v1 = vld [vmem:[%s2033_s1] sm:$0xff]   ;;  %1186 = vmatprep.subr.bf16.mxu1 %v1332_v0  ;;  %v1221_v2 = vld [vmem:[%s2033_s1 + $0x8] sm:$0xff]   ;;  %v1222_v3 = vld [vmem:[%s2033_s1 + $0x10] sm:$0xff]  }
   0x2   :  { %534 = vmatpush1.bf16.msra.mxu0 %v1220_v1  ;;  %1202 = vmatpush1.bf16.msra.mxu1 %v1220_v1  ;;  %v1223_v4 = vld [vmem:[%s2033_s1 + $0x18] sm:$0xff]   ;;  %v1224_v5 = vld [vmem:[%s2033_s1 + $0x20] sm:$0xff]   ;;  %v1225_v7 = vld [vmem:[%s2033_s1 + $0x28] sm:$0xff]  }
   0x3   :  { %535 = vmatprep.subr.bf16.mxu0 %v1332_v0  ;;  %1187 = vmatprep.subr.bf16.mxu1 %v1332_v0  ;;  %v1238_v6 = vld [vmem:[%s2034_s0 + $0x4] ss:$8 sps:$4 sm:$0xff]   ;;  %v1226_v8 = vld [vmem:[%s2033_s1 + $0x30] sm:$0xff]   ;;  %v1227_v9 = vld [vmem:[%s2033_s1 + $0x38] sm:$0xff]  }
   0x4   :  { %565 = vmatprep.mubr.bf16.mxu0 %v1238_v6  ;;  %v1262_v10 = vld [vmem:[%s2034_s0 + $0x104] ss:$8 sps:$4 sm:$0xff]   ;;  %v1230_v13 = vld [vmem:[%s2033_s1 + $0x50] sm:$0xff]   ;;  %v1231_v14 = vld [vmem:[%s2033_s1 + $0x58] sm:$0xff]  }
   0x5   :  { %693 = vmatprep.mubr.bf16.mxu1 %v1262_v10  ;;  %v1228_v11 = vld [vmem:[%s2033_s1 + $0x40] sm:$0xff]   ;;  %v1229_v12 = vld [vmem:[%s2033_s1 + $0x48] sm:$0xff]   ;;  %v1234_v17 = vld [vmem:[%s2033_s1 + $0x70] sm:$0xff]  }
   0x6   :  { %536 = vmatpush1.bf16.msra.mxu0 %v1221_v2  ;;  %1203 = vmatpush1.bf16.msra.mxu1 %v1221_v2  ;;  %v1232_v15 = vld [vmem:[%s2033_s1 + $0x60] sm:$0xff]   ;;  %v1233_v16 = vld [vmem:[%s2033_s1 + $0x68] sm:$0xff]   ;;  %v1235_v18 = vld [vmem:[%s2033_s1 + $0x78] sm:$0xff]  }
   0x7   :  { %537 = vmatprep.subr.bf16.mxu0 %v1332_v0  ;;  %1188 = vmatprep.subr.bf16.mxu1 %v1332_v0  ;;  %v1236_v19 = vld [vmem:[%s2034_s0] ss:$8 sps:$4 sm:$0xff]   ;;  %v1239_v21 = vld [vmem:[%s2034_s0 + $0x14] ss:$8 sps:$4 sm:$0xff]   ;;  %v1241_v23 = vld [vmem:[%s2034_s0 + $0x10] ss:$8 sps:$4 sm:$0xff]  }
   0x8   :  { %v1260_v20 = vld [vmem:[%s2034_s0 + $0x100] ss:$8 sps:$4 sm:$0xff]   ;;  %v1266_v22 = vld [vmem:[%s2034_s0 + $0x114] ss:$8 sps:$4 sm:$0xff]   ;;  %v1268_v24 = vld [vmem:[%s2034_s0 + $0x110] ss:$8 sps:$4 sm:$0xff]  }
   0x9   :  { %v1242_v25 = vld [vmem:[%s2034_s0 + $0x24] ss:$8 sps:$4 sm:$0xff]   ;;  %v1244_v27 = vld [vmem:[%s2034_s0 + $0x20] ss:$8 sps:$4 sm:$0xff]   ;;  %v1245_v29 = vld [vmem:[%s2034_s0 + $0x34] ss:$8 sps:$4 sm:$0xff]  }
   0xa   :  { %538 = vmatpush1.bf16.msra.mxu0 %v1222_v3  ;;  %1204 = vmatpush1.bf16.msra.mxu1 %v1222_v3  ;;  %v1272_v26 = vld [vmem:[%s2034_s0 + $0x124] ss:$8 sps:$4 sm:$0xff]   ;;  %v1274_v28 = vld [vmem:[%s2034_s0 + $0x120] ss:$8 sps:$4 sm:$0xff]   ;;  %v1278_v30 = vld [vmem:[%s2034_s0 + $0x134] ss:$8 sps:$4 sm:$0xff]  }
   0xb   :  { %539 = vmatprep.subr.bf16.mxu0 %v1332_v0  ;;  %1189 = vmatprep.subr.bf16.mxu1 %v1332_v0  ;;  %v1247_v31 = vld [vmem:[%s2034_s0 + $0x30] ss:$8 sps:$4 sm:$0xff]   ;;  %v1248_v33 = vld [vmem:[%s2034_s0 + $0x44] ss:$8 sps:$4 sm:$0xff]   ;;  %v1250_v35 = vld [vmem:[%s2034_s0 + $0x40] ss:$8 sps:$4 sm:$0xff]  }
   0xc   :  { %v1280_v32 = vld [vmem:[%s2034_s0 + $0x130] ss:$8 sps:$4 sm:$0xff]   ;;  %v1284_v34 = vld [vmem:[%s2034_s0 + $0x144] ss:$8 sps:$4 sm:$0xff]   ;;  %v1286_v36 = vld [vmem:[%s2034_s0 + $0x140] ss:$8 sps:$4 sm:$0xff]  }
   0xd   :  { %v1251_v37 = vld [vmem:[%s2034_s0 + $0x54] ss:$8 sps:$4 sm:$0xff]   ;;  %v1253_v39 = vld [vmem:[%s2034_s0 + $0x50] ss:$8 sps:$4 sm:$0xff]   ;;  %v1254_v41 = vld [vmem:[%s2034_s0 + $0x64] ss:$8 sps:$4 sm:$0xff]  }
   0xe   :  { %540 = vmatpush1.bf16.msra.mxu0 %v1223_v4  ;;  %1205 = vmatpush1.bf16.msra.mxu1 %v1223_v4  ;;  %v1290_v38 = vld [vmem:[%s2034_s0 + $0x154] ss:$8 sps:$4 sm:$0xff]   ;;  %v1292_v40 = vld [vmem:[%s2034_s0 + $0x150] ss:$8 sps:$4 sm:$0xff]   ;;  %v1296_v42 = vld [vmem:[%s2034_s0 + $0x164] ss:$8 sps:$4 sm:$0xff]  }
   0xf   :  { %541 = vmatprep.subr.bf16.mxu0 %v1332_v0  ;;  %1190 = vmatprep.subr.bf16.mxu1 %v1332_v0  ;;  %v1256_v43 = vld [vmem:[%s2034_s0 + $0x60] ss:$8 sps:$4 sm:$0xff]   ;;  %v1257_v45 = vld [vmem:[%s2034_s0 + $0x74] ss:$8 sps:$4 sm:$0xff]   ;;  %v1259_v47 = vld [vmem:[%s2034_s0 + $0x70] ss:$8 sps:$4 sm:$0xff]  }
  0x10   :  { %v1298_v44 = vld [vmem:[%s2034_s0 + $0x160] ss:$8 sps:$4 sm:$0xff]   ;;  %v1302_v46 = vld [vmem:[%s2034_s0 + $0x174] ss:$8 sps:$4 sm:$0xff]   ;;  %v1304_v48 = vld [vmem:[%s2034_s0 + $0x170] ss:$8 sps:$4 sm:$0xff]  }
  0x11   :  { %v1263_v49 = vld [vmem:[%s2034_s0 + $0x84] ss:$8 sps:$4 sm:$0xff]   ;;  %v1265_v51 = vld [vmem:[%s2034_s0 + $0x80] ss:$8 sps:$4 sm:$0xff]   ;;  %v1269_v53 = vld [vmem:[%s2034_s0 + $0x94] ss:$8 sps:$4 sm:$0xff]  }
  0x12   :  { %542 = vmatpush1.bf16.msra.mxu0 %v1224_v5  ;;  %1206 = vmatpush1.bf16.msra.mxu1 %v1224_v5  ;;  %v1308_v50 = vld [vmem:[%s2034_s0 + $0x184] ss:$8 sps:$4 sm:$0xff]   ;;  %v1310_v52 = vld [vmem:[%s2034_s0 + $0x180] ss:$8 sps:$4 sm:$0xff]   ;;  %v1311_v54 = vld [vmem:[%s2034_s0 + $0x194] ss:$8 sps:$4 sm:$0xff]  }
  0x13   :  { %543 = vmatprep.subr.bf16.mxu0 %v1332_v0  ;;  %1191 = vmatprep.subr.bf16.mxu1 %v1332_v0  ;;  %v1271_v55 = vld [vmem:[%s2034_s0 + $0x90] ss:$8 sps:$4 sm:$0xff]   ;;  %v1275_v57 = vld [vmem:[%s2034_s0 + $0xa4] ss:$8 sps:$4 sm:$0xff]   ;;  %v1277_v59 = vld [vmem:[%s2034_s0 + $0xa0] ss:$8 sps:$4 sm:$0xff]  }
  0x14   :  { %v1313_v56 = vld [vmem:[%s2034_s0 + $0x190] ss:$8 sps:$4 sm:$0xff]   ;;  %v1314_v58 = vld [vmem:[%s2034_s0 + $0x1a4] ss:$8 sps:$4 sm:$0xff]   ;;  %v1316_v60 = vld [vmem:[%s2034_s0 + $0x1a0] ss:$8 sps:$4 sm:$0xff]  }
  0x15   :  { %v1281_v61 = vld [vmem:[%s2034_s0 + $0xb4] ss:$8 sps:$4 sm:$0xff]   ;;  %v1283_v63 = vld [vmem:[%s2034_s0 + $0xb0] ss:$8 sps:$4 sm:$0xff]   ;;  %v1287_v1 = vld [vmem:[%s2034_s0 + $0xc4] ss:$8 sps:$4 sm:$0xff]  }
  0x16   :  { %544 = vmatpush1.bf16.msra.mxu0 %v1225_v7  ;;  %1207 = vmatpush1.bf16.msra.mxu1 %v1225_v7  ;;  %v1317_v62 = vld [vmem:[%s2034_s0 + $0x1b4] ss:$8 sps:$4 sm:$0xff]   ;;  %v1320_v2 = vld [vmem:[%s2034_s0 + $0x1c4] ss:$8 sps:$4 sm:$0xff]   ;;  %v1289_v3 = vld [vmem:[%s2034_s0 + $0xc0] ss:$8 sps:$4 sm:$0xff]  }
  0x17   :  { %545 = vmatprep.subr.bf16.mxu0 %v1332_v0  ;;  %1192 = vmatprep.subr.bf16.mxu1 %v1332_v0  ;;  %v1322_v4 = vld [vmem:[%s2034_s0 + $0x1c0] ss:$8 sps:$4 sm:$0xff]   ;;  %v1293_v5 = vld [vmem:[%s2034_s0 + $0xd4] ss:$8 sps:$4 sm:$0xff]   ;;  %v1295_v7 = vld [vmem:[%s2034_s0 + $0xd0] ss:$8 sps:$4 sm:$0xff]  }
  0x18   :  { %v1323_v6 = vld [vmem:[%s2034_s0 + $0x1d4] ss:$8 sps:$4 sm:$0xff]   ;;  %v1326_v10 = vld [vmem:[%s2034_s0 + $0x1e4] ss:$8 sps:$4 sm:$0xff]  }
  0x1a   :  { %546 = vmatpush1.bf16.msra.mxu0 %v1226_v8  ;;  %1208 = vmatpush1.bf16.msra.mxu1 %v1226_v8  ;;  %v1325_v8 = vld [vmem:[%s2034_s0 + $0x1d0] ss:$8 sps:$4 sm:$0xff]  }
  0x1b   :  { %547 = vmatprep.subr.bf16.mxu0 %v1332_v0  ;;  %1193 = vmatprep.subr.bf16.mxu1 %v1332_v0 }
  0x1e   :  { %548 = vmatpush1.bf16.msra.mxu0 %v1227_v9  ;;  %1209 = vmatpush1.bf16.msra.mxu1 %v1227_v9  ;;  %v1299_v9 = vld [vmem:[%s2034_s0 + $0xe4] ss:$8 sps:$4 sm:$0xff]  }
  0x1f   :  { %549 = vmatprep.subr.bf16.mxu0 %v1332_v0  ;;  %1194 = vmatprep.subr.bf16.mxu1 %v1332_v0 }
  0x22   :  { %550 = vmatpush1.bf16.msra.mxu0 %v1228_v11  ;;  %1210 = vmatpush1.bf16.msra.mxu1 %v1228_v11  ;;  %v1301_v11 = vld [vmem:[%s2034_s0 + $0xe0] ss:$8 sps:$4 sm:$0xff]  }
  0x23   :  { %551 = vmatprep.subr.bf16.mxu0 %v1332_v0  ;;  %1195 = vmatprep.subr.bf16.mxu1 %v1332_v0 }
  0x26   :  { %552 = vmatpush1.bf16.msra.mxu0 %v1229_v12  ;;  %1211 = vmatpush1.bf16.msra.mxu1 %v1229_v12  ;;  %v1328_v12 = vld [vmem:[%s2034_s0 + $0x1e0] ss:$8 sps:$4 sm:$0xff]  }
  0x27   :  { %553 = vmatprep.subr.bf16.mxu0 %v1332_v0  ;;  %1196 = vmatprep.subr.bf16.mxu1 %v1332_v0 }
  0x2a   :  { %554 = vmatpush1.bf16.msra.mxu0 %v1230_v13  ;;  %1212 = vmatpush1.bf16.msra.mxu1 %v1230_v13  ;;  %v1305_v13 = vld [vmem:[%s2034_s0 + $0xf4] ss:$8 sps:$4 sm:$0xff]  }
  0x2b   :  { %555 = vmatprep.subr.bf16.mxu0 %v1332_v0  ;;  %1197 = vmatprep.subr.bf16.mxu1 %v1332_v0 }
  0x2e   :  { %556 = vmatpush1.bf16.msra.mxu0 %v1231_v14  ;;  %1213 = vmatpush1.bf16.msra.mxu1 %v1231_v14  ;;  %v1329_v14 = vld [vmem:[%s2034_s0 + $0x1f4] ss:$8 sps:$4 sm:$0xff]  }
  0x2f   :  { %557 = vmatprep.subr.bf16.mxu0 %v1332_v0  ;;  %1198 = vmatprep.subr.bf16.mxu1 %v1332_v0 }
  0x32   :  { %558 = vmatpush1.bf16.msra.mxu0 %v1232_v15  ;;  %1214 = vmatpush1.bf16.msra.mxu1 %v1232_v15  ;;  %v1307_v15 = vld [vmem:[%s2034_s0 + $0xf0] ss:$8 sps:$4 sm:$0xff]  }
  0x33   :  { %559 = vmatprep.subr.bf16.mxu0 %v1332_v0  ;;  %1199 = vmatprep.subr.bf16.mxu1 %v1332_v0 }
  0x36   :  { %560 = vmatpush1.bf16.msra.mxu0 %v1233_v16  ;;  %1215 = vmatpush1.bf16.msra.mxu1 %v1233_v16  ;;  %v1331_v16 = vld [vmem:[%s2034_s0 + $0x1f0] ss:$8 sps:$4 sm:$0xff]  }
  0x37   :  { %561 = vmatprep.subr.bf16.mxu0 %v1332_v0  ;;  %1200 = vmatprep.subr.bf16.mxu1 %v1332_v0 }
  0x3a   :  { %562 = vmatpush1.bf16.msra.mxu0 %v1234_v17  ;;  %1216 = vmatpush1.bf16.msra.mxu1 %v1234_v17 }
  0x3b   :  { %563 = vmatprep.subr.bf16.mxu0 %v1332_v0  ;;  %1201 = vmatprep.subr.bf16.mxu1 %v1332_v0  ;;  %v1319_v0 = vld [vmem:[%s2034_s0 + $0x1b0] ss:$8 sps:$4 sm:$0xff]  }
  0x3e   :  { %564 = vmatpush1.bf16.msra.mxu0 %v1235_v18  ;;  %1217 = vmatpush1.bf16.msra.mxu1 %v1235_v18 }
  0x41   :  { %566 = vmatmul.mubr.bf16.vlgmr.msra.gmra.mrb[0].mxu0 %v1236_v19  ;;  %694 = vmatmul.mubr.bf16.vlgmr.msra.gmra.mrb[0].mxu1 %v1260_v20 }
  0x42   :  { %573 = vmatprep.mubr.bf16.mxu0 %v1239_v21  ;;  %701 = vmatprep.mubr.bf16.mxu1 %v1266_v22 }
  0x49   :  { %574 = vmatmul.mubr.bf16.gmra.mrb[4].mxu0 %v1241_v23  ;;  %702 = vmatmul.mubr.bf16.gmra.mrb[4].mxu1 %v1268_v24 }
  0x4a   :  { %581 = vmatprep.mubr.bf16.mxu0 %v1242_v25  ;;  %709 = vmatprep.mubr.bf16.mxu1 %v1272_v26 }
  0x51   :  { %582 = vmatmul.mubr.bf16.gmra.mrb[8].mxu0 %v1244_v27  ;;  %710 = vmatmul.mubr.bf16.gmra.mrb[8].mxu1 %v1274_v28 }
  0x52   :  { %589 = vmatprep.mubr.bf16.mxu0 %v1245_v29  ;;  %717 = vmatprep.mubr.bf16.mxu1 %v1278_v30 }
  0x59   :  { %590 = vmatmul.mubr.bf16.gmra.mrb[12].mxu0 %v1247_v31  ;;  %718 = vmatmul.mubr.bf16.gmra.mrb[12].mxu1 %v1280_v32 }
  0x5a   :  { %597 = vmatprep.mubr.bf16.mxu0 %v1248_v33  ;;  %725 = vmatprep.mubr.bf16.mxu1 %v1284_v34 }
  0x61   :  { %598 = vmatmul.mubr.bf16.gmra.mrb[16].mxu0 %v1250_v35  ;;  %726 = vmatmul.mubr.bf16.gmra.mrb[16].mxu1 %v1286_v36 }
  0x62   :  { %605 = vmatprep.mubr.bf16.mxu0 %v1251_v37  ;;  %733 = vmatprep.mubr.bf16.mxu1 %v1290_v38 }
  0x69   :  { %606 = vmatmul.mubr.bf16.gmra.mrb[20].mxu0 %v1253_v39  ;;  %734 = vmatmul.mubr.bf16.gmra.mrb[20].mxu1 %v1292_v40 }
  0x6a   :  { %613 = vmatprep.mubr.bf16.mxu0 %v1254_v41  ;;  %741 = vmatprep.mubr.bf16.mxu1 %v1296_v42 }
  0x71   :  { %614 = vmatmul.mubr.bf16.gmra.mrb[24].mxu0 %v1256_v43  ;;  %742 = vmatmul.mubr.bf16.gmra.mrb[24].mxu1 %v1298_v44 }
  0x72   :  { %621 = vmatprep.mubr.bf16.mxu0 %v1257_v45  ;;  %749 = vmatprep.mubr.bf16.mxu1 %v1302_v46 }
  0x79   :  { %622 = vmatmul.mubr.bf16.gmra.mrb[28].mxu0 %v1259_v47  ;;  %750 = vmatmul.mubr.bf16.gmra.mrb[28].mxu1 %v1304_v48 }
  0x7a   :  { %629 = vmatprep.mubr.bf16.mxu0 %v1263_v49  ;;  %757 = vmatprep.mubr.bf16.mxu1 %v1308_v50 }
  0x81   :  { %630 = vmatmul.mubr.bf16.gmra.mrb[32].mxu0 %v1265_v51  ;;  %758 = vmatmul.mubr.bf16.gmra.mrb[32].mxu1 %v1310_v52 }
  0x82   :  { %637 = vmatprep.mubr.bf16.mxu0 %v1269_v53  ;;  %765 = vmatprep.mubr.bf16.mxu1 %v1311_v54 }
  0x89   :  { %638 = vmatmul.mubr.bf16.gmra.mrb[36].mxu0 %v1271_v55  ;;  %766 = vmatmul.mubr.bf16.gmra.mrb[36].mxu1 %v1313_v56 }
  0x8a   :  { %645 = vmatprep.mubr.bf16.mxu0 %v1275_v57  ;;  %773 = vmatprep.mubr.bf16.mxu1 %v1314_v58 }
  0x91   :  { %646 = vmatmul.mubr.bf16.gmra.mrb[40].mxu0 %v1277_v59  ;;  %774 = vmatmul.mubr.bf16.gmra.mrb[40].mxu1 %v1316_v60 }
  0x92   :  { %653 = vmatprep.mubr.bf16.mxu0 %v1281_v61  ;;  %781 = vmatprep.mubr.bf16.mxu1 %v1317_v62 }
  0x99   :  { %654 = vmatmul.mubr.bf16.gmra.mrb[44].mxu0 %v1283_v63  ;;  %782 = vmatmul.mubr.bf16.gmra.mrb[44].mxu1 %v1319_v0 }
  0x9a   :  { %661 = vmatprep.mubr.bf16.mxu0 %v1287_v1  ;;  %789 = vmatprep.mubr.bf16.mxu1 %v1320_v2 }
  0xa1   :  { %662 = vmatmul.mubr.bf16.gmra.mrb[48].mxu0 %v1289_v3  ;;  %790 = vmatmul.mubr.bf16.gmra.mrb[48].mxu1 %v1322_v4 }
  0xa2   :  { %669 = vmatprep.mubr.bf16.mxu0 %v1293_v5  ;;  %797 = vmatprep.mubr.bf16.mxu1 %v1323_v6 }
  0xa9   :  { %670 = vmatmul.mubr.bf16.gmra.mrb[52].mxu0 %v1295_v7  ;;  %798 = vmatmul.mubr.bf16.gmra.mrb[52].mxu1 %v1325_v8 }
  0xaa   :  { %677 = vmatprep.mubr.bf16.mxu0 %v1299_v9  ;;  %805 = vmatprep.mubr.bf16.mxu1 %v1326_v10 }
  0xb1   :  { %678 = vmatmul.mubr.bf16.gmra.mrb[56].mxu0 %v1301_v11  ;;  %806 = vmatmul.mubr.bf16.gmra.mrb[56].mxu1 %v1328_v12 }
  0xb2   :  { %685 = vmatprep.mubr.bf16.mxu0 %v1305_v13  ;;  %813 = vmatprep.mubr.bf16.mxu1 %v1329_v14 }
  0xb9   :  { %686 = vmatmul.mubr.bf16.gmra.mrb[60].mxu0 %v1307_v15  ;;  %814 = vmatmul.mubr.bf16.gmra.mrb[60].mxu1 %v1331_v16 }
 0x114   :  { %v567_v17 = vpop.f32.mrb[0].mxu0  ;;  %v1631_v18 = vpop.f32.mrb[0].mxu1 }
 0x115   :  { %822 = vst [vmem:[%s2035_s2] sm:$0xff] %v567_v17  ;;  %v569_v19 = vpop.f32.mrb[1].mxu0  ;;  %854 = vst [vmem:[%s2035_s2 + $0x100] sm:$0xff] %v1631_v18  ;;  %v697_v20 = vpop.f32.mrb[1].mxu1  ;;  %v959_v23 = vmul.f32 %v567_v17, %v567_v17 }
 0x116   :  { %v570_v21 = vpop.f32.mrb[2].mxu0  ;;  %v1640_v22 = vpop.f32.mrb[2].mxu1 }
 0x117   :  { %823 = vst [vmem:[%s2035_s2 + $0x8] sm:$0xff] %v570_v21  ;;  %v887_v24 = vadd.f32 %v570_v21, %v567_v17  ;;  %v960_v25 = vmul.f32 %v570_v21, %v570_v21  ;;  %v572_v26 = vpop.f32.mrb[3].mxu0  ;;  %855 = vst [vmem:[%s2035_s2 + $0x108] sm:$0xff] %v1640_v22  ;;  %v700_v27 = vpop.f32.mrb[3].mxu1 }
 0x119   :  { %v1023_v28 = vadd.f32 %v960_v25, %v959_v23 }
 0x11c   :  { %v575_v29 = vpop.f32.mrb[4].mxu0  ;;  %v1649_v30 = vpop.f32.mrb[4].mxu1 }
 0x11d   :  { %824 = vst [vmem:[%s2035_s2 + $0x10] sm:$0xff] %v575_v29  ;;  %v888_v31 = vadd.f32 %v887_v24, %v575_v29  ;;  %v961_v32 = vmul.f32 %v575_v29, %v575_v29  ;;  %v577_v33 = vpop.f32.mrb[5].mxu0  ;;  %856 = vst [vmem:[%s2035_s2 + $0x110] sm:$0xff] %v1649_v30  ;;  %v705_v34 = vpop.f32.mrb[5].mxu1 }
 0x11e   :  { %v578_v35 = vpop.f32.mrb[6].mxu0  ;;  %v1658_v36 = vpop.f32.mrb[6].mxu1 }
 0x11f   :  { %v1024_v37 = vadd.f32 %v1023_v28, %v961_v32  ;;  %825 = vst [vmem:[%s2035_s2 + $0x18] sm:$0xff] %v578_v35  ;;  %v889_v38 = vadd.f32 %v888_v31, %v578_v35  ;;  %v962_v39 = vmul.f32 %v578_v35, %v578_v35  ;;  %v580_v40 = vpop.f32.mrb[7].mxu0  ;;  %857 = vst [vmem:[%s2035_s2 + $0x118] sm:$0xff] %v1658_v36  ;;  %v708_v41 = vpop.f32.mrb[7].mxu1 }
 0x121   :  { %v1025_v42 = vadd.f32 %v1024_v37, %v962_v39 }
 0x124   :  { %v583_v43 = vpop.f32.mrb[8].mxu0  ;;  %v1667_v44 = vpop.f32.mrb[8].mxu1 }
 0x125   :  { %826 = vst [vmem:[%s2035_s2 + $0x20] sm:$0xff] %v583_v43  ;;  %v890_v45 = vadd.f32 %v889_v38, %v583_v43  ;;  %v963_v46 = vmul.f32 %v583_v43, %v583_v43  ;;  %v585_v47 = vpop.f32.mrb[9].mxu0  ;;  %858 = vst [vmem:[%s2035_s2 + $0x120] sm:$0xff] %v1667_v44  ;;  %v713_v48 = vpop.f32.mrb[9].mxu1 }
 0x126   :  { %v586_v49 = vpop.f32.mrb[10].mxu0  ;;  %v1676_v50 = vpop.f32.mrb[10].mxu1 }
 0x127   :  { %v1026_v51 = vadd.f32 %v1025_v42, %v963_v46  ;;  %827 = vst [vmem:[%s2035_s2 + $0x28] sm:$0xff] %v586_v49  ;;  %v891_v52 = vadd.f32 %v890_v45, %v586_v49  ;;  %v964_v53 = vmul.f32 %v586_v49, %v586_v49  ;;  %v588_v54 = vpop.f32.mrb[11].mxu0  ;;  %859 = vst [vmem:[%s2035_s2 + $0x128] sm:$0xff] %v1676_v50  ;;  %v716_v55 = vpop.f32.mrb[11].mxu1 }
 0x129   :  { %v1027_v56 = vadd.f32 %v1026_v51, %v964_v53 }
 0x12c   :  { %v591_v57 = vpop.f32.mrb[12].mxu0  ;;  %v1685_v58 = vpop.f32.mrb[12].mxu1 }
 0x12d   :  { %828 = vst [vmem:[%s2035_s2 + $0x30] sm:$0xff] %v591_v57  ;;  %v892_v59 = vadd.f32 %v891_v52, %v591_v57  ;;  %v965_v60 = vmul.f32 %v591_v57, %v591_v57  ;;  %v593_v61 = vpop.f32.mrb[13].mxu0  ;;  %860 = vst [vmem:[%s2035_s2 + $0x130] sm:$0xff] %v1685_v58  ;;  %v721_v62 = vpop.f32.mrb[13].mxu1 }
 0x12e   :  { %v594_v63 = vpop.f32.mrb[14].mxu0  ;;  %v1694_v0 = vpop.f32.mrb[14].mxu1 }
 0x12f   :  { %v1028_v1 = vadd.f32 %v1027_v56, %v965_v60  ;;  %829 = vst [vmem:[%s2035_s2 + $0x38] sm:$0xff] %v594_v63  ;;  %v893_v2 = vadd.f32 %v892_v59, %v594_v63  ;;  %v966_v3 = vmul.f32 %v594_v63, %v594_v63  ;;  %v596_v4 = vpop.f32.mrb[15].mxu0  ;;  %861 = vst [vmem:[%s2035_s2 + $0x138] sm:$0xff] %v1694_v0  ;;  %v724_v5 = vpop.f32.mrb[15].mxu1 }
 0x131   :  { %v1029_v6 = vadd.f32 %v1028_v1, %v966_v3 }
 0x134   :  { %v599_v7 = vpop.f32.mrb[16].mxu0  ;;  %v1703_v8 = vpop.f32.mrb[16].mxu1 }
 0x135   :  { %830 = vst [vmem:[%s2035_s2 + $0x40] sm:$0xff] %v599_v7  ;;  %v894_v9 = vadd.f32 %v893_v2, %v599_v7  ;;  %v967_v10 = vmul.f32 %v599_v7, %v599_v7  ;;  %v601_v11 = vpop.f32.mrb[17].mxu0  ;;  %862 = vst [vmem:[%s2035_s2 + $0x140] sm:$0xff] %v1703_v8  ;;  %v729_v12 = vpop.f32.mrb[17].mxu1  ;;  %v1333_v7 = vmov 0.0  }
 0x136   :  { %v602_v13 = vpop.f32.mrb[18].mxu0  ;;  %v1712_v14 = vpop.f32.mrb[18].mxu1  ;;  %19 = vst [vmem:[%s2036_s3] sm:$0x1] %v1333_v7  ;;  %20 = vst [vmem:[%s2037_s4] sm:$0x1] %v1333_v7 }
 0x137   :  { %v1030_v15 = vadd.f32 %v1029_v6, %v967_v10  ;;  %831 = vst [vmem:[%s2035_s2 + $0x48] sm:$0xff] %v602_v13  ;;  %v895_v16 = vadd.f32 %v894_v9, %v602_v13  ;;  %v968_v17 = vmul.f32 %v602_v13, %v602_v13  ;;  %v604_v19 = vpop.f32.mrb[19].mxu0  ;;  %863 = vst [vmem:[%s2035_s2 + $0x148] sm:$0xff] %v1712_v14  ;;  %v732_v20 = vpop.f32.mrb[19].mxu1 }
 0x139   :  { %v1031_v21 = vadd.f32 %v1030_v15, %v968_v17 }
 0x13c   :  { %v607_v23 = vpop.f32.mrb[20].mxu0  ;;  %v1721_v24 = vpop.f32.mrb[20].mxu1 }
 0x13d   :  { %832 = vst [vmem:[%s2035_s2 + $0x50] sm:$0xff] %v607_v23  ;;  %v896_v25 = vadd.f32 %v895_v16, %v607_v23  ;;  %v969_v26 = vmul.f32 %v607_v23, %v607_v23  ;;  %v609_v27 = vpop.f32.mrb[21].mxu0  ;;  %864 = vst [vmem:[%s2035_s2 + $0x150] sm:$0xff] %v1721_v24  ;;  %v737_v28 = vpop.f32.mrb[21].mxu1 }
 0x13e   :  { %v610_v29 = vpop.f32.mrb[22].mxu0  ;;  %v1730_v31 = vpop.f32.mrb[22].mxu1 }
 0x13f   :  { %v1032_v32 = vadd.f32 %v1031_v21, %v969_v26  ;;  %833 = vst [vmem:[%s2035_s2 + $0x58] sm:$0xff] %v610_v29  ;;  %v897_v33 = vadd.f32 %v896_v25, %v610_v29  ;;  %v970_v34 = vmul.f32 %v610_v29, %v610_v29  ;;  %v612_v35 = vpop.f32.mrb[23].mxu0  ;;  %865 = vst [vmem:[%s2035_s2 + $0x158] sm:$0xff] %v1730_v31  ;;  %v740_v37 = vpop.f32.mrb[23].mxu1 }
 0x141   :  { %v1033_v38 = vadd.f32 %v1032_v32, %v970_v34 }
 0x144   :  { %v615_v39 = vpop.f32.mrb[24].mxu0  ;;  %v1739_v40 = vpop.f32.mrb[24].mxu1 }
 0x145   :  { %834 = vst [vmem:[%s2035_s2 + $0x60] sm:$0xff] %v615_v39  ;;  %v898_v41 = vadd.f32 %v897_v33, %v615_v39  ;;  %v971_v42 = vmul.f32 %v615_v39, %v615_v39  ;;  %v617_v43 = vpop.f32.mrb[25].mxu0  ;;  %866 = vst [vmem:[%s2035_s2 + $0x160] sm:$0xff] %v1739_v40  ;;  %v745_v45 = vpop.f32.mrb[25].mxu1 }
 0x146   :  { %v618_v46 = vpop.f32.mrb[26].mxu0  ;;  %v1748_v47 = vpop.f32.mrb[26].mxu1 }
 0x147   :  { %v1034_v48 = vadd.f32 %v1033_v38, %v971_v42  ;;  %835 = vst [vmem:[%s2035_s2 + $0x68] sm:$0xff] %v618_v46  ;;  %v899_v49 = vadd.f32 %v898_v41, %v618_v46  ;;  %v972_v51 = vmul.f32 %v618_v46, %v618_v46  ;;  %v620_v52 = vpop.f32.mrb[27].mxu0  ;;  %867 = vst [vmem:[%s2035_s2 + $0x168] sm:$0xff] %v1748_v47  ;;  %v748_v53 = vpop.f32.mrb[27].mxu1 }
 0x149   :  { %v1035_v54 = vadd.f32 %v1034_v48, %v972_v51 }
 0x14c   :  { %v623_v55 = vpop.f32.mrb[28].mxu0  ;;  %v1757_v56 = vpop.f32.mrb[28].mxu1 }
 0x14d   :  { %836 = vst [vmem:[%s2035_s2 + $0x70] sm:$0xff] %v623_v55  ;;  %v900_v57 = vadd.f32 %v899_v49, %v623_v55  ;;  %v973_v59 = vmul.f32 %v623_v55, %v623_v55  ;;  %v625_v60 = vpop.f32.mrb[29].mxu0  ;;  %868 = vst [vmem:[%s2035_s2 + $0x170] sm:$0xff] %v1757_v56  ;;  %v753_v61 = vpop.f32.mrb[29].mxu1 }
 0x14e   :  { %v626_v62 = vpop.f32.mrb[30].mxu0  ;;  %v1766_v63 = vpop.f32.mrb[30].mxu1 }
 0x14f   :  { %v1036_v1 = vadd.f32 %v1035_v54, %v973_v59  ;;  %837 = vst [vmem:[%s2035_s2 + $0x78] sm:$0xff] %v626_v62  ;;  %v901_v2 = vadd.f32 %v900_v57, %v626_v62  ;;  %v974_v3 = vmul.f32 %v626_v62, %v626_v62  ;;  %v628_v4 = vpop.f32.mrb[31].mxu0  ;;  %869 = vst [vmem:[%s2035_s2 + $0x178] sm:$0xff] %v1766_v63  ;;  %v756_v5 = vpop.f32.mrb[31].mxu1 }
 0x151   :  { %v1037_v6 = vadd.f32 %v1036_v1, %v974_v3 }
 0x154   :  { %v631_v9 = vpop.f32.mrb[32].mxu0  ;;  %v1781_v10 = vpop.f32.mrb[32].mxu1 }
 0x155   :  { %838 = vst [vmem:[%s2035_s2 + $0x80] sm:$0xff] %v631_v9  ;;  %v902_v11 = vadd.f32 %v901_v2, %v631_v9  ;;  %v975_v12 = vmul.f32 %v631_v9, %v631_v9  ;;  %v633_v13 = vpop.f32.mrb[33].mxu0  ;;  %870 = vst [vmem:[%s2035_s2 + $0x180] sm:$0xff] %v1781_v10  ;;  %v761_v15 = vpop.f32.mrb[33].mxu1 }
 0x156   :  { %v634_v16 = vpop.f32.mrb[34].mxu0  ;;  %v1790_v17 = vpop.f32.mrb[34].mxu1 }
 0x157   :  { %v1038_v19 = vadd.f32 %v1037_v6, %v975_v12  ;;  %839 = vst [vmem:[%s2035_s2 + $0x88] sm:$0xff] %v634_v16  ;;  %v903_v20 = vadd.f32 %v902_v11, %v634_v16  ;;  %v976_v21 = vmul.f32 %v634_v16, %v634_v16  ;;  %v636_v23 = vpop.f32.mrb[35].mxu0  ;;  %871 = vst [vmem:[%s2035_s2 + $0x188] sm:$0xff] %v1790_v17  ;;  %v764_v25 = vpop.f32.mrb[35].mxu1 }
 0x159   :  { %v1039_v26 = vadd.f32 %v1038_v19, %v976_v21 }
 0x15c   :  { %v639_v27 = vpop.f32.mrb[36].mxu0  ;;  %v1799_v28 = vpop.f32.mrb[36].mxu1 }
 0x15d   :  { %840 = vst [vmem:[%s2035_s2 + $0x90] sm:$0xff] %v639_v27  ;;  %v904_v29 = vadd.f32 %v903_v20, %v639_v27  ;;  %v977_v32 = vmul.f32 %v639_v27, %v639_v27  ;;  %v641_v33 = vpop.f32.mrb[37].mxu0  ;;  %872 = vst [vmem:[%s2035_s2 + $0x190] sm:$0xff] %v1799_v28  ;;  %v769_v34 = vpop.f32.mrb[37].mxu1 }
 0x15e   :  { %v642_v35 = vpop.f32.mrb[38].mxu0  ;;  %v1808_v37 = vpop.f32.mrb[38].mxu1 }
 0x15f   :  { %v1040_v38 = vadd.f32 %v1039_v26, %v977_v32  ;;  %841 = vst [vmem:[%s2035_s2 + $0x98] sm:$0xff] %v642_v35  ;;  %v905_v39 = vadd.f32 %v904_v29, %v642_v35  ;;  %v978_v41 = vmul.f32 %v642_v35, %v642_v35  ;;  %v644_v42 = vpop.f32.mrb[39].mxu0  ;;  %873 = vst [vmem:[%s2035_s2 + $0x198] sm:$0xff] %v1808_v37  ;;  %v772_v43 = vpop.f32.mrb[39].mxu1 }
 0x161   :  { %v1041_v45 = vadd.f32 %v1040_v38, %v978_v41 }
 0x164   :  { %v647_v46 = vpop.f32.mrb[40].mxu0  ;;  %v1817_v48 = vpop.f32.mrb[40].mxu1 }
 0x165   :  { %842 = vst [vmem:[%s2035_s2 + $0xa0] sm:$0xff] %v647_v46  ;;  %v906_v49 = vadd.f32 %v905_v39, %v647_v46  ;;  %v979_v51 = vmul.f32 %v647_v46, %v647_v46  ;;  %v649_v52 = vpop.f32.mrb[41].mxu0  ;;  %874 = vst [vmem:[%s2035_s2 + $0x1a0] sm:$0xff] %v1817_v48  ;;  %v777_v53 = vpop.f32.mrb[41].mxu1 }
 0x166   :  { %v650_v54 = vpop.f32.mrb[42].mxu0  ;;  %v1826_v55 = vpop.f32.mrb[42].mxu1 }
 0x167   :  { %v1042_v57 = vadd.f32 %v1041_v45, %v979_v51  ;;  %843 = vst [vmem:[%s2035_s2 + $0xa8] sm:$0xff] %v650_v54  ;;  %v907_v59 = vadd.f32 %v906_v49, %v650_v54  ;;  %v980_v60 = vmul.f32 %v650_v54, %v650_v54  ;;  %v652_v61 = vpop.f32.mrb[43].mxu0  ;;  %875 = vst [vmem:[%s2035_s2 + $0x1a8] sm:$0xff] %v1826_v55  ;;  %v780_v62 = vpop.f32.mrb[43].mxu1 }
 0x169   :  { %v1043_v1 = vadd.f32 %v1042_v57, %v980_v60 }
 0x16c   :  { %v655_v2 = vpop.f32.mrb[44].mxu0  ;;  %v1835_v3 = vpop.f32.mrb[44].mxu1 }
 0x16d   :  { %844 = vst [vmem:[%s2035_s2 + $0xb0] sm:$0xff] %v655_v2  ;;  %v908_v4 = vadd.f32 %v907_v59, %v655_v2  ;;  %v981_v5 = vmul.f32 %v655_v2, %v655_v2  ;;  %v657_v6 = vpop.f32.mrb[45].mxu0  ;;  %876 = vst [vmem:[%s2035_s2 + $0x1b0] sm:$0xff] %v1835_v3  ;;  %v785_v7 = vpop.f32.mrb[45].mxu1 }
 0x16e   :  { %v658_v9 = vpop.f32.mrb[46].mxu0  ;;  %v1844_v11 = vpop.f32.mrb[46].mxu1 }
 0x16f   :  { %v1044_v12 = vadd.f32 %v1043_v1, %v981_v5  ;;  %845 = vst [vmem:[%s2035_s2 + $0xb8] sm:$0xff] %v658_v9  ;;  %v909_v13 = vadd.f32 %v908_v4, %v658_v9  ;;  %v982_v15 = vmul.f32 %v658_v9, %v658_v9  ;;  %v660_v16 = vpop.f32.mrb[47].mxu0  ;;  %877 = vst [vmem:[%s2035_s2 + $0x1b8] sm:$0xff] %v1844_v11  ;;  %v788_v19 = vpop.f32.mrb[47].mxu1 }
 0x171   :  { %v1045_v20 = vadd.f32 %v1044_v12, %v982_v15 }
 0x174   :  { %v663_v21 = vpop.f32.mrb[48].mxu0  ;;  %v1853_v23 = vpop.f32.mrb[48].mxu1 }
 0x175   :  { %846 = vst [vmem:[%s2035_s2 + $0xc0] sm:$0xff] %v663_v21  ;;  %v910_v25 = vadd.f32 %v909_v13, %v663_v21  ;;  %v983_v26 = vmul.f32 %v663_v21, %v663_v21  ;;  %v665_v27 = vpop.f32.mrb[49].mxu0  ;;  %878 = vst [vmem:[%s2035_s2 + $0x1c0] sm:$0xff] %v1853_v23  ;;  %v793_v29 = vpop.f32.mrb[49].mxu1 }
 0x176   :  { %v666_v32 = vpop.f32.mrb[50].mxu0  ;;  %v1862_v33 = vpop.f32.mrb[50].mxu1 }
 0x177   :  { %v1046_v34 = vadd.f32 %v1045_v20, %v983_v26  ;;  %847 = vst [vmem:[%s2035_s2 + $0xc8] sm:$0xff] %v666_v32  ;;  %v911_v35 = vadd.f32 %v910_v25, %v666_v32  ;;  %v984_v38 = vmul.f32 %v666_v32, %v666_v32  ;;  %v668_v39 = vpop.f32.mrb[51].mxu0  ;;  %879 = vst [vmem:[%s2035_s2 + $0x1c8] sm:$0xff] %v1862_v33  ;;  %v796_v41 = vpop.f32.mrb[51].mxu1 }
 0x179   :  { %v1047_v42 = vadd.f32 %v1046_v34, %v984_v38 }
 0x17c   :  { %v671_v43 = vpop.f32.mrb[52].mxu0  ;;  %v1871_v45 = vpop.f32.mrb[52].mxu1 }
 0x17d   :  { %848 = vst [vmem:[%s2035_s2 + $0xd0] sm:$0xff] %v671_v43  ;;  %v912_v46 = vadd.f32 %v911_v35, %v671_v43  ;;  %v985_v49 = vmul.f32 %v671_v43, %v671_v43  ;;  %v673_v51 = vpop.f32.mrb[53].mxu0  ;;  %880 = vst [vmem:[%s2035_s2 + $0x1d0] sm:$0xff] %v1871_v45  ;;  %v801_v52 = vpop.f32.mrb[53].mxu1 }
 0x17e   :  { %v674_v53 = vpop.f32.mrb[54].mxu0  ;;  %v1880_v54 = vpop.f32.mrb[54].mxu1  ;;  %v991_v51 = vmul.f32 %v1631_v18, %v1631_v18 }
 0x17f   :  { %v1048_v57 = vadd.f32 %v1047_v42, %v985_v49  ;;  %849 = vst [vmem:[%s2035_s2 + $0xd8] sm:$0xff] %v674_v53  ;;  %v913_v59 = vadd.f32 %v912_v46, %v674_v53  ;;  %v986_v60 = vmul.f32 %v674_v53, %v674_v53  ;;  %v676_v61 = vpop.f32.mrb[55].mxu0  ;;  %881 = vst [vmem:[%s2035_s2 + $0x1d8] sm:$0xff] %v1880_v54  ;;  %v804_v62 = vpop.f32.mrb[55].mxu1 }
 0x180   :  { %v993_v61 = vmul.f32 %v1649_v30, %v1649_v30 }
 0x181   :  { %v1049_v1 = vadd.f32 %v1048_v57, %v986_v60  ;;  %v992_v57 = vmul.f32 %v1640_v22, %v1640_v22 }
 0x184   :  { %v679_v2 = vpop.f32.mrb[56].mxu0  ;;  %v1889_v4 = vpop.f32.mrb[56].mxu1 }
 0x185   :  { %850 = vst [vmem:[%s2035_s2 + $0xe0] sm:$0xff] %v679_v2  ;;  %v914_v5 = vadd.f32 %v913_v59, %v679_v2  ;;  %v987_v6 = vmul.f32 %v679_v2, %v679_v2  ;;  %v681_v7 = vpop.f32.mrb[57].mxu0  ;;  %882 = vst [vmem:[%s2035_s2 + $0x1e0] sm:$0xff] %v1889_v4  ;;  %v809_v9 = vpop.f32.mrb[57].mxu1  ;;  %v994_v2 = vmul.f32 %v1658_v36, %v1658_v36 }
 0x186   :  { %v682_v12 = vpop.f32.mrb[58].mxu0  ;;  %v1898_v13 = vpop.f32.mrb[58].mxu1 }
 0x187   :  { %v1050_v15 = vadd.f32 %v1049_v1, %v987_v6  ;;  %851 = vst [vmem:[%s2035_s2 + $0xe8] sm:$0xff] %v682_v12  ;;  %v915_v16 = vadd.f32 %v914_v5, %v682_v12  ;;  %v988_v19 = vmul.f32 %v682_v12, %v682_v12  ;;  %v684_v20 = vpop.f32.mrb[59].mxu0  ;;  %883 = vst [vmem:[%s2035_s2 + $0x1e8] sm:$0xff] %v1898_v13  ;;  %v812_v21 = vpop.f32.mrb[59].mxu1 }
 0x189   :  { %v1051_v25 = vadd.f32 %v1050_v15, %v988_v19 }
 0x18c   :  { %v687_v26 = vpop.f32.mrb[60].mxu0  ;;  %v1907_v27 = vpop.f32.mrb[60].mxu1 }
 0x18d   :  { %852 = vst [vmem:[%s2035_s2 + $0xf0] sm:$0xff] %v687_v26  ;;  %v916_v29 = vadd.f32 %v915_v16, %v687_v26  ;;  %v989_v32 = vmul.f32 %v687_v26, %v687_v26  ;;  %v689_v34 = vpop.f32.mrb[61].mxu0  ;;  %884 = vst [vmem:[%s2035_s2 + $0x1f0] sm:$0xff] %v1907_v27  ;;  %v817_v35 = vpop.f32.mrb[61].mxu1 }
 0x18e   :  { %v690_v38 = vpop.f32.mrb[62].mxu0  ;;  %v1916_v39 = vpop.f32.mrb[62].mxu1 }
 0x18f   :  { %v1052_v41 = vadd.f32 %v1051_v25, %v989_v32  ;;  %853 = vst [vmem:[%s2035_s2 + $0xf8] sm:$0xff] %v690_v38  ;;  %v917_v42 = vadd.f32 %v916_v29, %v690_v38  ;;  %v990_v43 = vmul.f32 %v690_v38, %v690_v38  ;;  %v692_v46 = vpop.f32.mrb[63].mxu0  ;;  %885 = vst [vmem:[%s2035_s2 + $0x1f8] sm:$0xff] %v1916_v39  ;;  %v820_v49 = vpop.f32.mrb[63].mxu1 }
 0x191   :  { %v918_v52 = vadd.f32 %v917_v42, %v1631_v18  ;;  %v1053_v53 = vadd.f32 %v1052_v41, %v990_v43  ;;  %v995_v18 = vmul.f32 %v1667_v44, %v1667_v44 }
 0x193   :  { %v919_v59 = vadd.f32 %v918_v52, %v1640_v22  ;;  %v1054_v60 = vadd.f32 %v1053_v53, %v991_v51  ;;  %v996_v22 = vmul.f32 %v1676_v50, %v1676_v50 }
 0x195   :  { %v920_v62 = vadd.f32 %v919_v59, %v1649_v30  ;;  %v1055_v1 = vadd.f32 %v1054_v60, %v992_v57  ;;  %v997_v30 = vmul.f32 %v1685_v58, %v1685_v58  ;;  %v1007_v59 = vmul.f32 %v1781_v10, %v1781_v10 }
 0x197   :  { %v921_v5 = vadd.f32 %v920_v62, %v1658_v36  ;;  %v1056_v6 = vadd.f32 %v1055_v1, %v993_v61  ;;  %v998_v36 = vmul.f32 %v1694_v0, %v1694_v0  ;;  %v1008_v62 = vmul.f32 %v1790_v17, %v1790_v17 }
 0x199   :  { %v922_v7 = vadd.f32 %v921_v5, %v1667_v44  ;;  %v1057_v9 = vadd.f32 %v1056_v6, %v994_v2  ;;  %v999_v44 = vmul.f32 %v1703_v8, %v1703_v8  ;;  %v1009_v2 = vmul.f32 %v1799_v28, %v1799_v28 }
 0x19a   :  { %v1010_v6 = vmul.f32 %v1808_v37, %v1808_v37 }
 0x19b   :  { %v923_v12 = vadd.f32 %v922_v7, %v1676_v50  ;;  %v1058_v15 = vadd.f32 %v1057_v9, %v995_v18  ;;  %v1000_v50 = vmul.f32 %v1712_v14, %v1712_v14  ;;  %v1011_v7 = vmul.f32 %v1817_v48, %v1817_v48 }
 0x19d   :  { %v924_v16 = vadd.f32 %v923_v12, %v1685_v58  ;;  %v1059_v19 = vadd.f32 %v1058_v15, %v996_v22  ;;  %v1001_v58 = vmul.f32 %v1721_v24, %v1721_v24  ;;  %v1012_v22 = vmul.f32 %v1826_v55, %v1826_v55 }
 0x19e   :  { %v1013_v15 = vmul.f32 %v1835_v3, %v1835_v3 }
 0x19f   :  { %v925_v20 = vadd.f32 %v924_v16, %v1694_v0  ;;  %v1060_v21 = vadd.f32 %v1059_v19, %v997_v30  ;;  %v1002_v0 = vmul.f32 %v1730_v31, %v1730_v31  ;;  %v1014_v16 = vmul.f32 %v1844_v11, %v1844_v11 }
 0x1a1   :  { %v1061_v25 = vadd.f32 %v1060_v21, %v998_v36  ;;  %v926_v26 = vadd.f32 %v925_v20, %v1703_v8  ;;  %v1003_v8 = vmul.f32 %v1739_v40, %v1739_v40  ;;  %v1015_v36 = vmul.f32 %v1853_v23, %v1853_v23 }
 0x1a2   :  { %v1016_v21 = vmul.f32 %v1862_v33, %v1862_v33 }
 0x1a3   :  { %v927_v29 = vadd.f32 %v926_v26, %v1712_v14  ;;  %v1062_v32 = vadd.f32 %v1061_v25, %v999_v44  ;;  %v1004_v14 = vmul.f32 %v1748_v47, %v1748_v47  ;;  %v1017_v25 = vmul.f32 %v1871_v45, %v1871_v45 }
 0x1a5   :  { %v928_v34 = vadd.f32 %v927_v29, %v1721_v24  ;;  %v1063_v35 = vadd.f32 %v1062_v32, %v1000_v50  ;;  %v1005_v24 = vmul.f32 %v1757_v56, %v1757_v56  ;;  %v1018_v50 = vmul.f32 %v1880_v54, %v1880_v54 }
 0x1a6   :  { %v1019_v32 = vmul.f32 %v1889_v4, %v1889_v4 }
 0x1a7   :  { %v929_v38 = vadd.f32 %v928_v34, %v1730_v31  ;;  %v1064_v41 = vadd.f32 %v1063_v35, %v1001_v58  ;;  %v1006_v31 = vmul.f32 %v1766_v63, %v1766_v63  ;;  %v1020_v34 = vmul.f32 %v1898_v13, %v1898_v13 }
 0x1a9   :  { %v930_v42 = vadd.f32 %v929_v38, %v1739_v40  ;;  %v1065_v43 = vadd.f32 %v1064_v41, %v1002_v0  ;;  %v1022_v41 = vmul.f32 %v1916_v39, %v1916_v39 }
 0x1ab   :  { %v931_v46 = vadd.f32 %v930_v42, %v1748_v47  ;;  %v1066_v49 = vadd.f32 %v1065_v43, %v1003_v8 }
 0x1ad   :  { %v932_v51 = vadd.f32 %v931_v46, %v1757_v56  ;;  %v1067_v52 = vadd.f32 %v1066_v49, %v1004_v14 }
 0x1af   :  { %v933_v53 = vadd.f32 %v932_v51, %v1766_v63  ;;  %v1068_v57 = vadd.f32 %v1067_v52, %v1005_v24 }
 0x1b1   :  { %v934_v40 = vadd.f32 %v933_v53, %v1781_v10  ;;  %v1069_v60 = vadd.f32 %v1068_v57, %v1006_v31 }
 0x1b3   :  { %v1070_v47 = vadd.f32 %v1069_v60, %v1007_v59  ;;  %v935_v61 = vadd.f32 %v934_v40, %v1790_v17 }
 0x1b5   :  { %v1071_v56 = vadd.f32 %v1070_v47, %v1008_v62  ;;  %v936_v1 = vadd.f32 %v935_v61, %v1799_v28 }
 0x1b7   :  { %v1072_v63 = vadd.f32 %v1071_v56, %v1009_v2  ;;  %v937_v5 = vadd.f32 %v936_v1, %v1808_v37 }
 0x1b9   :  { %v1073_v10 = vadd.f32 %v1072_v63, %v1010_v6  ;;  %v938_v18 = vadd.f32 %v937_v5, %v1817_v48 }
 0x1bb   :  { %v1074_v9 = vadd.f32 %v1073_v10, %v1011_v7  ;;  %v939_v17 = vadd.f32 %v938_v18, %v1826_v55 }
 0x1bd   :  { %v1075_v12 = vadd.f32 %v1074_v9, %v1012_v22  ;;  %v940_v28 = vadd.f32 %v939_v17, %v1835_v3 }
 0x1bf   :  { %v1076_v30 = vadd.f32 %v1075_v12, %v1013_v15  ;;  %v941_v37 = vadd.f32 %v940_v28, %v1844_v11 }
 0x1c1   :  { %v1077_v19 = vadd.f32 %v1076_v30, %v1014_v16  ;;  %v942_v48 = vadd.f32 %v941_v37, %v1853_v23 }
 0x1c3   :  { %v1078_v20 = vadd.f32 %v1077_v19, %v1015_v36  ;;  %v943_v55 = vadd.f32 %v942_v48, %v1862_v33 }
 0x1c5   :  { %v1079_v44 = vadd.f32 %v1078_v20, %v1016_v21  ;;  %v944_v3 = vadd.f32 %v943_v55, %v1871_v45  ;;  %v1021_v45 = vmul.f32 %v1907_v27, %v1907_v27 }
 0x1c7   :  { %v1080_v26 = vadd.f32 %v1079_v44, %v1017_v25  ;;  %v945_v11 = vadd.f32 %v944_v3, %v1880_v54 }
 0x1c9   :  { %v1081_v29 = vadd.f32 %v1080_v26, %v1018_v50  ;;  %v946_v23 = vadd.f32 %v945_v11, %v1889_v4 }
 0x1cb   :  { %v1082_v58 = vadd.f32 %v1081_v29, %v1019_v32  ;;  %v947_v33 = vadd.f32 %v946_v23, %v1898_v13 }
 0x1cd   :  { %v1083_v35 = vadd.f32 %v1082_v58, %v1020_v34  ;;  %v948_v0 = vadd.f32 %v947_v33, %v1907_v27  ;;  %v886_v27 = vld [vmem:[%s2036_s3] sm:$0x1] }
 0x1cf   :  { %v1084_v38 = vadd.f32 %v1083_v35, %v1021_v45  ;;  %v949_v54 = vadd.f32 %v948_v0, %v1916_v39  ;;  %v958_v39 = vld [vmem:[%s2037_s4] sm:$0x1] }
 0x1d1   :  { %v950_v8 = vrot.slane %v949_v54, 4  ;;  %v1085_v4 = vadd.f32 %v1084_v38, %v1022_v41 }
 0x1d3   :  { %v951_v42 = vadd.f32 %v950_v8, %v949_v54  ;;  %v1086_v43 = vrot.slane %v1085_v4, 4 }
 0x1d5   :  { %v952_v14 = vrot.slane %v951_v42, 2  ;;  %v1087_v46 = vadd.f32 %v1086_v43, %v1085_v4 }
 0x1d7   :  { %v953_v49 = vadd.f32 %v952_v14, %v951_v42  ;;  %v1088_v13 = vrot.slane %v1087_v46, 2 }
 0x1d9   :  { %v954_v24 = vrot.slane %v953_v49, 1  ;;  %v1089_v51 = vadd.f32 %v1088_v13, %v1087_v46 }
 0x1db   :  { %v955_v52 = vadd.f32 %v954_v24, %v953_v49  ;;  %v1090_v31 = vrot.slane %v1089_v51, 1 }
 0x1dd   :  { %v956_v53 = vadd.f32 %v955_v52, %v886_v27  ;;  %v1091_v57 = vadd.f32 %v1090_v31, %v1089_v51 }
 0x1df   :  { %957 = vst [vmem:[%s2036_s3] sm:$0x1] %v956_v53  ;;  %v1092_v40 = vadd.f32 %v1091_v57, %v958_v39 }
 0x1e1   :  { %1093 = vst [vmem:[%s2037_s4] sm:$0x1] %v1092_v40 }

</bundles_post_ra>
